<compile_context>
chip_gen: v7x
topology: tpu7x:2x2x1
jax: 0.10.0
libtpu: 0.0.40
codegen_flags: <defaults>
</compile_context>

<pallas_src>
import math
from functools import partial

import jax
import jax.numpy as jnp
from jax.experimental import pallas as pl
from jax.experimental.pallas import tpu as pltpu

# ---- small config consistent with GPT.forward (compute_loss=False, eval mode) ----
N_LAYER = 2
N_HEAD = 4
N_EMBD = 32
HEAD_DIM = N_EMBD // N_HEAD
BLOCK_SIZE = 128
VOCAB_SIZE = 1929          # implied by ignore_index / fill value 1928
VOCAB_PAD = 2048           # pad to multiple of 128 for lane-dense stores / clean MXU N tiling
FEN_FEATURES = 18          # per-square board feature planes fed to the FenEncoder stand-in
OUT_ROWS = 8               # lm_head evaluated on last 8 tokens -> sublane-dense output store
EPS = 1e-5
MASK_VALUE = -1e30


def _ln_normalize(x):
    """LayerNorm without affine (gamma/beta are folded into the following matmul)."""
    mu = jnp.mean(x, axis=-1, keepdims=True)
    var = jnp.mean((x - mu) ** 2, axis=-1, keepdims=True)
    return (x - mu) * jax.lax.rsqrt(var + EPS)


def _gelu(x):
    # TODO(synk): nn.GELU() default is exact erf-GELU; tanh approximation used here since
    # lax.erf has no guaranteed Mosaic lowering.
    c = math.sqrt(2.0 / math.pi)
    return 0.5 * x * (1.0 + jnp.tanh(c * (x + 0.044715 * x * x * x)))


# ---------------------------------------------------------------------------
# Fused per-sequence kernel: all transformer blocks + ln_f + lm_head for one
# batch element.  Grid = (B,), weights are resident across grid steps (index
# maps return the same block), attention is head-batched as (H, T, T).
# ---------------------------------------------------------------------------
def _gpt_seq_kernel(T,
                    x_ref,
                    wqkv_ref, bqkv_ref, wattn_ref, battn_ref,
                    wfc_ref, bfc_ref, wmp_ref, bmp_ref,
                    wlm_ref, blm_ref,
                    out_ref):
    C = N_EMBD
    H = N_HEAD
    D = HEAD_DIM

    x = x_ref[0]                                               # (T, C) f32

    # causal additive mask built in-kernel (no quadratic HBM input)
    row = jax.lax.broadcasted_iota(jnp.int32, (T, T), 0)
    col = jax.lax.broadcasted_iota(jnp.int32, (T, T), 1)
    causal_bias = jnp.where(col <= row, 0.0, MASK_VALUE).astype(jnp.float32)   # (T, T)

    for l in range(N_LAYER):          # layers unrolled; per-layer weights sliced statically
        # ---- causal self-attention (pre-LN; LN1 affine folded into w_qkv/b_qkv) ----
        h = _ln_normalize(x)
        qkv = jnp.dot(h.astype(jnp.bfloat16), wqkv_ref[l],
                      preferred_element_type=jnp.float32) + bqkv_ref[l]        # (T, 3C)

        q = jnp.transpose(qkv[:, 0 * C:1 * C].reshape(T, H, D), (1, 0, 2)).astype(jnp.bfloat16)
        k = jnp.transpose(qkv[:, 1 * C:2 * C].reshape(T, H, D), (1, 0, 2)).astype(jnp.bfloat16)
        v = jnp.transpose(qkv[:, 2 * C:3 * C].reshape(T, H, D), (1, 0, 2)).astype(jnp.bfloat16)

        att = jnp.einsum('hqd,hkd->hqk', q, k,
                         preferred_element_type=jnp.float32)                   # (H, T, T)
        att = att + causal_bias[None, :, :]
        att = att - jnp.max(att, axis=-1, keepdims=True)
        p = jnp.exp(att)
        inv = pl.reciprocal(jnp.sum(p, axis=-1, keepdims=True), approx=True)
        p = p * inv

        o = jnp.einsum('hqk,hkd->hqd', p.astype(jnp.bfloat16), v,
                       preferred_element_type=jnp.float32)                     # (H, T, D)
        y = jnp.transpose(o, (1, 0, 2)).reshape(T, C)                          # (T, C)
        y = jnp.dot(y.astype(jnp.bfloat16), wattn_ref[l],
                    preferred_element_type=jnp.float32) + battn_ref[l]
        x = x + y

        # ---- MLP (pre-LN; LN2 affine folded into w_fc/b_fc) ----
        h2 = _ln_normalize(x)
        m = jnp.dot(h2.astype(jnp.bfloat16), wfc_ref[l],
                    preferred_element_type=jnp.float32) + bfc_ref[l]
        m = _gelu(m)
        m = jnp.dot(m.astype(jnp.bfloat16), wmp_ref[l],
                    preferred_element_type=jnp.float32) + bmp_ref[l]
        x = x + m

    # ---- ln_f (affine folded into lm_head) + lm_head on the last OUT_ROWS tokens ----
    # Only the final row is the real x[:, [-1], :] logits; the extra rows make the store
    # sublane-dense and cost nothing on the MXU.
    x_tail = x[T - OUT_ROWS:T, :]                               # (OUT_ROWS, C)
    hf = _ln_normalize(x_tail)
    out_ref[0] = jnp.dot(hf.astype(jnp.bfloat16), wlm_ref[...],
                         preferred_element_type=jnp.float32) + blm_ref[...]    # (OUT_ROWS, V_PAD)


def run_gpt_fused(x, p, B, T):
    def full_spec(a):
        nd = a.ndim
        return pl.BlockSpec(tuple(a.shape), lambda b, nd=nd: (0,) * nd)

    weights = (p["w_qkv"], p["b_qkv"], p["w_attn_proj"], p["b_attn_proj"],
               p["w_fc"], p["b_fc"], p["w_mlp_proj"], p["b_mlp_proj"],
               p["w_lm_pad"], p["b_lm_pad"])

    return pl.pallas_call(
        partial(_gpt_seq_kernel, T),
        out_shape=jax.ShapeDtypeStruct((B, OUT_ROWS, VOCAB_PAD), jnp.float32),
        grid_spec=pltpu.PrefetchScalarGridSpec(
            num_scalar_prefetch=0,
            grid=(B,),
            in_specs=[pl.BlockSpec((1, T, N_EMBD), lambda b: (b, 0, 0))]
                     + [full_spec(a) for a in weights],
            out_specs=pl.BlockSpec((1, OUT_ROWS, VOCAB_PAD), lambda b: (b, 0, 0))),
        compiler_params=pltpu.CompilerParams(
            dimension_semantics=("parallel",)),
    )(x, *weights)


# ---------------------------------------------------------------------------
# Parameter setup (deterministic), kernel-friendly preparation, PE buffer.
# ---------------------------------------------------------------------------
def init_params(key):
    ks = jax.random.split(key, 8)

    def nrm(k, shape, std=0.02):
        return std * jax.random.normal(k, shape, dtype=jnp.float32)

    proj_std = 0.02 / math.sqrt(2 * N_LAYER)
    return {
        # tied token embedding / lm_head weight (vocab, n_embd)
        "wte": nrm(ks[0], (VOCAB_SIZE, N_EMBD)),
        # FenEncoder stand-in: per-square Linear(FEN_FEATURES -> n_embd)
        "fen_w": nrm(ks[1], (FEN_FEATURES, N_EMBD)),
        "fen_b": jnp.zeros((N_EMBD,), jnp.float32),
        "ln1_w": jnp.ones((N_LAYER, 1, N_EMBD), jnp.float32),
        "ln1_b": jnp.zeros((N_LAYER, 1, N_EMBD), jnp.float32),
        "ln2_w": jnp.ones((N_LAYER, 1, N_EMBD), jnp.float32),
        "ln2_b": jnp.zeros((N_LAYER, 1, N_EMBD), jnp.float32),
        "w_qkv": nrm(ks[2], (N_LAYER, N_EMBD, 3 * N_EMBD)),
        "b_qkv": jnp.zeros((N_LAYER, 1, 3 * N_EMBD), jnp.float32),
        "w_attn_proj": nrm(ks[3], (N_LAYER, N_EMBD, N_EMBD), std=proj_std),
        "b_attn_proj": jnp.zeros((N_LAYER, 1, N_EMBD), jnp.float32),
        "w_fc": nrm(ks[4], (N_LAYER, N_EMBD, 4 * N_EMBD)),
        "b_fc": jnp.zeros((N_LAYER, 1, 4 * N_EMBD), jnp.float32),
        "w_mlp_proj": nrm(ks[5], (N_LAYER, 4 * N_EMBD, N_EMBD), std=proj_std),
        "b_mlp_proj": jnp.zeros((N_LAYER, 1, N_EMBD), jnp.float32),
        "ln_f_w": jnp.ones((1, N_EMBD), jnp.float32),
        "ln_f_b": jnp.zeros((1, N_EMBD), jnp.float32),
    }


def make_pe():
    position = jnp.arange(BLOCK_SIZE, dtype=jnp.float32)[:, None]
    div_term = jnp.exp(jnp.arange(0, N_EMBD, 2, dtype=jnp.float32)
                       * (-math.log(10000.0) / N_EMBD))
    pe = jnp.zeros((BLOCK_SIZE, N_EMBD), jnp.float32)
    pe = pe.at[:, 0::2].set(jnp.sin(position * div_term))
    pe = pe.at[:, 1::2].set(jnp.cos(position * div_term))
    return pe


def prepare_params(raw):
    """One-time conversion to kernel-friendly layout (done outside the forward path)."""
    p = {"wte": raw["wte"], "fen_w": raw["fen_w"], "fen_b": raw["fen_b"], "pe": make_pe()}
    scale = 1.0 / math.sqrt(HEAD_DIM)

    # fold 1/sqrt(head_dim) into the Q columns of the QKV projection
    w_qkv_s = raw["w_qkv"].at[:, :, :N_EMBD].multiply(scale)        # (L, C, 3C)
    b_qkv_s = raw["b_qkv"].at[:, :, :N_EMBD].multiply(scale)        # (L, 1, 3C)

    # fold LN1 affine into qkv projection:  (x_n*g + b) @ W + c = x_n @ (g^T*W) + (b@W + c)
    g1 = raw["ln1_w"]                                               # (L, 1, C)
    b1 = raw["ln1_b"]                                               # (L, 1, C)
    p["w_qkv"] = (w_qkv_s * jnp.swapaxes(g1, 1, 2)).astype(jnp.bfloat16)
    p["b_qkv"] = jnp.einsum('lij,ljk->lik', b1, w_qkv_s) + b_qkv_s

    p["w_attn_proj"] = raw["w_attn_proj"].astype(jnp.bfloat16)
    p["b_attn_proj"] = raw["b_attn_proj"]

    # fold LN2 affine into the MLP fc projection
    g2 = raw["ln2_w"]
    b2 = raw["ln2_b"]
    p["w_fc"] = (raw["w_fc"] * jnp.swapaxes(g2, 1, 2)).astype(jnp.bfloat16)
    p["b_fc"] = jnp.einsum('lij,ljk->lik', b2, raw["w_fc"]) + raw["b_fc"]

    p["w_mlp_proj"] = raw["w_mlp_proj"].astype(jnp.bfloat16)
    p["b_mlp_proj"] = raw["b_mlp_proj"]

    # tied lm_head weight: pre-transposed (C, V), zero-padded to lane-dense 2048 columns,
    # with the ln_f affine folded in (lm_head has no bias -> bias becomes beta_f @ W).
    w_lm = jnp.zeros((N_EMBD, VOCAB_PAD), jnp.float32).at[:, :VOCAB_SIZE].set(raw["wte"].T)
    gf = raw["ln_f_w"]                                              # (1, C)
    bf = raw["ln_f_b"]                                              # (1, C)
    p["w_lm_pad"] = (w_lm * gf.T).astype(jnp.bfloat16)              # (C, V_PAD) bf16
    p["b_lm_pad"] = bf @ w_lm                                       # (1, V_PAD) f32
    return p


# ---------------------------------------------------------------------------
# GPT.forward equivalent (batch=(board, idx), compute_loss=False, eval mode).
# ---------------------------------------------------------------------------
def gpt_forward(params, board, idx):
    B = idx.shape[0]

    # TODO(synk): FenEncoder is not defined in the reference source; modeled here as a
    # deterministic per-square linear embedding producing (B, 64, n_embd).
    position = jnp.einsum('bsf,fc->bsc', board, params["fen_w"]) + params["fen_b"]

    targets_pos = jnp.full((B, 64), 1928, dtype=jnp.int32)
    targets = jnp.concatenate([targets_pos, idx.astype(jnp.int32)], axis=1)
    targets = jnp.roll(targets, shift=-1, axis=1)

    t = idx.shape[1] + 64
    assert t <= BLOCK_SIZE
    assert t >= OUT_ROWS

    tok_emb = jnp.take(params["wte"], idx, axis=0)            # (B, T_idx, C)
    tok_emb = jnp.concatenate([position, tok_emb], axis=1)    # (B, t, C)
    pos_emb = params["pe"][:t]                                # (t, C)
    x = (tok_emb + pos_emb[None]).astype(jnp.float32)         # dropout = identity (eval)

    logits_pad = run_gpt_fused(x, params, B, t)               # (B, OUT_ROWS, VOCAB_PAD)
    logits = logits_pad[:, -1:, :VOCAB_SIZE]                  # (B, 1, vocab)
    return logits, None, targets


if __name__ == "__main__":
    key = jax.random.PRNGKey(0)
    pk, bk, ik = jax.random.split(key, 3)

    params = prepare_params(init_params(pk))

    B = 2
    T_IDX = 8
    board = jax.random.normal(bk, (B, 64, FEN_FEATURES), dtype=jnp.float32)
    idx = jax.random.randint(ik, (B, T_IDX), 0, VOCAB_SIZE, dtype=jnp.int32)

    logits, loss, targets = jax.jit(gpt_forward)(params, board, idx)
    jax.block_until_ready((logits, targets))

    assert logits.shape == (B, 1, VOCAB_SIZE), logits.shape
    assert targets.shape == (B, 64 + T_IDX), targets.shape
    assert loss is None
    assert bool(jnp.all(jnp.isfinite(logits)))
    print("KERNEL_OK")
</pallas_src>

<mosaic_0001>
module attributes {stable_mosaic.version = 11 : i64} {
  func.func @_gpt_seq_kernel(%arg0: i32, %arg1: memref<1x72x32xf32, #tpu.memory_space<vmem>>, %arg2: memref<2x32x96xbf16, #tpu.memory_space<vmem>>, %arg3: memref<2x1x96xf32, #tpu.memory_space<vmem>>, %arg4: memref<2x32x32xbf16, #tpu.memory_space<vmem>>, %arg5: memref<2x1x32xf32, #tpu.memory_space<vmem>>, %arg6: memref<2x32x128xbf16, #tpu.memory_space<vmem>>, %arg7: memref<2x1x128xf32, #tpu.memory_space<vmem>>, %arg8: memref<2x128x32xbf16, #tpu.memory_space<vmem>>, %arg9: memref<2x1x32xf32, #tpu.memory_space<vmem>>, %arg10: memref<32x2048xbf16, #tpu.memory_space<vmem>>, %arg11: memref<1x2048xf32, #tpu.memory_space<vmem>>, %arg12: memref<1x8x2048xf32, #tpu.memory_space<vmem>>) attributes {dimension_semantics = [#tpu.dimension_semantics<parallel>], iteration_bounds = array<i64: 2>, scalar_prefetch = 0 : i64, scratch_operands = 0 : i64, tpu.core_type = #tpu.core_type<tc>, window_params = [{transform_indices = @transform_0, window_bounds = array<i64: 1, 72, 32>}, {pipeline_mode = #tpu.pipeline_mode<synchronous>, transform_indices = @transform_1, window_bounds = array<i64: 2, 32, 96>}, {pipeline_mode = #tpu.pipeline_mode<synchronous>, transform_indices = @transform_2, window_bounds = array<i64: 2, 1, 96>}, {pipeline_mode = #tpu.pipeline_mode<synchronous>, transform_indices = @transform_3, window_bounds = array<i64: 2, 32, 32>}, {pipeline_mode = #tpu.pipeline_mode<synchronous>, transform_indices = @transform_4, window_bounds = array<i64: 2, 1, 32>}, {pipeline_mode = #tpu.pipeline_mode<synchronous>, transform_indices = @transform_5, window_bounds = array<i64: 2, 32, 128>}, {pipeline_mode = #tpu.pipeline_mode<synchronous>, transform_indices = @transform_6, window_bounds = array<i64: 2, 1, 128>}, {pipeline_mode = #tpu.pipeline_mode<synchronous>, transform_indices = @transform_7, window_bounds = array<i64: 2, 128, 32>}, {pipeline_mode = #tpu.pipeline_mode<synchronous>, transform_indices = @transform_8, window_bounds = array<i64: 2, 1, 32>}, {pipeline_mode = #tpu.pipeline_mode<synchronous>, transform_indices = @transform_9, window_bounds = array<i64: 32, 2048>}, {pipeline_mode = #tpu.pipeline_mode<synchronous>, transform_indices = @transform_10, window_bounds = array<i64: 1, 2048>}, {transform_indices = @transform_11, window_bounds = array<i64: 1, 8, 2048>}]} {
    %c0 = arith.constant 0 : index
    %c0_0 = arith.constant 0 : index
    %c0_1 = arith.constant 0 : index
    %0 = vector.load %arg1[%c0, %c0_0, %c0_1] : memref<1x72x32xf32, #tpu.memory_space<vmem>>, vector<1x72x32xf32>
    %1 = vector.shape_cast %0 : vector<1x72x32xf32> to vector<72x32xf32>
    %2 = tpu.iota {dimensions = array<i32: 0>} : vector<72x72xi32>
    %3 = tpu.iota {dimensions = array<i32: 1>} : vector<72x72xi32>
    %4 = arith.cmpi sle, %3, %2 : vector<72x72xi32>
    %cst = arith.constant 0.000000e+00 : f32
    %cst_2 = arith.constant -1.000000e+30 : f32
    %5 = vector.broadcast %cst : f32 to vector<72x72xf32>
    %6 = vector.broadcast %cst_2 : f32 to vector<72x72xf32>
    %7 = arith.select %4, %5, %6 : vector<72x72xi1>, vector<72x72xf32>
    %cst_3 = arith.constant dense<0.000000e+00> : vector<72xf32>
    %8 = vector.multi_reduction <add>, %1, %cst_3 [1] : vector<72x32xf32> to vector<72xf32>
    %9 = vector.shape_cast %8 : vector<72xf32> to vector<72x1xf32>
    %cst_4 = arith.constant 3.200000e+01 : f32
    %10 = vector.broadcast %cst_4 : f32 to vector<72x1xf32>
    %11 = arith.divf %9, %10 : vector<72x1xf32>
    %12 = vector.broadcast %11 : vector<72x1xf32> to vector<72x32xf32>
    %13 = arith.subf %1, %12 : vector<72x32xf32>
    %14 = arith.mulf %13, %13 : vector<72x32xf32>
    %cst_5 = arith.constant dense<0.000000e+00> : vector<72xf32>
    %15 = vector.multi_reduction <add>, %14, %cst_5 [1] : vector<72x32xf32> to vector<72xf32>
    %16 = vector.shape_cast %15 : vector<72xf32> to vector<72x1xf32>
    %cst_6 = arith.constant 3.200000e+01 : f32
    %17 = vector.broadcast %cst_6 : f32 to vector<72x1xf32>
    %18 = arith.divf %16, %17 : vector<72x1xf32>
    %19 = vector.broadcast %11 : vector<72x1xf32> to vector<72x32xf32>
    %20 = arith.subf %1, %19 : vector<72x32xf32>
    %cst_7 = arith.constant 9.99999974E-6 : f32
    %21 = vector.broadcast %cst_7 : f32 to vector<72x1xf32>
    %22 = arith.addf %18, %21 : vector<72x1xf32>
    %23 = math.rsqrt %22 : vector<72x1xf32>
    %24 = vector.broadcast %23 : vector<72x1xf32> to vector<72x32xf32>
    %25 = arith.mulf %20, %24 : vector<72x32xf32>
    %26 = arith.truncf %25 : vector<72x32xf32> to vector<72x32xbf16>
    %c0_8 = arith.constant 0 : index
    %c0_9 = arith.constant 0 : index
    %c0_10 = arith.constant 0 : index
    %27 = vector.load %arg2[%c0_8, %c0_9, %c0_10] : memref<2x32x96xbf16, #tpu.memory_space<vmem>>, vector<1x32x96xbf16>
    %28 = vector.shape_cast %27 : vector<1x32x96xbf16> to vector<32x96xbf16>
    %cst_11 = arith.constant dense<0.000000e+00> : vector<72x96xf32>
    %29 = tpu.matmul %26, %28, %cst_11 {dimension_numbers = #tpu.dot_dimension_numbers<[1], [0], [0], [1], [0, 0, 1, 1], [], []>} : vector<72x32xbf16>, vector<32x96xbf16>, vector<72x96xf32> -> vector<72x96xf32>
    %c0_12 = arith.constant 0 : index
    %c0_13 = arith.constant 0 : index
    %c0_14 = arith.constant 0 : index
    %30 = vector.load %arg3[%c0_12, %c0_13, %c0_14] : memref<2x1x96xf32, #tpu.memory_space<vmem>>, vector<1x1x96xf32>
    %31 = vector.shape_cast %30 : vector<1x1x96xf32> to vector<1x96xf32>
    %32 = vector.broadcast %31 : vector<1x96xf32> to vector<72x96xf32>
    %33 = arith.addf %29, %32 : vector<72x96xf32>
    %34 = vector.extract_strided_slice %33 {offsets = [0, 0], sizes = [72, 32], strides = [1, 1]} : vector<72x96xf32> to vector<72x32xf32>
    %35 = vector.shape_cast %34 : vector<72x32xf32> to vector<72x4x8xf32>
    %36 = tpu.transpose %35, [1, 0, 2] : vector<72x4x8xf32> -> vector<4x72x8xf32>
    %37 = arith.truncf %36 : vector<4x72x8xf32> to vector<4x72x8xbf16>
    %38 = vector.extract_strided_slice %33 {offsets = [0, 32], sizes = [72, 32], strides = [1, 1]} : vector<72x96xf32> to vector<72x32xf32>
    %39 = vector.shape_cast %38 : vector<72x32xf32> to vector<72x4x8xf32>
    %40 = tpu.transpose %39, [1, 0, 2] : vector<72x4x8xf32> -> vector<4x72x8xf32>
    %41 = arith.truncf %40 : vector<4x72x8xf32> to vector<4x72x8xbf16>
    %42 = vector.extract_strided_slice %33 {offsets = [0, 64], sizes = [72, 32], strides = [1, 1]} : vector<72x96xf32> to vector<72x32xf32>
    %43 = vector.shape_cast %42 : vector<72x32xf32> to vector<72x4x8xf32>
    %44 = tpu.transpose %43, [1, 0, 2] : vector<72x4x8xf32> -> vector<4x72x8xf32>
    %45 = arith.truncf %44 : vector<4x72x8xf32> to vector<4x72x8xbf16>
    "tpu.trace_start"() <{level = 10 : i32, message = "hqd,hkd->hqk"}> : () -> ()
    %cst_15 = arith.constant dense<0.000000e+00> : vector<4x72x72xf32>
    %46 = tpu.matmul %37, %41, %cst_15 {dimension_numbers = #tpu.dot_dimension_numbers<[2], [2], [1], [1], [0, 0, 0, 1, 1, 1], [0], [0]>} : vector<4x72x8xbf16>, vector<4x72x8xbf16>, vector<4x72x72xf32> -> vector<4x72x72xf32>
    "tpu.trace_stop"() : () -> ()
    %47 = vector.shape_cast %7 : vector<72x72xf32> to vector<1x72x72xf32>
    %48 = vector.broadcast %47 : vector<1x72x72xf32> to vector<4x72x72xf32>
    %49 = arith.addf %46, %48 : vector<4x72x72xf32>
    %cst_16 = arith.constant dense<0xFF800000> : vector<4x72xf32>
    %50 = vector.multi_reduction <maximumf>, %49, %cst_16 [2] : vector<4x72x72xf32> to vector<4x72xf32>
    %51 = vector.shape_cast %50 : vector<4x72xf32> to vector<4x72x1xf32>
    %52 = vector.broadcast %51 : vector<4x72x1xf32> to vector<4x72x72xf32>
    %53 = arith.subf %49, %52 : vector<4x72x72xf32>
    %54 = math.exp %53 : vector<4x72x72xf32>
    %cst_17 = arith.constant dense<0.000000e+00> : vector<4x72xf32>
    %55 = vector.multi_reduction <add>, %54, %cst_17 [2] : vector<4x72x72xf32> to vector<4x72xf32>
    %56 = vector.shape_cast %55 : vector<4x72xf32> to vector<4x72x1xf32>
    %57 = tpu.reciprocal %56 {approx = true} : vector<4x72x1xf32> -> vector<4x72x1xf32>
    %58 = vector.broadcast %57 : vector<4x72x1xf32> to vector<4x72x72xf32>
    %59 = arith.mulf %54, %58 : vector<4x72x72xf32>
    %60 = arith.truncf %59 : vector<4x72x72xf32> to vector<4x72x72xbf16>
    "tpu.trace_start"() <{level = 10 : i32, message = "hqk,hkd->hqd"}> : () -> ()
    %cst_18 = arith.constant dense<0.000000e+00> : vector<4x72x8xf32>
    %61 = tpu.matmul %60, %45, %cst_18 {dimension_numbers = #tpu.dot_dimension_numbers<[2], [1], [1], [2], [0, 0, 0, 1, 1, 2], [0], [0]>} : vector<4x72x72xbf16>, vector<4x72x8xbf16>, vector<4x72x8xf32> -> vector<4x72x8xf32>
    "tpu.trace_stop"() : () -> ()
    %62 = tpu.transpose %61, [1, 0, 2] : vector<4x72x8xf32> -> vector<72x4x8xf32>
    %63 = vector.shape_cast %62 : vector<72x4x8xf32> to vector<72x32xf32>
    %64 = arith.truncf %63 : vector<72x32xf32> to vector<72x32xbf16>
    %c0_19 = arith.constant 0 : index
    %c0_20 = arith.constant 0 : index
    %c0_21 = arith.constant 0 : index
    %65 = vector.load %arg4[%c0_19, %c0_20, %c0_21] : memref<2x32x32xbf16, #tpu.memory_space<vmem>>, vector<1x32x32xbf16>
    %66 = vector.shape_cast %65 : vector<1x32x32xbf16> to vector<32x32xbf16>
    %cst_22 = arith.constant dense<0.000000e+00> : vector<72x32xf32>
    %67 = tpu.matmul %64, %66, %cst_22 {dimension_numbers = #tpu.dot_dimension_numbers<[1], [0], [0], [1], [0, 0, 1, 1], [], []>} : vector<72x32xbf16>, vector<32x32xbf16>, vector<72x32xf32> -> vector<72x32xf32>
    %c0_23 = arith.constant 0 : index
    %c0_24 = arith.constant 0 : index
    %c0_25 = arith.constant 0 : index
    %68 = vector.load %arg5[%c0_23, %c0_24, %c0_25] : memref<2x1x32xf32, #tpu.memory_space<vmem>>, vector<1x1x32xf32>
    %69 = vector.shape_cast %68 : vector<1x1x32xf32> to vector<1x32xf32>
    %70 = vector.broadcast %69 : vector<1x32xf32> to vector<72x32xf32>
    %71 = arith.addf %67, %70 : vector<72x32xf32>
    %72 = arith.addf %1, %71 : vector<72x32xf32>
    %cst_26 = arith.constant dense<0.000000e+00> : vector<72xf32>
    %73 = vector.multi_reduction <add>, %72, %cst_26 [1] : vector<72x32xf32> to vector<72xf32>
    %74 = vector.shape_cast %73 : vector<72xf32> to vector<72x1xf32>
    %cst_27 = arith.constant 3.200000e+01 : f32
    %75 = vector.broadcast %cst_27 : f32 to vector<72x1xf32>
    %76 = arith.divf %74, %75 : vector<72x1xf32>
    %77 = vector.broadcast %76 : vector<72x1xf32> to vector<72x32xf32>
    %78 = arith.subf %72, %77 : vector<72x32xf32>
    %79 = arith.mulf %78, %78 : vector<72x32xf32>
    %cst_28 = arith.constant dense<0.000000e+00> : vector<72xf32>
    %80 = vector.multi_reduction <add>, %79, %cst_28 [1] : vector<72x32xf32> to vector<72xf32>
    %81 = vector.shape_cast %80 : vector<72xf32> to vector<72x1xf32>
    %cst_29 = arith.constant 3.200000e+01 : f32
    %82 = vector.broadcast %cst_29 : f32 to vector<72x1xf32>
    %83 = arith.divf %81, %82 : vector<72x1xf32>
    %84 = vector.broadcast %76 : vector<72x1xf32> to vector<72x32xf32>
    %85 = arith.subf %72, %84 : vector<72x32xf32>
    %cst_30 = arith.constant 9.99999974E-6 : f32
    %86 = vector.broadcast %cst_30 : f32 to vector<72x1xf32>
    %87 = arith.addf %83, %86 : vector<72x1xf32>
    %88 = math.rsqrt %87 : vector<72x1xf32>
    %89 = vector.broadcast %88 : vector<72x1xf32> to vector<72x32xf32>
    %90 = arith.mulf %85, %89 : vector<72x32xf32>
    %91 = arith.truncf %90 : vector<72x32xf32> to vector<72x32xbf16>
    %c0_31 = arith.constant 0 : index
    %c0_32 = arith.constant 0 : index
    %c0_33 = arith.constant 0 : index
    %92 = vector.load %arg6[%c0_31, %c0_32, %c0_33] : memref<2x32x128xbf16, #tpu.memory_space<vmem>>, vector<1x32x128xbf16>
    %93 = vector.shape_cast %92 : vector<1x32x128xbf16> to vector<32x128xbf16>
    %cst_34 = arith.constant dense<0.000000e+00> : vector<72x128xf32>
    %94 = tpu.matmul %91, %93, %cst_34 {dimension_numbers = #tpu.dot_dimension_numbers<[1], [0], [0], [1], [0, 0, 1, 1], [], []>} : vector<72x32xbf16>, vector<32x128xbf16>, vector<72x128xf32> -> vector<72x128xf32>
    %c0_35 = arith.constant 0 : index
    %c0_36 = arith.constant 0 : index
    %c0_37 = arith.constant 0 : index
    %95 = vector.load %arg7[%c0_35, %c0_36, %c0_37] : memref<2x1x128xf32, #tpu.memory_space<vmem>>, vector<1x1x128xf32>
    %96 = vector.shape_cast %95 : vector<1x1x128xf32> to vector<1x128xf32>
    %97 = vector.broadcast %96 : vector<1x128xf32> to vector<72x128xf32>
    %98 = arith.addf %94, %97 : vector<72x128xf32>
    %cst_38 = arith.constant 5.000000e-01 : f32
    %99 = vector.broadcast %cst_38 : f32 to vector<72x128xf32>
    %100 = arith.mulf %99, %98 : vector<72x128xf32>
    %cst_39 = arith.constant 4.471500e-02 : f32
    %101 = vector.broadcast %cst_39 : f32 to vector<72x128xf32>
    %102 = arith.mulf %101, %98 : vector<72x128xf32>
    %103 = arith.mulf %102, %98 : vector<72x128xf32>
    %104 = arith.mulf %103, %98 : vector<72x128xf32>
    %105 = arith.addf %98, %104 : vector<72x128xf32>
    %cst_40 = arith.constant 0.797884583 : f32
    %106 = vector.broadcast %cst_40 : f32 to vector<72x128xf32>
    %107 = arith.mulf %106, %105 : vector<72x128xf32>
    %108 = math.tanh %107 : vector<72x128xf32>
    %cst_41 = arith.constant 1.000000e+00 : f32
    %109 = vector.broadcast %cst_41 : f32 to vector<72x128xf32>
    %110 = arith.addf %109, %108 : vector<72x128xf32>
    %111 = arith.mulf %100, %110 : vector<72x128xf32>
    %112 = arith.truncf %111 : vector<72x128xf32> to vector<72x128xbf16>
    %c0_42 = arith.constant 0 : index
    %c0_43 = arith.constant 0 : index
    %c0_44 = arith.constant 0 : index
    %113 = vector.load %arg8[%c0_42, %c0_43, %c0_44] : memref<2x128x32xbf16, #tpu.memory_space<vmem>>, vector<1x128x32xbf16>
    %114 = vector.shape_cast %113 : vector<1x128x32xbf16> to vector<128x32xbf16>
    %cst_45 = arith.constant dense<0.000000e+00> : vector<72x32xf32>
    %115 = tpu.matmul %112, %114, %cst_45 {dimension_numbers = #tpu.dot_dimension_numbers<[1], [0], [0], [1], [0, 0, 1, 1], [], []>} : vector<72x128xbf16>, vector<128x32xbf16>, vector<72x32xf32> -> vector<72x32xf32>
    %c0_46 = arith.constant 0 : index
    %c0_47 = arith.constant 0 : index
    %c0_48 = arith.constant 0 : index
    %116 = vector.load %arg9[%c0_46, %c0_47, %c0_48] : memref<2x1x32xf32, #tpu.memory_space<vmem>>, vector<1x1x32xf32>
    %117 = vector.shape_cast %116 : vector<1x1x32xf32> to vector<1x32xf32>
    %118 = vector.broadcast %117 : vector<1x32xf32> to vector<72x32xf32>
    %119 = arith.addf %115, %118 : vector<72x32xf32>
    %120 = arith.addf %72, %119 : vector<72x32xf32>
    %cst_49 = arith.constant dense<0.000000e+00> : vector<72xf32>
    %121 = vector.multi_reduction <add>, %120, %cst_49 [1] : vector<72x32xf32> to vector<72xf32>
    %122 = vector.shape_cast %121 : vector<72xf32> to vector<72x1xf32>
    %cst_50 = arith.constant 3.200000e+01 : f32
    %123 = vector.broadcast %cst_50 : f32 to vector<72x1xf32>
    %124 = arith.divf %122, %123 : vector<72x1xf32>
    %125 = vector.broadcast %124 : vector<72x1xf32> to vector<72x32xf32>
    %126 = arith.subf %120, %125 : vector<72x32xf32>
    %127 = arith.mulf %126, %126 : vector<72x32xf32>
    %cst_51 = arith.constant dense<0.000000e+00> : vector<72xf32>
    %128 = vector.multi_reduction <add>, %127, %cst_51 [1] : vector<72x32xf32> to vector<72xf32>
    %129 = vector.shape_cast %128 : vector<72xf32> to vector<72x1xf32>
    %cst_52 = arith.constant 3.200000e+01 : f32
    %130 = vector.broadcast %cst_52 : f32 to vector<72x1xf32>
    %131 = arith.divf %129, %130 : vector<72x1xf32>
    %132 = vector.broadcast %124 : vector<72x1xf32> to vector<72x32xf32>
    %133 = arith.subf %120, %132 : vector<72x32xf32>
    %cst_53 = arith.constant 9.99999974E-6 : f32
    %134 = vector.broadcast %cst_53 : f32 to vector<72x1xf32>
    %135 = arith.addf %131, %134 : vector<72x1xf32>
    %136 = math.rsqrt %135 : vector<72x1xf32>
    %137 = vector.broadcast %136 : vector<72x1xf32> to vector<72x32xf32>
    %138 = arith.mulf %133, %137 : vector<72x32xf32>
    %139 = arith.truncf %138 : vector<72x32xf32> to vector<72x32xbf16>
    %c1 = arith.constant 1 : index
    %c0_54 = arith.constant 0 : index
    %c0_55 = arith.constant 0 : index
    %140 = vector.load %arg2[%c1, %c0_54, %c0_55] : memref<2x32x96xbf16, #tpu.memory_space<vmem>>, vector<1x32x96xbf16>
    %141 = vector.shape_cast %140 : vector<1x32x96xbf16> to vector<32x96xbf16>
    %cst_56 = arith.constant dense<0.000000e+00> : vector<72x96xf32>
    %142 = tpu.matmul %139, %141, %cst_56 {dimension_numbers = #tpu.dot_dimension_numbers<[1], [0], [0], [1], [0, 0, 1, 1], [], []>} : vector<72x32xbf16>, vector<32x96xbf16>, vector<72x96xf32> -> vector<72x96xf32>
    %c1_57 = arith.constant 1 : index
    %c0_58 = arith.constant 0 : index
    %c0_59 = arith.constant 0 : index
    %143 = vector.load %arg3[%c1_57, %c0_58, %c0_59] : memref<2x1x96xf32, #tpu.memory_space<vmem>>, vector<1x1x96xf32>
    %144 = vector.shape_cast %143 : vector<1x1x96xf32> to vector<1x96xf32>
    %145 = vector.broadcast %144 : vector<1x96xf32> to vector<72x96xf32>
    %146 = arith.addf %142, %145 : vector<72x96xf32>
    %147 = vector.extract_strided_slice %146 {offsets = [0, 0], sizes = [72, 32], strides = [1, 1]} : vector<72x96xf32> to vector<72x32xf32>
    %148 = vector.shape_cast %147 : vector<72x32xf32> to vector<72x4x8xf32>
    %149 = tpu.transpose %148, [1, 0, 2] : vector<72x4x8xf32> -> vector<4x72x8xf32>
    %150 = arith.truncf %149 : vector<4x72x8xf32> to vector<4x72x8xbf16>
    %151 = vector.extract_strided_slice %146 {offsets = [0, 32], sizes = [72, 32], strides = [1, 1]} : vector<72x96xf32> to vector<72x32xf32>
    %152 = vector.shape_cast %151 : vector<72x32xf32> to vector<72x4x8xf32>
    %153 = tpu.transpose %152, [1, 0, 2] : vector<72x4x8xf32> -> vector<4x72x8xf32>
    %154 = arith.truncf %153 : vector<4x72x8xf32> to vector<4x72x8xbf16>
    %155 = vector.extract_strided_slice %146 {offsets = [0, 64], sizes = [72, 32], strides = [1, 1]} : vector<72x96xf32> to vector<72x32xf32>
    %156 = vector.shape_cast %155 : vector<72x32xf32> to vector<72x4x8xf32>
    %157 = tpu.transpose %156, [1, 0, 2] : vector<72x4x8xf32> -> vector<4x72x8xf32>
    %158 = arith.truncf %157 : vector<4x72x8xf32> to vector<4x72x8xbf16>
    "tpu.trace_start"() <{level = 10 : i32, message = "hqd,hkd->hqk"}> : () -> ()
    %cst_60 = arith.constant dense<0.000000e+00> : vector<4x72x72xf32>
    %159 = tpu.matmul %150, %154, %cst_60 {dimension_numbers = #tpu.dot_dimension_numbers<[2], [2], [1], [1], [0, 0, 0, 1, 1, 1], [0], [0]>} : vector<4x72x8xbf16>, vector<4x72x8xbf16>, vector<4x72x72xf32> -> vector<4x72x72xf32>
    "tpu.trace_stop"() : () -> ()
    %160 = vector.shape_cast %7 : vector<72x72xf32> to vector<1x72x72xf32>
    %161 = vector.broadcast %160 : vector<1x72x72xf32> to vector<4x72x72xf32>
    %162 = arith.addf %159, %161 : vector<4x72x72xf32>
    %cst_61 = arith.constant dense<0xFF800000> : vector<4x72xf32>
    %163 = vector.multi_reduction <maximumf>, %162, %cst_61 [2] : vector<4x72x72xf32> to vector<4x72xf32>
    %164 = vector.shape_cast %163 : vector<4x72xf32> to vector<4x72x1xf32>
    %165 = vector.broadcast %164 : vector<4x72x1xf32> to vector<4x72x72xf32>
    %166 = arith.subf %162, %165 : vector<4x72x72xf32>
    %167 = math.exp %166 : vector<4x72x72xf32>
    %cst_62 = arith.constant dense<0.000000e+00> : vector<4x72xf32>
    %168 = vector.multi_reduction <add>, %167, %cst_62 [2] : vector<4x72x72xf32> to vector<4x72xf32>
    %169 = vector.shape_cast %168 : vector<4x72xf32> to vector<4x72x1xf32>
    %170 = tpu.reciprocal %169 {approx = true} : vector<4x72x1xf32> -> vector<4x72x1xf32>
    %171 = vector.broadcast %170 : vector<4x72x1xf32> to vector<4x72x72xf32>
    %172 = arith.mulf %167, %171 : vector<4x72x72xf32>
    %173 = arith.truncf %172 : vector<4x72x72xf32> to vector<4x72x72xbf16>
    "tpu.trace_start"() <{level = 10 : i32, message = "hqk,hkd->hqd"}> : () -> ()
    %cst_63 = arith.constant dense<0.000000e+00> : vector<4x72x8xf32>
    %174 = tpu.matmul %173, %158, %cst_63 {dimension_numbers = #tpu.dot_dimension_numbers<[2], [1], [1], [2], [0, 0, 0, 1, 1, 2], [0], [0]>} : vector<4x72x72xbf16>, vector<4x72x8xbf16>, vector<4x72x8xf32> -> vector<4x72x8xf32>
    "tpu.trace_stop"() : () -> ()
    %175 = tpu.transpose %174, [1, 0, 2] : vector<4x72x8xf32> -> vector<72x4x8xf32>
    %176 = vector.shape_cast %175 : vector<72x4x8xf32> to vector<72x32xf32>
    %177 = arith.truncf %176 : vector<72x32xf32> to vector<72x32xbf16>
    %c1_64 = arith.constant 1 : index
    %c0_65 = arith.constant 0 : index
    %c0_66 = arith.constant 0 : index
    %178 = vector.load %arg4[%c1_64, %c0_65, %c0_66] : memref<2x32x32xbf16, #tpu.memory_space<vmem>>, vector<1x32x32xbf16>
    %179 = vector.shape_cast %178 : vector<1x32x32xbf16> to vector<32x32xbf16>
    %cst_67 = arith.constant dense<0.000000e+00> : vector<72x32xf32>
    %180 = tpu.matmul %177, %179, %cst_67 {dimension_numbers = #tpu.dot_dimension_numbers<[1], [0], [0], [1], [0, 0, 1, 1], [], []>} : vector<72x32xbf16>, vector<32x32xbf16>, vector<72x32xf32> -> vector<72x32xf32>
    %c1_68 = arith.constant 1 : index
    %c0_69 = arith.constant 0 : index
    %c0_70 = arith.constant 0 : index
    %181 = vector.load %arg5[%c1_68, %c0_69, %c0_70] : memref<2x1x32xf32, #tpu.memory_space<vmem>>, vector<1x1x32xf32>
    %182 = vector.shape_cast %181 : vector<1x1x32xf32> to vector<1x32xf32>
    %183 = vector.broadcast %182 : vector<1x32xf32> to vector<72x32xf32>
    %184 = arith.addf %180, %183 : vector<72x32xf32>
    %185 = arith.addf %120, %184 : vector<72x32xf32>
    %cst_71 = arith.constant dense<0.000000e+00> : vector<72xf32>
    %186 = vector.multi_reduction <add>, %185, %cst_71 [1] : vector<72x32xf32> to vector<72xf32>
    %187 = vector.shape_cast %186 : vector<72xf32> to vector<72x1xf32>
    %cst_72 = arith.constant 3.200000e+01 : f32
    %188 = vector.broadcast %cst_72 : f32 to vector<72x1xf32>
    %189 = arith.divf %187, %188 : vector<72x1xf32>
    %190 = vector.broadcast %189 : vector<72x1xf32> to vector<72x32xf32>
    %191 = arith.subf %185, %190 : vector<72x32xf32>
    %192 = arith.mulf %191, %191 : vector<72x32xf32>
    %cst_73 = arith.constant dense<0.000000e+00> : vector<72xf32>
    %193 = vector.multi_reduction <add>, %192, %cst_73 [1] : vector<72x32xf32> to vector<72xf32>
    %194 = vector.shape_cast %193 : vector<72xf32> to vector<72x1xf32>
    %cst_74 = arith.constant 3.200000e+01 : f32
    %195 = vector.broadcast %cst_74 : f32 to vector<72x1xf32>
    %196 = arith.divf %194, %195 : vector<72x1xf32>
    %197 = vector.broadcast %189 : vector<72x1xf32> to vector<72x32xf32>
    %198 = arith.subf %185, %197 : vector<72x32xf32>
    %cst_75 = arith.constant 9.99999974E-6 : f32
    %199 = vector.broadcast %cst_75 : f32 to vector<72x1xf32>
    %200 = arith.addf %196, %199 : vector<72x1xf32>
    %201 = math.rsqrt %200 : vector<72x1xf32>
    %202 = vector.broadcast %201 : vector<72x1xf32> to vector<72x32xf32>
    %203 = arith.mulf %198, %202 : vector<72x32xf32>
    %204 = arith.truncf %203 : vector<72x32xf32> to vector<72x32xbf16>
    %c1_76 = arith.constant 1 : index
    %c0_77 = arith.constant 0 : index
    %c0_78 = arith.constant 0 : index
    %205 = vector.load %arg6[%c1_76, %c0_77, %c0_78] : memref<2x32x128xbf16, #tpu.memory_space<vmem>>, vector<1x32x128xbf16>
    %206 = vector.shape_cast %205 : vector<1x32x128xbf16> to vector<32x128xbf16>
    %cst_79 = arith.constant dense<0.000000e+00> : vector<72x128xf32>
    %207 = tpu.matmul %204, %206, %cst_79 {dimension_numbers = #tpu.dot_dimension_numbers<[1], [0], [0], [1], [0, 0, 1, 1], [], []>} : vector<72x32xbf16>, vector<32x128xbf16>, vector<72x128xf32> -> vector<72x128xf32>
    %c1_80 = arith.constant 1 : index
    %c0_81 = arith.constant 0 : index
    %c0_82 = arith.constant 0 : index
    %208 = vector.load %arg7[%c1_80, %c0_81, %c0_82] : memref<2x1x128xf32, #tpu.memory_space<vmem>>, vector<1x1x128xf32>
    %209 = vector.shape_cast %208 : vector<1x1x128xf32> to vector<1x128xf32>
    %210 = vector.broadcast %209 : vector<1x128xf32> to vector<72x128xf32>
    %211 = arith.addf %207, %210 : vector<72x128xf32>
    %cst_83 = arith.constant 5.000000e-01 : f32
    %212 = vector.broadcast %cst_83 : f32 to vector<72x128xf32>
    %213 = arith.mulf %212, %211 : vector<72x128xf32>
    %cst_84 = arith.constant 4.471500e-02 : f32
    %214 = vector.broadcast %cst_84 : f32 to vector<72x128xf32>
    %215 = arith.mulf %214, %211 : vector<72x128xf32>
    %216 = arith.mulf %215, %211 : vector<72x128xf32>
    %217 = arith.mulf %216, %211 : vector<72x128xf32>
    %218 = arith.addf %211, %217 : vector<72x128xf32>
    %cst_85 = arith.constant 0.797884583 : f32
    %219 = vector.broadcast %cst_85 : f32 to vector<72x128xf32>
    %220 = arith.mulf %219, %218 : vector<72x128xf32>
    %221 = math.tanh %220 : vector<72x128xf32>
    %cst_86 = arith.constant 1.000000e+00 : f32
    %222 = vector.broadcast %cst_86 : f32 to vector<72x128xf32>
    %223 = arith.addf %222, %221 : vector<72x128xf32>
    %224 = arith.mulf %213, %223 : vector<72x128xf32>
    %225 = arith.truncf %224 : vector<72x128xf32> to vector<72x128xbf16>
    %c1_87 = arith.constant 1 : index
    %c0_88 = arith.constant 0 : index
    %c0_89 = arith.constant 0 : index
    %226 = vector.load %arg8[%c1_87, %c0_88, %c0_89] : memref<2x128x32xbf16, #tpu.memory_space<vmem>>, vector<1x128x32xbf16>
    %227 = vector.shape_cast %226 : vector<1x128x32xbf16> to vector<128x32xbf16>
    %cst_90 = arith.constant dense<0.000000e+00> : vector<72x32xf32>
    %228 = tpu.matmul %225, %227, %cst_90 {dimension_numbers = #tpu.dot_dimension_numbers<[1], [0], [0], [1], [0, 0, 1, 1], [], []>} : vector<72x128xbf16>, vector<128x32xbf16>, vector<72x32xf32> -> vector<72x32xf32>
    %c1_91 = arith.constant 1 : index
    %c0_92 = arith.constant 0 : index
    %c0_93 = arith.constant 0 : index
    %229 = vector.load %arg9[%c1_91, %c0_92, %c0_93] : memref<2x1x32xf32, #tpu.memory_space<vmem>>, vector<1x1x32xf32>
    %230 = vector.shape_cast %229 : vector<1x1x32xf32> to vector<1x32xf32>
    %231 = vector.broadcast %230 : vector<1x32xf32> to vector<72x32xf32>
    %232 = arith.addf %228, %231 : vector<72x32xf32>
    %233 = arith.addf %185, %232 : vector<72x32xf32>
    %234 = vector.extract_strided_slice %233 {offsets = [64, 0], sizes = [8, 32], strides = [1, 1]} : vector<72x32xf32> to vector<8x32xf32>
    %cst_94 = arith.constant dense<0.000000e+00> : vector<8xf32>
    %235 = vector.multi_reduction <add>, %234, %cst_94 [1] : vector<8x32xf32> to vector<8xf32>
    %236 = vector.shape_cast %235 : vector<8xf32> to vector<8x1xf32>
    %cst_95 = arith.constant 3.200000e+01 : f32
    %237 = vector.broadcast %cst_95 : f32 to vector<8x1xf32>
    %238 = arith.divf %236, %237 : vector<8x1xf32>
    %239 = vector.broadcast %238 : vector<8x1xf32> to vector<8x32xf32>
    %240 = arith.subf %234, %239 : vector<8x32xf32>
    %241 = arith.mulf %240, %240 : vector<8x32xf32>
    %cst_96 = arith.constant dense<0.000000e+00> : vector<8xf32>
    %242 = vector.multi_reduction <add>, %241, %cst_96 [1] : vector<8x32xf32> to vector<8xf32>
    %243 = vector.shape_cast %242 : vector<8xf32> to vector<8x1xf32>
    %cst_97 = arith.constant 3.200000e+01 : f32
    %244 = vector.broadcast %cst_97 : f32 to vector<8x1xf32>
    %245 = arith.divf %243, %244 : vector<8x1xf32>
    %246 = vector.broadcast %238 : vector<8x1xf32> to vector<8x32xf32>
    %247 = arith.subf %234, %246 : vector<8x32xf32>
    %cst_98 = arith.constant 9.99999974E-6 : f32
    %248 = vector.broadcast %cst_98 : f32 to vector<8x1xf32>
    %249 = arith.addf %245, %248 : vector<8x1xf32>
    %250 = math.rsqrt %249 : vector<8x1xf32>
    %251 = vector.broadcast %250 : vector<8x1xf32> to vector<8x32xf32>
    %252 = arith.mulf %247, %251 : vector<8x32xf32>
    %253 = arith.truncf %252 : vector<8x32xf32> to vector<8x32xbf16>
    %c0_99 = arith.constant 0 : index
    %c0_100 = arith.constant 0 : index
    %254 = vector.load %arg10[%c0_99, %c0_100] : memref<32x2048xbf16, #tpu.memory_space<vmem>>, vector<32x2048xbf16>
    %cst_101 = arith.constant dense<0.000000e+00> : vector<8x2048xf32>
    %255 = tpu.matmul %253, %254, %cst_101 {dimension_numbers = #tpu.dot_dimension_numbers<[1], [0], [0], [1], [0, 0, 1, 1], [], []>} : vector<8x32xbf16>, vector<32x2048xbf16>, vector<8x2048xf32> -> vector<8x2048xf32>
    %c0_102 = arith.constant 0 : index
    %c0_103 = arith.constant 0 : index
    %256 = vector.load %arg11[%c0_102, %c0_103] : memref<1x2048xf32, #tpu.memory_space<vmem>>, vector<1x2048xf32>
    %257 = vector.broadcast %256 : vector<1x2048xf32> to vector<8x2048xf32>
    %258 = arith.addf %255, %257 : vector<8x2048xf32>
    %c0_104 = arith.constant 0 : index
    %c0_105 = arith.constant 0 : index
    %c0_106 = arith.constant 0 : index
    %259 = vector.load %arg12[%c0_104, %c0_105, %c0_106] : memref<1x8x2048xf32, #tpu.memory_space<vmem>>, vector<1x8x2048xf32>
    %260 = vector.shape_cast %259 : vector<1x8x2048xf32> to vector<8x2048xf32>
    %261 = vector.shape_cast %258 : vector<8x2048xf32> to vector<1x8x2048xf32>
    tpu.vector_store %arg12[%c0_104, %c0_105, %c0_106], %261 {strides = array<i32>} : memref<1x8x2048xf32, #tpu.memory_space<vmem>>, vector<1x8x2048xf32>,
    return
  }
  func.func @transform_0(%arg0: i32) -> (i32, i32, i32) {
    %c0_i32 = arith.constant 0 : i32
    %c0_i32_0 = arith.constant 0 : i32
    %c0_i32_1 = arith.constant 0 : i32
    return %arg0, %c0_i32, %c0_i32_0 : i32, i32, i32
  }
  func.func @transform_1(%arg0: i32) -> (i32, i32, i32) {
    %c0_i32 = arith.constant 0 : i32
    %c0_i32_0 = arith.constant 0 : i32
    %c0_i32_1 = arith.constant 0 : i32
    %c0_i32_2 = arith.constant 0 : i32
    return %c0_i32, %c0_i32_0, %c0_i32_1 : i32, i32, i32
  }
  func.func @transform_2(%arg0: i32) -> (i32, i32, i32) {
    %c0_i32 = arith.constant 0 : i32
    %c0_i32_0 = arith.constant 0 : i32
    %c0_i32_1 = arith.constant 0 : i32
    %c0_i32_2 = arith.constant 0 : i32
    return %c0_i32, %c0_i32_0, %c0_i32_1 : i32, i32, i32
  }
  func.func @transform_3(%arg0: i32) -> (i32, i32, i32) {
    %c0_i32 = arith.constant 0 : i32
    %c0_i32_0 = arith.constant 0 : i32
    %c0_i32_1 = arith.constant 0 : i32
    %c0_i32_2 = arith.constant 0 : i32
    return %c0_i32, %c0_i32_0, %c0_i32_1 : i32, i32, i32
  }
  func.func @transform_4(%arg0: i32) -> (i32, i32, i32) {
    %c0_i32 = arith.constant 0 : i32
    %c0_i32_0 = arith.constant 0 : i32
    %c0_i32_1 = arith.constant 0 : i32
    %c0_i32_2 = arith.constant 0 : i32
    return %c0_i32, %c0_i32_0, %c0_i32_1 : i32, i32, i32
  }
  func.func @transform_5(%arg0: i32) -> (i32, i32, i32) {
    %c0_i32 = arith.constant 0 : i32
    %c0_i32_0 = arith.constant 0 : i32
    %c0_i32_1 = arith.constant 0 : i32
    %c0_i32_2 = arith.constant 0 : i32
    return %c0_i32, %c0_i32_0, %c0_i32_1 : i32, i32, i32
  }
  func.func @transform_6(%arg0: i32) -> (i32, i32, i32) {
    %c0_i32 = arith.constant 0 : i32
    %c0_i32_0 = arith.constant 0 : i32
    %c0_i32_1 = arith.constant 0 : i32
    %c0_i32_2 = arith.constant 0 : i32
    return %c0_i32, %c0_i32_0, %c0_i32_1 : i32, i32, i32
  }
  func.func @transform_7(%arg0: i32) -> (i32, i32, i32) {
    %c0_i32 = arith.constant 0 : i32
    %c0_i32_0 = arith.constant 0 : i32
    %c0_i32_1 = arith.constant 0 : i32
    %c0_i32_2 = arith.constant 0 : i32
    return %c0_i32, %c0_i32_0, %c0_i32_1 : i32, i32, i32
  }
  func.func @transform_8(%arg0: i32) -> (i32, i32, i32) {
    %c0_i32 = arith.constant 0 : i32
    %c0_i32_0 = arith.constant 0 : i32
    %c0_i32_1 = arith.constant 0 : i32
    %c0_i32_2 = arith.constant 0 : i32
    return %c0_i32, %c0_i32_0, %c0_i32_1 : i32, i32, i32
  }
  func.func @transform_9(%arg0: i32) -> (i32, i32) {
    %c0_i32 = arith.constant 0 : i32
    %c0_i32_0 = arith.constant 0 : i32
    %c0_i32_1 = arith.constant 0 : i32
    return %c0_i32, %c0_i32_0 : i32, i32
  }
  func.func @transform_10(%arg0: i32) -> (i32, i32) {
    %c0_i32 = arith.constant 0 : i32
    %c0_i32_0 = arith.constant 0 : i32
    %c0_i32_1 = arith.constant 0 : i32
    return %c0_i32, %c0_i32_0 : i32, i32
  }
  func.func @transform_11(%arg0: i32) -> (i32, i32, i32) {
    %c0_i32 = arith.constant 0 : i32
    %c0_i32_0 = arith.constant 0 : i32
    %c0_i32_1 = arith.constant 0 : i32
    return %arg0, %c0_i32, %c0_i32_0 : i32, i32, i32
  }
}

</mosaic_0001>

<bundles_post_ra>
// kernel: gpt_forward.1
= control target key start
LH: loop header
LB: loop body
LE: loop exit
PB: predicated region body
PF: predicated region fallthrough
CT: control target
= control target key end

     0   :  { %s17889_s17 = smov 0   ;;  %s24227_s0 = inlined_call_operand.vmem [shape: f32[2,72,32], index: 0, kind: input, shape index: {}]   ;;  %s24228_s1 = inlined_call_operand.vmem [shape: bf16[2,32,96], index: 1, kind: input, shape index: {}]   ;;  %s24229_s2 = inlined_call_operand.vmem [shape: f32[2,1,96], index: 2, kind: input, shape index: {}]   ;;  %s24230_s3 = inlined_call_operand.vmem [shape: bf16[2,32,32], index: 3, kind: input, shape index: {}]   ;;  %s24231_s4 = inlined_call_operand.vmem [shape: f32[2,1,32], index: 4, kind: input, shape index: {}]   ;;  %s24232_s5 = inlined_call_operand.vmem [shape: bf16[2,32,128], index: 5, kind: input, shape index: {}]   ;;  %s24233_s6 = inlined_call_operand.vmem [shape: f32[2,1,128], index: 6, kind: input, shape index: {}]   ;;  %s24234_s7 = inlined_call_operand.vmem [shape: bf16[2,128,32], index: 7, kind: input, shape index: {}]   ;;  %s24235_s8 = inlined_call_operand.vmem [shape: f32[2,1,32], index: 8, kind: input, shape index: {}]   ;;  %s24236_s9 = inlined_call_operand.vmem [shape: bf16[32,2048], index: 9, kind: input, shape index: {}]   ;;  %s24237_s10 = inlined_call_operand.vmem [shape: f32[1,2048], index: 10, kind: input, shape index: {}]   ;;  %s24238_s11 = inlined_call_operand.vmem [shape: f32[2,8,2048], index: 11, kind: output, shape index: {}]  }
   0x1 LB: > { %s15932_s18 = sadd.s32 4294967295, %s17813_s17   ;;  %p15936_p0 = scmp.ge.s32.totalorder %s17813_s17, 1  ;;  %s17813_s17 = sphi %s17889_s17, %s21_s17  }
   0x2   : > { %p337_p1 = scmp.lt.s32.totalorder %s17813_s17, 3 }
   0x4   : > { %p338_p2 = pnand %p15936_p0, %p337_p1 }
   0x6   : > { %341 = sbr.rel (%p338_p2) target bundleno = 6350 (0x18ce), region = 64 }
   0xd   : > { %p377_p3 = scmp.lt.s32.totalorder %s15932_s18, 1  ;;  %vm427_vm0 = vcmask 261120   ;;  %v17372_v63 = vld [vmem:[%s24228_s1] sm:$0xff]   ;;  %vm17816_vm1 = vmmov 0   ;;  %s17817_s29 = smov 112   ;;  %vm4699_vm2 = vcmask 64512  }
   0xe   : > { %s17818_s30 = smov 120   ;;  %s17819_s12 = smov 96   ;;  %vm5108_vm5 = vcmask 588800   ;;  %vm5540_vm13 = vcmask 1043456   ;;  %vm7227_vm14 = vcmask 130048   ;;  %vm7237_vm15 = vcmask 195584  }
   0xf   : > { %s24699_s18 = smov (!%p377_p3, %s15932_s18), 1  ;;  %s17820_s13 = smov 104  }
  0x10   : > { %s17229_s19 = smul.u32 72, %s24699_s18  ;;  %s17823_s14 = smov 64  }
  0x11   : > { %s17825_s21 = smov 16   ;;  %s17826_s23 = smov 8  }
  0x12   : > { %s17903_s22 = scalar_lea.vmem %s24227_s0, %s17229_s19  ;;  %s17827_s24 = smov 24  }
  0x13   : > { %v388_v0 = vld [vmem:[%s17903_s22] sm:$0xff]  ;;  %v390_v1 = vld [vmem:[%s17903_s22 + $0x10] sm:$0xff]  ;;  %v389_v2 = vld [vmem:[%s17903_s22 + $0x8] sm:$0xff]  ;;  %s16304_s26 = sshll.u32 %s24699_s18, 7 }
  0x14   : > { %v428_v3 = vsel %vm427_vm0, %v388_v0, 0.0  ;;  %v434_v4 = vsel %vm427_vm0, %v390_v1, 0.0  ;;  %v391_v5 = vld [vmem:[%s17903_s22 + $0x18] sm:$0xff]  ;;  %v392_v6 = vld [vmem:[%s17903_s22 + $0x20] sm:$0xff]  ;;  %v393_v7 = vld [vmem:[%s17903_s22 + $0x28] sm:$0xff]  ;;  %v431_v8 = vsel %vm427_vm0, %v389_v2, 0.0 }
  0x15   : > { %429 = vadd.xlane.f32.xlu0 %v428_v3  ;;  %435 = vadd.xlane.f32.xlu1 %v434_v4  ;;  %v437_v9 = vsel %vm427_vm0, %v391_v5, 0.0  ;;  %v440_v10 = vsel %vm427_vm0, %v392_v6, 0.0  ;;  %v394_v11 = vld [vmem:[%s17903_s22 + $0x30] sm:$0xff]  ;;  %v395_v12 = vld [vmem:[%s17903_s22 + $0x38] sm:$0xff]  ;;  %v396_v13 = vld [vmem:[%s17903_s22 + $0x40] sm:$0xff]  ;;  %v443_v14 = vsel %vm427_vm0, %v393_v7, 0.0 }
  0x16   : > { %v446_v15 = vsel %vm427_vm0, %v394_v11, 0.0  ;;  %v449_v16 = vsel %vm427_vm0, %v395_v12, 0.0  ;;  %v452_v17 = vsel %vm427_vm0, %v396_v13, 0.0 }
  0x19   : > { %432 = vadd.xlane.f32.xlu0 %v431_v8  ;;  %438 = vadd.xlane.f32.xlu1 %v437_v9 }
  0x1d   : > { %441 = vadd.xlane.f32.xlu0 %v440_v10  ;;  %444 = vadd.xlane.f32.xlu1 %v443_v14 }
  0x21   : > { %447 = vadd.xlane.f32.xlu0 %v446_v15  ;;  %450 = vadd.xlane.f32.xlu1 %v449_v16 }
  0x25   : > { %453 = vadd.xlane.f32.xlu0 %v452_v17 }
  0xa2   : > { %v430_v18 = vpop.xlane.xlu0 %429  ;;  %v436_v19 = vpop.xlane.xlu1 %435 }
  0xa3   : > { %v456_v20 = vmul.f32 0.03125, %v430_v18  ;;  %v458_v21 = vmul.f32 0.03125, %v436_v19 }
  0xa5   : > { %v17923_v22 = vsub.f32 %v388_v0, %v456_v20  ;;  %v17925_v23 = vsub.f32 %v390_v1, %v458_v21  ;;  %v24240_v0 = vmov 0.0   ;;  %v17373_v1 = vld [vmem:[%s24228_s1 + $0x8] sm:$0xff]  }
  0xa6   : > { %v433_v24 = vpop.xlane.xlu0 %432  ;;  %v439_v25 = vpop.xlane.xlu1 %438  ;;  %16533 = vmatprep.subr.bf16.mxu0 %v24240_v0  ;;  %16557 = vmatprep.subr.bf16.mxu1 %v24240_v0 }
  0xa7   : > { %v457_v26 = vmul.f32 0.03125, %v433_v24  ;;  %v459_v27 = vmul.f32 0.03125, %v439_v25  ;;  %v474_v28 = vmul.f32 %v17923_v22, %v17923_v22  ;;  %v476_v29 = vmul.f32 %v17925_v23, %v17925_v23  ;;  %16534 = vmatpush3.bf16.msra.mxu0 %v17372_v63  ;;  %16537 = vmatprep.mubr.msk.bf16.mxu0 %vm17816_vm1, %v24240_v0 }
  0xa8   : > { %16535 = vmatprep.subr.bf16.mxu0 %v24240_v0  ;;  %16567 = vmatprep.mubr.msk.bf16.mxu1 %vm17816_vm1, %v24240_v0 }
  0xa9   : > { %v17931_v30 = vsub.f32 %v389_v2, %v457_v26  ;;  %v17933_v31 = vsub.f32 %v391_v5, %v459_v27  ;;  %v483_v32 = vsel %vm427_vm0, %v474_v28, 0.0  ;;  %v489_v35 = vsel %vm427_vm0, %v476_v29, 0.0 }
  0xaa   : > { %484 = vadd.xlane.f32.xlu1 %v483_v32  ;;  %v442_v33 = vpop.xlane.xlu0 %441  ;;  %v445_v34 = vpop.xlane.xlu1 %444 }
  0xab   : > { %v460_v36 = vmul.f32 0.03125, %v442_v33  ;;  %v461_v37 = vmul.f32 0.03125, %v445_v34  ;;  %v475_v38 = vmul.f32 %v17931_v30, %v17931_v30  ;;  %v477_v39 = vmul.f32 %v17933_v31, %v17933_v31  ;;  %16536 = vmatpush3.bf16.msra.mxu0 %v17373_v1 }
  0xac   : > { %16587 = vmatprep.subr.bf16.mxu0 %v24240_v0 }
  0xad   : > { %v17941_v40 = vsub.f32 %v392_v6, %v460_v36  ;;  %v17943_v41 = vsub.f32 %v393_v7, %v461_v37  ;;  %v486_v42 = vsel %vm427_vm0, %v475_v38, 0.0  ;;  %v492_v45 = vsel %vm427_vm0, %v477_v39, 0.0 }
  0xae   : > { %490 = vadd.xlane.f32.xlu1 %v489_v35  ;;  %487 = vadd.xlane.f32.xlu0 %v486_v42  ;;  %v448_v43 = vpop.xlane.xlu0 %447  ;;  %v451_v44 = vpop.xlane.xlu1 %450 }
  0xaf   : > { %v462_v46 = vmul.f32 0.03125, %v448_v43  ;;  %v463_v47 = vmul.f32 0.03125, %v451_v44  ;;  %v478_v48 = vmul.f32 %v17941_v40, %v17941_v40  ;;  %v479_v49 = vmul.f32 %v17943_v41, %v17943_v41 }
  0xb1   : > { %v17951_v50 = vsub.f32 %v394_v11, %v462_v46  ;;  %v17953_v51 = vsub.f32 %v395_v12, %v463_v47  ;;  %v495_v52 = vsel %vm427_vm0, %v478_v48, 0.0  ;;  %v498_v55 = vsel %vm427_vm0, %v479_v49, 0.0 }
  0xb2   : > { %493 = vadd.xlane.f32.xlu0 %v492_v45  ;;  %496 = vadd.xlane.f32.xlu1 %v495_v52  ;;  %v454_v53 = vpop.xlane.xlu0 %453 }
  0xb3   : > { %v464_v54 = vmul.f32 0.03125, %v454_v53  ;;  %v480_v56 = vmul.f32 %v17951_v50, %v17951_v50  ;;  %v481_v57 = vmul.f32 %v17953_v51, %v17953_v51 }
  0xb5   : > { %v17961_v58 = vsub.f32 %v396_v13, %v464_v54  ;;  %v501_v59 = vsel %vm427_vm0, %v480_v56, 0.0  ;;  %v504_v60 = vsel %vm427_vm0, %v481_v57, 0.0 }
  0xb6   : > { %499 = vadd.xlane.f32.xlu0 %v498_v55  ;;  %502 = vadd.xlane.f32.xlu1 %v501_v59 }
  0xb7   : > { %v482_v61 = vmul.f32 %v17961_v58, %v17961_v58 }
  0xb9   : > { %v507_v62 = vsel %vm427_vm0, %v482_v61, 0.0 }
  0xba   : > { %505 = vadd.xlane.f32.xlu0 %v504_v60  ;;  %508 = vadd.xlane.f32.xlu1 %v507_v62 }
 0x137   : > { %v485_v2 = vpop.xlane.xlu1 %484 }
 0x138   : > { %v510_v3 = vmul.f32 0.03125, %v485_v2 }
 0x13a   : > { %v519_v4 = vadd.f32 1e-05, %v510_v3 }
 0x13b   : > { %v488_v5 = vpop.xlane.xlu0 %487  ;;  %v491_v6 = vpop.xlane.xlu1 %490 }
 0x13c   : > { %v511_v7 = vmul.f32 0.03125, %v488_v5  ;;  %17400 = vrsqrt.f32 %v519_v4  ;;  %v512_v9 = vmul.f32 0.03125, %v491_v6 }
 0x13e   : > { %v520_v8 = vadd.f32 1e-05, %v511_v7  ;;  %v521_v13 = vadd.f32 1e-05, %v512_v9 }
 0x13f   : > { %v494_v10 = vpop.xlane.xlu0 %493  ;;  %v497_v15 = vpop.xlane.xlu1 %496 }
 0x140   : > { %v513_v11 = vmul.f32 0.03125, %v494_v10  ;;  %17402 = vrsqrt.f32 %v520_v8  ;;  %v514_v17 = vmul.f32 0.03125, %v497_v15 }
 0x142   : > { %v522_v12 = vadd.f32 1e-05, %v513_v11  ;;  %v523_v24 = vadd.f32 1e-05, %v514_v17 }
 0x143   : > { %v500_v14 = vpop.xlane.xlu0 %499  ;;  %v503_v25 = vpop.xlane.xlu1 %502 }
 0x144   : > { %17404 = vrsqrt.f32 %v522_v12  ;;  %v515_v16 = vmul.f32 0.03125, %v500_v14  ;;  %v516_v33 = vmul.f32 0.03125, %v503_v25 }
 0x145   : > { %17406 = vrsqrt.f32 %v521_v13 }
 0x146   : > { %v17401_v18 = vpop.eup %17400  ;;  %v524_v19 = vadd.f32 1e-05, %v515_v16  ;;  %v525_v38 = vadd.f32 1e-05, %v516_v33 }
 0x147   : > { %v506_v20 = vpop.xlane.xlu0 %505  ;;  %v537_v26 = vmul.f32 %v17401_v18, %v17923_v22  ;;  %v509_v36 = vpop.xlane.xlu1 %508 }
 0x148   : > { %17408 = vrsqrt.f32 %v524_v19  ;;  %v517_v28 = vmul.f32 0.03125, %v506_v20 }
 0x149   : > { %17410 = vrsqrt.f32 %v523_v24 }
 0x14a   : > { %v17403_v21 = vpop.eup %17402  ;;  %v526_v35 = vadd.f32 1e-05, %v517_v28 }
 0x14b   : > { %v538_v27 = vmul.f32 %v17403_v21, %v17931_v30  ;;  %v518_v30 = vmul.f32 0.03125, %v509_v36  ;;  %v17821_v36 = vmov 1983009808  }
 0x14c   : > { %17412 = vrsqrt.f32 %v526_v35  ;;  %v24239_v35 = vlaneseq }
 0x14d   : > { %v546_v29 = vpack.c.bf16 %v538_v27, %v537_v26  ;;  %17414 = vrsqrt.f32 %v525_v38  ;;  %v527_v44 = vadd.f32 1e-05, %v518_v30 }
 0x14e   : > { %v17405_v32 = vpop.eup %17404  ;;  %v18144_v30 = vshrl.u32 %v24239_v35, 7 }
 0x14f   : > { %16538 = vmatmul.mubr.msk.bf16.vlgmr.msra.gmra.mrb[0].mxu0 %vm427_vm0, %v546_v29  ;;  %v17407_v34 = vpop.eup %17406  ;;  %v540_v37 = vmul.f32 %v17405_v32, %v17933_v31  ;;  %17416 = vrsqrt.f32 %v527_v44 }
 0x150   : > { %16541 = vmatprep.mubr.msk.bf16.mxu0 %vm17816_vm1, %v24240_v0  ;;  %v539_v22 = vmul.f32 %v17407_v34, %v17925_v23  ;;  %24378 = vst [vmem:[#allocation8_spill] sm:$0xff] %v18144_v30 }
 0x152   : > { %v547_v39 = vpack.c.bf16 %v540_v37, %v539_v22  ;;  %v17409_v42 = vpop.eup %17408  ;;  %v754_v37 = vunpack.c.l.s4 %v17821_v36 }
 0x153   : > { %v17411_v43 = vpop.eup %17410  ;;  %v542_v45 = vmul.f32 %v17409_v42, %v17943_v41  ;;  %v17822_v42 = vmov 1934713408  }
 0x154   : > { %v541_v46 = vmul.f32 %v17411_v43, %v17941_v40  ;;  %v786_v43 = vunpack.c.l.s4 %v17822_v42 }
 0x156   : > { %v548_v31 = vpack.c.bf16 %v542_v45, %v541_v46  ;;  %v17413_v47 = vpop.eup %17412 }
 0x157   : > { %16542 = vmatmul.mubr.msk.bf16.gmra.mrb[4].mxu0 %vm427_vm0, %v547_v39  ;;  %v17415_v23 = vpop.eup %17414  ;;  %v544_v48 = vmul.f32 %v17413_v47, %v17953_v51  ;;  %v15940_v51 = vld [vmem:[%s24229_s2] ss:$0 sm:$0xff]  ;;  %v755_v39 = vunpack.c.0.s8 %v754_v37 }
 0x158   : > { %16545 = vmatprep.mubr.msk.bf16.mxu0 %vm17816_vm1, %v24240_v0  ;;  %v543_v49 = vmul.f32 %v17415_v23, %v17951_v50 }
 0x159   : > { %v17417_v53 = vpop.eup %17416 }
 0x15a   : > { %v549_v52 = vpack.c.bf16 %v544_v48, %v543_v49  ;;  %v545_v40 = vmul.f32 %v17417_v53, %v17961_v58  ;;  %v787_v49 = vunpack.c.0.s8 %v786_v43 }
 0x15c   : > { %v550_v41 = vpack.c.bf16 %v545_v40, %v545_v40 }
 0x15f   : > { %16546 = vmatmul.mubr.msk.bf16.gmra.mrb[8].mxu0 %vm427_vm0, %v548_v31  ;;  %v18155_v31 = vsub.s32 %v755_v39, %v18144_v30 }
 0x160   : > { %16549 = vmatprep.mubr.msk.bf16.mxu0 %vm17816_vm1, %v24240_v0 }
 0x161   : > { %24380 = vst [vmem:[#allocation10_spill] sm:$0xff] %v18155_v31 }
 0x167   : > { %16550 = vmatmul.mubr.msk.bf16.gmra.mrb[12].mxu0 %vm427_vm0, %v549_v52 }
 0x168   : > { %16553 = vmatprep.mubr.msk.bf16.mxu0 %vm17816_vm1, %v24240_v0 }
 0x16f   : > { %16554 = vmatmul.mubr.msk.bf16.gmra.mrb[16].mxu0 %vm427_vm0, %v550_v41 }
 0x170   : > { %16597 = vmatprep.mubr.msk.bf16.mxu0 %vm17816_vm1, %v24240_v0 }
 0x222   : > { %v623_v50 = vpop.f32.mrb[0].mxu0 }
 0x223   : > { %v18009_v54 = vadd.f32 %v15940_v51, %v623_v50  ;;  %v16539_v55 = vpop.f32.mrb[1].mxu0 }
 0x224   : > { %v626_v56 = vpop.f32.mrb[2].mxu0  ;;  %v18180_v55 = vsub.s32 %v787_v49, %v18144_v30 }
 0x225   : > { %697 = vrot.lane.b32.xlu1 %v18009_v54, %s17817_s29  ;;  %670 = vrot.lane.b32.xlu0 %v18009_v54, %s17818_s30  ;;  %v16540_v57 = vpop.f32.mrb[3].mxu0  ;;  %v18019_v59 = vadd.f32 %v15940_v51, %v626_v56 }
 0x229   : > { %1995 = vrot.lane.b32.xlu1 %v18009_v54, %s17819_s12  ;;  %724 = vrot.lane.b32.xlu0 %v18009_v54, %s17820_s13 }
 0x22a   : > { %v631_v58 = vpop.f32.mrb[4].mxu0 }
 0x22b   : > { %v16543_v60 = vpop.f32.mrb[5].mxu0  ;;  %v18025_v63 = vadd.f32 %v15940_v51, %v631_v58 }
 0x22c   : > { %v634_v61 = vpop.f32.mrb[6].mxu0 }
 0x22d   : > { %1997 = vrot.lane.b32.xlu0 %v18019_v59, %s17819_s12  ;;  %672 = vrot.lane.b32.xlu1 %v18019_v59, %s17818_s30  ;;  %v16544_v62 = vpop.f32.mrb[7].mxu0  ;;  %v18039_v6 = vadd.f32 %v15940_v51, %v634_v61 }
 0x231   : > { %699 = vrot.lane.b32.xlu1 %v18019_v59, %s17817_s29  ;;  %674 = vrot.lane.b32.xlu0 %v18025_v63, %s17818_s30 }
 0x232   : > { %v639_v1 = vpop.f32.mrb[8].mxu0 }
 0x233   : > { %v16547_v2 = vpop.f32.mrb[9].mxu0  ;;  %v18045_v10 = vadd.f32 %v15940_v51, %v639_v1 }
 0x234   : > { %v642_v3 = vpop.f32.mrb[10].mxu0 }
 0x235   : > { %726 = vrot.lane.b32.xlu1 %v18019_v59, %s17820_s13  ;;  %701 = vrot.lane.b32.xlu0 %v18025_v63, %s17817_s29  ;;  %v16548_v4 = vpop.f32.mrb[11].mxu0  ;;  %v18055_v15 = vadd.f32 %v15940_v51, %v642_v3 }
 0x239   : > { %1999 = vrot.lane.b32.xlu1 %v18025_v63, %s17819_s12  ;;  %728 = vrot.lane.b32.xlu0 %v18025_v63, %s17820_s13 }
 0x23a   : > { %v647_v5 = vpop.f32.mrb[12].mxu0 }
 0x23b   : > { %v16551_v7 = vpop.f32.mrb[13].mxu0  ;;  %v18061_v16 = vadd.f32 %v15940_v51, %v647_v5 }
 0x23c   : > { %v650_v8 = vpop.f32.mrb[14].mxu0 }
 0x23d   : > { %2001 = vrot.lane.b32.xlu0 %v18039_v6, %s17819_s12  ;;  %676 = vrot.lane.b32.xlu1 %v18039_v6, %s17818_s30  ;;  %v16552_v9 = vpop.f32.mrb[15].mxu0  ;;  %v18071_v17 = vadd.f32 %v15940_v51, %v650_v8 }
 0x241   : > { %703 = vrot.lane.b32.xlu1 %v18039_v6, %s17817_s29  ;;  %678 = vrot.lane.b32.xlu0 %v18045_v10, %s17818_s30 }
 0x242   : > { %v655_v11 = vpop.f32.mrb[16].mxu0 }
 0x243   : > { %v16555_v12 = vpop.f32.mrb[17].mxu0  ;;  %v18081_v18 = vadd.f32 %v15940_v51, %v655_v11 }
 0x244   : > { %v658_v13 = vpop.f32.mrb[18].mxu0 }
 0x245   : > { %730 = vrot.lane.b32.xlu1 %v18039_v6, %s17820_s13  ;;  %705 = vrot.lane.b32.xlu0 %v18045_v10, %s17817_s29  ;;  %v16556_v14 = vpop.f32.mrb[19].mxu0  ;;  %24372 = vst [vmem:[#allocation2_spill] sm:$0xff] %v18081_v18 }
 0x249   : > { %732 = vrot.lane.b32.xlu0 %v18045_v10, %s17820_s13  ;;  %680 = vrot.lane.b32.xlu1 %v18055_v15, %s17818_s30 }
 0x24d   : > { %707 = vrot.lane.b32.xlu1 %v18055_v15, %s17817_s29  ;;  %682 = vrot.lane.b32.xlu0 %v18061_v16, %s17818_s30 }
 0x251   : > { %734 = vrot.lane.b32.xlu1 %v18055_v15, %s17820_s13  ;;  %709 = vrot.lane.b32.xlu0 %v18061_v16, %s17817_s29 }
 0x255   : > { %736 = vrot.lane.b32.xlu0 %v18061_v16, %s17820_s13  ;;  %684 = vrot.lane.b32.xlu1 %v18071_v17, %s17818_s30 }
 0x259   : > { %2005 = vrot.lane.b32.xlu0 %v18055_v15, %s17819_s12  ;;  %711 = vrot.lane.b32.xlu1 %v18071_v17, %s17817_s29 }
 0x25d   : > { %738 = vrot.lane.b32.xlu1 %v18071_v17, %s17820_s13  ;;  %686 = vrot.lane.b32.xlu0 %v18081_v18, %s17818_s30 }
 0x261   : > { %2003 = vrot.lane.b32.xlu1 %v18045_v10, %s17819_s12  ;;  %740 = vrot.lane.b32.xlu0 %v18081_v18, %s17820_s13 }
 0x265   : > { %713 = vrot.lane.b32.xlu1 %v18081_v18, %s17817_s29  ;;  %2009 = vrot.lane.b32.xlu0 %v18071_v17, %s17819_s12 }
 0x269   : > { %2007 = vrot.lane.b32.xlu1 %v18061_v16, %s17819_s12 }
 0x297   : > { %v18097_v19 = vpop.permute.xlu1 %697  ;;  %v18099_v20 = vpop.permute.xlu0 %670 }
 0x298   : > { %2013 = vrot.lane.b32.xlu1 %v18099_v20, %s17819_s12  ;;  %v751_v47 = vcombine.low %v18009_v54, %v18097_v19  ;;  %v752_v48 = vcombine.high %v18009_v54, %v18097_v19 }
 0x29a   : > { %v759_v41 = vrot.slane %v751_v47, %v18155_v31  ;;  %v766_v50 = vrot.slane %v752_v48, %v18155_v31 }
 0x29b   : > { %v18103_v21 = vpop.permute.xlu1 %1995  ;;  %v18105_v24 = vpop.permute.xlu0 %724 }
 0x29c   : > { %24373 = vst [vmem:[#allocation3_spill] sm:$0xff] %v18103_v21  ;;  %2031 = vrot.lane.b32.xlu1 %v18097_v19, %s17819_s12  ;;  %v767_v44 = vcombine.low %v18099_v20, %v18105_v24  ;;  %v768_v23 = vcombine.high %v18099_v20, %v18105_v24 }
 0x29e   : > { %v775_v52 = vrot.slane %v767_v44, %v18155_v31  ;;  %v782_v51 = vrot.slane %v768_v23, %v18155_v31 }
 0x29f   : > { %v18109_v25 = vpop.permute.xlu1 %672  ;;  %v18111_v26 = vpop.permute.xlu0 %1997 }
 0x2a0   : > { %24374 = vst [vmem:[#allocation4_spill] sm:$0xff] %v18111_v26  ;;  %2015 = vrot.lane.b32.xlu0 %v18109_v25, %s17819_s12  ;;  %2049 = vrot.lane.b32.xlu1 %v18105_v24, %s17819_s12  ;;  %v783_v56 = vcombine.low %v759_v41, %v775_v52  ;;  %v784_v57 = vcombine.high %v759_v41, %v775_v52 }
 0x2a1   : > { %v799_v61 = vcombine.low %v766_v50, %v782_v51  ;;  %v800_v62 = vcombine.high %v766_v50, %v782_v51 }
 0x2a2   : > { %v791_v1 = vrot.slane %v783_v56, %v18180_v55  ;;  %v798_v2 = vrot.slane %v784_v57, %v18180_v55 }
 0x2a3   : > { %v18117_v27 = vpop.permute.xlu1 %699  ;;  %v18119_v28 = vpop.permute.xlu0 %674  ;;  %v807_v8 = vrot.slane %v799_v61, %v18180_v55  ;;  %v814_v9 = vrot.slane %v800_v62, %v18180_v55 }
 0x2a4   : > { %2033 = vrot.lane.b32.xlu0 %v18117_v27, %s17819_s12  ;;  %2017 = vrot.lane.b32.xlu1 %v18119_v28, %s17819_s12  ;;  %v819_v11 = vcombine.low %v18019_v59, %v18117_v27  ;;  %v820_v12 = vcombine.high %v18019_v59, %v18117_v27  ;;  %v1363_v13 = vcombine.low %v791_v1, %v798_v2 }
 0x2a5   : > { %v15948_v14 = vcombine.high %v791_v1, %v798_v2  ;;  %v1379_v43 = vcombine.low %v807_v8, %v814_v9  ;;  %v15949_v44 = vcombine.high %v807_v8, %v814_v9 }
 0x2a6   : > { %v827_v47 = vrot.slane %v819_v11, %v18155_v31  ;;  %v834_v23 = vrot.slane %v820_v12, %v18155_v31  ;;  %v1370_v49 = vrot.slane %v1363_v13, %v18155_v31 }
 0x2a7   : > { %v18125_v29 = vpop.permute.xlu1 %726  ;;  %v18127_v32 = vpop.permute.xlu0 %701  ;;  %v1378_v52 = vrot.slane %v15948_v14, %v18155_v31  ;;  %v1386_v2 = vrot.slane %v1379_v43, %v18155_v31 }
 0x2a8   : > { %2051 = vrot.lane.b32.xlu0 %v18125_v29, %s17819_s12  ;;  %2035 = vrot.lane.b32.xlu1 %v18127_v32, %s17819_s12  ;;  %v835_v3 = vcombine.low %v18109_v25, %v18125_v29  ;;  %v836_v4 = vcombine.high %v18109_v25, %v18125_v29  ;;  %v887_v62 = vcombine.low %v18025_v63, %v18127_v32 }
 0x2aa   : > { %v843_v36 = vrot.slane %v835_v3, %v18155_v31  ;;  %v850_v37 = vrot.slane %v836_v4, %v18155_v31  ;;  %v1394_v3 = vrot.slane %v15949_v44, %v18155_v31  ;;  %v888_v4 = vcombine.high %v18025_v63, %v18127_v32 }
 0x2ab   : > { %v18133_v33 = vpop.permute.xlu1 %1999  ;;  %v18135_v34 = vpop.permute.xlu0 %728  ;;  %v1395_v44 = vcombine.low %v1370_v49, %v1378_v52 }
 0x2ac   : > { %24375 = vst [vmem:[#allocation5_spill] sm:$0xff] %v18133_v33  ;;  %24376 = vst [vmem:[#allocation6_spill] sm:$0xff] %v18135_v34  ;;  %2053 = vrot.lane.b32.xlu1 %v18135_v34, %s17819_s12  ;;  %v903_v48 = vcombine.low %v18119_v28, %v18135_v34  ;;  %v851_v41 = vcombine.low %v827_v47, %v843_v36  ;;  %v852_v51 = vcombine.high %v827_v47, %v843_v36 }
 0x2ad   : > { %v867_v50 = vcombine.low %v834_v23, %v850_v37  ;;  %v868_v56 = vcombine.high %v834_v23, %v850_v37  ;;  %v904_v1 = vcombine.high %v18119_v28, %v18135_v34  ;;  %v895_v36 = vrot.slane %v887_v62, %v18155_v31 }
 0x2ae   : > { %v911_v8 = vrot.slane %v903_v48, %v18155_v31  ;;  %v859_v9 = vrot.slane %v851_v41, %v18180_v55  ;;  %v866_v11 = vrot.slane %v852_v51, %v18180_v55  ;;  %v1411_v47 = vcombine.low %v1386_v2, %v1394_v3 }
 0x2af   : > { %v18139_v38 = vpop.permute.xlu1 %676  ;;  %v18141_v22 = vpop.permute.xlu0 %2001  ;;  %v875_v12 = vrot.slane %v867_v50, %v18180_v55  ;;  %v882_v13 = vrot.slane %v868_v56, %v18180_v55  ;;  %v918_v37 = vrot.slane %v904_v1, %v18155_v31  ;;  %v1396_v23 = vcombine.high %v1370_v49, %v1378_v52 }
 0x2b0   : > { %24377 = vst [vmem:[#allocation7_spill] sm:$0xff] %v18141_v22  ;;  %2019 = vrot.lane.b32.xlu0 %v18139_v38, %s17819_s12  ;;  %v1412_v48 = vcombine.high %v1386_v2, %v1394_v3  ;;  %v902_v41 = vrot.slane %v888_v4, %v18155_v31  ;;  %v919_v51 = vcombine.low %v895_v36, %v911_v8 }
 0x2b1   : > { %v920_v50 = vcombine.high %v895_v36, %v911_v8  ;;  %v1431_v56 = vcombine.low %v859_v9, %v866_v11  ;;  %v15950_v62 = vcombine.high %v859_v9, %v866_v11  ;;  %v1447_v35 = vcombine.low %v875_v12, %v882_v13 }
 0x2b2   : > { %v15951_v1 = vcombine.high %v875_v12, %v882_v13  ;;  %v935_v30 = vcombine.low %v902_v41, %v918_v37  ;;  %v18263_v22 = vrot.slane %v1395_v44, %v18180_v55  ;;  %v18266_v49 = vrot.slane %v1411_v47, %v18180_v55 }
 0x2b3   : > { %v18150_v45 = vpop.permute.xlu1 %703  ;;  %v18152_v46 = vpop.permute.xlu0 %678  ;;  %v18271_v2 = vrot.slane %v1396_v23, %v18180_v55  ;;  %v18274_v3 = vrot.slane %v1412_v48, %v18180_v55  ;;  %v927_v4 = vrot.slane %v919_v51, %v18180_v55  ;;  %v934_v8 = vrot.slane %v920_v50, %v18180_v55 }
 0x2b4   : > { %24379 = vst [vmem:[#allocation9_spill] sm:$0xff] %v18152_v46  ;;  %2037 = vrot.lane.b32.xlu0 %v18150_v45, %s17819_s12  ;;  %2021 = vrot.lane.b32.xlu1 %v18152_v46, %s17819_s12  ;;  %24389 = vst [vmem:[#allocation19_spill] sm:$0xff] %v18263_v22  ;;  %v955_v9 = vcombine.low %v18039_v6, %v18150_v45  ;;  %v18285_v13 = vrot.slane %v1431_v56, %v18155_v31 }
 0x2b5   : > { %24390 = vst [vmem:[#allocation20_spill] sm:$0xff] %v18266_v49  ;;  %24391 = vst [vmem:[#allocation21_spill] sm:$0xff] %v18274_v3  ;;  %v18288_v36 = vrot.slane %v15950_v62, %v18155_v31  ;;  %v18294_v44 = vrot.slane %v15951_v1, %v18155_v31  ;;  %v943_v47 = vrot.slane %v935_v30, %v18180_v55 }
 0x2b6   : > { %v15952_v56 = vcombine.high %v927_v4, %v934_v8  ;;  %v963_v62 = vrot.slane %v955_v9, %v18155_v31 }
 0x2b7   : > { %v18168_v53 = vpop.permute.xlu1 %730  ;;  %v18170_v40 = vpop.permute.xlu0 %705  ;;  %v1463_v50 = vcombine.low %v18285_v13, %v18288_v36 }
 0x2b8   : > { %24381 = vst [vmem:[#allocation11_spill] sm:$0xff] %v18170_v40  ;;  %2055 = vrot.lane.b32.xlu0 %v18168_v53, %s17819_s12  ;;  %2039 = vrot.lane.b32.xlu1 %v18170_v40, %s17819_s12  ;;  %v971_v52 = vcombine.low %v18139_v38, %v18168_v53  ;;  %v972_v48 = vcombine.high %v18139_v38, %v18168_v53 }
 0x2b9   : > { %v1024_v9 = vcombine.high %v18045_v10, %v18170_v40  ;;  %v18343_v34 = vrot.slane %v15952_v56, %v18155_v31 }
 0x2ba   : > { %v979_v51 = vrot.slane %v971_v52, %v18155_v31 }
 0x2bb   : > { %v18182_v58 = vpop.permute.xlu1 %680  ;;  %v18184_v60 = vpop.permute.xlu0 %732  ;;  %v1038_v26 = vrot.slane %v1024_v9, %v18155_v31 }
 0x2bc   : > { %24382 = vst [vmem:[#allocation12_spill] sm:$0xff] %v18184_v60  ;;  %2023 = vrot.lane.b32.xlu0 %v18182_v58, %s17819_s12  ;;  %2057 = vrot.lane.b32.xlu1 %v18184_v60, %s17819_s12  ;;  %v1039_v1 = vcombine.low %v18152_v46, %v18184_v60  ;;  %v988_v49 = vcombine.high %v963_v62, %v979_v51 }
 0x2bf   : > { %v18196_v5 = vpop.permute.xlu1 %707  ;;  %v18198_v7 = vpop.permute.xlu0 %682 }
 0x2c0   : > { %24383 = vst [vmem:[#allocation13_spill] sm:$0xff] %v18198_v7  ;;  %2041 = vrot.lane.b32.xlu0 %v18196_v5, %s17819_s12  ;;  %2025 = vrot.lane.b32.xlu1 %v18198_v7, %s17819_s12 }
 0x2c3   : > { %v18212_v39 = vpop.permute.xlu1 %734  ;;  %v18214_v42 = vpop.permute.xlu0 %709 }
 0x2c4   : > { %24384 = vst [vmem:[#allocation14_spill] sm:$0xff] %v18214_v42  ;;  %2059 = vrot.lane.b32.xlu0 %v18212_v39, %s17819_s12  ;;  %2043 = vrot.lane.b32.xlu1 %v18214_v42, %s17819_s12 }
 0x2c7   : > { %v18226_v57 = vpop.permute.xlu1 %684  ;;  %v18228_v61 = vpop.permute.xlu0 %736 }
 0x2c8   : > { %24385 = vst [vmem:[#allocation15_spill] sm:$0xff] %v18226_v57  ;;  %24386 = vst [vmem:[#allocation16_spill] sm:$0xff] %v18228_v61  ;;  %2027 = vrot.lane.b32.xlu0 %v18226_v57, %s17819_s12  ;;  %2061 = vrot.lane.b32.xlu1 %v18228_v61, %s17819_s12  ;;  %v1175_v3 = vcombine.low %v18198_v7, %v18228_v61 }
 0x2cb   : > { %v18247_v14 = vpop.permute.xlu1 %711  ;;  %v18251_v43 = vpop.permute.xlu0 %2005 }
 0x2cc   : > { %24387 = vst [vmem:[#allocation17_spill] sm:$0xff] %v18251_v43  ;;  %2045 = vrot.lane.b32.xlu0 %v18247_v14, %s17819_s12  ;;  %2011 = vrot.lane.b32.xlu1 %v18081_v18, %s17819_s12  ;;  %v936_v43 = vcombine.high %v902_v41, %v918_v37  ;;  %v18291_v37 = vrot.slane %v1447_v35, %v18155_v31 }
 0x2cd   : > { %v956_v35 = vcombine.high %v18039_v6, %v18150_v45  ;;  %v1023_v41 = vcombine.low %v18045_v10, %v18170_v40 }
 0x2ce   : > { %v950_v23 = vrot.slane %v936_v43, %v18180_v55  ;;  %v1499_v43 = vcombine.low %v927_v4, %v934_v8  ;;  %v1479_v30 = vcombine.low %v18291_v37, %v18294_v44  ;;  %v986_v8 = vrot.slane %v972_v48, %v18155_v31 }
 0x2cf   : > { %v18258_v0 = vpop.permute.xlu1 %738  ;;  %v18280_v11 = vpop.permute.xlu0 %686  ;;  %v1047_v48 = vrot.slane %v1039_v1, %v18155_v31 }
 0x2d0   : > { %24388 = vst [vmem:[#allocation18_spill] sm:$0xff] %v18258_v0  ;;  %2063 = vrot.lane.b32.xlu0 %v18258_v0, %s17819_s12  ;;  %24392 = vst [vmem:[#allocation22_spill] sm:$0xff] %v18280_v11  ;;  %v1515_v4 = vcombine.low %v943_v47, %v950_v23  ;;  %v15953_v21 = vcombine.high %v943_v47, %v950_v23  ;;  %v18340_v22 = vrot.slane %v1499_v43, %v18155_v31 }
 0x2d1   : > { %v1031_v47 = vrot.slane %v1023_v41, %v18155_v31 }
 0x2d2   : > { %v18357_v43 = vrot.slane %v1515_v4, %v18155_v31 }
 0x2d3   : > { %v18282_v12 = vpop.permute.xlu1 %2003  ;;  %v18327_v33 = vpop.permute.xlu0 %740  ;;  %v1056_v56 = vcombine.high %v1031_v47, %v1047_v48 }
 0x2d4   : > { %24393 = vst [vmem:[#allocation23_spill] sm:$0xff] %v18282_v12  ;;  %2029 = vrot.lane.b32.xlu0 %v18280_v11, %s17819_s12  ;;  %v1040_v12 = vcombine.high %v18152_v46, %v18184_v60  ;;  %24395 = vst [vmem:[#allocation25_spill] sm:$0xff] %v18327_v33  ;;  %v970_v60 = vrot.slane %v956_v35, %v18155_v31  ;;  %v987_v46 = vcombine.low %v963_v62, %v979_v51 }
 0x2d5   : > { %v18348_v35 = vrot.slane %v1463_v50, %v18180_v55  ;;  %v18351_v51 = vrot.slane %v1479_v30, %v18180_v55  ;;  %v1107_v50 = vcombine.low %v18182_v58, %v18212_v39  ;;  %v1055_v30 = vcombine.low %v1031_v47, %v1047_v48 }
 0x2d6   : > { %v1054_v23 = vrot.slane %v1040_v12, %v18155_v31  ;;  %v1003_v62 = vcombine.low %v970_v60, %v986_v8  ;;  %v1004_v1 = vcombine.high %v970_v60, %v986_v8  ;;  %v995_v41 = vrot.slane %v987_v46, %v18180_v55 }
 0x2d7   : > { %v18318_v52 = vpop.permute.xlu1 %713  ;;  %v1002_v12 = vrot.slane %v988_v49, %v18180_v55  ;;  %v18366_v60 = vrot.slane %v15953_v21, %v18155_v31  ;;  %v1091_v49 = vcombine.low %v18055_v15, %v18196_v5  ;;  %v1092_v48 = vcombine.high %v18055_v15, %v18196_v5 }
 0x2d8   : > { %24394 = vst [vmem:[#allocation24_spill] sm:$0xff] %v18318_v52  ;;  %2047 = vrot.lane.b32.xlu1 %v18318_v52, %s17819_s12  ;;  %2065 = vrot.lane.b32.xlu0 %v18327_v33, %s17819_s12  ;;  %v1071_v46 = vcombine.low %v1038_v26, %v1054_v23  ;;  %v1072_v8 = vcombine.high %v1038_v26, %v1054_v23 }
 0x2d9   : > { %v1018_v21 = vrot.slane %v1004_v1, %v18180_v55  ;;  %v1531_v47 = vcombine.low %v18340_v22, %v18343_v34  ;;  %v1567_v26 = vcombine.low %v995_v41, %v1002_v12  ;;  %v1115_v23 = vrot.slane %v1107_v50, %v18155_v31 }
 0x2da   : > { %v1547_v1 = vcombine.low %v18357_v43, %v18366_v60  ;;  %v15954_v9 = vcombine.high %v995_v41, %v1002_v12  ;;  %v18392_v4 = vrot.slane %v1055_v30, %v18180_v55  ;;  %v18399_v50 = vrot.slane %v1071_v46, %v18180_v55 }
 0x2db   : > { %v1106_v30 = vrot.slane %v1092_v48, %v18155_v31  ;;  %v1176_v48 = vcombine.high %v18198_v7, %v18228_v61 }
 0x2dc   : > { %3347 = vrot.lane.b32.xlu1 %v18009_v54, %s17823_s14  ;;  %3349 = vrot.lane.b32.xlu0 %v18019_v59, %s17823_s14  ;;  %v1108_v54 = vcombine.high %v18182_v58, %v18212_v39  ;;  %v1011_v59 = vrot.slane %v1003_v62, %v18180_v55  ;;  %v1099_v62 = vrot.slane %v1091_v49, %v18155_v31 }
 0x2dd   : > { %v18418_v49 = vrot.slane %v1547_v1, %v18180_v55  ;;  %v18439_v61 = vrot.slane %v15954_v9, %v18155_v31 }
 0x2de   : > { %v1122_v40 = vrot.slane %v1108_v54, %v18155_v31  ;;  %v1583_v41 = vcombine.low %v1011_v59, %v1018_v21  ;;  %v15955_v12 = vcombine.high %v1011_v59, %v1018_v21  ;;  %v1123_v54 = vcombine.low %v1099_v62, %v1115_v23 }
 0x2df   : > { %v1124_v46 = vcombine.high %v1099_v62, %v1115_v23  ;;  %v1183_v62 = vrot.slane %v1175_v3, %v18155_v31  ;;  %v18436_v59 = vrot.slane %v1567_v26, %v18155_v31  ;;  %v1190_v26 = vrot.slane %v1176_v48, %v18155_v31 }
 0x2e0   : > { %3365 = vrot.lane.b32.xlu1 %v18099_v20, %s17823_s14  ;;  %3385 = vrot.lane.b32.xlu0 %v18117_v27, %s17823_s14  ;;  %v18395_v20 = vrot.slane %v1056_v56, %v18180_v55  ;;  %v18402_v27 = vrot.slane %v1072_v8, %v18180_v55  ;;  %v18411_v56 = vrot.slane %v1531_v47, %v18180_v55 }
 0x2e1   : > { %v1159_v8 = vcombine.low %v18061_v16, %v18214_v42  ;;  %v1139_v21 = vcombine.low %v1106_v30, %v1122_v40  ;;  %v18442_v47 = vrot.slane %v1583_v41, %v18155_v31  ;;  %v1131_v23 = vrot.slane %v1123_v54, %v18180_v55 }
 0x2e2   : > { %v1244_v41 = vcombine.high %v18226_v57, %v18258_v0 }
 0x2e3   : > { %v1167_v3 = vrot.slane %v1159_v8, %v18155_v31  ;;  %v1227_v8 = vcombine.low %v18071_v17, %v18247_v14 }
 0x2e4   : > { %3367 = vrot.lane.b32.xlu1 %v18109_v25, %s17823_s14  ;;  %3403 = vrot.lane.b32.xlu0 %v18125_v29, %s17823_s14  ;;  %v1160_v25 = vcombine.high %v18061_v16, %v18214_v42  ;;  %v1140_v29 = vcombine.high %v1106_v30, %v1122_v40  ;;  %v1138_v40 = vrot.slane %v1124_v46, %v18180_v55 }
 0x2e5   : > { %v1243_v30 = vcombine.low %v18226_v57, %v18258_v0  ;;  %v1191_v46 = vcombine.low %v1167_v3, %v1183_v62  ;;  %v1192_v1 = vcombine.high %v1167_v3, %v1183_v62  ;;  %v1228_v42 = vcombine.high %v18071_v17, %v18247_v14 }
 0x2e6   : > { %v1174_v9 = vrot.slane %v1160_v25, %v18155_v31  ;;  %v1154_v54 = vrot.slane %v1140_v29, %v18180_v55  ;;  %v18468_v25 = vrot.slane %v15955_v12, %v18155_v31  ;;  %v1703_v48 = vcombine.low %v1131_v23, %v1138_v40 }
 0x2e7   : > { %v15958_v29 = vcombine.high %v1131_v23, %v1138_v40  ;;  %v1251_v62 = vrot.slane %v1243_v30, %v18155_v31  ;;  %v1599_v3 = vcombine.low %v18436_v59, %v18439_v61  ;;  %v1258_v7 = vrot.slane %v1244_v41, %v18155_v31 }
 0x2e8   : > { %3383 = vrot.lane.b32.xlu1 %v18097_v19, %s17823_s14  ;;  %3353 = vrot.lane.b32.xlu0 %v18039_v6, %s17823_s14  ;;  %v1147_v19 = vrot.slane %v1139_v21, %v18180_v55  ;;  %v1295_v6 = vcombine.low %v18081_v18, %v18318_v52  ;;  %v1296_v21 = vcombine.high %v18081_v18, %v18318_v52 }
 0x2e9   : > { %v1207_v57 = vcombine.low %v1174_v9, %v1190_v26  ;;  %v1311_v52 = vcombine.low %v18280_v11, %v18327_v33  ;;  %v18481_v12 = vrot.slane %v1191_v46, %v18180_v55  ;;  %v18484_v23 = vrot.slane %v1192_v1, %v18180_v55 }
 0x2ea   : > { %v1208_v40 = vcombine.high %v1174_v9, %v1190_v26  ;;  %v1719_v30 = vcombine.low %v1147_v19, %v1154_v54  ;;  %v1242_v18 = vrot.slane %v1228_v42, %v18155_v31  ;;  %v1303_v41 = vrot.slane %v1295_v6, %v18155_v31 }
 0x2eb   : > { %v1310_v0 = vrot.slane %v1296_v21, %v18155_v31  ;;  %v18495_v1 = vrot.slane %v1599_v3, %v18180_v55  ;;  %v1319_v42 = vrot.slane %v1311_v52, %v18155_v31  ;;  %v1215_v6 = vrot.slane %v1207_v57, %v18180_v55 }
 0x2ec   : > { %3401 = vrot.lane.b32.xlu1 %v18105_v24, %s17823_s14  ;;  %3371 = vrot.lane.b32.xlu0 %v18139_v38, %s17823_s14  ;;  %v1312_v24 = vcombine.high %v18280_v11, %v18327_v33  ;;  %v1235_v38 = vrot.slane %v1227_v8, %v18155_v31  ;;  %v15959_v33 = vcombine.high %v1147_v19, %v1154_v54 }
 0x2ed   : > { %v1275_v9 = vcombine.low %v1242_v18, %v1258_v7  ;;  %v1276_v26 = vcombine.high %v1242_v18, %v1258_v7  ;;  %v1222_v21 = vrot.slane %v1208_v40, %v18180_v55  ;;  %v1615_v19 = vcombine.low %v18442_v47, %v18468_v25 }
 0x2ee   : > { %v1259_v11 = vcombine.low %v1235_v38, %v1251_v62  ;;  %v1260_v46 = vcombine.high %v1235_v38, %v1251_v62  ;;  %v1326_v8 = vrot.slane %v1312_v24, %v18155_v31  ;;  %v1328_v54 = vcombine.high %v1303_v41, %v1319_v42 }
 0x2ef   : > { %v18510_v18 = vrot.slane %v1703_v48, %v18155_v31  ;;  %v18513_v7 = vrot.slane %v15958_v29, %v18155_v31  ;;  %v18516_v57 = vrot.slane %v1719_v30, %v18155_v31  ;;  %v18519_v52 = vrot.slane %v15959_v33, %v18155_v31 }
 0x2f0   : > { %3351 = vrot.lane.b32.xlu1 %v18025_v63, %s17823_s14  ;;  %3389 = vrot.lane.b32.xlu0 %v18150_v45, %s17823_s14  ;;  %v1771_v63 = vcombine.low %v18481_v12, %v18484_v23  ;;  %v1327_v45 = vcombine.low %v1303_v41, %v1319_v42  ;;  %v1343_v62 = vcombine.low %v1310_v0, %v1326_v8 }
 0x2f1   : > { %v1344_v3 = vcombine.high %v1310_v0, %v1326_v8  ;;  %v1267_v0 = vrot.slane %v1259_v11, %v18180_v55  ;;  %v1274_v24 = vrot.slane %v1260_v46, %v18180_v55  ;;  %v24396_v48 = vcombine.low %v18392_v4, %v18395_v20 }
 0x2f2   : > { %v24397_v40 = vcombine.high %v18392_v4, %v18395_v20  ;;  %v24398_v11 = vcombine.low %v18399_v50, %v18402_v27  ;;  %v24399_v30 = vcombine.high %v18399_v50, %v18402_v27  ;;  %v1335_v46 = vrot.slane %v1327_v45, %v18180_v55 }
 0x2f3   : > { %v18529_v29 = vrot.slane %v24396_v48, %v18155_v31  ;;  %v1351_v4 = vrot.slane %v1343_v62, %v18180_v55  ;;  %v1358_v20 = vrot.slane %v1344_v3, %v18180_v55  ;;  %v1787_v42 = vcombine.low %v1215_v6, %v1222_v21 }
 0x2f4   : > { %3369 = vrot.lane.b32.xlu1 %v18119_v28, %s17823_s14  ;;  %3407 = vrot.lane.b32.xlu0 %v18168_v53, %s17823_s14  ;;  %v1283_v28 = vrot.slane %v1275_v9, %v18180_v55  ;;  %v1290_v53 = vrot.slane %v1276_v26, %v18180_v55  ;;  %v18535_v33 = vrot.slane %v24397_v40, %v18155_v31 }
 0x2f5   : > { %v18541_v38 = vrot.slane %v24398_v11, %v18155_v31  ;;  %v18547_v41 = vrot.slane %v24399_v30, %v18155_v31  ;;  %v1342_v9 = vrot.slane %v1328_v54, %v18180_v55  ;;  %v15960_v26 = vcombine.high %v18481_v12, %v18484_v23 }
 0x2f6   : > { %v1735_v50 = vcombine.low %v18510_v18, %v18513_v7  ;;  %v1751_v27 = vcombine.low %v18516_v57, %v18519_v52  ;;  %v1839_v8 = vcombine.low %v1267_v0, %v1274_v24  ;;  %v15962_v45 = vcombine.high %v1267_v0, %v1274_v24 }
 0x2f7   : > { %v1855_v54 = vcombine.low %v1283_v28, %v1290_v53  ;;  %v15963_v62 = vcombine.high %v1283_v28, %v1290_v53  ;;  %v15961_v3 = vcombine.high %v1215_v6, %v1222_v21  ;;  %v1667_v12 = vcombine.low %v18529_v29, %v18535_v33 }
 0x2f8   : > { %3387 = vrot.lane.b32.xlu1 %v18127_v32, %s17823_s14  ;;  %3355 = vrot.lane.b32.xlu0 %v18045_v10, %s17823_s14  ;;  %v1623_v32 = vrot.slane %v1615_v19, %v18180_v55  ;;  %v1683_v23 = vcombine.low %v18541_v38, %v18547_v41  ;;  %v24400_v10 = vld [vmem:[#allocation6_spill] sm:$0xff]  ;;  %v1907_v48 = vcombine.low %v1335_v46, %v1342_v9 }
 0x2f9   : > { %v15964_v40 = vcombine.high %v1335_v46, %v1342_v9  ;;  %v1923_v11 = vcombine.low %v1351_v4, %v1358_v20  ;;  %v15965_v30 = vcombine.high %v1351_v4, %v1358_v20  ;;  %v1743_v6 = vrot.slane %v1735_v50, %v18180_v55 }
 0x2fa   : > { %v1759_v21 = vrot.slane %v1751_v27, %v18180_v55  ;;  %v18575_v19 = vrot.slane %v1771_v63, %v18155_v31  ;;  %v18578_v0 = vrot.slane %v15960_v26, %v18155_v31  ;;  %v18581_v24 = vrot.slane %v1839_v8, %v18155_v31 }
 0x2fb   : > { %v18584_v28 = vrot.slane %v15962_v45, %v18155_v31  ;;  %v18587_v53 = vrot.slane %v1855_v54, %v18155_v31  ;;  %v1675_v46 = vrot.slane %v1667_v12, %v18180_v55  ;;  %v1691_v63 = vrot.slane %v1683_v23, %v18180_v55  ;;  %v24404_v23 = vld [vmem:[#allocation20_spill] sm:$0xff] }
 0x2fc   : > { %3405 = vrot.lane.b32.xlu1 %v24400_v10, %s17823_s14  ;;  %3375 = vrot.lane.b32.xlu0 %v18182_v58, %s17823_s14  ;;  %v18590_v58 = vrot.slane %v15963_v62, %v18155_v31  ;;  %v18595_v9 = vrot.slane %v1787_v42, %v18155_v31  ;;  %v18598_v4 = vrot.slane %v15961_v3, %v18155_v31 }
 0x2fd   : > { %v18603_v20 = vrot.slane %v1907_v48, %v18155_v31  ;;  %v18606_v26 = vrot.slane %v15964_v40, %v18155_v31  ;;  %v18609_v50 = vrot.slane %v1923_v11, %v18155_v31  ;;  %v18612_v27 = vrot.slane %v15965_v30, %v18155_v31  ;;  %v24410_v30 = vld [vmem:[#allocation9_spill] sm:$0xff] }
 0x2fe   : > { %v24401_v42 = vcombine.high %v18285_v13, %v18288_v36  ;;  %v24402_v8 = vcombine.high %v18291_v37, %v18294_v44  ;;  %v1631_v54 = vcombine.low %v18495_v1, %v1623_v32  ;;  %v1632_v62 = vcombine.high %v18495_v1, %v1623_v32  ;;  %v24403_v36 = vld [vmem:[#allocation19_spill] sm:$0xff] }
 0x2ff   : > { %v1767_v3 = vcombine.low %v1743_v6, %v1759_v21  ;;  %v1803_v12 = vcombine.low %v18575_v19, %v18578_v0  ;;  %v1887_v13 = vcombine.low %v18587_v53, %v18590_v58  ;;  %v24405_v10 = vcombine.low %v24403_v36, %v24404_v23 }
 0x300   : > { %3357 = vrot.lane.b32.xlu1 %v18055_v15, %s17823_s14  ;;  %3393 = vrot.lane.b32.xlu0 %v18196_v5, %s17823_s14  ;;  %v1478_v15 = vrot.slane %v24401_v42, %v18180_v55  ;;  %v1494_v45 = vrot.slane %v24402_v8, %v18180_v55  ;;  %v1871_v5 = vcombine.low %v18581_v24, %v18584_v28 }
 0x301   : > { %v24406_v37 = vcombine.low %v18348_v35, %v18351_v51  ;;  %v24407_v1 = vcombine.high %v24403_v36, %v24404_v23  ;;  %v24408_v32 = vcombine.high %v18348_v35, %v18351_v51  ;;  %v1563_v40 = vcombine.low %v18411_v56, %v18418_v49 }
 0x302   : > { %v1564_v11 = vcombine.high %v18411_v56, %v18418_v49  ;;  %v1699_v42 = vcombine.low %v1675_v46, %v1691_v63  ;;  %v1819_v8 = vcombine.low %v18595_v9, %v18598_v4  ;;  %v1939_v36 = vcombine.low %v18603_v20, %v18606_v26 }
 0x303   : > { %v18638_v44 = vpack.c.bf16 %v24406_v37, %v24405_v10  ;;  %v18646_v48 = vpack.c.bf16 %v24408_v32, %v24407_v1  ;;  %v1955_v35 = vcombine.low %v18609_v50, %v18612_v27  ;;  %v18662_v51 = vpack.c.bf16 %v1631_v54, %v1563_v40  ;;  %v18666_v10 = vpop.permute.xlu1 %2007 }
 0x304   : > { %3373 = vrot.lane.b32.xlu1 %v24410_v30, %s17823_s14  ;;  %3411 = vrot.lane.b32.xlu0 %v18212_v39, %s17823_s14  ;;  %v18664_v23 = vpack.c.bf16 %v1632_v62, %v1564_v11  ;;  %v1700_v56 = vcombine.high %v1675_v46, %v1691_v63  ;;  %v1768_v49 = vcombine.high %v1743_v6, %v1759_v21  ;;  %v24411_v21 = vld [vmem:[#allocation11_spill] sm:$0xff] }
 0x305   : > { %24409 = vst [vmem:[#allocation6_spill] sm:$0xff] %v18646_v48  ;;  %v18668_v37 = vpack.c.bf16 %v1767_v3, %v1699_v42  ;;  %v1811_v1 = vrot.slane %v1803_v12, %v18180_v55  ;;  %v1879_v32 = vrot.slane %v1871_v5, %v18180_v55  ;;  %v1895_v30 = vrot.slane %v1887_v13, %v18180_v55  ;;  %v18724_v42 = vpop.permute.xlu0 %2009 }
 0x306   : > { %v1532_v48 = vcombine.high %v18340_v22, %v18343_v34  ;;  %v1548_v39 = vcombine.high %v18357_v43, %v18366_v60  ;;  %v1600_v46 = vcombine.high %v18436_v59, %v18439_v61  ;;  %v1616_v6 = vcombine.high %v18442_v47, %v18468_v25 }
 0x307   : > { %v1827_v63 = vrot.slane %v1819_v8, %v18180_v55  ;;  %v1947_v54 = vrot.slane %v1939_v36, %v18180_v55  ;;  %v1963_v62 = vrot.slane %v1955_v35, %v18180_v55  ;;  %v1497_v3 = vcombine.low %v1478_v15, %v1494_v45 }
 0x308   : > { %3391 = vrot.lane.b32.xlu1 %v24411_v21, %s17823_s14  ;;  %3361 = vrot.lane.b32.xlu0 %v18071_v17, %s17823_s14  ;;  %v18688_v34 = vpack.c.bf16 %v1768_v49, %v1700_v56  ;;  %v1498_v22 = vcombine.high %v1478_v15, %v1494_v45  ;;  %v1736_v61 = vcombine.high %v18510_v18, %v18513_v7  ;;  %v24413_v7 = vld [vmem:[#allocation12_spill] sm:$0xff]  ;;  %v24423_v21 = vld [vmem:[#allocation18_spill] sm:$0xff] }
 0x309   : > { %v1752_v43 = vcombine.high %v18516_v57, %v18519_v52  ;;  %v1903_v59 = vcombine.low %v1879_v32, %v1895_v30  ;;  %v1904_v47 = vcombine.high %v1879_v32, %v1895_v30  ;;  %v1668_v25 = vcombine.high %v18529_v29, %v18535_v33  ;;  %v24415_v29 = vld [vmem:[#allocation21_spill] sm:$0xff] }
 0x30a   : > { %24412 = vst [vmem:[#allocation19_spill] sm:$0xff] %v18688_v34  ;;  %v18694_v60 = vpop.permute.xlu1 %2013  ;;  %v1684_v12 = vcombine.high %v18541_v38, %v18547_v41  ;;  %v1546_v17 = vrot.slane %v1532_v48, %v18180_v55  ;;  %v1562_v15 = vrot.slane %v1548_v39, %v18180_v55  ;;  %v1614_v45 = vrot.slane %v1600_v46, %v18180_v55 }
 0x30b   : > { %v1630_v18 = vrot.slane %v1616_v6, %v18180_v55  ;;  %v1835_v57 = vcombine.low %v1811_v1, %v1827_v63  ;;  %v1836_v52 = vcombine.high %v1811_v1, %v1827_v63  ;;  %v18706_v5 = vcombine.low %v1947_v54, %v1963_v62 }
 0x30c   : > { %3409 = vrot.lane.b32.xlu1 %v24413_v7, %s17823_s14  ;;  %v24416_v33 = vcombine.low %v18271_v2, %v24415_v29  ;;  %3397 = vrot.lane.b32.xlu0 %v18247_v14, %s17823_s14  ;;  %v18715_v38 = vcombine.high %v1947_v54, %v1963_v62  ;;  %v24419_v41 = vcombine.high %v18271_v2, %v24415_v29 }
 0x30d   : > { %24414 = vst [vmem:[#allocation20_spill] sm:$0xff] %v18706_v5  ;;  %v1750_v40 = vrot.slane %v1736_v61, %v18180_v55  ;;  %v1766_v11 = vrot.slane %v1752_v43, %v18180_v55  ;;  %v18726_v36 = vpack.c.bf16 %v1903_v59, %v1835_v57  ;;  %v18728_v35 = vpack.c.bf16 %v1904_v47, %v1836_v52  ;;  %v24428_v47 = vld [vmem:[#allocation13_spill] sm:$0xff] }
 0x30e   : > { %v18711_v13 = vpack.c.bf16 %v1497_v3, %v24416_v33  ;;  %24418 = vst [vmem:[#allocation11_spill] sm:$0xff] %v18715_v38  ;;  %v18720_v48 = vpack.c.bf16 %v1498_v22, %v24419_v41  ;;  %v2032_v8 = vpop.permute.xlu1 %2031  ;;  %v1682_v14 = vrot.slane %v1668_v25, %v18180_v55  ;;  %v1698_v56 = vrot.slane %v1684_v12, %v18180_v55  ;;  %v24435_v33 = vld [vmem:[#allocation4_spill] sm:$0xff] }
 0x30f   : > { %24421 = vst [vmem:[#allocation21_spill] sm:$0xff] %v18726_v36  ;;  %24422 = vst [vmem:[#allocation26_spill] sm:$0xff] %v18728_v35  ;;  %v1565_v49 = vcombine.low %v1546_v17, %v1562_v15  ;;  %v1633_v1 = vcombine.low %v1614_v45, %v1630_v18  ;;  %v1804_v2 = vcombine.high %v18575_v19, %v18578_v0 }
 0x310   : > { %24417 = vst [vmem:[#allocation9_spill] sm:$0xff] %v18711_v13  ;;  %24420 = vst [vmem:[#allocation12_spill] sm:$0xff] %v18720_v48  ;;  %v1820_v32 = vcombine.high %v18595_v9, %v18598_v4  ;;  %3359 = vrot.lane.b32.xlu1 %v18061_v16, %s17823_s14  ;;  %v1566_v39 = vcombine.high %v1546_v17, %v1562_v15  ;;  %v1634_v46 = vcombine.high %v1614_v45, %v1630_v18  ;;  %v24424_v16 = vld [vmem:[#allocation3_spill] sm:$0xff]  ;;  %v24431_v17 = vld [vmem:[#allocation22_spill] sm:$0xff] }
 0x311   : > { %v1872_v6 = vcombine.high %v18581_v24, %v18584_v28  ;;  %3415 = vrot.lane.b32.xlu0 %v24423_v21, %s17823_s14  ;;  %v1769_v0 = vcombine.low %v1750_v40, %v1766_v11  ;;  %v1770_v63 = vcombine.high %v1750_v40, %v1766_v11  ;;  %v1888_v9 = vcombine.high %v18587_v53, %v18590_v58 }
 0x312   : > { %v2103_v4 = vcombine.low %v24424_v16, %v2032_v8  ;;  %v2104_v54 = vcombine.high %v24424_v16, %v2032_v8  ;;  %v2016_v62 = vpop.permute.xlu0 %2015  ;;  %v1701_v3 = vcombine.low %v1682_v14, %v1698_v56  ;;  %v1702_v22 = vcombine.high %v1682_v14, %v1698_v56  ;;  %v2050_v61 = vpop.permute.xlu1 %2049 }
 0x313   : > { %v18750_v24 = vpack.c.bf16 %v1633_v1, %v1565_v49  ;;  %v18753_v28 = vrot.slane %v1804_v2, %v18180_v55  ;;  %v18756_v43 = vrot.slane %v1820_v32, %v18180_v55  ;;  %v1940_v59 = vcombine.high %v18603_v20, %v18606_v26  ;;  %v24437_v49 = vld [vmem:[#allocation15_spill] sm:$0xff] }
 0x314   : > { %v2119_v53 = vcombine.low %v18694_v60, %v2050_v61  ;;  %v2120_v58 = vcombine.high %v18694_v60, %v2050_v61  ;;  %3377 = vrot.lane.b32.xlu1 %v24428_v47, %s17823_s14  ;;  %v18764_v25 = vpack.c.bf16 %v1634_v46, %v1566_v39  ;;  %v18767_v12 = vrot.slane %v1872_v6, %v18180_v55  ;;  %v24440_v47 = vld [vmem:[#allocation5_spill] sm:$0xff] }
 0x315   : > { %24425 = vst [vmem:[#allocation18_spill] sm:$0xff] %v18750_v24  ;;  %24426 = vst [vmem:[#allocation3_spill] sm:$0xff] %v18753_v28  ;;  %3381 = vrot.lane.b32.xlu0 %v24431_v17, %s17823_s14  ;;  %v18771_v15 = vpack.c.bf16 %v1769_v0, %v1701_v3  ;;  %v18773_v45 = vpack.c.bf16 %v1770_v63, %v1702_v22  ;;  %v18776_v20 = vrot.slane %v1888_v9, %v18180_v55 }
 0x316   : > { %24427 = vst [vmem:[#allocation27_spill] sm:$0xff] %v18756_v43  ;;  %24429 = vst [vmem:[#allocation13_spill] sm:$0xff] %v18764_v25  ;;  %v1956_v26 = vcombine.high %v18609_v50, %v18612_v27  ;;  %v2111_v60 = vrot.slane %v2103_v4, %v18155_v31  ;;  %v2118_v18 = vrot.slane %v2104_v54, %v18155_v31  ;;  %v2034_v52 = vpop.permute.xlu0 %2033  ;;  %v2018_v29 = vpop.permute.xlu1 %2017 }
 0x317   : > { %24430 = vst [vmem:[#allocation28_spill] sm:$0xff] %v18767_v12  ;;  %24432 = vst [vmem:[#allocation22_spill] sm:$0xff] %v18771_v15  ;;  %v2127_v7 = vrot.slane %v2119_v53, %v18155_v31  ;;  %v2134_v57 = vrot.slane %v2120_v58, %v18155_v31  ;;  %v2171_v41 = vcombine.low %v24435_v33, %v2034_v52  ;;  %v24439_v58 = vld [vmem:[#allocation14_spill] sm:$0xff] }
 0x318   : > { %24433 = vst [vmem:[#allocation29_spill] sm:$0xff] %v18773_v45  ;;  %24434 = vst [vmem:[#allocation30_spill] sm:$0xff] %v18776_v20  ;;  %v2172_v40 = vcombine.high %v24435_v33, %v2034_v52  ;;  %v18789_v8 = vrot.slane %v1940_v59, %v18180_v55  ;;  %3379 = vrot.lane.b32.xlu1 %v24437_v49, %s17823_s14  ;;  %v18800_v39 = vrot.slane %v1956_v26, %v18180_v55 }
 0x319   : > { %v2135_v50 = vcombine.low %v2111_v60, %v2127_v7  ;;  %v2136_v27 = vcombine.high %v2111_v60, %v2127_v7  ;;  %v2151_v14 = vcombine.low %v2118_v18, %v2134_v57  ;;  %v2152_v56 = vcombine.high %v2118_v18, %v2134_v57 }
 0x31a   : > { %24436 = vst [vmem:[#allocation4_spill] sm:$0xff] %v18789_v8  ;;  %24438 = vst [vmem:[#allocation15_spill] sm:$0xff] %v18800_v39  ;;  %v2052_v63 = vpop.permute.xlu0 %2051  ;;  %v2179_v9 = vrot.slane %v2171_v41, %v18155_v31  ;;  %v2186_v16 = vrot.slane %v2172_v40, %v18155_v31  ;;  %v2036_v4 = vpop.permute.xlu1 %2035 }
 0x31b   : > { %v2143_v46 = vrot.slane %v2135_v50, %v18180_v55  ;;  %v2150_v6 = vrot.slane %v2136_v27, %v18180_v55  ;;  %v2159_v21 = vrot.slane %v2151_v14, %v18180_v55  ;;  %v2166_v0 = vrot.slane %v2152_v56, %v18180_v55 }
 0x31c   : > { %v2187_v54 = vcombine.low %v2016_v62, %v2052_v63  ;;  %v2188_v3 = vcombine.high %v2016_v62, %v2052_v63  ;;  %3395 = vrot.lane.b32.xlu1 %v24439_v58, %s17823_s14  ;;  %v2239_v17 = vcombine.low %v24440_v47, %v2036_v4  ;;  %v2240_v26 = vcombine.high %v24440_v47, %v2036_v4 }
 0x31d   : > { %v2715_v22 = vcombine.low %v2143_v46, %v2150_v6  ;;  %v15966_v61 = vcombine.high %v2143_v46, %v2150_v6  ;;  %v2731_v59 = vcombine.low %v2159_v21, %v2166_v0  ;;  %v15967_v53 = vcombine.high %v2159_v21, %v2166_v0  ;;  %v24441_v6 = vld [vmem:[#allocation16_spill] sm:$0xff] }
 0x31e   : > { %v2195_v60 = vrot.slane %v2187_v54, %v18155_v31  ;;  %v2202_v18 = vrot.slane %v2188_v3, %v18155_v31  ;;  %v2247_v33 = vrot.slane %v2239_v17, %v18155_v31  ;;  %v2254_v41 = vrot.slane %v2240_v26, %v18155_v31  ;;  %v2054_v27 = vpop.permute.xlu1 %2053 }
 0x31f   : > { %v18815_v7 = vrot.slane %v2715_v22, %v18155_v31  ;;  %v18818_v62 = vrot.slane %v15966_v61, %v18155_v31  ;;  %v18821_v57 = vrot.slane %v2731_v59, %v18155_v31  ;;  %v18824_v52 = vrot.slane %v15967_v53, %v18155_v31 }
 0x320   : > { %v2203_v40 = vcombine.low %v2179_v9, %v2195_v60  ;;  %v2204_v50 = vcombine.high %v2179_v9, %v2195_v60  ;;  %v2219_v14 = vcombine.low %v2186_v16, %v2202_v18  ;;  %v2220_v56 = vcombine.high %v2186_v16, %v2202_v18  ;;  %3413 = vrot.lane.b32.xlu1 %v24441_v6, %s17823_s14  ;;  %v24442_v60 = vld [vmem:[#allocation2_spill] sm:$0xff] }
 0x321   : > { %v2255_v49 = vcombine.low %v2018_v29, %v2054_v27  ;;  %v2256_v46 = vcombine.high %v2018_v29, %v2054_v27  ;;  %v2747_v63 = vcombine.low %v18815_v7, %v18818_v62  ;;  %v2763_v4 = vcombine.low %v18821_v57, %v18824_v52 }
 0x322   : > { %v2211_v21 = vrot.slane %v2203_v40, %v18180_v55  ;;  %v2218_v0 = vrot.slane %v2204_v50, %v18180_v55  ;;  %v2227_v9 = vrot.slane %v2219_v14, %v18180_v55  ;;  %v2234_v54 = vrot.slane %v2220_v56, %v18180_v55  ;;  %v2020_v3 = vpop.permute.xlu0 %2019 }
 0x323   : > { %v2263_v16 = vrot.slane %v2255_v49, %v18155_v31  ;;  %v2270_v29 = vrot.slane %v2256_v46, %v18155_v31  ;;  %v2755_v59 = vrot.slane %v2747_v63, %v18180_v55  ;;  %v2771_v53 = vrot.slane %v2763_v4, %v18180_v55 }
 0x324   : > { %v2783_v22 = vcombine.low %v2211_v21, %v2218_v0  ;;  %v15968_v61 = vcombine.high %v2211_v21, %v2218_v0  ;;  %v2799_v58 = vcombine.low %v2227_v9, %v2234_v54  ;;  %v15969_v47 = vcombine.high %v2227_v9, %v2234_v54  ;;  %3363 = vrot.lane.b32.xlu1 %v24442_v60, %s17823_s14  ;;  %v24443_v0 = vld [vmem:[#allocation7_spill] sm:$0xff] }
 0x325   : > { %v2271_v17 = vcombine.low %v2247_v33, %v2263_v16  ;;  %v2272_v26 = vcombine.high %v2247_v33, %v2263_v16  ;;  %v2287_v18 = vcombine.low %v2254_v41, %v2270_v29  ;;  %v2288_v40 = vcombine.high %v2254_v41, %v2270_v29 }
 0x326   : > { %v2779_v50 = vcombine.low %v2755_v59, %v2771_v53  ;;  %v18845_v27 = vrot.slane %v2783_v22, %v18155_v31  ;;  %v2022_v49 = vpop.permute.xlu1 %2021  ;;  %v2038_v46 = vpop.permute.xlu0 %2037  ;;  %v18850_v6 = vrot.slane %v15968_v61, %v18155_v31  ;;  %v18853_v33 = vrot.slane %v2799_v58, %v18155_v31 }
 0x327   : > { %v2279_v14 = vrot.slane %v2271_v17, %v18180_v55  ;;  %v2286_v56 = vrot.slane %v2272_v26, %v18180_v55  ;;  %v2295_v21 = vrot.slane %v2287_v18, %v18180_v55  ;;  %v2302_v41 = vrot.slane %v2288_v40, %v18180_v55 }
 0x328   : > { %v2307_v63 = vcombine.low %v24443_v0, %v2038_v46  ;;  %v2308_v4 = vcombine.high %v24443_v0, %v2038_v46  ;;  %v18860_v16 = vrot.slane %v15969_v47, %v18155_v31  ;;  %v2815_v29 = vcombine.low %v18845_v27, %v18850_v6 }
 0x329   : > { %v2851_v9 = vcombine.low %v2279_v14, %v2286_v56  ;;  %v15970_v54 = vcombine.high %v2279_v14, %v2286_v56  ;;  %v2867_v22 = vcombine.low %v2295_v21, %v2302_v41  ;;  %v15971_v61 = vcombine.high %v2295_v21, %v2302_v41  ;;  %v24444_v41 = vld [vmem:[#allocation23_spill] sm:$0xff] }
 0x32a   : > { %v2315_v58 = vrot.slane %v2307_v63, %v18155_v31  ;;  %v2322_v17 = vrot.slane %v2308_v4, %v18155_v31  ;;  %v2056_v26 = vpop.permute.xlu0 %2055  ;;  %v2823_v60 = vrot.slane %v2815_v29, %v18180_v55  ;;  %v2831_v18 = vcombine.low %v18853_v33, %v18860_v16  ;;  %v2040_v47 = vpop.permute.xlu1 %2039 }
 0x32b   : > { %v2780_v40 = vcombine.high %v2755_v59, %v2771_v53  ;;  %v18870_v14 = vrot.slane %v2851_v9, %v18155_v31  ;;  %v2323_v56 = vcombine.low %v2020_v3, %v2056_v26  ;;  %v2324_v46 = vcombine.high %v2020_v3, %v2056_v26 }
 0x32c   : > { %v18873_v0 = vrot.slane %v15970_v54, %v18155_v31  ;;  %v18876_v21 = vrot.slane %v2867_v22, %v18155_v31  ;;  %v2375_v63 = vcombine.low %v24444_v41, %v2040_v47  ;;  %v2376_v4 = vcombine.high %v24444_v41, %v2040_v47 }
 0x32d   : > { %v2839_v29 = vrot.slane %v2831_v18, %v18180_v55  ;;  %v18882_v59 = vrot.slane %v15971_v61, %v18155_v31  ;;  %v2331_v53 = vrot.slane %v2323_v56, %v18155_v31  ;;  %v2338_v9 = vrot.slane %v2324_v46, %v18155_v31 }
 0x32e   : > { %v2883_v3 = vcombine.low %v18870_v14, %v18873_v0  ;;  %v2383_v22 = vrot.slane %v2375_v63, %v18155_v31  ;;  %v2390_v26 = vrot.slane %v2376_v4, %v18155_v31  ;;  %v2024_v47 = vpop.permute.xlu0 %2023  ;;  %v2058_v56 = vpop.permute.xlu1 %2057 }
 0x32f   : > { %v2847_v41 = vcombine.low %v2823_v60, %v2839_v29  ;;  %v2848_v18 = vcombine.high %v2823_v60, %v2839_v29  ;;  %v2339_v32 = vcombine.low %v2315_v58, %v2331_v53  ;;  %v2340_v61 = vcombine.high %v2315_v58, %v2331_v53 }
 0x330   : > { %v2355_v2 = vcombine.low %v2322_v17, %v2338_v9  ;;  %v2356_v1 = vcombine.high %v2322_v17, %v2338_v9  ;;  %v2391_v11 = vcombine.low %v2022_v49, %v2058_v56  ;;  %v2392_v46 = vcombine.high %v2022_v49, %v2058_v56 }
 0x331   : > { %v3327_v19 = vpack.c.bf16 %v2847_v41, %v2779_v50  ;;  %v3332_v30 = vpack.c.bf16 %v2848_v18, %v2780_v40  ;;  %v2347_v8 = vrot.slane %v2339_v32, %v18180_v55  ;;  %v2354_v54 = vrot.slane %v2340_v61, %v18180_v55 }
 0x332   : > { %v2363_v63 = vrot.slane %v2355_v2, %v18180_v55  ;;  %v2370_v4 = vrot.slane %v2356_v1, %v18180_v55  ;;  %v2399_v39 = vrot.slane %v2391_v11, %v18155_v31  ;;  %v2406_v60 = vrot.slane %v2392_v46, %v18155_v31  ;;  %v2042_v29 = vpop.permute.xlu0 %2041  ;;  %v2026_v32 = vpop.permute.xlu1 %2025  ;;  %v24445_v1 = vld [vmem:[#allocation17_spill] sm:$0xff] }
 0x333   : > { %v4716_v58 = vsel %vm4699_vm2, %v3327_v19, 0  ;;  %v4818_v17 = vsel %vm4699_vm2, %v3332_v30, 0  ;;  %v2919_v49 = vcombine.low %v2347_v8, %v2354_v54  ;;  %v15972_v50 = vcombine.high %v2347_v8, %v2354_v54 }
 0x334   : > { %v2935_v40 = vcombine.low %v2363_v63, %v2370_v4  ;;  %v15973_v53 = vcombine.high %v2363_v63, %v2370_v4  ;;  %16558 = vmatpush3.bf16.xpose.msra.mxu1 %v4716_v58  ;;  %v2407_v9 = vcombine.low %v2383_v22, %v2399_v39  ;;  %v2408_v41 = vcombine.high %v2383_v22, %v2399_v39 }
 0x335   : > { %v2423_v2 = vcombine.low %v2390_v26, %v2406_v60  ;;  %v2424_v18 = vcombine.high %v2390_v26, %v2406_v60  ;;  %16588 = vmatpush3.bf16.xpose.msra.mxu0 %v4818_v17  ;;  %v2443_v11 = vcombine.low %v24445_v1, %v2042_v29  ;;  %v2444_v61 = vcombine.high %v24445_v1, %v2042_v29 }
 0x336   : > { %v24446_v56 = vmov 0.0   ;;  %v18905_v30 = vrot.slane %v2883_v3, %v18180_v55  ;;  %v18908_v19 = vrot.slane %v2407_v9, %v18180_v55  ;;  %v18911_v8 = vrot.slane %v2408_v41, %v18180_v55  ;;  %v2060_v22 = vpop.permute.xlu0 %2059  ;;  %v2044_v63 = vpop.permute.xlu1 %2043 }
 0x337   : > { %16559 = vmatprep.subr.bf16.mxu1 %v24446_v56  ;;  %16589 = vmatprep.subr.bf16.mxu0 %v24446_v56  ;;  %v18914_v39 = vrot.slane %v2423_v2, %v18180_v55  ;;  %v18917_v54 = vrot.slane %v2424_v18, %v18180_v55  ;;  %v2451_v26 = vrot.slane %v2443_v11, %v18155_v31 }
 0x338   : > { %v2458_v46 = vrot.slane %v2444_v61, %v18155_v31  ;;  %v2459_v3 = vcombine.low %v2024_v47, %v2060_v22  ;;  %v2460_v4 = vcombine.high %v2024_v47, %v2060_v22  ;;  %v2511_v9 = vcombine.low %v18666_v10, %v2044_v63 }
 0x339   : > { %v2512_v41 = vcombine.high %v18666_v10, %v2044_v63  ;;  %v2899_v1 = vcombine.low %v18876_v21, %v18882_v59  ;;  %v18936_v11 = vrot.slane %v2919_v49, %v18155_v31  ;;  %v18939_v61 = vrot.slane %v15972_v50, %v18155_v31 }
 0x33a   : > { %v2467_v2 = vrot.slane %v2459_v3, %v18155_v31  ;;  %v2474_v47 = vrot.slane %v2460_v4, %v18155_v31  ;;  %v2028_v18 = vpop.permute.xlu0 %2027  ;;  %v18942_v22 = vrot.slane %v2935_v40, %v18155_v31  ;;  %v2519_v29 = vrot.slane %v2511_v9, %v18155_v31  ;;  %v2062_v4 = vpop.permute.xlu1 %2061 }
 0x33b   : > { %v2526_v10 = vrot.slane %v2512_v41, %v18155_v31  ;;  %v2527_v60 = vcombine.low %v2026_v32, %v2062_v4  ;;  %v2528_v45 = vcombine.high %v2026_v32, %v2062_v4  ;;  %v2907_v40 = vrot.slane %v2899_v1, %v18180_v55 }
 0x33c   : > { %v2475_v63 = vcombine.low %v2451_v26, %v2467_v2  ;;  %v2476_v3 = vcombine.high %v2451_v26, %v2467_v2  ;;  %v2491_v17 = vcombine.low %v2458_v46, %v2474_v47  ;;  %v2492_v58 = vcombine.high %v2458_v46, %v2474_v47 }
 0x33d   : > { %v18954_v15 = vrot.slane %v15973_v53, %v18155_v31  ;;  %v2535_v46 = vrot.slane %v2527_v60, %v18155_v31  ;;  %v2542_v32 = vrot.slane %v2528_v45, %v18155_v31 }
 0x33e   : > { %v18947_v49 = vrot.slane %v2475_v63, %v18180_v55  ;;  %v18950_v50 = vrot.slane %v2476_v3, %v18180_v55  ;;  %v18957_v9 = vrot.slane %v2491_v17, %v18180_v55  ;;  %v18960_v26 = vrot.slane %v2492_v58, %v18180_v55  ;;  %v2046_v41 = vpop.permute.xlu0 %2045  ;;  %v2012_v28 = vpop.permute.xlu1 %2011 }
 0x33f   : > { %v2579_v53 = vcombine.low %v18724_v42, %v2046_v41  ;;  %v2580_v1 = vcombine.high %v18724_v42, %v2046_v41  ;;  %v2543_v60 = vcombine.low %v2519_v29, %v2535_v46  ;;  %v2544_v63 = vcombine.high %v2519_v29, %v2535_v46 }
 0x340   : > { %v3055_v2 = vcombine.low %v18947_v49, %v18950_v50  ;;  %v2559_v45 = vcombine.low %v2526_v10, %v2542_v32  ;;  %v2560_v3 = vcombine.high %v2526_v10, %v2542_v32  ;;  %v2915_v42 = vcombine.low %v18905_v30, %v2907_v40 }
 0x341   : > { %v2587_v4 = vrot.slane %v2579_v53, %v18155_v31  ;;  %v2594_v20 = vrot.slane %v2580_v1, %v18155_v31  ;;  %v18977_v47 = vrot.slane %v2543_v60, %v18180_v55  ;;  %v18980_v12 = vrot.slane %v2544_v63, %v18180_v55 }
 0x342   : > { %v2951_v41 = vcombine.low %v18936_v11, %v18939_v61  ;;  %v2064_v58 = vpop.permute.xlu0 %2063  ;;  %v18986_v29 = vrot.slane %v2559_v45, %v18180_v55  ;;  %v18989_v10 = vrot.slane %v2560_v3, %v18180_v55  ;;  %v2967_v46 = vcombine.low %v18942_v22, %v18954_v15 }
 0x343   : > { %v2916_v32 = vcombine.high %v18905_v30, %v2907_v40  ;;  %v2595_v63 = vcombine.low %v2028_v18, %v2064_v58  ;;  %v2596_v43 = vcombine.high %v2028_v18, %v2064_v58  ;;  %v24447_v1 = vcombine.low %v18908_v19, %v18911_v8 }
 0x344   : > { %v2959_v60 = vrot.slane %v2951_v41, %v18180_v55  ;;  %v2975_v17 = vrot.slane %v2967_v46, %v18180_v55  ;;  %v24448_v41 = vcombine.high %v18908_v19, %v18911_v8  ;;  %v24449_v18 = vcombine.low %v18914_v39, %v18917_v54 }
 0x345   : > { %v2603_v30 = vrot.slane %v2595_v63, %v18155_v31  ;;  %v19009_v53 = vrot.slane %v24447_v1, %v18155_v31  ;;  %v2610_v3 = vrot.slane %v2596_v43, %v18155_v31  ;;  %v24450_v1 = vcombine.high %v18914_v39, %v18917_v54 }
 0x346   : > { %v2030_v40 = vpop.permute.xlu0 %2029  ;;  %v19015_v45 = vrot.slane %v24448_v41, %v18155_v31  ;;  %v19021_v58 = vrot.slane %v24449_v18, %v18155_v31  ;;  %v2983_v46 = vcombine.low %v2959_v60, %v2975_v17  ;;  %v2984_v63 = vcombine.high %v2959_v60, %v2975_v17 }
 0x347   : > { %v19028_v25 = vrot.slane %v24450_v1, %v18155_v31  ;;  %v2611_v24 = vcombine.low %v2587_v4, %v2603_v30  ;;  %v2612_v19 = vcombine.high %v2587_v4, %v2603_v30  ;;  %v19033_v41 = vrot.slane %v3055_v2, %v18155_v31 }
 0x348   : > { %v3019_v8 = vcombine.low %v19009_v53, %v19015_v45  ;;  %v3328_v18 = vpack.c.bf16 %v2983_v46, %v2915_v42  ;;  %v3333_v48 = vpack.c.bf16 %v2984_v63, %v2916_v32  ;;  %v2627_v13 = vcombine.low %v2594_v20, %v2610_v3 }
 0x349   : > { %v2628_v17 = vcombine.high %v2594_v20, %v2610_v3  ;;  %v19036_v43 = vrot.slane %v2611_v24, %v18180_v55  ;;  %v19039_v60 = vrot.slane %v2612_v19, %v18180_v55  ;;  %v3035_v4 = vcombine.low %v19021_v58, %v19028_v25 }
 0x34a   : > { %v2048_v39 = vpop.permute.xlu1 %2047  ;;  %v3027_v54 = vrot.slane %v3019_v8, %v18180_v55  ;;  %v4719_v30 = vsel %vm4699_vm2, %v3328_v18, 0  ;;  %v4821_v2 = vsel %vm4699_vm2, %v3333_v48, 0  ;;  %v19047_v42 = vrot.slane %v2627_v13, %v18180_v55  ;;  %v2066_v24 = vpop.permute.xlu0 %2065 }
 0x34b   : > { %v19050_v20 = vrot.slane %v2628_v17, %v18180_v55  ;;  %16560 = vmatpush3.bf16.xpose.msra.mxu1 %v4719_v30  ;;  %16590 = vmatpush3.bf16.xpose.msra.mxu0 %v4821_v2  ;;  %v3191_v32 = vcombine.low %v19036_v43, %v19039_v60  ;;  %v15980_v3 = vcombine.high %v19036_v43, %v19039_v60 }
 0x34c   : > { %v2647_v46 = vcombine.low %v2012_v28, %v2048_v39  ;;  %v2648_v48 = vcombine.high %v2012_v28, %v2048_v39  ;;  %v2663_v1 = vcombine.low %v2030_v40, %v2066_v24  ;;  %16561 = vmatprep.subr.bf16.mxu1 %v24446_v56  ;;  %v2664_v8 = vcombine.high %v2030_v40, %v2066_v24 }
 0x34d   : > { %16591 = vmatprep.subr.bf16.mxu0 %v24446_v56  ;;  %v3043_v18 = vrot.slane %v3035_v4, %v18180_v55  ;;  %v24451_v17 = vcombine.high %v18947_v49, %v18950_v50  ;;  %v24452_v40 = vcombine.low %v18957_v9, %v18960_v26  ;;  %v24453_v4 = vcombine.high %v18957_v9, %v18960_v26 }
 0x34e   : > { %v2655_v19 = vrot.slane %v2647_v46, %v18155_v31  ;;  %v19070_v60 = vpop.permute.xlu1 %3347  ;;  %v2662_v28 = vrot.slane %v2648_v48, %v18155_v31  ;;  %v2671_v39 = vrot.slane %v2663_v1, %v18155_v31  ;;  %v3350_v49 = vpop.permute.xlu0 %3349  ;;  %v2678_v50 = vrot.slane %v2664_v8, %v18155_v31 }
 0x34f   : > { %v19068_v43 = vrot.slane %v24451_v17, %v18155_v31  ;;  %v19078_v30 = vrot.slane %v24452_v40, %v18155_v31  ;;  %v19084_v2 = vrot.slane %v24453_v4, %v18155_v31  ;;  %v3051_v24 = vcombine.low %v3027_v54, %v3043_v18 }
 0x350   : > { %v3052_v48 = vcombine.high %v3027_v54, %v3043_v18  ;;  %v2679_v1 = vcombine.low %v2655_v19, %v2671_v39  ;;  %v2680_v17 = vcombine.high %v2655_v19, %v2671_v39  ;;  %v24454_v13 = vcombine.low %v18977_v47, %v18980_v12 }
 0x351   : > { %v3087_v46 = vcombine.low %v19033_v41, %v19068_v43  ;;  %v3103_v40 = vcombine.low %v19078_v30, %v19084_v2  ;;  %v2695_v26 = vcombine.low %v2662_v28, %v2678_v50  ;;  %v2696_v4 = vcombine.high %v2662_v28, %v2678_v50 }
 0x352   : > { %v19095_v9 = vrot.slane %v24454_v13, %v18155_v31  ;;  %v19098_v63 = vpop.permute.xlu1 %3365  ;;  %v24455_v54 = vcombine.high %v18977_v47, %v18980_v12  ;;  %v19107_v18 = vrot.slane %v2679_v1, %v18180_v55  ;;  %v19110_v39 = vrot.slane %v2680_v17, %v18180_v55  ;;  %v3386_v38 = vpop.permute.xlu0 %3385 }
 0x353   : > { %v3095_v8 = vrot.slane %v3087_v46, %v18180_v55  ;;  %v3111_v13 = vrot.slane %v3103_v40, %v18180_v55  ;;  %v24456_v28 = vcombine.low %v18986_v29, %v18989_v10  ;;  %v19120_v46 = vrot.slane %v2695_v26, %v18180_v55 }
 0x354   : > { %v19104_v19 = vrot.slane %v24455_v54, %v18155_v31  ;;  %v19123_v12 = vrot.slane %v2696_v4, %v18180_v55  ;;  %v3523_v47 = vcombine.low %v3350_v49, %v3386_v38  ;;  %v3524_v1 = vcombine.high %v3350_v49, %v3386_v38 }
 0x355   : > { %v19117_v50 = vrot.slane %v24456_v28, %v18155_v31  ;;  %v3119_v54 = vcombine.low %v3095_v8, %v3111_v13  ;;  %v3120_v5 = vcombine.high %v3095_v8, %v3111_v13  ;;  %v24458_v40 = vcombine.high %v18986_v29, %v18989_v10 }
 0x356   : > { %v3531_v35 = vrot.slane %v3523_v47, %v18155_v31  ;;  %v3538_v4 = vrot.slane %v3524_v1, %v18155_v31  ;;  %v3368_v36 = vpop.permute.xlu1 %3367  ;;  %v3404_v34 = vpop.permute.xlu0 %3403  ;;  %v3155_v8 = vcombine.low %v19095_v9, %v19104_v19  ;;  %v19144_v26 = vrot.slane %v3191_v32, %v18155_v31 }
 0x357   : > { %24457 = vst [vmem:[#allocation14_spill] sm:$0xff] %v19117_v50  ;;  %v3329_v38 = vpack.c.bf16 %v3119_v54, %v3051_v24  ;;  %v3334_v49 = vpack.c.bf16 %v3120_v5, %v3052_v48  ;;  %v19139_v17 = vrot.slane %v24458_v40, %v18155_v31  ;;  %v3539_v13 = vcombine.low %v3368_v36, %v3404_v34 }
 0x358   : > { %v3540_v28 = vcombine.high %v3368_v36, %v3404_v34  ;;  %24460 = vst [vmem:[#allocation16_spill] sm:$0xff] %v19144_v26  ;;  %v19147_v47 = vrot.slane %v15980_v3, %v18155_v31  ;;  %v3163_v48 = vrot.slane %v3155_v8, %v18180_v55  ;;  %v24462_v36 = vcombine.low %v19047_v42, %v19050_v20 }
 0x359   : > { %24459 = vst [vmem:[#allocation5_spill] sm:$0xff] %v19139_v17  ;;  %v4722_v5 = vsel %vm4699_vm2, %v3329_v38, 0  ;;  %v4824_v24 = vsel %vm4699_vm2, %v3334_v49, 0  ;;  %v3171_v29 = vcombine.low %v19117_v50, %v19139_v17  ;;  %v3547_v10 = vrot.slane %v3539_v13, %v18155_v31 }
 0x35a   : > { %24461 = vst [vmem:[#allocation2_spill] sm:$0xff] %v19147_v47  ;;  %16562 = vmatpush3.bf16.xpose.msra.mxu1 %v4722_v5  ;;  %16592 = vmatpush3.bf16.xpose.msra.mxu0 %v4824_v24  ;;  %v3554_v34 = vrot.slane %v3540_v28, %v18155_v31  ;;  %v19160_v32 = vrot.slane %v24462_v36, %v18155_v31  ;;  %v3384_v3 = vpop.permute.xlu1 %3383  ;;  %v19173_v38 = vpop.permute.xlu0 %3353 }
 0x35b   : > { %16563 = vmatprep.subr.bf16.mxu1 %v24446_v56  ;;  %16593 = vmatprep.subr.bf16.mxu0 %v24446_v56  ;;  %v3179_v1 = vrot.slane %v3171_v29, %v18180_v55  ;;  %v24464_v40 = vcombine.high %v19047_v42, %v19050_v20  ;;  %v3223_v28 = vcombine.low %v19144_v26, %v19147_v47 }
 0x35c   : > { %24463 = vst [vmem:[#allocation7_spill] sm:$0xff] %v19160_v32  ;;  %v3555_v49 = vcombine.low %v3531_v35, %v3547_v10  ;;  %v3556_v8 = vcombine.high %v3531_v35, %v3547_v10  ;;  %v3571_v13 = vcombine.low %v3538_v4, %v3554_v34  ;;  %v3572_v5 = vcombine.high %v3538_v4, %v3554_v34 }
 0x35d   : > { %v19169_v54 = vrot.slane %v24464_v40, %v18155_v31  ;;  %v3187_v24 = vcombine.low %v3163_v48, %v3179_v1  ;;  %v3231_v36 = vrot.slane %v3223_v28, %v18180_v55  ;;  %v3188_v50 = vcombine.high %v3163_v48, %v3179_v1 }
 0x35e   : > { %v3563_v42 = vrot.slane %v3555_v49, %v18180_v55  ;;  %v3570_v20 = vrot.slane %v3556_v8, %v18180_v55  ;;  %v3579_v40 = vrot.slane %v3571_v13, %v18180_v55  ;;  %v3586_v26 = vrot.slane %v3572_v5, %v18180_v55  ;;  %v3402_v47 = vpop.permute.xlu1 %3401  ;;  %v19186_v28 = vpop.permute.xlu0 %3371 }
 0x35f   : > { %24465 = vst [vmem:[#allocation23_spill] sm:$0xff] %v19169_v54  ;;  %v3239_v29 = vcombine.low %v19160_v32, %v19169_v54  ;;  %v3455_v4 = vcombine.low %v19070_v60, %v3384_v3  ;;  %v3456_v10 = vcombine.high %v19070_v60, %v3384_v3  ;;  %v3471_v34 = vcombine.low %v19098_v63, %v3402_v47 }
 0x360   : > { %v4135_v48 = vcombine.low %v3563_v42, %v3570_v20  ;;  %v15986_v1 = vcombine.high %v3563_v42, %v3570_v20  ;;  %v4151_v49 = vcombine.low %v3579_v40, %v3586_v26  ;;  %v15987_v32 = vcombine.high %v3579_v40, %v3586_v26 }
 0x361   : > { %v3247_v35 = vrot.slane %v3239_v29, %v18180_v55  ;;  %v3463_v13 = vrot.slane %v3455_v4, %v18155_v31  ;;  %v3470_v5 = vrot.slane %v3456_v10, %v18155_v31  ;;  %v3472_v20 = vcombine.high %v19098_v63, %v3402_v47 }
 0x362   : > { %v19191_v29 = vrot.slane %v4135_v48, %v18155_v31  ;;  %v19194_v17 = vrot.slane %v15986_v1, %v18155_v31  ;;  %v19197_v60 = vrot.slane %v4151_v49, %v18155_v31  ;;  %v19200_v3 = vrot.slane %v15987_v32, %v18155_v31  ;;  %v19202_v42 = vpop.permute.xlu1 %3351 }
 0x363   : > { %v3255_v8 = vcombine.low %v3231_v36, %v3247_v35  ;;  %v3256_v54 = vcombine.high %v3231_v36, %v3247_v35  ;;  %v3479_v40 = vrot.slane %v3471_v34, %v18155_v31  ;;  %v3390_v35 = vpop.permute.xlu0 %3389  ;;  %v24470_v4 = vcombine.low %v19107_v18, %v19110_v39 }
 0x364   : > { %24466 = vst [vmem:[#allocation17_spill] sm:$0xff] %v19191_v29  ;;  %24467 = vst [vmem:[#allocation31_spill] sm:$0xff] %v19194_v17  ;;  %v24471_v32 = vcombine.high %v19107_v18, %v19110_v39  ;;  %v24473_v47 = vcombine.high %v19120_v46, %v19123_v12  ;;  %v3486_v18 = vrot.slane %v3472_v20, %v18155_v31 }
 0x365   : > { %24468 = vst [vmem:[#allocation32_spill] sm:$0xff] %v19197_v60  ;;  %24469 = vst [vmem:[#allocation33_spill] sm:$0xff] %v19200_v3  ;;  %v3330_v26 = vpack.c.bf16 %v3255_v8, %v3187_v24  ;;  %v3335_v36 = vpack.c.bf16 %v3256_v54, %v3188_v50  ;;  %v19210_v10 = vrot.slane %v24470_v4, %v18155_v31 }
 0x366   : > { %v19216_v48 = vrot.slane %v24471_v32, %v18155_v31  ;;  %v24472_v50 = vcombine.low %v19120_v46, %v19123_v12  ;;  %v19228_v54 = vrot.slane %v24473_v47, %v18155_v31  ;;  %v3487_v39 = vcombine.low %v3463_v13, %v3479_v40  ;;  %v19237_v4 = vpop.permute.xlu1 %3369 }
 0x367   : > { %v4725_v24 = vsel %vm4699_vm2, %v3330_v26, 0  ;;  %v4827_v34 = vsel %vm4699_vm2, %v3335_v36, 0  ;;  %v3488_v1 = vcombine.high %v3463_v13, %v3479_v40  ;;  %v3503_v12 = vcombine.low %v3470_v5, %v3486_v18  ;;  %v3408_v36 = vpop.permute.xlu0 %3407 }
 0x368   : > { %v19222_v63 = vrot.slane %v24472_v50, %v18155_v31  ;;  %16564 = vmatpush3.bf16.xpose.msra.mxu1 %v4725_v24  ;;  %16594 = vmatpush3.bf16.xpose.msra.mxu0 %v4827_v34  ;;  %v3291_v49 = vcombine.low %v19210_v10, %v19216_v48  ;;  %v3495_v46 = vrot.slane %v3487_v39, %v18180_v55 }
 0x369   : > { %v3504_v26 = vcombine.high %v3470_v5, %v3486_v18  ;;  %16565 = vmatprep.subr.bf16.mxu1 %v24446_v56  ;;  %16595 = vmatprep.subr.bf16.mxu0 %v24446_v56  ;;  %v3502_v20 = vrot.slane %v3488_v1, %v18180_v55  ;;  %v3659_v32 = vcombine.low %v19173_v38, %v3390_v35 }
 0x36a   : > { %v3307_v8 = vcombine.low %v19222_v63, %v19228_v54  ;;  %v3299_v13 = vrot.slane %v3291_v49, %v18180_v55  ;;  %v3511_v50 = vrot.slane %v3503_v12, %v18180_v55  ;;  %v3660_v24 = vcombine.high %v19173_v38, %v3390_v35  ;;  %v3388_v3 = vpop.permute.xlu1 %3387 }
 0x36b   : > { %v3518_v47 = vrot.slane %v3504_v26, %v18180_v55  ;;  %v3675_v5 = vcombine.low %v19186_v28, %v3408_v36  ;;  %v4067_v34 = vcombine.low %v3495_v46, %v3502_v20  ;;  %v15984_v18 = vcombine.high %v3495_v46, %v3502_v20 }
 0x36c   : > { %v3315_v40 = vrot.slane %v3307_v8, %v18180_v55  ;;  %v3667_v49 = vrot.slane %v3659_v32, %v18155_v31  ;;  %v3674_v8 = vrot.slane %v3660_v24, %v18155_v31  ;;  %v3676_v20 = vcombine.high %v19186_v28, %v3408_v36 }
 0x36d   : > { %v4083_v1 = vcombine.low %v3511_v50, %v3518_v47  ;;  %v15985_v29 = vcombine.high %v3511_v50, %v3518_v47  ;;  %v19253_v17 = vrot.slane %v4067_v34, %v18155_v31  ;;  %v19256_v12 = vrot.slane %v15984_v18, %v18155_v31 }
 0x36e   : > { %v3323_v39 = vcombine.low %v3299_v13, %v3315_v40  ;;  %v3324_v60 = vcombine.high %v3299_v13, %v3315_v40  ;;  %v3683_v13 = vrot.slane %v3675_v5, %v18155_v31  ;;  %v19266_v40 = vpop.permute.xlu0 %3355  ;;  %v2764_v24 = vcombine.high %v18821_v57, %v18824_v52 }
 0x36f   : > { %v19259_v26 = vrot.slane %v4083_v1, %v18155_v31  ;;  %v19262_v46 = vrot.slane %v15985_v29, %v18155_v31  ;;  %v3406_v29 = vpop.permute.xlu1 %3405  ;;  %v3690_v28 = vrot.slane %v3676_v20, %v18155_v31 }
 0x370   : > { %v3331_v38 = vpack.c.bf16 %v3323_v39, %v3323_v39  ;;  %v3336_v35 = vpack.c.bf16 %v3324_v60, %v3324_v60  ;;  %v24474_v60 = vcombine.high %v18815_v7, %v18818_v62  ;;  %v3691_v36 = vcombine.low %v3667_v49, %v3683_v13 }
 0x371   : > { %v3692_v5 = vcombine.high %v3667_v49, %v3683_v13  ;;  %v2778_v34 = vrot.slane %v2764_v24, %v18180_v55  ;;  %v2816_v7 = vcombine.high %v18845_v27, %v18850_v6  ;;  %v2832_v62 = vcombine.high %v18853_v33, %v18860_v16 }
 0x372   : > { %v4728_v32 = vsel %vm4699_vm2, %v3331_v38, 0  ;;  %v4830_v50 = vsel %vm4699_vm2, %v3336_v35, 0  ;;  %v2762_v47 = vrot.slane %v24474_v60, %v18180_v55  ;;  %v3699_v57 = vrot.slane %v3691_v36, %v18180_v55  ;;  %v19292_v16 = vpop.permute.xlu0 %3375 }
 0x373   : > { %16566 = vmatpush3.bf16.xpose.msra.mxu1 %v4728_v32  ;;  %16596 = vmatpush3.bf16.xpose.msra.mxu0 %v4830_v50  ;;  %v3706_v52 = vrot.slane %v3692_v5, %v18180_v55  ;;  %v3707_v18 = vcombine.low %v3674_v8, %v3690_v28  ;;  %v3708_v39 = vcombine.high %v3674_v8, %v3690_v28  ;;  %v19288_v20 = vpop.permute.xlu1 %3357  ;;  %v24475_v5 = vld [vmem:[#allocation6_spill] sm:$0xff] }
 0x374   : > { %16617 = vmatprep.subr.bf16.mxu1 %v24446_v56  ;;  %16647 = vmatprep.subr.bf16.mxu0 %v24446_v56  ;;  %v2781_v1 = vcombine.low %v2762_v47, %v2778_v34  ;;  %v2830_v49 = vrot.slane %v2816_v7, %v18180_v55  ;;  %v2846_v38 = vrot.slane %v2832_v62, %v18180_v55 }
 0x375   : > { %v2782_v35 = vcombine.high %v2762_v47, %v2778_v34  ;;  %v3715_v13 = vrot.slane %v3707_v18, %v18180_v55  ;;  %v3722_v27 = vrot.slane %v3708_v39, %v18180_v55  ;;  %v4271_v6 = vcombine.low %v3699_v57, %v3706_v52 }
 0x376   : > { %v15990_v33 = vcombine.high %v3699_v57, %v3706_v52  ;;  %v2849_v32 = vcombine.low %v2830_v49, %v2846_v38  ;;  %v2850_v50 = vcombine.high %v2830_v49, %v2846_v38  ;;  %v3591_v8 = vcombine.low %v19202_v42, %v3388_v3 }
 0x377   : > { %v3592_v60 = vcombine.high %v19202_v42, %v3388_v3  ;;  %v19297_v24 = vrot.slane %v4271_v6, %v18155_v31  ;;  %v4287_v28 = vcombine.low %v3715_v13, %v3722_v27  ;;  %v15991_v36 = vcombine.high %v3715_v13, %v3722_v27  ;;  %v19307_v57 = vpop.permute.xlu1 %3373  ;;  %v3394_v27 = vpop.permute.xlu0 %3393 }
 0x378   : > { %v19300_v47 = vrot.slane %v15990_v33, %v18155_v31  ;;  %v3337_v34 = vpack.c.bf16 %v2849_v32, %v2781_v1  ;;  %v3342_v7 = vpack.c.bf16 %v2850_v50, %v2782_v35  ;;  %v3599_v62 = vrot.slane %v3591_v8, %v18155_v31 }
 0x379   : > { %v19310_v3 = vrot.slane %v4287_v28, %v18155_v31  ;;  %v19313_v42 = vrot.slane %v15991_v36, %v18155_v31  ;;  %v3606_v52 = vrot.slane %v3592_v60, %v18155_v31  ;;  %v3607_v18 = vcombine.low %v19237_v4, %v3406_v29 }
 0x37a   : > { %16568 = vmatmul.mubr.msk.bf16.vlgmr.msra.gmra.mrb[0].mxu1 %vm4699_vm2, %v18638_v44  ;;  %16598 = vmatmul.mubr.msk.bf16.vlgmr.msra.gmra.mrb[20].mxu0 %vm4699_vm2, %v24475_v5  ;;  %v4920_v44 = vsel %vm4699_vm2, %v3337_v34, 0  ;;  %v5022_v39 = vsel %vm4699_vm2, %v3342_v7, 0  ;;  %v3608_v1 = vcombine.high %v19237_v4, %v3406_v29  ;;  %v2884_v49 = vcombine.high %v18870_v14, %v18873_v0 }
 0x37b   : > { %16571 = vmatprep.mubr.msk.bf16.mxu1 %vm17816_vm1, %v24446_v56  ;;  %16601 = vmatprep.mubr.msk.bf16.mxu0 %vm17816_vm1, %v24446_v56  ;;  %v3615_v38 = vrot.slane %v3607_v18, %v18155_v31  ;;  %v2900_v35 = vcombine.high %v18876_v21, %v18882_v59  ;;  %v2952_v13 = vcombine.high %v18936_v11, %v18939_v61  ;;  %v19337_v0 = vpop.permute.xlu1 %3391 }
 0x37c   : > { %16618 = vmatpush3.bf16.xpose.msra.mxu1 %v4920_v44  ;;  %16648 = vmatpush3.bf16.xpose.msra.mxu0 %v5022_v39  ;;  %v3622_v6 = vrot.slane %v3608_v1, %v18155_v31  ;;  %v2898_v4 = vrot.slane %v2884_v49, %v18180_v55  ;;  %v2968_v14 = vcombine.high %v18942_v22, %v18954_v15  ;;  %v3412_v44 = vpop.permute.xlu0 %3411 }
 0x37d   : > { %16619 = vmatprep.subr.bf16.mxu1 %v24446_v56  ;;  %16649 = vmatprep.subr.bf16.mxu0 %v24446_v56  ;;  %v3623_v29 = vcombine.low %v3599_v62, %v3615_v38  ;;  %v3624_v33 = vcombine.high %v3599_v62, %v3615_v38  ;;  %v2914_v21 = vrot.slane %v2900_v35, %v18180_v55 }
 0x37e   : > { %v2966_v59 = vrot.slane %v2952_v13, %v18180_v55  ;;  %v3639_v11 = vcombine.low %v3606_v52, %v3622_v6  ;;  %v3640_v61 = vcombine.high %v3606_v52, %v3622_v6  ;;  %v2982_v32 = vrot.slane %v2968_v14, %v18180_v55 }
 0x37f   : > { %v3795_v50 = vcombine.low %v19288_v20, %v3394_v27  ;;  %v3631_v8 = vrot.slane %v3623_v29, %v18180_v55  ;;  %v3638_v60 = vrot.slane %v3624_v33, %v18180_v55  ;;  %v2917_v28 = vcombine.low %v2898_v4, %v2914_v21  ;;  %v19351_v34 = vpop.permute.xlu1 %3409 }
 0x380   : > { %v2918_v15 = vcombine.high %v2898_v4, %v2914_v21  ;;  %v3647_v22 = vrot.slane %v3639_v11, %v18180_v55  ;;  %v3654_v36 = vrot.slane %v3640_v61, %v18180_v55  ;;  %v2985_v5 = vcombine.low %v2966_v59, %v2982_v32 }
 0x381   : > { %v4203_v7 = vcombine.low %v3631_v8, %v3638_v60  ;;  %v15988_v62 = vcombine.high %v3631_v8, %v3638_v60  ;;  %v2986_v52 = vcombine.high %v2966_v59, %v2982_v32  ;;  %v3796_v18 = vcombine.high %v19288_v20, %v3394_v27 }
 0x382   : > { %16572 = vmatmul.mubr.msk.bf16.gmra.mrb[4].mxu1 %vm4699_vm2, %v18662_v51  ;;  %16602 = vmatmul.mubr.msk.bf16.gmra.mrb[24].mxu0 %vm4699_vm2, %v18664_v23  ;;  %v4219_v39 = vcombine.low %v3647_v22, %v3654_v36  ;;  %v15989_v1 = vcombine.high %v3647_v22, %v3654_v36  ;;  %v3338_v49 = vpack.c.bf16 %v2985_v5, %v2917_v28 }
 0x383   : > { %16575 = vmatprep.mubr.msk.bf16.mxu1 %vm17816_vm1, %v24446_v56  ;;  %v3803_v51 = vrot.slane %v3795_v50, %v18155_v31  ;;  %16605 = vmatprep.mubr.msk.bf16.mxu0 %vm17816_vm1, %v24446_v56  ;;  %v19360_v23 = vrot.slane %v4203_v7, %v18155_v31  ;;  %v19363_v38 = vrot.slane %v15988_v62, %v18155_v31  ;;  %v19380_v59 = vpop.permute.xlu1 %3359 }
 0x384   : > { %v3343_v35 = vpack.c.bf16 %v2986_v52, %v2918_v15  ;;  %v3810_v20 = vrot.slane %v3796_v18, %v18155_v31  ;;  %v19367_v13 = vrot.slane %v4219_v39, %v18155_v31  ;;  %v19370_v27 = vrot.slane %v15989_v1, %v18155_v31 }
 0x385   : > { %v4923_v6 = vsel %vm4699_vm2, %v3338_v49, 0  ;;  %v3811_v4 = vcombine.low %v19292_v16, %v3412_v44  ;;  %v3812_v29 = vcombine.high %v19292_v16, %v3412_v44  ;;  %v3020_v33 = vcombine.high %v19009_v53, %v19015_v45 }
 0x386   : > { %16620 = vmatpush3.bf16.xpose.msra.mxu1 %v4923_v6  ;;  %v5025_v14 = vsel %vm4699_vm2, %v3343_v35, 0  ;;  %v3036_v21 = vcombine.high %v19021_v58, %v19028_v25  ;;  %v3088_v61 = vcombine.high %v19033_v41, %v19068_v43  ;;  %v3104_v32 = vcombine.high %v19078_v30, %v19084_v2  ;;  %v3362_v58 = vpop.permute.xlu0 %3361  ;;  %v24476_v41 = vld [vmem:[#allocation19_spill] sm:$0xff] }
 0x387   : > { %16650 = vmatpush3.bf16.xpose.msra.mxu0 %v5025_v14  ;;  %v3819_v11 = vrot.slane %v3811_v4, %v18155_v31  ;;  %16621 = vmatprep.subr.bf16.mxu1 %v24446_v56  ;;  %v3826_v16 = vrot.slane %v3812_v29, %v18155_v31  ;;  %v3034_v53 = vrot.slane %v3020_v33, %v18180_v55  ;;  %v19410_v18 = vpop.permute.xlu1 %3377 }
 0x388   : > { %16651 = vmatprep.subr.bf16.mxu0 %v24446_v56  ;;  %v3050_v25 = vrot.slane %v3036_v21, %v18180_v55  ;;  %v3727_v45 = vcombine.low %v19266_v40, %v19337_v0  ;;  %v3102_v43 = vrot.slane %v3088_v61, %v18180_v55  ;;  %v3118_v28 = vrot.slane %v3104_v32, %v18180_v55 }
 0x389   : > { %v3827_v50 = vcombine.low %v3803_v51, %v3819_v11  ;;  %v3828_v8 = vcombine.high %v3803_v51, %v3819_v11  ;;  %v3843_v30 = vcombine.low %v3810_v20, %v3826_v16  ;;  %v3844_v2 = vcombine.high %v3810_v20, %v3826_v16 }
 0x38a   : > { %16576 = vmatmul.mubr.msk.bf16.gmra.mrb[8].mxu1 %vm4699_vm2, %v18668_v37  ;;  %16606 = vmatmul.mubr.msk.bf16.gmra.mrb[28].mxu0 %vm4699_vm2, %v24476_v41  ;;  %v3053_v60 = vcombine.low %v3034_v53, %v3050_v25  ;;  %v3054_v36 = vcombine.high %v3034_v53, %v3050_v25  ;;  %v3728_v37 = vcombine.high %v19266_v40, %v19337_v0  ;;  %v3398_v20 = vpop.permute.xlu0 %3397 }
 0x38b   : > { %16579 = vmatprep.mubr.msk.bf16.mxu1 %vm17816_vm1, %v24446_v56  ;;  %v3835_v15 = vrot.slane %v3827_v50, %v18180_v55  ;;  %v3842_v22 = vrot.slane %v3828_v8, %v18180_v55  ;;  %16609 = vmatprep.mubr.msk.bf16.mxu0 %vm17816_vm1, %v24446_v56  ;;  %v3851_v5 = vrot.slane %v3843_v30, %v18180_v55  ;;  %v24479_v50 = vld [vmem:[#allocation5_spill] sm:$0xff]  ;;  %v24480_v8 = vld [vmem:[#allocation14_spill] sm:$0xff] }
 0x38c   : > { %v3858_v7 = vrot.slane %v3844_v2, %v18180_v55  ;;  %v3121_v62 = vcombine.low %v3102_v43, %v3118_v28  ;;  %v3122_v52 = vcombine.high %v3102_v43, %v3118_v28  ;;  %v3735_v1 = vrot.slane %v3727_v45, %v18155_v31  ;;  %v24477_v45 = vld [vmem:[#allocation21_spill] sm:$0xff]  ;;  %v3380_v43 = vpop.permute.xlu1 %3379 }
 0x38d   : > { %v4407_v44 = vcombine.low %v3835_v15, %v3842_v22  ;;  %v15994_v39 = vcombine.high %v3835_v15, %v3842_v22  ;;  %v3742_v49 = vrot.slane %v3728_v37, %v18155_v31  ;;  %v3743_v14 = vcombine.low %v19307_v57, %v19351_v34 }
 0x38e   : > { %v4423_v51 = vcombine.low %v3851_v5, %v3858_v7  ;;  %v15995_v35 = vcombine.high %v3851_v5, %v3858_v7  ;;  %v3339_v40 = vpack.c.bf16 %v3121_v62, %v3053_v60  ;;  %v3344_v0 = vpack.c.bf16 %v3122_v52, %v3054_v36  ;;  %v24481_v62 = vld [vmem:[#allocation2_spill] sm:$0xff]  ;;  %v24482_v52 = vld [vmem:[#allocation16_spill] sm:$0xff] }
 0x38f   : > { %v19415_v6 = vrot.slane %v4407_v44, %v18155_v31  ;;  %v19418_v4 = vrot.slane %v15994_v39, %v18155_v31  ;;  %v3744_v29 = vcombine.high %v19307_v57, %v19351_v34  ;;  %v3751_v32 = vrot.slane %v3743_v14, %v18155_v31  ;;  %v24478_v57 = vld [vmem:[#allocation26_spill] sm:$0xff]  ;;  %v24483_v39 = vld [vmem:[#allocation23_spill] sm:$0xff] }
 0x390   : > { %v19425_v33 = vrot.slane %v4423_v51, %v18155_v31  ;;  %v19428_v21 = vrot.slane %v15995_v35, %v18155_v31  ;;  %v4926_v11 = vsel %vm4699_vm2, %v3339_v40, 0  ;;  %v5028_v61 = vsel %vm4699_vm2, %v3344_v0, 0 }
 0x391   : > { %16622 = vmatpush3.bf16.xpose.msra.mxu1 %v4926_v11  ;;  %16652 = vmatpush3.bf16.xpose.msra.mxu0 %v5028_v61  ;;  %v3758_v16 = vrot.slane %v3744_v29, %v18155_v31  ;;  %v3931_v53 = vcombine.low %v3362_v58, %v3398_v20  ;;  %v3932_v25 = vcombine.high %v3362_v58, %v3398_v20 }
 0x392   : > { %16580 = vmatmul.mubr.msk.bf16.gmra.mrb[12].mxu1 %vm4699_vm2, %v24477_v45  ;;  %16610 = vmatmul.mubr.msk.bf16.gmra.mrb[32].mxu0 %vm4699_vm2, %v24478_v57  ;;  %v3156_v34 = vcombine.high %v19095_v9, %v19104_v19  ;;  %v3172_v41 = vcombine.high %v24480_v8, %v24479_v50  ;;  %v3759_v30 = vcombine.low %v3735_v1, %v3751_v32  ;;  %v3416_v50 = vpop.permute.xlu0 %3415 }
 0x393   : > { %v3760_v2 = vcombine.high %v3735_v1, %v3751_v32  ;;  %v3775_v60 = vcombine.low %v3742_v49, %v3758_v16  ;;  %v3776_v28 = vcombine.high %v3742_v49, %v3758_v16  ;;  %16623 = vmatprep.subr.bf16.mxu1 %v24446_v56  ;;  %v19444_v58 = vrot.slane %v3931_v53, %v18155_v31  ;;  %v24484_v1 = vld [vmem:[#allocation7_spill] sm:$0xff]  ;;  %v3396_v32 = vpop.permute.xlu1 %3395 }
 0x394   : > { %v19447_v15 = vrot.slane %v3932_v25, %v18155_v31  ;;  %16653 = vmatprep.subr.bf16.mxu0 %v24446_v56  ;;  %v3170_v9 = vrot.slane %v3156_v34, %v18180_v55  ;;  %v3186_v19 = vrot.slane %v3172_v41, %v18180_v55  ;;  %v3767_v22 = vrot.slane %v3759_v30, %v18180_v55 }
 0x395   : > { %v3774_v36 = vrot.slane %v3760_v2, %v18180_v55  ;;  %v3783_v37 = vrot.slane %v3775_v60, %v18180_v55  ;;  %v3790_v5 = vrot.slane %v3776_v28, %v18180_v55  ;;  %16583 = vmatprep.mubr.msk.bf16.mxu1 %vm17816_vm1, %v24446_v56  ;;  %v3224_v44 = vcombine.high %v24482_v52, %v24481_v62 }
 0x396   : > { %v3189_v7 = vcombine.low %v3170_v9, %v3186_v19  ;;  %v3240_v49 = vcombine.high %v24484_v1, %v24483_v39  ;;  %v3190_v51 = vcombine.high %v3170_v9, %v3186_v19  ;;  %16613 = vmatprep.mubr.msk.bf16.mxu0 %vm17816_vm1, %v24446_v56  ;;  %v3292_v11 = vcombine.high %v19210_v10, %v19216_v48  ;;  %v24485_v10 = vld [vmem:[#allocation20_spill] sm:$0xff] }
 0x397   : > { %v4339_v35 = vcombine.low %v3767_v22, %v3774_v36  ;;  %v15992_v40 = vcombine.high %v3767_v22, %v3774_v36  ;;  %v4355_v0 = vcombine.low %v3783_v37, %v3790_v5  ;;  %v15993_v20 = vcombine.high %v3783_v37, %v3790_v5 }
 0x398   : > { %v3238_v14 = vrot.slane %v3224_v44, %v18180_v55  ;;  %v3254_v29 = vrot.slane %v3240_v49, %v18180_v55  ;;  %v3308_v61 = vcombine.high %v19222_v63, %v19228_v54  ;;  %v24486_v48 = vpack.c.bf16 %v24485_v10, %v24485_v10  ;;  %v24487_v63 = vld [vmem:[#allocation11_spill] sm:$0xff]  ;;  %v24492_v10 = vld [vmem:[#allocation32_spill] sm:$0xff] }
 0x399   : > { %v19471_v16 = vrot.slane %v4339_v35, %v18155_v31  ;;  %v19474_v53 = vrot.slane %v15992_v40, %v18155_v31  ;;  %v19477_v25 = vrot.slane %v4355_v0, %v18155_v31  ;;  %v19480_v45 = vrot.slane %v15993_v20, %v18155_v31  ;;  %v3414_v40 = vpop.permute.xlu1 %3413 }
 0x39a   : > { %v3257_v57 = vcombine.low %v3238_v14, %v3254_v29  ;;  %v3258_v34 = vcombine.high %v3238_v14, %v3254_v29  ;;  %16584 = vmatmul.mubr.msk.bf16.gmra.mrb[16].mxu1 %vm4699_vm2, %v24486_v48  ;;  %v24488_v54 = vpack.c.bf16 %v24487_v63, %v24487_v63  ;;  %v3306_v8 = vrot.slane %v3292_v11, %v18180_v55 }
 0x39b   : > { %v3322_v41 = vrot.slane %v3308_v61, %v18180_v55  ;;  %v3947_v30 = vcombine.low %v3380_v43, %v3416_v50  ;;  %v3948_v2 = vcombine.high %v3380_v43, %v3416_v50  ;;  %v3863_v60 = vcombine.low %v19380_v59, %v3396_v32  ;;  %16627 = vmatprep.mubr.msk.bf16.mxu1 %vm17816_vm1, %v24446_v56  ;;  %v24491_v50 = vld [vmem:[#allocation33_spill] sm:$0xff] }
 0x39c   : > { %16614 = vmatmul.mubr.msk.bf16.gmra.mrb[36].mxu0 %vm4699_vm2, %v24488_v54  ;;  %v3340_v28 = vpack.c.bf16 %v3257_v57, %v3189_v7  ;;  %v3345_v9 = vpack.c.bf16 %v3258_v34, %v3190_v51  ;;  %v3864_v19 = vcombine.high %v19380_v59, %v3396_v32  ;;  %v4099_v22 = vcombine.low %v19253_v17, %v19256_v12  ;;  %v24489_v57 = vld [vmem:[#allocation31_spill] sm:$0xff] }
 0x39d   : > { %16657 = vmatprep.mubr.msk.bf16.mxu0 %vm17816_vm1, %v24446_v56  ;;  %v3325_v36 = vcombine.low %v3306_v8, %v3322_v41  ;;  %v3326_v37 = vcombine.high %v3306_v8, %v3322_v41  ;;  %v3955_v5 = vrot.slane %v3947_v30, %v18155_v31  ;;  %v3962_v43 = vrot.slane %v3948_v2, %v18155_v31 }
 0x39e   : > { %v4929_v62 = vsel %vm4699_vm2, %v3340_v28, 0  ;;  %v5031_v52 = vsel %vm4699_vm2, %v3345_v9, 0  ;;  %v3871_v7 = vrot.slane %v3863_v60, %v18155_v31  ;;  %v3878_v59 = vrot.slane %v3864_v19, %v18155_v31 }
 0x39f   : > { %16624 = vmatpush3.bf16.xpose.msra.mxu1 %v4929_v62  ;;  %16654 = vmatpush3.bf16.xpose.msra.mxu0 %v5031_v52  ;;  %v3341_v44 = vpack.c.bf16 %v3325_v36, %v3325_v36  ;;  %v3346_v39 = vpack.c.bf16 %v3326_v37, %v3326_v37  ;;  %v3963_v1 = vcombine.low %v19444_v58, %v3955_v5 }
 0x3a0   : > { %16625 = vmatprep.subr.bf16.mxu1 %v24446_v56  ;;  %16655 = vmatprep.subr.bf16.mxu0 %v24446_v56  ;;  %v3964_v49 = vcombine.high %v19444_v58, %v3955_v5  ;;  %v3979_v51 = vcombine.low %v19447_v15, %v3962_v43  ;;  %v3980_v35 = vcombine.high %v19447_v15, %v3962_v43  ;;  %v24490_v15 = vld [vmem:[#allocation17_spill] sm:$0xff] }
 0x3a1   : > { %v4932_v0 = vsel %vm4699_vm2, %v3341_v44, 0  ;;  %v5034_v20 = vsel %vm4699_vm2, %v3346_v39, 0  ;;  %v3971_v14 = vrot.slane %v3963_v1, %v18180_v55  ;;  %v4107_v29 = vrot.slane %v4099_v22, %v18180_v55 }
 0x3a2   : > { %v3978_v11 = vrot.slane %v3964_v49, %v18180_v55  ;;  %v3987_v61 = vrot.slane %v3979_v51, %v18180_v55  ;;  %v3994_v32 = vrot.slane %v3980_v35, %v18180_v55  ;;  %v4115_v58 = vcombine.low %v19259_v26, %v19262_v46 }
 0x3a3   : > { %v4167_v34 = vcombine.low %v24490_v15, %v24489_v57  ;;  %v4183_v48 = vcombine.low %v24492_v10, %v24491_v50  ;;  %v3879_v63 = vcombine.low %v19410_v18, %v3414_v40  ;;  %v3880_v54 = vcombine.high %v19410_v18, %v3414_v40 }
 0x3a4   : > { %v4543_v8 = vcombine.low %v3971_v14, %v3978_v11  ;;  %v15998_v41 = vcombine.high %v3971_v14, %v3978_v11  ;;  %v4559_v30 = vcombine.low %v3987_v61, %v3994_v32  ;;  %v15999_v2 = vcombine.high %v3987_v61, %v3994_v32 }
 0x3a5   : > { %v4123_v60 = vrot.slane %v4115_v58, %v18180_v55  ;;  %v4175_v28 = vrot.slane %v4167_v34, %v18180_v55  ;;  %v4191_v9 = vrot.slane %v4183_v48, %v18180_v55  ;;  %v3887_v19 = vrot.slane %v3879_v63, %v18155_v31 }
 0x3a6   : > { %v19532_v22 = vrot.slane %v4543_v8, %v18155_v31  ;;  %v19535_v36 = vrot.slane %v15998_v41, %v18155_v31  ;;  %v19538_v18 = vrot.slane %v4559_v30, %v18155_v31  ;;  %v19541_v37 = vrot.slane %v15999_v2, %v18155_v31  ;;  %v24493_v41 = vld [vmem:[#allocation9_spill] sm:$0xff]  ;;  %v24494_v30 = vld [vmem:[#allocation12_spill] sm:$0xff] }
 0x3a7   : > { %16626 = vmatpush3.bf16.xpose.msra.mxu1 %v4932_v0  ;;  %16656 = vmatpush3.bf16.xpose.msra.mxu0 %v5034_v20  ;;  %v4131_v5 = vcombine.low %v4107_v29, %v4123_v60  ;;  %v4199_v43 = vcombine.low %v4175_v28, %v4191_v9  ;;  %v4132_v62 = vcombine.high %v4107_v29, %v4123_v60 }
 0x3a8   : > { %16677 = vmatprep.subr.bf16.mxu1 %v24446_v56  ;;  %16707 = vmatprep.subr.bf16.mxu0 %v24446_v56  ;;  %v4200_v52 = vcombine.high %v4175_v28, %v4191_v9  ;;  %v3894_v44 = vrot.slane %v3880_v54, %v18155_v31  ;;  %v3895_v39 = vcombine.low %v3871_v7, %v3887_v19 }
 0x3a9   : > { %v4679_v1 = vpack.c.bf16 %v4199_v43, %v4131_v5  ;;  %v3896_v49 = vcombine.high %v3871_v7, %v3887_v19  ;;  %v4235_v51 = vcombine.low %v19360_v23, %v19363_v38  ;;  %v4251_v35 = vcombine.low %v19367_v13, %v19370_v27 }
 0x3aa   : > { %v4684_v40 = vpack.c.bf16 %v4200_v52, %v4132_v62  ;;  %v3903_v0 = vrot.slane %v3895_v39, %v18180_v55  ;;  %v3911_v20 = vcombine.low %v3878_v59, %v3894_v44  ;;  %v3912_v14 = vcombine.high %v3878_v59, %v3894_v44 }
 0x3ab   : > { %v3910_v29 = vrot.slane %v3896_v49, %v18180_v55  ;;  %v4243_v11 = vrot.slane %v4235_v51, %v18180_v55  ;;  %v4259_v61 = vrot.slane %v4251_v35, %v18180_v55  ;;  %v4303_v7 = vcombine.low %v19297_v24, %v19300_v47 }
 0x3ac   : > { %v3919_v32 = vrot.slane %v3911_v20, %v18180_v55  ;;  %v3926_v58 = vrot.slane %v3912_v14, %v18180_v55  ;;  %v4319_v34 = vcombine.low %v19310_v3, %v19313_v42  ;;  %v4371_v48 = vcombine.low %v19471_v16, %v19474_v53 }
 0x3ad   : > { %v4475_v59 = vcombine.low %v3903_v0, %v3910_v29  ;;  %v15996_v63 = vcombine.high %v3903_v0, %v3910_v29  ;;  %v4267_v54 = vcombine.low %v4243_v11, %v4259_v61  ;;  %v4311_v8 = vrot.slane %v4303_v7, %v18180_v55 }
 0x3ae   : > { %16628 = vmatmul.mubr.msk.bf16.vlgmr.msra.gmra.mrb[20].mxu1 %vm4699_vm2, %v24493_v41  ;;  %16658 = vmatmul.mubr.msk.bf16.vlgmr.msra.gmra.mrb[40].mxu0 %vm4699_vm2, %v24494_v30  ;;  %v4491_v2 = vcombine.low %v3919_v32, %v3926_v58  ;;  %v15997_v60 = vcombine.high %v3919_v32, %v3926_v58  ;;  %v4327_v28 = vrot.slane %v4319_v34, %v18180_v55 }
 0x3af   : > { %16678 = vmatpush3.bf16.msra.mxu1 %v4679_v1  ;;  %16708 = vmatpush3.bf16.msra.mxu0 %v4684_v40  ;;  %v19569_v9 = vrot.slane %v4475_v59, %v18155_v31  ;;  %v19572_v19 = vrot.slane %v15996_v63, %v18155_v31  ;;  %v4268_v5 = vcombine.high %v4243_v11, %v4259_v61  ;;  %v24495_v59 = vld [vmem:[#allocation18_spill] sm:$0xff]  ;;  %v24496_v63 = vld [vmem:[#allocation13_spill] sm:$0xff] }
 0x3b0   : > { %v19575_v43 = vrot.slane %v4491_v2, %v18155_v31  ;;  %v19578_v62 = vrot.slane %v15997_v60, %v18155_v31  ;;  %16679 = vmatprep.subr.bf16.mxu1 %v24446_v56  ;;  %16709 = vmatprep.subr.bf16.mxu0 %v24446_v56  ;;  %v4335_v52 = vcombine.low %v4311_v8, %v4327_v28 }
 0x3b1   : > { %v4336_v44 = vcombine.high %v4311_v8, %v4327_v28  ;;  %16631 = vmatprep.mubr.msk.bf16.mxu1 %vm17816_vm1, %v24446_v56  ;;  %16661 = vmatprep.mubr.msk.bf16.mxu0 %vm17816_vm1, %v24446_v56  ;;  %v4379_v39 = vrot.slane %v4371_v48, %v18180_v55  ;;  %v4387_v1 = vcombine.low %v19477_v25, %v19480_v45 }
 0x3b2   : > { %v4680_v49 = vpack.c.bf16 %v4335_v52, %v4267_v54  ;;  %v4439_v51 = vcombine.low %v19415_v6, %v19418_v4  ;;  %v4455_v35 = vcombine.low %v19425_v33, %v19428_v21  ;;  %v4507_v40 = vcombine.low %v19569_v9, %v19572_v19  ;;  %v24497_v52 = vld [vmem:[#allocation3_spill] sm:$0xff] }
 0x3b3   : > { %v4685_v0 = vpack.c.bf16 %v4336_v44, %v4268_v5  ;;  %v4395_v20 = vrot.slane %v4387_v1, %v18180_v55  ;;  %v4523_v14 = vcombine.low %v19575_v43, %v19578_v62  ;;  %v4575_v29 = vcombine.low %v19532_v22, %v19535_v36  ;;  %v24498_v44 = vld [vmem:[#allocation27_spill] sm:$0xff]  ;;  %v24500_v1 = vld [vmem:[#allocation28_spill] sm:$0xff] }
 0x3b4   : > { %16680 = vmatpush3.bf16.msra.mxu1 %v4680_v49  ;;  %v4447_v11 = vrot.slane %v4439_v51, %v18180_v55  ;;  %v4463_v61 = vrot.slane %v4455_v35, %v18180_v55  ;;  %v4515_v7 = vrot.slane %v4507_v40, %v18180_v55  ;;  %v4591_v32 = vcombine.low %v19538_v18, %v19541_v37  ;;  %v24501_v49 = vld [vmem:[#allocation30_spill] sm:$0xff] }
 0x3b5   : > { %16710 = vmatpush3.bf16.msra.mxu0 %v4685_v0  ;;  %16681 = vmatprep.subr.bf16.mxu1 %v24446_v56  ;;  %v4403_v58 = vcombine.low %v4379_v39, %v4395_v20  ;;  %v4404_v34 = vcombine.high %v4379_v39, %v4395_v20  ;;  %v4531_v48 = vrot.slane %v4523_v14, %v18180_v55 }
 0x3b6   : > { %16632 = vmatmul.mubr.msk.bf16.gmra.mrb[24].mxu1 %vm4699_vm2, %v24495_v59  ;;  %16662 = vmatmul.mubr.msk.bf16.gmra.mrb[44].mxu0 %vm4699_vm2, %v24496_v63  ;;  %v4471_v54 = vcombine.low %v4447_v11, %v4463_v61  ;;  %v4472_v8 = vcombine.high %v4447_v11, %v4463_v61  ;;  %v4583_v41 = vrot.slane %v4575_v29, %v18180_v55  ;;  %v24505_v63 = vld [vmem:[#allocation22_spill] sm:$0xff] }
 0x3b7   : > { %16711 = vmatprep.subr.bf16.mxu0 %v24446_v56  ;;  %16635 = vmatprep.mubr.msk.bf16.mxu1 %vm17816_vm1, %v24446_v56  ;;  %v4539_v30 = vcombine.low %v4515_v7, %v4531_v48  ;;  %v4599_v2 = vrot.slane %v4591_v32, %v18180_v55  ;;  %v4540_v60 = vcombine.high %v4515_v7, %v4531_v48 }
 0x3b8   : > { %v4681_v28 = vpack.c.bf16 %v4471_v54, %v4403_v58  ;;  %v4686_v5 = vpack.c.bf16 %v4472_v8, %v4404_v34  ;;  %16665 = vmatprep.mubr.msk.bf16.mxu0 %vm17816_vm1, %v24446_v56  ;;  %v24499_v39 = vcombine.low %v24497_v52, %v24498_v44  ;;  %v24502_v51 = vcombine.low %v24500_v1, %v24501_v49  ;;  %v24506_v54 = vld [vmem:[#allocation29_spill] sm:$0xff] }
 0x3b9   : > { %v4100_v40 = vcombine.high %v19253_v17, %v19256_v12  ;;  %v24503_v0 = vcombine.high %v24497_v52, %v24498_v44  ;;  %v24504_v20 = vcombine.high %v24500_v1, %v24501_v49  ;;  %v4607_v29 = vcombine.low %v4583_v41, %v4599_v2 }
 0x3ba   : > { %v1988_v35 = vpack.c.bf16 %v24502_v51, %v24499_v39  ;;  %v4608_v11 = vcombine.high %v4583_v41, %v4599_v2  ;;  %v4116_v61 = vcombine.high %v19259_v26, %v19262_v46  ;;  %16682 = vmatpush3.bf16.msra.mxu1 %v4681_v28  ;;  %16712 = vmatpush3.bf16.msra.mxu0 %v4686_v5  ;;  %v24507_v51 = vld [vmem:[#allocation15_spill] sm:$0xff] }
 0x3bb   : > { %v1993_v14 = vpack.c.bf16 %v24504_v20, %v24503_v0  ;;  %v4114_v7 = vrot.slane %v4100_v40, %v18180_v55  ;;  %v4168_v32 = vcombine.high %v24490_v15, %v24489_v57  ;;  %v4184_v17 = vcombine.high %v24492_v10, %v24491_v50  ;;  %16683 = vmatprep.subr.bf16.mxu1 %v24446_v56  ;;  %v24508_v40 = vld [vmem:[#allocation4_spill] sm:$0xff] }
 0x3bc   : > { %16713 = vmatprep.subr.bf16.mxu0 %v24446_v56  ;;  %v4682_v12 = vpack.c.bf16 %v4607_v29, %v4539_v30  ;;  %v4687_v58 = vpack.c.bf16 %v4608_v11, %v4540_v60  ;;  %v4130_v34 = vrot.slane %v4116_v61, %v18180_v55  ;;  %v4236_v48 = vcombine.high %v19360_v23, %v19363_v38 }
 0x3bd   : > { %v4182_v26 = vrot.slane %v4168_v32, %v18180_v55  ;;  %v4198_v46 = vrot.slane %v4184_v17, %v18180_v55  ;;  %v4252_v57 = vcombine.high %v19367_v13, %v19370_v27  ;;  %v4304_v10 = vcombine.high %v19297_v24, %v19300_v47 }
 0x3be   : > { %v4133_v15 = vcombine.low %v4114_v7, %v4130_v34  ;;  %v4134_v50 = vcombine.high %v4114_v7, %v4130_v34  ;;  %v4320_v59 = vcombine.high %v19310_v3, %v19313_v42  ;;  %16636 = vmatmul.mubr.msk.bf16.gmra.mrb[28].mxu1 %vm4699_vm2, %v24505_v63  ;;  %16666 = vmatmul.mubr.msk.bf16.gmra.mrb[48].mxu0 %vm4699_vm2, %v24506_v54  ;;  %v24510_v34 = vld [vmem:[#allocation8_spill] sm:$0xff] }
 0x3bf   : > { %v4201_v8 = vcombine.low %v4182_v26, %v4198_v46  ;;  %v4202_v41 = vcombine.high %v4182_v26, %v4198_v46  ;;  %v4250_v23 = vrot.slane %v4236_v48, %v18180_v55  ;;  %16639 = vmatprep.mubr.msk.bf16.mxu1 %vm17816_vm1, %v24446_v56  ;;  %16669 = vmatprep.mubr.msk.bf16.mxu0 %vm17816_vm1, %v24446_v56  ;;  %v399_v26 = vadd.s32 8, %v24510_v34 }
 0x3c0   : > { %v4266_v24 = vrot.slane %v4252_v57, %v18180_v55  ;;  %v4318_v47 = vrot.slane %v4304_v10, %v18180_v55  ;;  %v4334_v3 = vrot.slane %v4320_v59, %v18180_v55  ;;  %16684 = vmatpush3.bf16.msra.mxu1 %v4682_v12  ;;  %16714 = vmatpush3.bf16.msra.mxu0 %v4687_v58  ;;  %v24509_v12 = vlaneseq }
 0x3c1   : > { %v19664_v42 = vpack.c.bf16 %v4201_v8, %v4133_v15  ;;  %v19666_v38 = vpack.c.bf16 %v4202_v41, %v4134_v50  ;;  %v4372_v13 = vcombine.high %v19471_v16, %v19474_v53  ;;  %16685 = vmatprep.subr.bf16.mxu1 %v24446_v56  ;;  %16715 = vmatprep.subr.bf16.mxu0 %v24446_v56  ;;  %v17824_v46 = vmov -1e+30  }
 0x3c2   : > { %v4269_v27 = vcombine.low %v4250_v23, %v4266_v24  ;;  %v4337_v30 = vcombine.low %v4318_v47, %v4334_v3  ;;  %v4270_v2 = vcombine.high %v4250_v23, %v4266_v24  ;;  %v4338_v60 = vcombine.high %v4318_v47, %v4334_v3 }
 0x3c3   : > { %v4386_v28 = vrot.slane %v4372_v13, %v18180_v55  ;;  %v4388_v5 = vcombine.high %v19477_v25, %v19480_v45  ;;  %v4440_v52 = vcombine.high %v19415_v6, %v19418_v4  ;;  %v4456_v16 = vcombine.high %v19425_v33, %v19428_v21 }
 0x3c4   : > { %v19677_v44 = vpack.c.bf16 %v4337_v30, %v4269_v27  ;;  %v4508_v53 = vcombine.high %v19569_v9, %v19572_v19  ;;  %v4524_v39 = vcombine.high %v19575_v43, %v19578_v62  ;;  %v19685_v1 = vpack.c.bf16 %v4338_v60, %v4270_v2 }
 0x3c5   : > { %v4402_v49 = vrot.slane %v4388_v5, %v18180_v55  ;;  %v4454_v25 = vrot.slane %v4440_v52, %v18180_v55  ;;  %v4576_v6 = vcombine.high %v19532_v22, %v19535_v36  ;;  %v4470_v4 = vrot.slane %v4456_v16, %v18180_v55 }
 0x3c6   : > { %v4522_v45 = vrot.slane %v4508_v53, %v18180_v55  ;;  %v4538_v33 = vrot.slane %v4524_v39, %v18180_v55  ;;  %v4592_v21 = vcombine.high %v19538_v18, %v19541_v37  ;;  %16640 = vmatmul.mubr.msk.bf16.gmra.mrb[32].mxu1 %vm4699_vm2, %v1988_v35  ;;  %16670 = vmatmul.mubr.msk.bf16.gmra.mrb[52].mxu0 %vm4699_vm2, %v1993_v14  ;;  %v19723_v58 = vand.u32 127, %v24509_v12 }
 0x3c7   : > { %v4405_v9 = vcombine.low %v4386_v28, %v4402_v49  ;;  %v4406_v19 = vcombine.high %v4386_v28, %v4402_v49  ;;  %v4590_v43 = vrot.slane %v4576_v6, %v18180_v55  ;;  %16643 = vmatprep.mubr.msk.bf16.mxu1 %vm17816_vm1, %v24446_v56  ;;  %16673 = vmatprep.mubr.msk.bf16.mxu0 %vm17816_vm1, %v24446_v56  ;;  %v400_v57 = vadd.s32 16, %v24510_v34 }
 0x3c8   : > { %v4473_v22 = vcombine.low %v4454_v25, %v4470_v4  ;;  %v4474_v36 = vcombine.high %v4454_v25, %v4470_v4  ;;  %v4541_v62 = vcombine.low %v4522_v45, %v4538_v33  ;;  %v1973_v18 = vcombine.low %v24508_v40, %v24507_v51 }
 0x3c9   : > { %v1974_v37 = vcombine.high %v24508_v40, %v24507_v51  ;;  %v4606_v35 = vrot.slane %v4592_v21, %v18180_v55  ;;  %v4542_v0 = vcombine.high %v4522_v45, %v4538_v33  ;;  %vm409_vm3 = vcmp.le.s32.totalorder %v19723_v58, %v24510_v34 }
 0x3ca   : > { %v19708_v20 = vpack.c.bf16 %v4473_v22, %v4405_v9  ;;  %v19710_v14 = vpack.c.bf16 %v4474_v36, %v4406_v19  ;;  %v1989_v61 = vpack.c.bf16 %v1973_v18, %v1973_v18  ;;  %vm410_vm4 = vcmp.le.s32.totalorder %v19723_v58, %v399_v26 }
 0x3cb   : > { %v4609_v29 = vcombine.low %v4590_v43, %v4606_v35  ;;  %v4610_v11 = vcombine.high %v4590_v43, %v4606_v35  ;;  %v1994_v7 = vpack.c.bf16 %v1974_v37, %v1974_v37  ;;  %v19730_v48 = vsel %vm409_vm3, 0.0, %v17824_v46 }
 0x3cc   : > { %24511 = vst [vmem:[#allocation6_spill] sm:$0xff] %v19730_v48  ;;  %v19734_v10 = vsel %vm410_vm4, 0.0, %v17824_v46  ;;  %v401_v41 = vadd.s32 24, %v24510_v34  ;;  %vm411_vm6 = vcmp.le.s32.totalorder %v19723_v58, %v400_v57  ;;  %v402_v60 = vadd.s32 32, %v24510_v34 }
 0x3cd   : > { %v19712_v32 = vpack.c.bf16 %v4609_v29, %v4541_v62  ;;  %v19714_v17 = vpack.c.bf16 %v4610_v11, %v4542_v0  ;;  %24512 = vst [vmem:[#allocation19_spill] sm:$0xff] %v19734_v10  ;;  %v19753_v2 = vsel %vm411_vm6, 0.0, %v17824_v46  ;;  %v403_v6 = vadd.s32 40, %v24510_v34 }
 0x3ce   : > { %16644 = vmatmul.mubr.msk.bf16.gmra.mrb[36].mxu1 %vm4699_vm2, %v1989_v61  ;;  %16674 = vmatmul.mubr.msk.bf16.gmra.mrb[56].mxu0 %vm4699_vm2, %v1994_v7  ;;  %vm412_vm7 = vcmp.le.s32.totalorder %v19723_v58, %v401_v41  ;;  %24513 = vst [vmem:[#allocation21_spill] sm:$0xff] %v19753_v2  ;;  %vm413_vm8 = vcmp.le.s32.totalorder %v19723_v58, %v402_v60  ;;  %v404_v0 = vadd.s32 48, %v24510_v34  ;;  %v405_v26 = vadd.s32 56, %v24510_v34 }
 0x3cf   : > { %16687 = vmatprep.mubr.msk.bf16.mxu1 %vm17816_vm1, %v24446_v56  ;;  %16717 = vmatprep.mubr.msk.bf16.mxu0 %vm17816_vm1, %v24446_v56  ;;  %v19762_v53 = vsel %vm412_vm7, 0.0, %v17824_v46  ;;  %vm414_vm9 = vcmp.le.s32.totalorder %v19723_v58, %v403_v6  ;;  %v19781_v36 = vsel %vm413_vm8, 0.0, %v17824_v46 }
 0x3d0   : > { %24514 = vst [vmem:[#allocation26_spill] sm:$0xff] %v19762_v53  ;;  %24515 = vst [vmem:[#allocation5_spill] sm:$0xff] %v19781_v36  ;;  %v19791_v35 = vsel %vm414_vm9, 0.0, %v17824_v46  ;;  %vm415_vm10 = vcmp.le.s32.totalorder %v19723_v58, %v404_v0  ;;  %vm416_vm11 = vcmp.le.s32.totalorder %v19723_v58, %v405_v26 }
 0x3d1   : > { %24516 = vst [vmem:[#allocation14_spill] sm:$0xff] %v19791_v35 }
 0x44d   : > { %v4764_v15 = vpop.f32.mrb[0].mxu1  ;;  %v4866_v50 = vpop.f32.mrb[20].mxu0 }
 0x44e   : > { %v19737_v59 = vadd.f32 %v4764_v15, %v19730_v48  ;;  %v19740_v63 = vadd.f32 %v4866_v50, %v19730_v48  ;;  %v16569_v54 = vpop.f32.mrb[1].mxu1  ;;  %v16599_v8 = vpop.f32.mrb[21].mxu0 }
 0x44f   : > { %v4767_v23 = vpop.f32.mrb[2].mxu1  ;;  %v4869_v24 = vpop.f32.mrb[22].mxu0 }
 0x450   : > { %v19744_v47 = vadd.f32 %v4767_v23, %v19734_v10  ;;  %v16570_v3 = vpop.f32.mrb[3].mxu1  ;;  %v16600_v13 = vpop.f32.mrb[23].mxu0  ;;  %v5136_v27 = vsel %vm5108_vm5, %v19740_v63, -inf  ;;  %v5109_v30 = vsel %vm5108_vm5, %v19737_v59, -inf  ;;  %v19757_v28 = vadd.f32 %v4869_v24, %v19734_v10 }
 0x451   : > { %5137 = vmax.xlane.f32.xlu0 %v5136_v27  ;;  %5110 = vmax.xlane.f32.xlu1 %v5109_v30  ;;  %v19814_v24 = vsel %vm415_vm10, 0.0, %v17824_v46  ;;  %v406_v27 = vadd.s32 64, %v24510_v34 }
 0x452   : > { %v5112_v5 = vsel %vm5108_vm5, %v19744_v47, -inf  ;;  %v5139_v43 = vsel %vm5108_vm5, %v19757_v28, -inf  ;;  %24517 = vst [vmem:[#allocation2_spill] sm:$0xff] %v19814_v24 }
 0x453   : > { %vm417_vm12 = vcmp.le.s32.totalorder %v19723_v58, %v406_v27 }
 0x455   : > { %v4874_v52 = vpop.f32.mrb[24].mxu0  ;;  %5113 = vmax.xlane.f32.xlu0 %v5112_v5  ;;  %v4772_v16 = vpop.f32.mrb[4].mxu1  ;;  %v19822_v5 = vsel %vm416_vm11, 0.0, %v17824_v46 }
 0x456   : > { %v19765_v39 = vadd.f32 %v4772_v16, %v19753_v2  ;;  %v16573_v49 = vpop.f32.mrb[5].mxu1  ;;  %v16603_v25 = vpop.f32.mrb[25].mxu0  ;;  %v19770_v33 = vadd.f32 %v4874_v52, %v19753_v2  ;;  %24518 = vst [vmem:[#allocation16_spill] sm:$0xff] %v19822_v5 }
 0x457   : > { %v4775_v4 = vpop.f32.mrb[6].mxu1  ;;  %v4877_v45 = vpop.f32.mrb[26].mxu0 }
 0x458   : > { %v19773_v21 = vadd.f32 %v4775_v4, %v19762_v53  ;;  %v16574_v9 = vpop.f32.mrb[7].mxu1  ;;  %v16604_v19 = vpop.f32.mrb[27].mxu0  ;;  %v5115_v22 = vsel %vm5108_vm5, %v19765_v39, -inf  ;;  %v19784_v62 = vadd.f32 %v4877_v45, %v19762_v53  ;;  %v5142_v51 = vsel %vm5108_vm5, %v19770_v33, -inf }
 0x459   : > { %5140 = vmax.xlane.f32.xlu0 %v5139_v43  ;;  %5116 = vmax.xlane.f32.xlu1 %v5115_v22 }
 0x45a   : > { %v5118_v40 = vsel %vm5108_vm5, %v19773_v21, -inf  ;;  %v5145_v8 = vsel %vm5108_vm5, %v19784_v62, -inf }
 0x45d   : > { %v4882_v18 = vpop.f32.mrb[28].mxu0  ;;  %5143 = vmax.xlane.f32.xlu1 %v5142_v51  ;;  %5119 = vmax.xlane.f32.xlu0 %v5118_v40  ;;  %v4780_v37 = vpop.f32.mrb[8].mxu1  ;;  %v19842_v40 = vsel %vm417_vm12, 0.0, %v17824_v46 }
 0x45e   : > { %v19795_v29 = vadd.f32 %v4780_v37, %v19781_v36  ;;  %v16577_v11 = vpop.f32.mrb[9].mxu1  ;;  %v16607_v61 = vpop.f32.mrb[29].mxu0  ;;  %v19799_v57 = vadd.f32 %v4882_v18, %v19781_v36  ;;  %24519 = vst [vmem:[#allocation23_spill] sm:$0xff] %v19842_v40 }
 0x45f   : > { %v4783_v7 = vpop.f32.mrb[10].mxu1  ;;  %v4885_v12 = vpop.f32.mrb[30].mxu0 }
 0x460   : > { %v19802_v15 = vadd.f32 %v4783_v7, %v19791_v35  ;;  %v16578_v50 = vpop.f32.mrb[11].mxu1  ;;  %v16608_v54 = vpop.f32.mrb[31].mxu0  ;;  %v5121_v41 = vsel %vm5108_vm5, %v19795_v29, -inf  ;;  %v19811_v23 = vadd.f32 %v4885_v12, %v19791_v35  ;;  %v5148_v3 = vsel %vm5108_vm5, %v19799_v57, -inf }
 0x461   : > { %5146 = vmax.xlane.f32.xlu0 %v5145_v8  ;;  %5122 = vmax.xlane.f32.xlu1 %v5121_v41 }
 0x462   : > { %v5124_v13 = vsel %vm5108_vm5, %v19802_v15, -inf  ;;  %v5151_v4 = vsel %vm5108_vm5, %v19811_v23, -inf }
 0x465   : > { %5149 = vmax.xlane.f32.xlu1 %v5148_v3  ;;  %5125 = vmax.xlane.f32.xlu0 %v5124_v13  ;;  %v4890_v30 = vpop.f32.mrb[32].mxu0  ;;  %v4788_v60 = vpop.f32.mrb[12].mxu1 }
 0x466   : > { %v19825_v52 = vadd.f32 %v4788_v60, %v19814_v24  ;;  %v16581_v16 = vpop.f32.mrb[13].mxu1  ;;  %v16611_v49 = vpop.f32.mrb[33].mxu0  ;;  %v19830_v45 = vadd.f32 %v4890_v30, %v19814_v24 }
 0x467   : > { %v4791_v25 = vpop.f32.mrb[14].mxu1  ;;  %v4893_v6 = vpop.f32.mrb[34].mxu0 }
 0x468   : > { %v19833_v9 = vadd.f32 %v4791_v25, %v19822_v5  ;;  %v16582_v19 = vpop.f32.mrb[15].mxu1  ;;  %v16612_v43 = vpop.f32.mrb[35].mxu0  ;;  %v5127_v22 = vsel %vm5108_vm5, %v19825_v52, -inf  ;;  %v19839_v51 = vadd.f32 %v4893_v6, %v19822_v5  ;;  %v5154_v37 = vsel %vm5108_vm5, %v19830_v45, -inf }
 0x469   : > { %5152 = vmax.xlane.f32.xlu0 %v5151_v4  ;;  %5128 = vmax.xlane.f32.xlu1 %v5127_v22 }
 0x46a   : > { %v5130_v18 = vsel %vm5108_vm5, %v19833_v9, -inf  ;;  %v5157_v50 = vsel %vm5108_vm5, %v19839_v51, -inf }
 0x46d   : > { %5131 = vmax.xlane.f32.xlu0 %v5130_v18  ;;  %5155 = vmax.xlane.f32.xlu1 %v5154_v37  ;;  %v4796_v11 = vpop.f32.mrb[16].mxu1 }
 0x46e   : > { %v19849_v61 = vadd.f32 %v4796_v11, %v19842_v40  ;;  %v16585_v58 = vpop.f32.mrb[17].mxu1 }
 0x46f   : > { %v4898_v0 = vpop.f32.mrb[36].mxu0  ;;  %v4799_v46 = vpop.f32.mrb[18].mxu1 }
 0x470   : > { %v16615_v7 = vpop.f32.mrb[37].mxu0  ;;  %v19852_v12 = vadd.f32 %v4898_v0, %v19842_v40  ;;  %v16586_v54 = vpop.f32.mrb[19].mxu1  ;;  %v5133_v41 = vsel %vm5108_vm5, %v19849_v61, -inf }
 0x471   : > { %v4901_v26 = vpop.f32.mrb[38].mxu0  ;;  %5158 = vmax.xlane.f32.xlu0 %v5157_v50  ;;  %5134 = vmax.xlane.f32.xlu1 %v5133_v41 }
 0x472   : > { %v16616_v8 = vpop.f32.mrb[39].mxu0  ;;  %v5160_v3 = vsel %vm5108_vm5, %v19852_v12, -inf }
 0x475   : > { %5161 = vmax.xlane.f32.xlu0 %v5160_v3 }
 0x481   : > { %v5070_v13 = vpop.f32.mrb[40].mxu0  ;;  %v4968_v27 = vpop.f32.mrb[20].mxu1 }
 0x482   : > { %v19861_v30 = vadd.f32 %v4968_v27, %v19730_v48  ;;  %v16629_v60 = vpop.f32.mrb[21].mxu1  ;;  %v16659_v16 = vpop.f32.mrb[41].mxu0  ;;  %v19864_v6 = vadd.f32 %v5070_v13, %v19730_v48 }
 0x483   : > { %v4971_v49 = vpop.f32.mrb[22].mxu1  ;;  %v5073_v25 = vpop.f32.mrb[42].mxu0 }
 0x484   : > { %v19867_v4 = vadd.f32 %v4971_v49, %v19734_v10  ;;  %v16630_v19 = vpop.f32.mrb[23].mxu1  ;;  %v16660_v43 = vpop.f32.mrb[43].mxu0  ;;  %v5163_v22 = vsel %vm5108_vm5, %v19861_v30, -inf  ;;  %v19872_v18 = vadd.f32 %v5073_v25, %v19734_v10  ;;  %v5190_v0 = vsel %vm5108_vm5, %v19864_v6, -inf }
 0x485   : > { %5164 = vmax.xlane.f32.xlu1 %v5163_v22 }
 0x486   : > { %v5166_v37 = vsel %vm5108_vm5, %v19867_v4, -inf  ;;  %v5193_v50 = vsel %vm5108_vm5, %v19872_v18, -inf }
 0x487   : > { %5167 = vmax.xlane.f32.xlu0 %v5166_v37 }
 0x489   : > { %v5078_v11 = vpop.f32.mrb[44].mxu0  ;;  %5191 = vmax.xlane.f32.xlu1 %v5190_v0  ;;  %v4976_v58 = vpop.f32.mrb[24].mxu1 }
 0x48a   : > { %v19879_v7 = vadd.f32 %v4976_v58, %v19753_v2  ;;  %v16633_v46 = vpop.f32.mrb[25].mxu1  ;;  %v16663_v26 = vpop.f32.mrb[45].mxu0  ;;  %v19884_v41 = vadd.f32 %v5078_v11, %v19753_v2 }
 0x48b   : > { %v5081_v54 = vpop.f32.mrb[46].mxu0  ;;  %5194 = vmax.xlane.f32.xlu0 %v5193_v50  ;;  %v4979_v8 = vpop.f32.mrb[26].mxu1 }
 0x48c   : > { %v19887_v3 = vadd.f32 %v4979_v8, %v19762_v53  ;;  %v16634_v13 = vpop.f32.mrb[27].mxu1  ;;  %v16664_v27 = vpop.f32.mrb[47].mxu0  ;;  %v5169_v60 = vsel %vm5108_vm5, %v19879_v7, -inf  ;;  %v19892_v16 = vadd.f32 %v5081_v54, %v19762_v53  ;;  %v5196_v25 = vsel %vm5108_vm5, %v19884_v41, -inf }
 0x48d   : > { %5170 = vmax.xlane.f32.xlu1 %v5169_v60 }
 0x48e   : > { %v5172_v49 = vsel %vm5108_vm5, %v19887_v3, -inf  ;;  %v5199_v11 = vsel %vm5108_vm5, %v19892_v16, -inf }
 0x48f   : > { %5173 = vmax.xlane.f32.xlu0 %v5172_v49 }
 0x491   : > { %v5086_v19 = vpop.f32.mrb[48].mxu0  ;;  %5197 = vmax.xlane.f32.xlu1 %v5196_v25  ;;  %v4984_v43 = vpop.f32.mrb[28].mxu1 }
 0x492   : > { %v19899_v22 = vadd.f32 %v4984_v43, %v19781_v36  ;;  %v16637_v37 = vpop.f32.mrb[29].mxu1  ;;  %v16667_v0 = vpop.f32.mrb[49].mxu0  ;;  %v19904_v26 = vadd.f32 %v5086_v19, %v19781_v36 }
 0x493   : > { %v5089_v58 = vpop.f32.mrb[50].mxu0  ;;  %5200 = vmax.xlane.f32.xlu0 %v5199_v11  ;;  %v4987_v46 = vpop.f32.mrb[30].mxu1 }
 0x494   : > { %v19907_v50 = vadd.f32 %v4987_v46, %v19791_v35  ;;  %v16638_v54 = vpop.f32.mrb[31].mxu1  ;;  %v16668_v8 = vpop.f32.mrb[51].mxu0  ;;  %v5175_v13 = vsel %vm5108_vm5, %v19899_v22, -inf  ;;  %v19912_v27 = vadd.f32 %v5089_v58, %v19791_v35  ;;  %v5202_v49 = vsel %vm5108_vm5, %v19904_v26, -inf }
 0x495   : > { %5176 = vmax.xlane.f32.xlu1 %v5175_v13 }
 0x496   : > { %v5178_v60 = vsel %vm5108_vm5, %v19907_v50, -inf  ;;  %v5205_v11 = vsel %vm5108_vm5, %v19912_v27, -inf }
 0x497   : > { %5179 = vmax.xlane.f32.xlu0 %v5178_v60 }
 0x499   : > { %v5094_v25 = vpop.f32.mrb[52].mxu0  ;;  %5203 = vmax.xlane.f32.xlu1 %v5202_v49  ;;  %v4992_v19 = vpop.f32.mrb[32].mxu1 }
 0x49a   : > { %v19919_v43 = vadd.f32 %v4992_v19, %v19814_v24  ;;  %v16641_v37 = vpop.f32.mrb[33].mxu1  ;;  %v16671_v0 = vpop.f32.mrb[53].mxu0  ;;  %v19924_v54 = vadd.f32 %v5094_v25, %v19814_v24 }
 0x49b   : > { %v5097_v58 = vpop.f32.mrb[54].mxu0  ;;  %5206 = vmax.xlane.f32.xlu0 %v5205_v11  ;;  %v4995_v46 = vpop.f32.mrb[34].mxu1 }
 0x49c   : > { %v19927_v8 = vadd.f32 %v4995_v46, %v19822_v5  ;;  %v16642_v13 = vpop.f32.mrb[35].mxu1  ;;  %v16672_v60 = vpop.f32.mrb[55].mxu0  ;;  %v5181_v49 = vsel %vm5108_vm5, %v19919_v43, -inf  ;;  %v19932_v19 = vadd.f32 %v5097_v58, %v19822_v5  ;;  %v5208_v25 = vsel %vm5108_vm5, %v19924_v54, -inf }
 0x49d   : > { %5182 = vmax.xlane.f32.xlu1 %v5181_v49 }
 0x49e   : > { %v5184_v37 = vsel %vm5108_vm5, %v19927_v8, -inf  ;;  %v5211_v58 = vsel %vm5108_vm5, %v19932_v19, -inf }
 0x49f   : > { %5185 = vmax.xlane.f32.xlu0 %v5184_v37 }
 0x4a1   : > { %v5102_v0 = vpop.f32.mrb[56].mxu0  ;;  %5209 = vmax.xlane.f32.xlu1 %v5208_v25  ;;  %v5000_v11 = vpop.f32.mrb[36].mxu1 }
 0x4a2   : > { %v19939_v46 = vadd.f32 %v5102_v0, %v19842_v40  ;;  %v19942_v13 = vadd.f32 %v5000_v11, %v19842_v40  ;;  %v16645_v60 = vpop.f32.mrb[37].mxu1  ;;  %v16675_v49 = vpop.f32.mrb[57].mxu0  ;;  %v24520_v11 = vld [vmem:[#allocation25_spill] sm:$0xff] }
 0x4a3   : > { %v5105_v34 = vpop.f32.mrb[58].mxu0  ;;  %5212 = vmax.xlane.f32.xlu0 %v5211_v58  ;;  %v5003_v37 = vpop.f32.mrb[38].mxu1 }
 0x4a4   : > { %v16646_v5 = vpop.f32.mrb[39].mxu1  ;;  %v16676_v24 = vpop.f32.mrb[59].mxu0  ;;  %v5187_v25 = vsel %vm5108_vm5, %v19942_v13, -inf  ;;  %v5214_v0 = vsel %vm5108_vm5, %v19939_v46, -inf }
 0x4a5   : > { %5188 = vmax.xlane.f32.xlu1 %v5187_v25  ;;  %v19952_v60 = vpop.permute.xlu0 %3381  ;;  %v19954_v49 = vpop.permute.xlu1 %3363 }
 0x4a7   : > { %5215 = vmax.xlane.f32.xlu0 %v5214_v0 }
 0x4bd   : > { %3417 = vrot.lane.b32.xlu0 %v24520_v11, %s17823_s14 }
 0x4de   : > { %v5111_v34 = vpop.xlane.xlu1 %5110  ;;  %v5138_v58 = vpop.xlane.xlu0 %5137 }
 0x4df   : > { %v5217_v5 = vsub.f32 %v19737_v59, %v5111_v34  ;;  %v5226_v24 = vsub.f32 %v19740_v63, %v5138_v58 }
 0x4e1   : > { %v5253_v37 = vmul.f32 1.442695, %v5217_v5  ;;  %v5271_v40 = vmul.f32 1.442695, %v5226_v24 }
 0x4e2   : > { %v5114_v25 = vpop.xlane.xlu0 %5113 }
 0x4e3   : > { %17418 = vpow2.f32 %v5253_v37  ;;  %v5218_v35 = vsub.f32 %v19744_v47, %v5114_v25 }
 0x4e4   : > { %17420 = vpow2.f32 %v5271_v40 }
 0x4e5   : > { %v5255_v0 = vmul.f32 1.442695, %v5218_v35 }
 0x4e6   : > { %v19959_v36 = vpop.xlane.xlu1 %5116  ;;  %v5141_v11 = vpop.xlane.xlu0 %5140 }
 0x4e7   : > { %17422 = vpow2.f32 %v5255_v0  ;;  %v5227_v53 = vsub.f32 %v19757_v28, %v5141_v11 }
 0x4e9   : > { %v5273_v2 = vmul.f32 1.442695, %v5227_v53 }
 0x4ea   : > { %v5144_v10 = vpop.xlane.xlu1 %5143  ;;  %v5120_v48 = vpop.xlane.xlu0 %5119 }
 0x4eb   : > { %v5228_v59 = vsub.f32 %v19770_v33, %v5144_v10  ;;  %v5220_v63 = vsub.f32 %v19773_v21, %v5120_v48  ;;  %17424 = vpow2.f32 %v5273_v2 }
 0x4ed   : > { %v19964_v34 = vpop.eup %17418  ;;  %v5275_v58 = vmul.f32 1.442695, %v5228_v59  ;;  %v5259_v35 = vmul.f32 1.442695, %v5220_v63 }
 0x4ee   : > { %v19966_v47 = vpop.eup %17420  ;;  %v5147_v40 = vpop.xlane.xlu0 %5146  ;;  %v5325_v5 = vsel %vm5108_vm5, %v19964_v34, 0.0 }
 0x4ef   : > { %17426 = vpow2.f32 %v5275_v58  ;;  %v5229_v28 = vsub.f32 %v19784_v62, %v5147_v40  ;;  %5326 = vadd.xlane.f32.xlu1 %v5325_v5  ;;  %v5352_v10 = vsel %vm5108_vm5, %v19966_v47, 0.0  ;;  %v5123_v25 = vpop.xlane.xlu1 %5122 }
 0x4f0   : > { %5353 = vadd.xlane.f32.xlu0 %v5352_v10  ;;  %17428 = vpow2.f32 %v5259_v35 }
 0x4f1   : > { %v19973_v48 = vpop.eup %17422  ;;  %v5277_v2 = vmul.f32 1.442695, %v5229_v28 }
 0x4f2   : > { %v5126_v53 = vpop.xlane.xlu0 %5125  ;;  %v5328_v33 = vsel %vm5108_vm5, %v19973_v48, 0.0 }
 0x4f3   : > { %v5222_v21 = vsub.f32 %v19802_v15, %v5126_v53  ;;  %17430 = vpow2.f32 %v5277_v2  ;;  %v5150_v5 = vpop.xlane.xlu1 %5149 }
 0x4f4   : > { %5329 = vadd.xlane.f32.xlu0 %v5328_v33  ;;  %v24521_v33 = vld [vmem:[#allocation24_spill] sm:$0xff] }
 0x4f5   : > { %v19978_v24 = vpop.eup %17424  ;;  %v5263_v62 = vmul.f32 1.442695, %v5222_v21 }
 0x4f6   : > { %v5153_v37 = vpop.xlane.xlu0 %5152  ;;  %v5355_v11 = vsel %vm5108_vm5, %v19978_v24, 0.0 }
 0x4f7   : > { %v5231_v0 = vsub.f32 %v19811_v23, %v5153_v37  ;;  %17432 = vpow2.f32 %v5263_v62  ;;  %v5129_v62 = vpop.xlane.xlu1 %5128 }
 0x4f8   : > { %5356 = vadd.xlane.f32.xlu0 %v5355_v11 }
 0x4f9   : > { %v19983_v59 = vpop.eup %17426  ;;  %v5281_v63 = vmul.f32 1.442695, %v5231_v0 }
 0x4fa   : > { %v5132_v58 = vpop.xlane.xlu0 %5131  ;;  %v5358_v15 = vsel %vm5108_vm5, %v19983_v59, 0.0  ;;  %v19988_v40 = vpop.eup %17428 }
 0x4fb   : > { %v5224_v35 = vsub.f32 %v19833_v9, %v5132_v58  ;;  %17434 = vpow2.f32 %v5281_v63  ;;  %v5334_v2 = vsel %vm5108_vm5, %v19988_v40, 0.0 }
 0x4fc   : > { %5359 = vadd.xlane.f32.xlu0 %v5358_v15  ;;  %v5156_v15 = vpop.xlane.xlu1 %5155 }
 0x4fd   : > { %v5267_v23 = vmul.f32 1.442695, %v5224_v35  ;;  %v19993_v53 = vpop.eup %17430 }
 0x4fe   : > { %v5159_v28 = vpop.xlane.xlu0 %5158  ;;  %v5361_v0 = vsel %vm5108_vm5, %v19993_v53, 0.0 }
 0x4ff   : > { %v5233_v10 = vsub.f32 %v19839_v51, %v5159_v28  ;;  %17436 = vpow2.f32 %v5267_v23  ;;  %v5219_v23 = vsub.f32 %v19765_v39, %v19959_v36  ;;  %v5230_v39 = vsub.f32 %v19799_v57, %v5150_v5 }
 0x500   : > { %5335 = vadd.xlane.f32.xlu0 %v5334_v2  ;;  %3399 = vrot.lane.b32.xlu1 %v24521_v33, %s17823_s14  ;;  %v5135_v28 = vpop.xlane.xlu1 %5134  ;;  %v5221_v33 = vsub.f32 %v19795_v29, %v5123_v25  ;;  %v5223_v25 = vsub.f32 %v19825_v52, %v5129_v62  ;;  %v5232_v5 = vsub.f32 %v19830_v45, %v5156_v15 }
 0x501   : > { %v5285_v9 = vmul.f32 1.442695, %v5233_v10  ;;  %v20000_v11 = vpop.eup %17432  ;;  %v5279_v29 = vmul.f32 1.442695, %v5230_v39  ;;  %v5225_v62 = vsub.f32 %v19849_v61, %v5135_v28 }
 0x502   : > { %v5162_v21 = vpop.xlane.xlu0 %5161  ;;  %v5340_v63 = vsel %vm5108_vm5, %v20000_v11, 0.0  ;;  %v5265_v57 = vmul.f32 1.442695, %v5223_v25  ;;  %v5283_v52 = vmul.f32 1.442695, %v5232_v5 }
 0x503   : > { %v5234_v37 = vsub.f32 %v19852_v12, %v5162_v21  ;;  %17438 = vpow2.f32 %v5285_v9  ;;  %v5257_v9 = vmul.f32 1.442695, %v5219_v23 }
 0x504   : > { %5362 = vadd.xlane.f32.xlu0 %v5361_v0 }
 0x505   : > { %v5287_v51 = vmul.f32 1.442695, %v5234_v37  ;;  %v20004_v58 = vpop.eup %17434 }
 0x506   : > { %v5367_v35 = vsel %vm5108_vm5, %v20004_v58, 0.0 }
 0x507   : > { %17440 = vpow2.f32 %v5287_v51  ;;  %v5261_v51 = vmul.f32 1.442695, %v5221_v33 }
 0x508   : > { %5341 = vadd.xlane.f32.xlu0 %v5340_v63  ;;  %17442 = vpow2.f32 %v5257_v9 }
 0x509   : > { %v20008_v12 = vpop.eup %17436  ;;  %17444 = vpow2.f32 %v5261_v51 }
 0x50a   : > { %v5346_v10 = vsel %vm5108_vm5, %v20008_v12, 0.0 }
 0x50c   : > { %5368 = vadd.xlane.f32.xlu0 %v5367_v35 }
 0x50d   : > { %v20014_v2 = vpop.eup %17438 }
 0x50e   : > { %24522 = vst [vmem:[#allocation7_spill] sm:$0xff] %v20014_v2  ;;  %v5373_v37 = vsel %vm5108_vm5, %v20014_v2, 0.0 }
 0x510   : > { %5347 = vadd.xlane.f32.xlu0 %v5346_v10 }
 0x511   : > { %v20019_v0 = vpop.eup %17440 }
 0x512   : > { %v5165_v21 = vpop.xlane.xlu1 %5164  ;;  %v5376_v35 = vsel %vm5108_vm5, %v20019_v0, 0.0 }
 0x514   : > { %5374 = vadd.xlane.f32.xlu0 %v5373_v37  ;;  %v5168_v36 = vpop.xlane.xlu0 %5167 }
 0x515   : > { %v5236_v63 = vsub.f32 %v19867_v4, %v5168_v36 }
 0x516   : > { %v5192_v23 = vpop.xlane.xlu1 %5191 }
 0x517   : > { %v5291_v10 = vmul.f32 1.442695, %v5236_v63  ;;  %v20029_v63 = vpop.eup %17442 }
 0x518   : > { %5377 = vadd.xlane.f32.xlu0 %v5376_v35  ;;  %v5195_v2 = vpop.xlane.xlu0 %5194  ;;  %v5331_v45 = vsel %vm5108_vm5, %v20029_v63, 0.0  ;;  %v5269_v35 = vmul.f32 1.442695, %v5225_v62 }
 0x519   : > { %17446 = vpow2.f32 %v5291_v10  ;;  %v5245_v33 = vsub.f32 %v19872_v18, %v5195_v2  ;;  %v20033_v2 = vpop.eup %17444  ;;  %v5235_v10 = vsub.f32 %v19861_v30, %v5165_v21  ;;  %v5244_v21 = vsub.f32 %v19864_v6, %v5192_v23 }
 0x51a   : > { %17448 = vpow2.f32 %v5279_v29  ;;  %v5171_v36 = vpop.xlane.xlu1 %5170 }
 0x51b   : > { %v5309_v37 = vmul.f32 1.442695, %v5245_v33  ;;  %v5337_v33 = vsel %vm5108_vm5, %v20033_v2, 0.0  ;;  %v5289_v30 = vmul.f32 1.442695, %v5235_v10  ;;  %v5237_v23 = vsub.f32 %v19879_v7, %v5171_v36 }
 0x51c   : > { %v5174_v4 = vpop.xlane.xlu0 %5173  ;;  %v5307_v6 = vmul.f32 1.442695, %v5244_v21 }
 0x51d   : > { %17450 = vpow2.f32 %v5309_v37  ;;  %v5238_v9 = vsub.f32 %v19887_v3, %v5174_v4 }
 0x51e   : > { %17452 = vpow2.f32 %v5265_v57  ;;  %v5198_v29 = vpop.xlane.xlu1 %5197 }
 0x51f   : > { %v5295_v51 = vmul.f32 1.442695, %v5238_v9  ;;  %v5246_v7 = vsub.f32 %v19884_v41, %v5198_v29 }
 0x520   : > { %v5201_v39 = vpop.xlane.xlu0 %5200 }
 0x521   : > { %17454 = vpow2.f32 %v5295_v51  ;;  %v5247_v18 = vsub.f32 %v19892_v16, %v5201_v39  ;;  %v5311_v41 = vmul.f32 1.442695, %v5246_v7 }
 0x522   : > { %17456 = vpow2.f32 %v5283_v52  ;;  %v5177_v51 = vpop.xlane.xlu1 %5176 }
 0x523   : > { %v20037_v15 = vpop.eup %17446  ;;  %v5313_v3 = vmul.f32 1.442695, %v5247_v18 }
 0x524   : > { %5332 = vadd.xlane.f32.xlu1 %v5331_v45  ;;  %v5180_v25 = vpop.xlane.xlu0 %5179  ;;  %v5382_v61 = vsel %vm5108_vm5, %v20037_v15, 0.0  ;;  %v20043_v28 = vpop.eup %17448 }
 0x525   : > { %17458 = vpow2.f32 %v5313_v3  ;;  %v5240_v16 = vsub.f32 %v19907_v50, %v5180_v25  ;;  %5383 = vadd.xlane.f32.xlu0 %v5382_v61  ;;  %v5364_v52 = vsel %vm5108_vm5, %v20043_v28, 0.0  ;;  %v5293_v61 = vmul.f32 1.442695, %v5237_v23 }
 0x526   : > { %17460 = vpow2.f32 %v5269_v35  ;;  %v5204_v36 = vpop.xlane.xlu1 %5203 }
 0x527   : > { %v20047_v37 = vpop.eup %17450  ;;  %v5299_v57 = vmul.f32 1.442695, %v5240_v16 }
 0x528   : > { %5338 = vadd.xlane.f32.xlu1 %v5337_v33  ;;  %v5207_v5 = vpop.xlane.xlu0 %5206  ;;  %v5409_v4 = vsel %vm5108_vm5, %v20047_v37, 0.0  ;;  %v20053_v9 = vpop.eup %17452 }
 0x529   : > { %17462 = vpow2.f32 %v5299_v57  ;;  %v5249_v50 = vsub.f32 %v19912_v27, %v5207_v5  ;;  %5410 = vadd.xlane.f32.xlu0 %v5409_v4  ;;  %v5343_v35 = vsel %vm5108_vm5, %v20053_v9, 0.0 }
 0x52a   : > { %17464 = vpow2.f32 %v5289_v30 }
 0x52b   : > { %v20057_v62 = vpop.eup %17454  ;;  %v5317_v39 = vmul.f32 1.442695, %v5249_v50  ;;  %v5239_v50 = vsub.f32 %v19899_v22, %v5177_v51  ;;  %v5248_v22 = vsub.f32 %v19904_v26, %v5204_v36 }
 0x52c   : > { %5365 = vadd.xlane.f32.xlu1 %v5364_v52  ;;  %v5186_v18 = vpop.xlane.xlu0 %5185  ;;  %v5388_v45 = vsel %vm5108_vm5, %v20057_v62, 0.0  ;;  %v20063_v3 = vpop.eup %17456 }
 0x52d   : > { %17466 = vpow2.f32 %v5317_v39  ;;  %v5242_v27 = vsub.f32 %v19927_v8, %v5186_v18  ;;  %5389 = vadd.xlane.f32.xlu0 %v5388_v45  ;;  %v5370_v30 = vsel %vm5108_vm5, %v20063_v3, 0.0  ;;  %v5183_v39 = vpop.xlane.xlu1 %5182  ;;  %v5315_v7 = vmul.f32 1.442695, %v5248_v22 }
 0x52e   : > { %17468 = vpow2.f32 %v5307_v6 }
 0x52f   : > { %v20067_v10 = vpop.eup %17458  ;;  %v5303_v25 = vmul.f32 1.442695, %v5242_v27  ;;  %v5297_v27 = vmul.f32 1.442695, %v5239_v50 }
 0x530   : > { %5344 = vadd.xlane.f32.xlu1 %v5343_v35  ;;  %v5213_v16 = vpop.xlane.xlu0 %5212  ;;  %v5415_v33 = vsel %vm5108_vm5, %v20067_v10, 0.0  ;;  %v20073_v57 = vpop.eup %17460 }
 0x531   : > { %17470 = vpow2.f32 %v5303_v25  ;;  %v5251_v8 = vsub.f32 %v19932_v19, %v5213_v16  ;;  %5416 = vadd.xlane.f32.xlu0 %v5415_v33  ;;  %v5349_v6 = vsel %vm5108_vm5, %v20073_v57, 0.0  ;;  %v5210_v25 = vpop.xlane.xlu1 %5209  ;;  %v5241_v16 = vsub.f32 %v19919_v43, %v5183_v39 }
 0x532   : > { %17472 = vpow2.f32 %v5293_v61 }
 0x533   : > { %v20077_v21 = vpop.eup %17462  ;;  %v5321_v5 = vmul.f32 1.442695, %v5251_v8 }
 0x534   : > { %5371 = vadd.xlane.f32.xlu1 %v5370_v30  ;;  %v5216_v29 = vpop.xlane.xlu0 %5215  ;;  %v5394_v4 = vsel %vm5108_vm5, %v20077_v21, 0.0  ;;  %v20083_v52 = vpop.eup %17464  ;;  %v5301_v30 = vmul.f32 1.442695, %v5241_v16 }
 0x535   : > { %17474 = vpow2.f32 %v5321_v5  ;;  %v5252_v19 = vsub.f32 %v19939_v46, %v5216_v29  ;;  %5395 = vadd.xlane.f32.xlu0 %v5394_v4  ;;  %v5379_v51 = vsel %vm5108_vm5, %v20083_v52, 0.0  ;;  %v5250_v5 = vsub.f32 %v19924_v54, %v5210_v25  ;;  %v5189_v43 = vpop.xlane.xlu1 %5188 }
 0x536   : > { %17476 = vpow2.f32 %v5311_v41  ;;  %v5243_v39 = vsub.f32 %v19942_v13, %v5189_v43 }
 0x537   : > { %v20087_v23 = vpop.eup %17466  ;;  %v5323_v18 = vmul.f32 1.442695, %v5252_v19  ;;  %v5319_v19 = vmul.f32 1.442695, %v5250_v5 }
 0x538   : > { %5350 = vadd.xlane.f32.xlu1 %v5349_v6  ;;  %v5421_v45 = vsel %vm5108_vm5, %v20087_v23, 0.0  ;;  %v20092_v46 = vpop.eup %17468 }
 0x539   : > { %17478 = vpow2.f32 %v5323_v18  ;;  %5422 = vadd.xlane.f32.xlu0 %v5421_v45  ;;  %v5406_v36 = vsel %vm5108_vm5, %v20092_v46, 0.0  ;;  %v5305_v18 = vmul.f32 1.442695, %v5243_v39 }
 0x53a   : > { %17480 = vpow2.f32 %v5297_v27 }
 0x53b   : > { %v20096_v35 = vpop.eup %17470  ;;  %17482 = vpow2.f32 %v5315_v7 }
 0x53c   : > { %5380 = vadd.xlane.f32.xlu1 %v5379_v51  ;;  %v5400_v61 = vsel %vm5108_vm5, %v20096_v35, 0.0  ;;  %v20101_v26 = vpop.eup %17472  ;;  %17484 = vpow2.f32 %v5301_v30 }
 0x53d   : > { %5401 = vadd.xlane.f32.xlu0 %v5400_v61  ;;  %v5385_v29 = vsel %vm5108_vm5, %v20101_v26, 0.0  ;;  %17486 = vpow2.f32 %v5319_v19 }
 0x53e   : > { %17488 = vpow2.f32 %v5305_v18 }
 0x53f   : > { %v20105_v33 = vpop.eup %17474 }
 0x540   : > { %24523 = vst [vmem:[#allocation20_spill] sm:$0xff] %v20105_v33  ;;  %5407 = vadd.xlane.f32.xlu1 %v5406_v36  ;;  %v5427_v8 = vsel %vm5108_vm5, %v20105_v33, 0.0  ;;  %v20110_v41 = vpop.eup %17476  ;;  %v3418_v36 = vpop.permute.xlu0 %3417 }
 0x541   : > { %5428 = vadd.xlane.f32.xlu0 %v5427_v8  ;;  %v5412_v54 = vsel %vm5108_vm5, %v20110_v41, 0.0  ;;  %v4015_v5 = vcombine.low %v19952_v60, %v3418_v36  ;;  %v4016_v43 = vcombine.high %v19952_v60, %v3418_v36 }
 0x543   : > { %v20114_v4 = vpop.eup %17478  ;;  %v4030_v18 = vrot.slane %v4016_v43, %v18155_v31 }
 0x544   : > { %24524 = vst [vmem:[#allocation11_spill] sm:$0xff] %v20114_v4  ;;  %5386 = vadd.xlane.f32.xlu1 %v5385_v29  ;;  %v5430_v50 = vsel %vm5108_vm5, %v20114_v4, 0.0  ;;  %v20121_v6 = vpop.eup %17480 }
 0x545   : > { %5431 = vadd.xlane.f32.xlu0 %v5430_v50  ;;  %v5391_v45 = vsel %vm5108_vm5, %v20121_v6, 0.0  ;;  %v20125_v27 = vpop.eup %17482 }
 0x546   : > { %v5418_v22 = vsel %vm5108_vm5, %v20125_v27, 0.0  ;;  %v20129_v13 = vpop.eup %17484 }
 0x547   : > { %v5397_v51 = vsel %vm5108_vm5, %v20129_v13, 0.0  ;;  %v20133_v25 = vpop.eup %17486 }
 0x548   : > { %5413 = vadd.xlane.f32.xlu1 %v5412_v54  ;;  %v5424_v61 = vsel %vm5108_vm5, %v20133_v25, 0.0  ;;  %v20137_v7 = vpop.eup %17488  ;;  %v4023_v54 = vrot.slane %v4015_v5, %v18155_v31 }
 0x549   : > { %24525 = vst [vmem:[#allocation31_spill] sm:$0xff] %v20137_v7  ;;  %v5403_v16 = vsel %vm5108_vm5, %v20137_v7, 0.0 }
 0x54c   : > { %5392 = vadd.xlane.f32.xlu1 %v5391_v45 }
 0x550   : > { %5419 = vadd.xlane.f32.xlu1 %v5418_v22 }
 0x554   : > { %5398 = vadd.xlane.f32.xlu1 %v5397_v51 }
 0x558   : > { %5425 = vadd.xlane.f32.xlu1 %v5424_v61 }
 0x55c   : > { %5404 = vadd.xlane.f32.xlu1 %v5403_v16 }
 0x57c   : > { %v5327_v8 = vpop.xlane.xlu1 %5326 }
 0x57d   : > { %v5354_v30 = vpop.xlane.xlu0 %5353 }
 0x580   : > { %v3400_v29 = vpop.permute.xlu1 %3399 }
 0x581   : > { %v3999_v50 = vcombine.low %v19954_v49, %v3400_v29  ;;  %v4000_v19 = vcombine.high %v19954_v49, %v3400_v29  ;;  %v5330_v39 = vpop.xlane.xlu0 %5329 }
 0x582   : > { %17490 = vrcp.f32 %v5330_v39 }
 0x583   : > { %v4007_v45 = vrot.slane %v3999_v50, %v18155_v31  ;;  %v4014_v22 = vrot.slane %v4000_v19, %v18155_v31 }
 0x585   : > { %v4031_v51 = vcombine.low %v4007_v45, %v4023_v54  ;;  %v4032_v61 = vcombine.high %v4007_v45, %v4023_v54  ;;  %v4047_v16 = vcombine.low %v4014_v22, %v4030_v18  ;;  %v4048_v4 = vcombine.high %v4014_v22, %v4030_v18  ;;  %v5357_v60 = vpop.xlane.xlu0 %5356 }
 0x586   : > { %17492 = vrcp.f32 %v5357_v60 }
 0x587   : > { %v4039_v36 = vrot.slane %v4031_v51, %v18180_v55  ;;  %v4046_v49 = vrot.slane %v4032_v61, %v18180_v55  ;;  %v4055_v29 = vrot.slane %v4047_v16, %v18180_v55  ;;  %v4062_v5 = vrot.slane %v4048_v4, %v18180_v55 }
 0x588   : > { %17494 = vrcp.f32 %v5327_v8 }
 0x589   : > { %17496 = vrcp.f32 %v5354_v30  ;;  %v4611_v43 = vcombine.low %v4039_v36, %v4046_v49  ;;  %v16000_v50 = vcombine.high %v4039_v36, %v4046_v49  ;;  %v4627_v19 = vcombine.low %v4055_v29, %v4062_v5  ;;  %v5360_v39 = vpop.xlane.xlu0 %5359 }
 0x58a   : > { %v16001_v7 = vcombine.high %v4055_v29, %v4062_v5  ;;  %17498 = vrcp.f32 %v5360_v39 }
 0x58b   : > { %v4618_v54 = vrot.slane %v4611_v43, %v18155_v31  ;;  %v4626_v18 = vrot.slane %v16000_v50, %v18155_v31  ;;  %v4634_v45 = vrot.slane %v4627_v19, %v18155_v31 }
 0x58c   : > { %v4642_v22 = vrot.slane %v16001_v7, %v18155_v31  ;;  %v17491_v16 = vpop.eup %17490 }
 0x58d   : > { %v20157_v51 = vpop.xlane.xlu0 %5335  ;;  %v4643_v61 = vcombine.low %v4618_v54, %v4626_v18  ;;  %v5470_v7 = vmul.f32 %v17491_v16, %v19973_v48 }
 0x58e   : > { %v4659_v4 = vcombine.low %v4634_v45, %v4642_v22 }
 0x58f   : > { %v4651_v8 = vrot.slane %v4643_v61, %v18180_v55 }
 0x590   : > { %v17493_v30 = vpop.eup %17492  ;;  %v4667_v60 = vrot.slane %v4659_v4, %v18180_v55 }
 0x591   : > { %v5363_v36 = vpop.xlane.xlu0 %5362  ;;  %v5479_v50 = vmul.f32 %v17493_v30, %v19978_v24  ;;  %v4660_v24 = vcombine.high %v4634_v45, %v4642_v22 }
 0x592   : > { %v17495_v49 = vpop.eup %17494  ;;  %17500 = vrcp.f32 %v5363_v36  ;;  %v4675_v29 = vcombine.low %v4651_v8, %v4667_v60  ;;  %v4676_v5 = vcombine.high %v4651_v8, %v4667_v60 }
 0x593   : > { %v17497_v43 = vpop.eup %17496  ;;  %v5469_v33 = vmul.f32 %v17495_v49, %v19964_v34  ;;  %v4644_v34 = vcombine.high %v4618_v54, %v4626_v18  ;;  %17502 = vrcp.f32 %v20157_v51 }
 0x594   : > { %v4683_v19 = vpack.c.bf16 %v4675_v29, %v4675_v29  ;;  %v4688_v31 = vpack.c.bf16 %v4676_v5, %v4676_v5  ;;  %v5478_v61 = vmul.f32 %v17497_v43, %v19966_v47  ;;  %v17499_v48 = vpop.eup %17498 }
 0x595   : > { %v5505_v36 = vpack.c.bf16 %v5470_v7, %v5469_v33  ;;  %v5342_v47 = vpop.xlane.xlu0 %5341  ;;  %v5480_v33 = vmul.f32 %v17499_v48, %v19983_v59 }
 0x596   : > { %v5542_v39 = vsel %vm5540_vm13, %v4683_v19, 0  ;;  %v5632_v4 = vsel %vm5540_vm13, %v4688_v31, 0  ;;  %v5510_v8 = vpack.c.bf16 %v5479_v50, %v5478_v61 }
 0x597   : > { %16686 = vmatpush3.bf16.msra.mxu1 %v5542_v39  ;;  %16716 = vmatpush3.bf16.msra.mxu0 %v5632_v4 }
 0x598   : > { %16737 = vmatprep.subr.bf16.mxu1 %v24446_v56  ;;  %16767 = vmatprep.subr.bf16.mxu0 %v24446_v56 }
 0x599   : > { %v5369_v18 = vpop.xlane.xlu0 %5368 }
 0x59a   : > { %16688 = vmatmul.mubr.msk.bf16.vlgmr.msra.gmra.mrb[40].mxu1 %vm5108_vm5, %v5505_v36  ;;  %16718 = vmatmul.mubr.msk.bf16.vlgmr.msra.gmra.mrb[60].mxu0 %vm5108_vm5, %v5510_v8 }
 0x59b   : > { %16738 = vmatpush3.bf16.msra.mxu1 %v19664_v42  ;;  %16768 = vmatpush3.bf16.msra.mxu0 %v19666_v38  ;;  %v4658_v42 = vrot.slane %v4644_v34, %v18180_v55  ;;  %v4674_v38 = vrot.slane %v4660_v24, %v18180_v55 }
 0x59c   : > { %v17501_v31 = vpop.eup %17500  ;;  %16739 = vmatprep.subr.bf16.mxu1 %v24446_v56  ;;  %16769 = vmatprep.subr.bf16.mxu0 %v24446_v56 }
 0x59d   : > { %16721 = vmatprep.mubr.msk.bf16.mxu0 %vm17816_vm1, %v24446_v56  ;;  %v5481_v16 = vmul.f32 %v17501_v31, %v19993_v53  ;;  %16691 = vmatprep.mubr.msk.bf16.mxu1 %vm17816_vm1, %v24446_v56  ;;  %v4677_v59 = vcombine.low %v4658_v42, %v4674_v38  ;;  %v4678_v53 = vcombine.high %v4658_v42, %v4674_v38  ;;  %v5348_v45 = vpop.xlane.xlu0 %5347  ;;  %v17503_v49 = vpop.eup %17502 }
 0x59e   : > { %v5472_v50 = vmul.f32 %v17503_v49, %v19988_v40 }
 0x59f   : > { %16740 = vmatpush3.bf16.msra.mxu1 %v19677_v44  ;;  %16770 = vmatpush3.bf16.msra.mxu0 %v19685_v1  ;;  %v5511_v54 = vpack.c.bf16 %v5481_v16, %v5480_v33  ;;  %v4693_v44 = vpack.c.bf16 %v4677_v59, %v4677_v59  ;;  %v4698_v1 = vpack.c.bf16 %v4678_v53, %v4678_v53  ;;  %v24526_v53 = vld [vmem:[#allocation7_spill] sm:$0xff] }
 0x5a0   : > { %16741 = vmatprep.subr.bf16.mxu1 %v24446_v56  ;;  %16771 = vmatprep.subr.bf16.mxu0 %v24446_v56 }
 0x5a1   : > { %v5375_v22 = vpop.xlane.xlu0 %5374 }
 0x5a2   : > { %16722 = vmatmul.mubr.msk.bf16.gmra.mrb[64].mxu0 %vm5108_vm5, %v5511_v54 }
 0x5a3   : > { %16742 = vmatpush3.bf16.msra.mxu1 %v19708_v20  ;;  %16772 = vmatpush3.bf16.msra.mxu0 %v19710_v14  ;;  %v5722_v20 = vsel %vm5540_vm13, %v4693_v44, 0  ;;  %v5812_v14 = vsel %vm5540_vm13, %v4698_v1, 0 }
 0x5a4   : > { %16743 = vmatprep.subr.bf16.mxu1 %v24446_v56  ;;  %16773 = vmatprep.subr.bf16.mxu0 %v24446_v56 }
 0x5a5   : > { %16725 = vmatprep.mubr.msk.bf16.mxu0 %vm17816_vm1, %v24446_v56 }
 0x5a7   : > { %16744 = vmatpush3.bf16.msra.mxu1 %v19712_v32  ;;  %16774 = vmatpush3.bf16.msra.mxu0 %v19714_v17  ;;  %v5378_v17 = vpop.xlane.xlu0 %5377 }
 0x5a8   : > { %16745 = vmatprep.subr.bf16.mxu1 %v24446_v56  ;;  %16775 = vmatprep.subr.bf16.mxu0 %v24446_v56 }
 0x5ab   : > { %16746 = vmatpush3.bf16.msra.mxu1 %v5722_v20  ;;  %16776 = vmatpush3.bf16.msra.mxu0 %v5812_v14 }
 0x5ac   : > { %16797 = vmatprep.subr.bf16.mxu1 %v24446_v56  ;;  %16821 = vmatprep.subr.bf16.mxu0 %v24446_v56 }
 0x5b1   : > { %v5333_v32 = vpop.xlane.xlu1 %5332 }
 0x5b2   : > { %17504 = vrcp.f32 %v5333_v32  ;;  %v5384_v29 = vpop.xlane.xlu0 %5383 }
 0x5b5   : > { %v5339_v30 = vpop.xlane.xlu1 %5338 }
 0x5b6   : > { %17506 = vrcp.f32 %v5339_v30  ;;  %v5411_v61 = vpop.xlane.xlu0 %5410 }
 0x5b7   : > { %17508 = vrcp.f32 %v5342_v47 }
 0x5b8   : > { %17510 = vrcp.f32 %v5369_v18 }
 0x5b9   : > { %v5366_v60 = vpop.xlane.xlu1 %5365 }
 0x5ba   : > { %17512 = vrcp.f32 %v5366_v60  ;;  %v5390_v31 = vpop.xlane.xlu0 %5389 }
 0x5bc   : > { %v17505_v5 = vpop.eup %17504 }
 0x5bd   : > { %v5345_v43 = vpop.xlane.xlu1 %5344  ;;  %v5471_v7 = vmul.f32 %v17505_v5, %v20029_v63 }
 0x5be   : > { %17514 = vrcp.f32 %v5345_v43 }
 0x5bf   : > { %17516 = vrcp.f32 %v5348_v45  ;;  %v5506_v51 = vpack.c.bf16 %v5472_v50, %v5471_v7 }
 0x5c0   : > { %v17507_v19 = vpop.eup %17506  ;;  %17518 = vrcp.f32 %v5375_v22 }
 0x5c1   : > { %v17509_v39 = vpop.eup %17508  ;;  %v5372_v4 = vpop.xlane.xlu1 %5371  ;;  %16692 = vmatmul.mubr.msk.bf16.gmra.mrb[44].mxu1 %vm5108_vm5, %v5506_v51  ;;  %v5473_v8 = vmul.f32 %v17507_v19, %v20033_v2 }
 0x5c2   : > { %v17511_v36 = vpop.eup %17510  ;;  %17520 = vrcp.f32 %v5372_v4  ;;  %16695 = vmatprep.mubr.msk.bf16.mxu1 %vm17816_vm1, %v24446_v56  ;;  %v5474_v48 = vmul.f32 %v17509_v39, %v20000_v11 }
 0x5c3   : > { %17522 = vrcp.f32 %v5378_v17  ;;  %v5483_v24 = vmul.f32 %v17511_v36, %v20004_v58 }
 0x5c4   : > { %v17513_v63 = vpop.eup %17512  ;;  %v5507_v47 = vpack.c.bf16 %v5474_v48, %v5473_v8 }
 0x5c5   : > { %v5351_v40 = vpop.xlane.xlu1 %5350  ;;  %v5482_v34 = vmul.f32 %v17513_v63, %v20043_v28  ;;  %v5417_v28 = vpop.xlane.xlu0 %5416 }
 0x5c6   : > { %17524 = vrcp.f32 %v5351_v40 }
 0x5c7   : > { %v5512_v33 = vpack.c.bf16 %v5483_v24, %v5482_v34 }
 0x5c8   : > { %v17515_v16 = vpop.eup %17514 }
 0x5c9   : > { %v17517_v42 = vpop.eup %17516  ;;  %v5381_v38 = vpop.xlane.xlu1 %5380  ;;  %16696 = vmatmul.mubr.msk.bf16.gmra.mrb[48].mxu1 %vm5108_vm5, %v5507_v47  ;;  %16726 = vmatmul.mubr.msk.bf16.gmra.mrb[68].mxu0 %vm5108_vm5, %v5512_v33  ;;  %v5475_v11 = vmul.f32 %v17515_v16, %v20053_v9 }
 0x5ca   : > { %v17519_v2 = vpop.eup %17518  ;;  %16699 = vmatprep.mubr.msk.bf16.mxu1 %vm17816_vm1, %v24446_v56  ;;  %16729 = vmatprep.mubr.msk.bf16.mxu0 %vm17816_vm1, %v24446_v56  ;;  %17526 = vrcp.f32 %v5381_v38  ;;  %v5476_v18 = vmul.f32 %v17517_v42, %v20008_v12  ;;  %v5396_v9 = vpop.xlane.xlu0 %5395 }
 0x5cb   : > { %v5485_v44 = vmul.f32 %v17519_v2, %v24526_v53 }
 0x5cc   : > { %v17521_v58 = vpop.eup %17520  ;;  %v5508_v45 = vpack.c.bf16 %v5476_v18, %v5475_v11 }
 0x5cd   : > { %v5408_v54 = vpop.xlane.xlu1 %5407  ;;  %v5484_v59 = vmul.f32 %v17521_v58, %v20063_v3  ;;  %v17523_v1 = vpop.eup %17522 }
 0x5ce   : > { %17528 = vrcp.f32 %v5408_v54  ;;  %v5486_v3 = vmul.f32 %v17523_v1, %v20019_v0 }
 0x5cf   : > { %17530 = vrcp.f32 %v5384_v29  ;;  %v5513_v20 = vpack.c.bf16 %v5485_v44, %v5484_v59  ;;  %v5423_v29 = vpop.xlane.xlu0 %5422 }
 0x5d0   : > { %v17525_v14 = vpop.eup %17524  ;;  %17532 = vrcp.f32 %v5411_v61  ;;  %v5514_v60 = vpack.c.bf16 %v5486_v3, %v5486_v3 }
 0x5d1   : > { %v5387_v22 = vpop.xlane.xlu1 %5386  ;;  %16700 = vmatmul.mubr.msk.bf16.gmra.mrb[52].mxu1 %vm5108_vm5, %v5508_v45  ;;  %16730 = vmatmul.mubr.msk.bf16.gmra.mrb[72].mxu0 %vm5108_vm5, %v5513_v20  ;;  %v5477_v12 = vmul.f32 %v17525_v14, %v20073_v57 }
 0x5d2   : > { %16703 = vmatprep.mubr.msk.bf16.mxu1 %vm17816_vm1, %v24446_v56  ;;  %16733 = vmatprep.mubr.msk.bf16.mxu0 %vm17816_vm1, %v24446_v56  ;;  %17534 = vrcp.f32 %v5387_v22  ;;  %v24529_v22 = vld [vmem:[#allocation11_spill] sm:$0xff] }
 0x5d3   : > { %v5509_v30 = vpack.c.bf16 %v5477_v12, %v5477_v12  ;;  %v5402_v61 = vpop.xlane.xlu0 %5401 }
 0x5d4   : > { %v17527_v17 = vpop.eup %17526 }
 0x5d5   : > { %v5414_v32 = vpop.xlane.xlu1 %5413  ;;  %v5487_v0 = vmul.f32 %v17527_v17, %v20083_v52 }
 0x5d6   : > { %17536 = vrcp.f32 %v5414_v32 }
 0x5d7   : > { %17538 = vrcp.f32 %v5390_v31 }
 0x5d8   : > { %v17529_v49 = vpop.eup %17528  ;;  %17540 = vrcp.f32 %v5417_v28 }
 0x5d9   : > { %v17531_v5 = vpop.eup %17530  ;;  %v5393_v43 = vpop.xlane.xlu1 %5392  ;;  %16704 = vmatmul.mubr.msk.bf16.gmra.mrb[56].mxu1 %vm5108_vm5, %v5509_v30  ;;  %16734 = vmatmul.mubr.msk.bf16.gmra.mrb[76].mxu0 %vm5108_vm5, %v5514_v60  ;;  %v5496_v57 = vmul.f32 %v17529_v49, %v20092_v46 }
 0x5da   : > { %v17533_v7 = vpop.eup %17532  ;;  %16747 = vmatprep.mubr.msk.bf16.mxu1 %vm17816_vm1, %v24446_v56  ;;  %16777 = vmatprep.mubr.msk.bf16.mxu0 %vm17816_vm1, %v24446_v56  ;;  %v5488_v50 = vmul.f32 %v17531_v5, %v20037_v15  ;;  %17542 = vrcp.f32 %v5393_v43  ;;  %v5429_v46 = vpop.xlane.xlu0 %5428 }
 0x5db   : > { %v5497_v51 = vmul.f32 %v17533_v7, %v20047_v37 }
 0x5dc   : > { %v17535_v39 = vpop.eup %17534  ;;  %v5515_v4 = vpack.c.bf16 %v5488_v50, %v5487_v0  ;;  %v17374_v50 = vld [vmem:[%s24230_s3] sm:$0xff]  }
 0x5dd   : > { %v5420_v19 = vpop.xlane.xlu1 %5419  ;;  %v5520_v36 = vpack.c.bf16 %v5497_v51, %v5496_v57  ;;  %v5489_v15 = vmul.f32 %v17535_v39, %v20101_v26 }
 0x5de   : > { %17544 = vrcp.f32 %v5420_v19 }
 0x5df   : > { %17546 = vrcp.f32 %v5396_v9 }
 0x5e0   : > { %v17537_v8 = vpop.eup %17536  ;;  %17548 = vrcp.f32 %v5423_v29 }
 0x5e1   : > { %v17539_v63 = vpop.eup %17538  ;;  %v5399_v40 = vpop.xlane.xlu1 %5398  ;;  %16748 = vmatmul.mubr.msk.bf16.vlgmr.msra.gmra.mrb[60].mxu1 %vm5108_vm5, %v5515_v4  ;;  %16778 = vmatmul.mubr.msk.bf16.vlgmr.msra.gmra.mrb[80].mxu0 %vm5108_vm5, %v5520_v36  ;;  %v5498_v37 = vmul.f32 %v17537_v8, %v20110_v41 }
 0x5e2   : > { %v17541_v52 = vpop.eup %17540  ;;  %16751 = vmatprep.mubr.msk.bf16.mxu1 %vm17816_vm1, %v24446_v56  ;;  %16781 = vmatprep.mubr.msk.bf16.mxu0 %vm17816_vm1, %v24446_v56  ;;  %17550 = vrcp.f32 %v5399_v40  ;;  %v5490_v34 = vmul.f32 %v17539_v63, %v20057_v62  ;;  %v5432_v41 = vpop.xlane.xlu0 %5431 }
 0x5e3   : > { %v5499_v24 = vmul.f32 %v17541_v52, %v20067_v10  ;;  %16798 = vmatpush3.bf16.msra.mxu1 %v17374_v50 }
 0x5e4   : > { %v17543_v31 = vpop.eup %17542  ;;  %v5516_v47 = vpack.c.bf16 %v5490_v34, %v5489_v15  ;;  %16799 = vmatprep.subr.bf16.mxu1 %v24446_v56 }
 0x5e5   : > { %v5426_v48 = vpop.xlane.xlu1 %5425  ;;  %v5521_v33 = vpack.c.bf16 %v5499_v24, %v5498_v37  ;;  %v5491_v10 = vmul.f32 %v17543_v31, %v20121_v6 }
 0x5e6   : > { %17552 = vrcp.f32 %v5426_v48 }
 0x5e7   : > { %17554 = vrcp.f32 %v5402_v61  ;;  %v17375_v61 = vld [vmem:[%s24230_s3 + $0x8] sm:$0xff]  }
 0x5e8   : > { %v17545_v16 = vpop.eup %17544  ;;  %17556 = vrcp.f32 %v5429_v46  ;;  %16800 = vmatpush3.bf16.msra.mxu1 %v17375_v61 }
 0x5e9   : > { %v17547_v42 = vpop.eup %17546  ;;  %16752 = vmatmul.mubr.msk.bf16.gmra.mrb[64].mxu1 %vm5108_vm5, %v5516_v47  ;;  %16782 = vmatmul.mubr.msk.bf16.gmra.mrb[84].mxu0 %vm5108_vm5, %v5521_v33  ;;  %v5405_v62 = vpop.xlane.xlu1 %5404  ;;  %v5500_v38 = vmul.f32 %v17545_v16, %v20125_v27  ;;  %17558 = vrcp.f32 %v5432_v41  ;;  %v24527_v27 = vld [vmem:[#allocation20_spill] sm:$0xff] }
 0x5ea   : > { %v17549_v26 = vpop.eup %17548  ;;  %16755 = vmatprep.mubr.msk.bf16.mxu1 %vm17816_vm1, %v24446_v56  ;;  %16785 = vmatprep.mubr.msk.bf16.mxu0 %vm17816_vm1, %v24446_v56  ;;  %v5492_v2 = vmul.f32 %v17547_v42, %v20077_v21  ;;  %17560 = vrcp.f32 %v5405_v62 }
 0x5eb   : > { %v5501_v11 = vmul.f32 %v17549_v26, %v20087_v23  ;;  %16845 = vmatprep.subr.bf16.mxu1 %v24446_v56 }
 0x5ec   : > { %v17551_v58 = vpop.eup %17550  ;;  %v5517_v28 = vpack.c.bf16 %v5492_v2, %v5491_v10 }
 0x5ed   : > { %v5522_v54 = vpack.c.bf16 %v5501_v11, %v5500_v38  ;;  %v5493_v21 = vmul.f32 %v17551_v58, %v20129_v13  ;;  %v24528_v13 = vld [vmem:[#allocation31_spill] sm:$0xff] }
 0x5f0   : > { %v17553_v18 = vpop.eup %17552 }
 0x5f1   : > { %v17555_v59 = vpop.eup %17554  ;;  %16756 = vmatmul.mubr.msk.bf16.gmra.mrb[68].mxu1 %vm5108_vm5, %v5517_v28  ;;  %16786 = vmatmul.mubr.msk.bf16.gmra.mrb[88].mxu0 %vm5108_vm5, %v5522_v54  ;;  %v5502_v23 = vmul.f32 %v17553_v18, %v20133_v25 }
 0x5f2   : > { %v17557_v53 = vpop.eup %17556  ;;  %16759 = vmatprep.mubr.msk.bf16.mxu1 %vm17816_vm1, %v24446_v56  ;;  %16789 = vmatprep.mubr.msk.bf16.mxu0 %vm17816_vm1, %v24446_v56  ;;  %v5494_v6 = vmul.f32 %v17555_v59, %v20096_v35 }
 0x5f3   : > { %v5503_v44 = vmul.f32 %v17557_v53, %v24527_v27  ;;  %v17559_v1 = vpop.eup %17558 }
 0x5f4   : > { %v5518_v45 = vpack.c.bf16 %v5494_v6, %v5493_v21  ;;  %v17561_v14 = vpop.eup %17560  ;;  %v5504_v35 = vmul.f32 %v17559_v1, %v24529_v22  ;;  %v24530_v1 = vld [vmem:[#allocation10_spill] sm:$0xff] }
 0x5f5   : > { %v5523_v20 = vpack.c.bf16 %v5503_v44, %v5502_v23  ;;  %v5495_v25 = vmul.f32 %v17561_v14, %v24528_v13 }
 0x5f6   : > { %v5524_v12 = vpack.c.bf16 %v5504_v35, %v5504_v35 }
 0x5f7   : > { %v5519_v9 = vpack.c.bf16 %v5495_v25, %v5495_v25 }
 0x5f9   : > { %16760 = vmatmul.mubr.msk.bf16.gmra.mrb[72].mxu1 %vm5108_vm5, %v5518_v45  ;;  %16790 = vmatmul.mubr.msk.bf16.gmra.mrb[92].mxu0 %vm5108_vm5, %v5523_v20 }
 0x5fa   : > { %16763 = vmatprep.mubr.msk.bf16.mxu1 %vm17816_vm1, %v24446_v56  ;;  %16793 = vmatprep.mubr.msk.bf16.mxu0 %vm17816_vm1, %v24446_v56 }
 0x601   : > { %16764 = vmatmul.mubr.msk.bf16.gmra.mrb[76].mxu1 %vm5108_vm5, %v5519_v9  ;;  %16794 = vmatmul.mubr.msk.bf16.gmra.mrb[96].mxu0 %vm5108_vm5, %v5524_v12 }
 0x602   : > { %16801 = vmatprep.mubr.msk.bf16.mxu1 %vm17816_vm1, %v24446_v56  ;;  %16825 = vmatprep.mubr.msk.bf16.mxu0 %vm17816_vm1, %v24446_v56 }
 0x66d   : > { %v5578_v3 = vpop.f32.mrb[40].mxu1  ;;  %v5668_v32 = vpop.f32.mrb[60].mxu0 }
 0x66e   : > { %v16689_v17 = vpop.f32.mrb[41].mxu1  ;;  %v16719_v30 = vpop.f32.mrb[61].mxu0 }
 0x66f   : > { %v20284_v60 = vpop.f32.mrb[42].mxu1  ;;  %v20286_v49 = vpop.f32.mrb[62].mxu0 }
 0x670   : > { %v16690_v29 = vpop.f32.mrb[43].mxu1  ;;  %v16720_v5 = vpop.f32.mrb[63].mxu0 }
 0x675   : > { %v20288_v43 = vpop.f32.mrb[64].mxu0 }
 0x676   : > { %v16723_v7 = vpop.f32.mrb[65].mxu0 }
 0x677   : > { %v20290_v0 = vpop.f32.mrb[66].mxu0 }
 0x678   : > { %v16724_v57 = vpop.f32.mrb[67].mxu0 }
 0x694   : > { %v20295_v51 = vpop.f32.mrb[44].mxu1 }
 0x695   : > { %v16693_v19 = vpop.f32.mrb[45].mxu1 }
 0x696   : > { %v20300_v39 = vpop.f32.mrb[46].mxu1 }
 0x697   : > { %v16694_v4 = vpop.f32.mrb[47].mxu1 }
 0x69c   : > { %v20304_v36 = vpop.f32.mrb[48].mxu1  ;;  %v20306_v8 = vpop.f32.mrb[68].mxu0 }
 0x69d   : > { %v16697_v63 = vpop.f32.mrb[49].mxu1  ;;  %v16727_v40 = vpop.f32.mrb[69].mxu0 }
 0x69e   : > { %v20308_v52 = vpop.f32.mrb[50].mxu1  ;;  %v20310_v15 = vpop.f32.mrb[70].mxu0 }
 0x69f   : > { %v16698_v37 = vpop.f32.mrb[51].mxu1  ;;  %v16728_v46 = vpop.f32.mrb[71].mxu0 }
 0x6a4   : > { %v20312_v48 = vpop.f32.mrb[52].mxu1  ;;  %v20314_v34 = vpop.f32.mrb[72].mxu0 }
 0x6a5   : > { %v16701_v24 = vpop.f32.mrb[53].mxu1  ;;  %v16731_v31 = vpop.f32.mrb[73].mxu0 }
 0x6a6   : > { %v20316_v47 = vpop.f32.mrb[54].mxu1  ;;  %v20318_v33 = vpop.f32.mrb[74].mxu0 }
 0x6a7   : > { %v16702_v16 = vpop.f32.mrb[55].mxu1  ;;  %v16732_v42 = vpop.f32.mrb[75].mxu0 }
 0x6ac   : > { %v20320_v26 = vpop.f32.mrb[56].mxu1  ;;  %v20322_v41 = vpop.f32.mrb[76].mxu0 }
 0x6ad   : > { %v16705_v62 = vpop.f32.mrb[57].mxu1  ;;  %v16735_v10 = vpop.f32.mrb[77].mxu0 }
 0x6ae   : > { %v5613_v38 = vpop.f32.mrb[58].mxu1  ;;  %v5703_v2 = vpop.f32.mrb[78].mxu0 }
 0x6af   : > { %v16706_v11 = vpop.f32.mrb[59].mxu1  ;;  %v16736_v58 = vpop.f32.mrb[79].mxu0 }
 0x6b4   : > { %v5758_v28 = vpop.f32.mrb[60].mxu1  ;;  %v5848_v54 = vpop.f32.mrb[80].mxu0 }
 0x6b5   : > { %v5886_v18 = vcombine.low %v5578_v3, %v5758_v28  ;;  %v5887_v59 = vcombine.high %v5578_v3, %v5758_v28  ;;  %v5902_v53 = vcombine.low %v5668_v32, %v5848_v54  ;;  %v5903_v21 = vcombine.high %v5668_v32, %v5848_v54  ;;  %v16749_v23 = vpop.f32.mrb[61].mxu1  ;;  %v16779_v6 = vpop.f32.mrb[81].mxu0 }
 0x6b6   : > { %v5761_v27 = vpop.f32.mrb[62].mxu1  ;;  %v5851_v44 = vpop.f32.mrb[82].mxu0 }
 0x6b7   : > { %v5894_v45 = vrot.slane %v5886_v18, %v24530_v1  ;;  %v5901_v20 = vrot.slane %v5887_v59, %v24530_v1  ;;  %v5910_v14 = vrot.slane %v5902_v53, %v24530_v1  ;;  %v5917_v13 = vrot.slane %v5903_v21, %v24530_v1  ;;  %v16750_v25 = vpop.f32.mrb[63].mxu1  ;;  %v16780_v22 = vpop.f32.mrb[83].mxu0 }
 0x6b8   : > { %v5954_v35 = vcombine.low %v20284_v60, %v5761_v27  ;;  %v5955_v9 = vcombine.high %v20284_v60, %v5761_v27  ;;  %v5970_v12 = vcombine.low %v20286_v49, %v5851_v44  ;;  %v5971_v3 = vcombine.high %v20286_v49, %v5851_v44 }
 0x6b9   : > { %v5918_v32 = vcombine.low %v5894_v45, %v5910_v14  ;;  %v5919_v17 = vcombine.high %v5894_v45, %v5910_v14  ;;  %v5934_v30 = vcombine.low %v5901_v20, %v5917_v13  ;;  %v5935_v29 = vcombine.high %v5901_v20, %v5917_v13 }
 0x6ba   : > { %v5962_v5 = vrot.slane %v5954_v35, %v24530_v1  ;;  %v5969_v7 = vrot.slane %v5955_v9, %v24530_v1  ;;  %v5978_v57 = vrot.slane %v5970_v12, %v24530_v1  ;;  %v5985_v50 = vrot.slane %v5971_v3, %v24530_v1 }
 0x6bb   : > { %v5926_v19 = vrot.slane %v5918_v32, %v18180_v55  ;;  %v5933_v60 = vrot.slane %v5919_v17, %v18180_v55  ;;  %v5942_v61 = vrot.slane %v5934_v30, %v18180_v55  ;;  %v5949_v49 = vrot.slane %v5935_v29, %v18180_v55 }
 0x6bc   : > { %v5986_v4 = vcombine.low %v5962_v5, %v5978_v57  ;;  %v5987_v63 = vcombine.high %v5962_v5, %v5978_v57  ;;  %v6002_v40 = vcombine.low %v5969_v7, %v5985_v50  ;;  %v6003_v37 = vcombine.high %v5969_v7, %v5985_v50  ;;  %v5766_v46 = vpop.f32.mrb[64].mxu1  ;;  %v5856_v24 = vpop.f32.mrb[84].mxu0 }
 0x6bd   : > { %v6498_v31 = vcombine.low %v5926_v19, %v5933_v60  ;;  %v16042_v16 = vcombine.high %v5926_v19, %v5933_v60  ;;  %v6514_v42 = vcombine.low %v5942_v61, %v5949_v49  ;;  %v16043_v62 = vcombine.high %v5942_v61, %v5949_v49  ;;  %v16753_v10 = vpop.f32.mrb[65].mxu1  ;;  %v16783_v38 = vpop.f32.mrb[85].mxu0 }
 0x6be   : > { %v5994_v2 = vrot.slane %v5986_v4, %v18180_v55  ;;  %v6001_v11 = vrot.slane %v5987_v63, %v18180_v55  ;;  %v6010_v58 = vrot.slane %v6002_v40, %v18180_v55  ;;  %v6017_v28 = vrot.slane %v6003_v37, %v18180_v55  ;;  %v5769_v54 = vpop.f32.mrb[66].mxu1  ;;  %v5859_v18 = vpop.f32.mrb[86].mxu0 }
 0x6bf   : > { %v20345_v59 = vrot.slane %v6498_v31, %v24530_v1  ;;  %v20348_v53 = vrot.slane %v16042_v16, %v24530_v1  ;;  %v20351_v21 = vrot.slane %v6514_v42, %v24530_v1  ;;  %v20354_v23 = vrot.slane %v16043_v62, %v24530_v1  ;;  %v16754_v6 = vpop.f32.mrb[67].mxu1  ;;  %v16784_v27 = vpop.f32.mrb[87].mxu0 }
 0x6c0   : > { %v6566_v44 = vcombine.low %v5994_v2, %v6001_v11  ;;  %v16044_v45 = vcombine.high %v5994_v2, %v6001_v11  ;;  %v6582_v20 = vcombine.low %v6010_v58, %v6017_v28  ;;  %v16045_v14 = vcombine.high %v6010_v58, %v6017_v28 }
 0x6c1   : > { %v6022_v13 = vcombine.low %v20295_v51, %v5766_v46  ;;  %v6023_v25 = vcombine.high %v20295_v51, %v5766_v46  ;;  %v6038_v22 = vcombine.low %v20288_v43, %v5856_v24  ;;  %v6039_v35 = vcombine.high %v20288_v43, %v5856_v24 }
 0x6c2   : > { %v20361_v9 = vrot.slane %v6566_v44, %v24530_v1  ;;  %v20364_v12 = vrot.slane %v16044_v45, %v24530_v1  ;;  %v20367_v3 = vrot.slane %v6582_v20, %v24530_v1  ;;  %v20370_v32 = vrot.slane %v16045_v14, %v24530_v1 }
 0x6c3   : > { %v6030_v17 = vrot.slane %v6022_v13, %v24530_v1  ;;  %v6037_v51 = vrot.slane %v6023_v25, %v24530_v1  ;;  %v6046_v30 = vrot.slane %v6038_v22, %v24530_v1  ;;  %v6053_v43 = vrot.slane %v6039_v35, %v24530_v1 }
 0x6c4   : > { %v6090_v29 = vcombine.low %v20300_v39, %v5769_v54  ;;  %v6091_v5 = vcombine.high %v20300_v39, %v5769_v54  ;;  %v6106_v7 = vcombine.low %v20290_v0, %v5859_v18  ;;  %v6107_v57 = vcombine.high %v20290_v0, %v5859_v18  ;;  %v5774_v50 = vpop.f32.mrb[68].mxu1  ;;  %v5864_v19 = vpop.f32.mrb[88].mxu0 }
 0x6c5   : > { %v6054_v60 = vcombine.low %v6030_v17, %v6046_v30  ;;  %v6055_v61 = vcombine.high %v6030_v17, %v6046_v30  ;;  %v6070_v49 = vcombine.low %v6037_v51, %v6053_v43  ;;  %v6071_v4 = vcombine.high %v6037_v51, %v6053_v43  ;;  %v16757_v63 = vpop.f32.mrb[69].mxu1  ;;  %v16787_v40 = vpop.f32.mrb[89].mxu0 }
 0x6c6   : > { %v6098_v37 = vrot.slane %v6090_v29, %v24530_v1  ;;  %v6105_v46 = vrot.slane %v6091_v5, %v24530_v1  ;;  %v6114_v24 = vrot.slane %v6106_v7, %v24530_v1  ;;  %v6121_v39 = vrot.slane %v6107_v57, %v24530_v1  ;;  %v5777_v31 = vpop.f32.mrb[70].mxu1  ;;  %v5867_v16 = vpop.f32.mrb[90].mxu0 }
 0x6c7   : > { %v6062_v0 = vrot.slane %v6054_v60, %v18180_v55  ;;  %v6069_v42 = vrot.slane %v6055_v61, %v18180_v55  ;;  %v6078_v62 = vrot.slane %v6070_v49, %v18180_v55  ;;  %v6085_v10 = vrot.slane %v6071_v4, %v18180_v55  ;;  %v16758_v38 = vpop.f32.mrb[71].mxu1  ;;  %v16788_v2 = vpop.f32.mrb[91].mxu0 }
 0x6c8   : > { %v6122_v11 = vcombine.low %v6098_v37, %v6114_v24  ;;  %v6123_v58 = vcombine.high %v6098_v37, %v6114_v24  ;;  %v6138_v28 = vcombine.low %v6105_v46, %v6121_v39  ;;  %v6139_v54 = vcombine.high %v6105_v46, %v6121_v39 }
 0x6c9   : > { %v6634_v18 = vcombine.low %v6062_v0, %v6069_v42  ;;  %v16046_v6 = vcombine.high %v6062_v0, %v6069_v42  ;;  %v6650_v27 = vcombine.low %v6078_v62, %v6085_v10  ;;  %v16047_v44 = vcombine.high %v6078_v62, %v6085_v10 }
 0x6ca   : > { %v6130_v45 = vrot.slane %v6122_v11, %v18180_v55  ;;  %v6137_v20 = vrot.slane %v6123_v58, %v18180_v55  ;;  %v6146_v14 = vrot.slane %v6138_v28, %v18180_v55  ;;  %v6153_v13 = vrot.slane %v6139_v54, %v18180_v55 }
 0x6cb   : > { %v20393_v25 = vrot.slane %v6634_v18, %v24530_v1  ;;  %v20396_v22 = vrot.slane %v16046_v6, %v24530_v1  ;;  %v20399_v35 = vrot.slane %v6650_v27, %v24530_v1  ;;  %v20402_v17 = vrot.slane %v16047_v44, %v24530_v1 }
 0x6cc   : > { %v6702_v51 = vcombine.low %v6130_v45, %v6137_v20  ;;  %v16048_v30 = vcombine.high %v6130_v45, %v6137_v20  ;;  %v6718_v43 = vcombine.low %v6146_v14, %v6153_v13  ;;  %v16049_v29 = vcombine.high %v6146_v14, %v6153_v13  ;;  %v20404_v5 = vpop.f32.mrb[72].mxu1  ;;  %v20406_v7 = vpop.f32.mrb[92].mxu0 }
 0x6cd   : > { %v6158_v57 = vcombine.low %v20304_v36, %v5774_v50  ;;  %v6159_v60 = vcombine.high %v20304_v36, %v5774_v50  ;;  %v6174_v61 = vcombine.low %v20306_v8, %v5864_v19  ;;  %v6175_v49 = vcombine.high %v20306_v8, %v5864_v19  ;;  %v16761_v4 = vpop.f32.mrb[73].mxu1  ;;  %v16791_v63 = vpop.f32.mrb[93].mxu0 }
 0x6ce   : > { %v20413_v40 = vrot.slane %v6702_v51, %v24530_v1  ;;  %v20416_v37 = vrot.slane %v16048_v30, %v24530_v1  ;;  %v20419_v46 = vrot.slane %v6718_v43, %v24530_v1  ;;  %v20422_v24 = vrot.slane %v16049_v29, %v24530_v1  ;;  %v20424_v39 = vpop.f32.mrb[74].mxu1  ;;  %v20426_v36 = vpop.f32.mrb[94].mxu0 }
 0x6cf   : > { %v6166_v8 = vrot.slane %v6158_v57, %v24530_v1  ;;  %v6173_v50 = vrot.slane %v6159_v60, %v24530_v1  ;;  %v6182_v19 = vrot.slane %v6174_v61, %v24530_v1  ;;  %v6189_v0 = vrot.slane %v6175_v49, %v24530_v1  ;;  %v16762_v42 = vpop.f32.mrb[75].mxu1  ;;  %v16792_v62 = vpop.f32.mrb[95].mxu0 }
 0x6d0   : > { %v6226_v10 = vcombine.low %v20308_v52, %v5777_v31  ;;  %v6227_v38 = vcombine.high %v20308_v52, %v5777_v31  ;;  %v6242_v2 = vcombine.low %v20310_v15, %v5867_v16  ;;  %v6243_v11 = vcombine.high %v20310_v15, %v5867_v16 }
 0x6d1   : > { %v6190_v58 = vcombine.low %v6166_v8, %v6182_v19  ;;  %v6191_v28 = vcombine.high %v6166_v8, %v6182_v19  ;;  %v6206_v54 = vcombine.low %v6173_v50, %v6189_v0  ;;  %v6207_v18 = vcombine.high %v6173_v50, %v6189_v0 }
 0x6d2   : > { %v6234_v6 = vrot.slane %v6226_v10, %v24530_v1  ;;  %v6241_v27 = vrot.slane %v6227_v38, %v24530_v1  ;;  %v6250_v44 = vrot.slane %v6242_v2, %v24530_v1  ;;  %v6257_v45 = vrot.slane %v6243_v11, %v24530_v1 }
 0x6d3   : > { %v6198_v20 = vrot.slane %v6190_v58, %v18180_v55  ;;  %v6205_v52 = vrot.slane %v6191_v28, %v18180_v55  ;;  %v6214_v31 = vrot.slane %v6206_v54, %v18180_v55  ;;  %v6221_v15 = vrot.slane %v6207_v18, %v18180_v55 }
 0x6d4   : > { %v6258_v16 = vcombine.low %v6234_v6, %v6250_v44  ;;  %v6259_v14 = vcombine.high %v6234_v6, %v6250_v44  ;;  %v6274_v13 = vcombine.low %v6241_v27, %v6257_v45  ;;  %v6275_v51 = vcombine.high %v6241_v27, %v6257_v45  ;;  %v20444_v30 = vpop.f32.mrb[76].mxu1  ;;  %v20446_v43 = vpop.f32.mrb[96].mxu0 }
 0x6d5   : > { %v6770_v29 = vcombine.low %v6198_v20, %v6205_v52  ;;  %v16050_v57 = vcombine.high %v6198_v20, %v6205_v52  ;;  %v6786_v60 = vcombine.low %v6214_v31, %v6221_v15  ;;  %v16051_v61 = vcombine.high %v6214_v31, %v6221_v15  ;;  %v16765_v49 = vpop.f32.mrb[77].mxu1  ;;  %v16795_v4 = vpop.f32.mrb[97].mxu0 }
 0x6d6   : > { %v6266_v63 = vrot.slane %v6258_v16, %v18180_v55  ;;  %v6273_v8 = vrot.slane %v6259_v14, %v18180_v55  ;;  %v6282_v50 = vrot.slane %v6274_v13, %v18180_v55  ;;  %v6289_v19 = vrot.slane %v6275_v51, %v18180_v55  ;;  %v5793_v0 = vpop.f32.mrb[78].mxu1  ;;  %v5883_v42 = vpop.f32.mrb[98].mxu0 }
 0x6d7   : > { %v20453_v62 = vrot.slane %v6770_v29, %v24530_v1  ;;  %v20456_v10 = vrot.slane %v16050_v57, %v24530_v1  ;;  %v20459_v38 = vrot.slane %v6786_v60, %v24530_v1  ;;  %v20462_v2 = vrot.slane %v16051_v61, %v24530_v1  ;;  %v16766_v11 = vpop.f32.mrb[79].mxu1  ;;  %v16796_v58 = vpop.f32.mrb[99].mxu0 }
 0x6d8   : > { %v6838_v28 = vcombine.low %v6266_v63, %v6273_v8  ;;  %v16052_v54 = vcombine.high %v6266_v63, %v6273_v8  ;;  %v6854_v18 = vcombine.low %v6282_v50, %v6289_v19  ;;  %v16053_v6 = vcombine.high %v6282_v50, %v6289_v19 }
 0x6d9   : > { %v6531_v27 = vcombine.high %v20345_v59, %v20348_v53  ;;  %v6547_v44 = vcombine.high %v20351_v21, %v20354_v23  ;;  %v6599_v45 = vcombine.high %v20361_v9, %v20364_v12  ;;  %v6615_v20 = vcombine.high %v20367_v3, %v20370_v32 }
 0x6da   : > { %v20473_v52 = vrot.slane %v6838_v28, %v24530_v1  ;;  %v20476_v31 = vrot.slane %v16052_v54, %v24530_v1  ;;  %v20479_v15 = vrot.slane %v6854_v18, %v24530_v1  ;;  %v20482_v16 = vrot.slane %v16053_v6, %v24530_v1 }
 0x6db   : > { %v20485_v14 = vrot.slane %v6531_v27, %v18180_v55  ;;  %v20488_v13 = vrot.slane %v6547_v44, %v18180_v55  ;;  %v20491_v51 = vrot.slane %v6599_v45, %v18180_v55  ;;  %v20494_v29 = vrot.slane %v6615_v20, %v18180_v55 }
 0x6dc   : > { %v6530_v57 = vcombine.low %v20345_v59, %v20348_v53  ;;  %v6546_v60 = vcombine.low %v20351_v21, %v20354_v23  ;;  %v6598_v61 = vcombine.low %v20361_v9, %v20364_v12  ;;  %v6614_v49 = vcombine.low %v20367_v3, %v20370_v32 }
 0x6dd   : > { %v6564_v4 = vcombine.low %v20485_v14, %v20488_v13  ;;  %v6632_v63 = vcombine.low %v20491_v51, %v20494_v29  ;;  %v6294_v8 = vcombine.low %v20312_v48, %v20404_v5  ;;  %v6295_v59 = vcombine.high %v20312_v48, %v20404_v5 }
 0x6de   : > { %v20513_v53 = vrot.slane %v6530_v57, %v18180_v55  ;;  %v20516_v21 = vrot.slane %v6546_v60, %v18180_v55  ;;  %v20519_v23 = vrot.slane %v6598_v61, %v18180_v55  ;;  %v20522_v9 = vrot.slane %v6614_v49, %v18180_v55 }
 0x6df   : > { %v17257_v12 = vpack.i.bf16 %v6632_v63, %v6564_v4  ;;  %v6302_v3 = vrot.slane %v6294_v8, %v24530_v1  ;;  %v6309_v32 = vrot.slane %v6295_v59, %v24530_v1  ;;  %v6310_v48 = vcombine.low %v20314_v34, %v20406_v7 }
 0x6e0   : > { %v6563_v5 = vcombine.high %v20513_v53, %v20516_v21  ;;  %v6631_v50 = vcombine.high %v20519_v23, %v20522_v9  ;;  %v6311_v19 = vcombine.high %v20314_v34, %v20406_v7  ;;  %v6362_v0 = vcombine.low %v20316_v47, %v20424_v39 }
 0x6e1   : > { %17258 = vrot.lane.b32.xlu0 %v17257_v12, %s17825_s21  ;;  %v6318_v42 = vrot.slane %v6310_v48, %v24530_v1  ;;  %v6363_v11 = vcombine.high %v20316_v47, %v20424_v39  ;;  %v6378_v58 = vcombine.low %v20318_v33, %v20426_v36  ;;  %v6379_v28 = vcombine.high %v20318_v33, %v20426_v36 }
 0x6e2   : > { %v17252_v54 = vpack.i.bf16 %v6631_v50, %v6563_v5  ;;  %v6325_v34 = vrot.slane %v6311_v19, %v24530_v1  ;;  %v6370_v7 = vrot.slane %v6362_v0, %v24530_v1  ;;  %v6565_v18 = vcombine.high %v20485_v14, %v20488_v13 }
 0x6e3   : > { %v6326_v6 = vcombine.low %v6302_v3, %v6318_v42  ;;  %v6327_v27 = vcombine.high %v6302_v3, %v6318_v42  ;;  %v6377_v44 = vrot.slane %v6363_v11, %v24530_v1  ;;  %v6386_v47 = vrot.slane %v6378_v58, %v24530_v1 }
 0x6e4   : > { %17253 = vrot.lane.b32.xlu1 %v17252_v54, %s17826_s23  ;;  %v6342_v39 = vcombine.low %v6309_v32, %v6325_v34  ;;  %v6343_v45 = vcombine.high %v6309_v32, %v6325_v34  ;;  %v6393_v33 = vrot.slane %v6379_v28, %v24530_v1  ;;  %v6633_v36 = vcombine.high %v20491_v51, %v20494_v29 }
 0x6e5   : > { %v6334_v20 = vrot.slane %v6326_v6, %v18180_v55  ;;  %v6341_v14 = vrot.slane %v6327_v27, %v18180_v55  ;;  %v6394_v13 = vcombine.low %v6370_v7, %v6386_v47  ;;  %v6395_v57 = vcombine.high %v6370_v7, %v6386_v47 }
 0x6e6   : > { %v6350_v60 = vrot.slane %v6342_v39, %v18180_v55  ;;  %v6357_v61 = vrot.slane %v6343_v45, %v18180_v55  ;;  %v6410_v49 = vcombine.low %v6377_v44, %v6393_v33  ;;  %v6411_v4 = vcombine.high %v6377_v44, %v6393_v33 }
 0x6e7   : > { %v6906_v63 = vcombine.low %v6334_v20, %v6341_v14  ;;  %v16054_v8 = vcombine.high %v6334_v20, %v6341_v14  ;;  %v6402_v59 = vrot.slane %v6394_v13, %v18180_v55  ;;  %v6409_v12 = vrot.slane %v6395_v57, %v18180_v55 }
 0x6e8   : > { %v6922_v3 = vcombine.low %v6350_v60, %v6357_v61  ;;  %v16055_v51 = vcombine.high %v6350_v60, %v6357_v61  ;;  %v6418_v29 = vrot.slane %v6410_v49, %v18180_v55  ;;  %v6425_v32 = vrot.slane %v6411_v4, %v18180_v55 }
 0x6e9   : > { %v20563_v48 = vrot.slane %v6906_v63, %v24530_v1  ;;  %v20566_v5 = vrot.slane %v16054_v8, %v24530_v1  ;;  %v6974_v50 = vcombine.low %v6402_v59, %v6409_v12  ;;  %v16056_v19 = vcombine.high %v6402_v59, %v6409_v12 }
 0x6ea   : > { %v20569_v0 = vrot.slane %v6922_v3, %v24530_v1  ;;  %v20572_v42 = vrot.slane %v16055_v51, %v24530_v1  ;;  %v6990_v11 = vcombine.low %v6418_v29, %v6425_v32  ;;  %v16057_v58 = vcombine.high %v6418_v29, %v6425_v32 }
 0x6eb   : > { %v20575_v28 = vrot.slane %v6974_v50, %v24530_v1  ;;  %v20578_v54 = vrot.slane %v16056_v19, %v24530_v1  ;;  %v17262_v34 = vpack.i.bf16 %v6633_v36, %v6565_v18  ;;  %v6667_v7 = vcombine.high %v20393_v25, %v20396_v22 }
 0x6ec   : > { %v20583_v6 = vrot.slane %v6990_v11, %v24530_v1  ;;  %v20586_v27 = vrot.slane %v16057_v58, %v24530_v1  ;;  %v6683_v44 = vcombine.high %v20399_v35, %v20402_v17  ;;  %v6735_v47 = vcombine.high %v20413_v40, %v20416_v37 }
 0x6ed   : > { %17263 = vrot.lane.b32.xlu1 %v17262_v34, %s17827_s24  ;;  %v6681_v18 = vrot.slane %v6667_v7, %v18180_v55  ;;  %v6751_v39 = vcombine.high %v20419_v46, %v20422_v24  ;;  %v6666_v45 = vcombine.low %v20393_v25, %v20396_v22  ;;  %v6682_v33 = vcombine.low %v20399_v35, %v20402_v17 }
 0x6ee   : > { %v6697_v36 = vrot.slane %v6683_v44, %v18180_v55  ;;  %v6749_v20 = vrot.slane %v6735_v47, %v18180_v55  ;;  %v6734_v14 = vcombine.low %v20413_v40, %v20416_v37  ;;  %v6750_v13 = vcombine.low %v20419_v46, %v20422_v24 }
 0x6ef   : > { %v6765_v57 = vrot.slane %v6751_v39, %v18180_v55  ;;  %v20608_v60 = vrot.slane %v6666_v45, %v18180_v55  ;;  %v20611_v25 = vrot.slane %v6682_v33, %v18180_v55  ;;  %v6430_v22 = vcombine.low %v20320_v26, %v20444_v30 }
 0x6f0   : > { %v6701_v35 = vcombine.high %v6681_v18, %v6697_v36  ;;  %v20616_v17 = vrot.slane %v6734_v14, %v18180_v55  ;;  %v20619_v40 = vrot.slane %v6750_v13, %v18180_v55  ;;  %v6431_v37 = vcombine.high %v20320_v26, %v20444_v30 }
 0x6f1   : > { %v6769_v46 = vcombine.high %v6749_v20, %v6765_v57  ;;  %v6699_v24 = vcombine.high %v20608_v60, %v20611_v25  ;;  %v6438_v61 = vrot.slane %v6430_v22, %v24530_v1  ;;  %v6446_v49 = vcombine.low %v20322_v41, %v20446_v43 }
 0x6f2   : > { %v6767_v4 = vcombine.high %v20616_v17, %v20619_v40  ;;  %v6445_v63 = vrot.slane %v6431_v37, %v24530_v1  ;;  %v6447_v8 = vcombine.high %v20322_v41, %v20446_v43  ;;  %v6700_v59 = vcombine.low %v6681_v18, %v6697_v36 }
 0x6f3   : > { %v17277_v12 = vpack.i.bf16 %v6769_v46, %v6701_v35  ;;  %v6454_v26 = vrot.slane %v6446_v49, %v24530_v1  ;;  %v6768_v30 = vcombine.low %v6749_v20, %v6765_v57  ;;  %v6803_v3 = vcombine.high %v20453_v62, %v20456_v10 }
 0x6f4   : > { %v17267_v51 = vpack.i.bf16 %v6767_v4, %v6699_v24  ;;  %v6461_v29 = vrot.slane %v6447_v8, %v24530_v1  ;;  %v6819_v32 = vcombine.high %v20459_v38, %v20462_v2  ;;  %v6871_v50 = vcombine.high %v20473_v52, %v20476_v31 }
 0x6f5   : > { %17278 = vrot.lane.b32.xlu0 %v17277_v12, %s17827_s24  ;;  %v6462_v41 = vcombine.low %v6438_v61, %v6454_v26  ;;  %v6463_v43 = vcombine.high %v6438_v61, %v6454_v26  ;;  %v17272_v19 = vpack.i.bf16 %v6768_v30, %v6700_v59  ;;  %v6817_v11 = vrot.slane %v6803_v3, %v18180_v55 }
 0x6f6   : > { %17268 = vrot.lane.b32.xlu1 %v17267_v51, %s17826_s23  ;;  %v6478_v58 = vcombine.low %v6445_v63, %v6461_v29  ;;  %v6479_v34 = vcombine.high %v6445_v63, %v6461_v29  ;;  %v6833_v7 = vrot.slane %v6819_v32, %v18180_v55  ;;  %v6885_v44 = vrot.slane %v6871_v50, %v18180_v55 }
 0x6f7   : > { %v6470_v47 = vrot.slane %v6462_v41, %v18180_v55  ;;  %v6477_v18 = vrot.slane %v6463_v43, %v18180_v55  ;;  %v6887_v39 = vcombine.high %v20479_v15, %v20482_v16  ;;  %v6802_v45 = vcombine.low %v20453_v62, %v20456_v10 }
 0x6f8   : > { %v6486_v33 = vrot.slane %v6478_v58, %v18180_v55  ;;  %v6493_v36 = vrot.slane %v6479_v34, %v18180_v55  ;;  %v6836_v20 = vcombine.low %v6817_v11, %v6833_v7  ;;  %v6818_v14 = vcombine.low %v20459_v38, %v20462_v2 }
 0x6f9   : > { %v7042_v13 = vcombine.low %v6470_v47, %v6477_v18  ;;  %v16058_v57 = vcombine.high %v6470_v47, %v6477_v18  ;;  %v6901_v22 = vrot.slane %v6887_v39, %v18180_v55  ;;  %v20658_v35 = vrot.slane %v6802_v45, %v18180_v55 }
 0x6fa   : > { %v7058_v37 = vcombine.low %v6486_v33, %v6493_v36  ;;  %v16059_v46 = vcombine.high %v6486_v33, %v6493_v36  ;;  %17273 = vrot.lane.b32.xlu1 %v17272_v19, %s17825_s21  ;;  %v20662_v62 = vrot.slane %v6818_v14, %v18180_v55  ;;  %v6870_v10 = vcombine.low %v20473_v52, %v20476_v31 }
 0x6fb   : > { %v7049_v24 = vrot.slane %v7042_v13, %v24530_v1  ;;  %v7057_v38 = vrot.slane %v16058_v57, %v24530_v1  ;;  %v6904_v2 = vcombine.low %v6885_v44, %v6901_v22  ;;  %v6886_v61 = vcombine.low %v20479_v15, %v20482_v16 }
 0x6fc   : > { %v7065_v49 = vrot.slane %v7058_v37, %v24530_v1  ;;  %v7073_v4 = vrot.slane %v16059_v46, %v24530_v1  ;;  %v6835_v63 = vcombine.high %v20658_v35, %v20662_v62  ;;  %v20675_v8 = vrot.slane %v6870_v10, %v18180_v55 }
 0x6fd   : > { %v17287_v59 = vpack.i.bf16 %v6904_v2, %v6836_v20  ;;  %v20678_v52 = vrot.slane %v6886_v61, %v18180_v55  ;;  %v6837_v31 = vcombine.high %v6817_v11, %v6833_v7  ;;  %v6905_v12 = vcombine.high %v6885_v44, %v6901_v22 }
 0x6fe   : > { %v6939_v26 = vcombine.high %v20563_v48, %v20566_v5  ;;  %v6955_v15 = vcombine.high %v20569_v0, %v20572_v42  ;;  %v7007_v16 = vcombine.high %v20575_v28, %v20578_v54  ;;  %v7023_v30 = vcombine.high %v20583_v6, %v20586_v27 }
 0x6ff   : > { %17288 = vrot.lane.b32.xlu0 %v17287_v59, %s17825_s21  ;;  %v6903_v3 = vcombine.high %v20675_v8, %v20678_v52  ;;  %v17292_v51 = vpack.i.bf16 %v6905_v12, %v6837_v31  ;;  %v6938_v29 = vcombine.low %v20563_v48, %v20566_v5  ;;  %v6954_v32 = vcombine.low %v20569_v0, %v20572_v42 }
 0x700   : > { %v6953_v50 = vrot.slane %v6939_v26, %v18180_v55  ;;  %v6969_v41 = vrot.slane %v6955_v15, %v18180_v55  ;;  %v7021_v43 = vrot.slane %v7007_v16, %v18180_v55  ;;  %v7037_v19 = vrot.slane %v7023_v30, %v18180_v55 }
 0x701   : > { %v17282_v11 = vpack.i.bf16 %v6903_v3, %v6835_v63  ;;  %v20700_v58 = vrot.slane %v6938_v29, %v18180_v55  ;;  %v20703_v34 = vrot.slane %v6954_v32, %v18180_v55  ;;  %v7006_v48 = vcombine.low %v20575_v28, %v20578_v54 }
 0x702   : > { %v6972_v5 = vcombine.low %v6953_v50, %v6969_v41  ;;  %v7040_v0 = vcombine.low %v7021_v43, %v7037_v19  ;;  %v7022_v42 = vcombine.low %v20583_v6, %v20586_v27  ;;  %v6973_v7 = vcombine.high %v6953_v50, %v6969_v41 }
 0x703   : > { %17283 = vrot.lane.b32.xlu1 %v17282_v11, %s17826_s23  ;;  %v6971_v44 = vcombine.high %v20700_v58, %v20703_v34  ;;  %v20713_v47 = vrot.slane %v7006_v48, %v18180_v55  ;;  %v7041_v18 = vcombine.high %v7021_v43, %v7037_v19  ;;  %v7074_v39 = vcombine.low %v7049_v24, %v7057_v38 }
 0x704   : > { %v17302_v45 = vpack.i.bf16 %v7040_v0, %v6972_v5  ;;  %v20716_v33 = vrot.slane %v7022_v42, %v18180_v55  ;;  %v7090_v28 = vcombine.low %v7065_v49, %v7073_v4  ;;  %v7075_v54 = vcombine.high %v7049_v24, %v7057_v38 }
 0x705   : > { %v17307_v36 = vpack.i.bf16 %v7041_v18, %v6973_v7  ;;  %v20719_v6 = vrot.slane %v7074_v39, %v18180_v55  ;;  %v7091_v27 = vcombine.high %v7065_v49, %v7073_v4  ;;  %v6562_v20 = vcombine.low %v20513_v53, %v20516_v21 }
 0x706   : > { %v7039_v14 = vcombine.high %v20713_v47, %v20716_v33  ;;  %v20726_v13 = vrot.slane %v7090_v28, %v18180_v55  ;;  %v7089_v57 = vrot.slane %v7075_v54, %v18180_v55  ;;  %v6630_v22 = vcombine.low %v20519_v23, %v20522_v9 }
 0x707   : > { %17293 = vrot.lane.b32.xlu1 %v17292_v51, %s17827_s24  ;;  %v7105_v37 = vrot.slane %v7091_v27, %v18180_v55  ;;  %v6698_v46 = vcombine.low %v20608_v60, %v20611_v25  ;;  %v6766_v21 = vcombine.low %v20616_v17, %v20619_v40  ;;  %v6834_v24 = vcombine.low %v20658_v35, %v20662_v62 }
 0x708   : > { %v17297_v10 = vpack.i.bf16 %v7039_v14, %v6971_v44  ;;  %v7107_v53 = vcombine.high %v20719_v6, %v20726_v13  ;;  %v6902_v23 = vcombine.low %v20675_v8, %v20678_v52  ;;  %v6970_v9 = vcombine.low %v20700_v58, %v20703_v34 }
 0x709   : > { %v7108_v38 = vcombine.low %v7089_v57, %v7105_v37  ;;  %v7109_v2 = vcombine.high %v7089_v57, %v7105_v37  ;;  %v7038_v60 = vcombine.low %v20713_v47, %v20716_v33  ;;  %v7106_v25 = vcombine.low %v20719_v6, %v20726_v13  ;;  %v16060_v6 = vld [vmem:[%s24231_s4] ss:$0 sm:$0xff] }
 0x70a   : > { %17298 = vrot.lane.b32.xlu0 %v17297_v10, %s17826_s23 }
 0x70b   : > { %17303 = vrot.lane.b32.xlu1 %v17302_v45, %s17825_s21 }
 0x70e   : > { %17308 = vrot.lane.b32.xlu0 %v17307_v36, %s17827_s24 }
 0x70f   : > { %7135 = vrot.lane.b32.xlu1 %v7107_v53, %s17826_s23 }
 0x712   : > { %7171 = vrot.lane.b32.xlu0 %v7108_v38, %s17825_s21 }
 0x713   : > { %7207 = vrot.lane.b32.xlu1 %v7109_v2, %s17827_s24 }
 0x753   : > { %v17259_v62 = vpop.permute.xlu0 %17258 }
 0x754   : > { %v17261_v61 = vunpack.i.h.bf16 %v17259_v62  ;;  %v17260_v49 = vunpack.i.l.bf16 %v17259_v62 }
 0x756   : > { %v17254_v17 = vpop.permute.xlu1 %17253 }
 0x757   : > { %v17256_v40 = vunpack.i.h.bf16 %v17254_v17  ;;  %v17255_v35 = vunpack.i.l.bf16 %v17254_v17 }
 0x759   : > { %v7218_v4 = vsel %vm4699_vm2, %v6562_v20, %v17255_v35  ;;  %v7219_v63 = vsel %vm4699_vm2, %v6630_v22, %v17256_v40 }
 0x75a   : > { %v7229_v31 = vsel %vm7227_vm14, %v7219_v63, %v17261_v61  ;;  %v7228_v12 = vsel %vm7227_vm14, %v7218_v4, %v17260_v49 }
 0x75f   : > { %v17264_v8 = vpop.permute.xlu1 %17263 }
 0x760   : > { %v17266_v59 = vunpack.i.h.bf16 %v17264_v8  ;;  %v17265_v52 = vunpack.i.l.bf16 %v17264_v8 }
 0x762   : > { %v7238_v26 = vsel %vm7237_vm15, %v7228_v12, %v17265_v52  ;;  %v7239_v15 = vsel %vm7237_vm15, %v7229_v31, %v17266_v59 }
 0x763   : > { %v7247_v16 = vpack.c.bf16 %v7239_v15, %v7238_v26 }
 0x765   : > { %16802 = vmatmul.mubr.msk.bf16.vlgmr.msra.gmra.mrb[80].mxu1 %vm427_vm0, %v7247_v16  ;;  %v17798_v16 = vld [vmem:[%s17903_s22] sm:$0xff] }
 0x766   : > { %16805 = vmatprep.mubr.msk.bf16.mxu1 %vm17816_vm1, %v24446_v56 }
 0x767   : > { %v17279_v29 = vpop.permute.xlu0 %17278 }
 0x768   : > { %v17269_v30 = vpop.permute.xlu1 %17268  ;;  %v17281_v11 = vunpack.i.h.bf16 %v17279_v29  ;;  %v17280_v48 = vunpack.i.l.bf16 %v17279_v29  ;;  %v17799_v29 = vld [vmem:[%s17903_s22 + $0x8] sm:$0xff] }
 0x769   : > { %v17271_v3 = vunpack.i.h.bf16 %v17269_v30  ;;  %v17270_v51 = vunpack.i.l.bf16 %v17269_v30 }
 0x76b   : > { %v7220_v43 = vsel %vm4699_vm2, %v6698_v46, %v17270_v51  ;;  %v7221_v19 = vsel %vm4699_vm2, %v6766_v21, %v17271_v3 }
 0x76c   : > { %v17274_v32 = vpop.permute.xlu1 %17273 }
 0x76d   : > { %v17276_v50 = vunpack.i.h.bf16 %v17274_v32  ;;  %v17275_v41 = vunpack.i.l.bf16 %v17274_v32 }
 0x76f   : > { %v7230_v5 = vsel %vm7227_vm14, %v7220_v43, %v17275_v41  ;;  %v7231_v0 = vsel %vm7227_vm14, %v7221_v19, %v17276_v50 }
 0x770   : > { %v7240_v42 = vsel %vm7237_vm15, %v7230_v5, %v17280_v48  ;;  %v7241_v7 = vsel %vm7237_vm15, %v7231_v0, %v17281_v11  ;;  %v17800_v5 = vld [vmem:[%s17903_s22 + $0x10] sm:$0xff] }
 0x771   : > { %v7248_v44 = vpack.c.bf16 %v7241_v7, %v7240_v42  ;;  %v17289_v18 = vpop.permute.xlu0 %17288 }
 0x772   : > { %v17291_v54 = vunpack.i.h.bf16 %v17289_v18  ;;  %v17290_v36 = vunpack.i.l.bf16 %v17289_v18 }
 0x773   : > { %16806 = vmatmul.mubr.msk.bf16.gmra.mrb[84].mxu1 %vm427_vm0, %v7248_v44  ;;  %v17801_v44 = vld [vmem:[%s17903_s22 + $0x18] sm:$0xff] }
 0x774   : > { %16809 = vmatprep.mubr.msk.bf16.mxu1 %vm17816_vm1, %v24446_v56 }
 0x775   : > { %v17284_v39 = vpop.permute.xlu1 %17283 }
 0x776   : > { %v17286_v45 = vunpack.i.h.bf16 %v17284_v39  ;;  %v17285_v28 = vunpack.i.l.bf16 %v17284_v39 }
 0x778   : > { %v7222_v27 = vsel %vm4699_vm2, %v6834_v24, %v17285_v28  ;;  %v7223_v20 = vsel %vm4699_vm2, %v6902_v23, %v17286_v45 }
 0x779   : > { %v17294_v14 = vpop.permute.xlu1 %17293  ;;  %v7233_v37 = vsel %vm7227_vm14, %v7223_v20, %v17291_v54  ;;  %v7232_v46 = vsel %vm7227_vm14, %v7222_v27, %v17290_v36  ;;  %v17802_v20 = vld [vmem:[%s17903_s22 + $0x20] sm:$0xff] }
 0x77a   : > { %v17296_v57 = vunpack.i.h.bf16 %v17294_v14  ;;  %v17295_v22 = vunpack.i.l.bf16 %v17294_v14 }
 0x77c   : > { %v7242_v10 = vsel %vm7237_vm15, %v7232_v46, %v17295_v22  ;;  %v7243_v53 = vsel %vm7237_vm15, %v7233_v37, %v17296_v57  ;;  %v17299_v21 = vpop.permute.xlu0 %17298  ;;  %v17803_v37 = vld [vmem:[%s17903_s22 + $0x28] sm:$0xff] }
 0x77d   : > { %v17304_v38 = vpop.permute.xlu1 %17303  ;;  %v17301_v2 = vunpack.i.h.bf16 %v17299_v21  ;;  %v17300_v17 = vunpack.i.l.bf16 %v17299_v21  ;;  %v7249_v40 = vpack.c.bf16 %v7243_v53, %v7242_v10 }
 0x77e   : > { %v17306_v35 = vunpack.i.h.bf16 %v17304_v38  ;;  %v17305_v24 = vunpack.i.l.bf16 %v17304_v38 }
 0x77f   : > { %v7225_v23 = vsel %vm4699_vm2, %v7038_v60, %v17301_v2  ;;  %v7224_v62 = vsel %vm4699_vm2, %v6970_v9, %v17300_v17  ;;  %16810 = vmatmul.mubr.msk.bf16.gmra.mrb[88].mxu1 %vm427_vm0, %v7249_v40  ;;  %v17804_v40 = vld [vmem:[%s17903_s22 + $0x30] sm:$0xff] }
 0x780   : > { %v17309_v61 = vpop.permute.xlu0 %17308  ;;  %16813 = vmatprep.mubr.msk.bf16.mxu1 %vm17816_vm1, %v24446_v56  ;;  %v7234_v8 = vsel %vm7227_vm14, %v7224_v62, %v17305_v24  ;;  %v7235_v47 = vsel %vm7227_vm14, %v7225_v23, %v17306_v35  ;;  %v17805_v62 = vld [vmem:[%s17903_s22 + $0x38] sm:$0xff] }
 0x781   : > { %v7136_v49 = vpop.permute.xlu1 %7135  ;;  %v17311_v4 = vunpack.i.h.bf16 %v17309_v61  ;;  %v17310_v63 = vunpack.i.l.bf16 %v17309_v61 }
 0x782   : > { %v7226_v9 = vsel %vm4699_vm2, %v7106_v25, %v7136_v49 }
 0x783   : > { %v7244_v33 = vsel %vm7237_vm15, %v7234_v8, %v17310_v63  ;;  %v7245_v60 = vsel %vm7237_vm15, %v7235_v47, %v17311_v4 }
 0x784   : > { %v7172_v58 = vpop.permute.xlu0 %7171  ;;  %v7250_v34 = vpack.c.bf16 %v7245_v60, %v7244_v33  ;;  %v17806_v60 = vld [vmem:[%s17903_s22 + $0x40] sm:$0xff]  ;;  %s24192_s22 = scalar_lea.vmem %s24238_s11, %s16304_s26 }
 0x785   : > { %v7208_v59 = vpop.permute.xlu1 %7207  ;;  %v7236_v52 = vsel %vm7227_vm14, %v7226_v9, %v7172_v58 }
 0x786   : > { %v7246_v31 = vsel %vm7237_vm15, %v7236_v52, %v7208_v59  ;;  %v17376_v59 = vld [vmem:[%s24232_s5] sm:$0xff]  }
 0x787   : > { %16814 = vmatmul.mubr.msk.bf16.gmra.mrb[92].mxu1 %vm427_vm0, %v7250_v34  ;;  %v7251_v12 = vpack.c.bf16 %v7246_v31, %v7246_v31  ;;  %16822 = vmatpush3.bf16.msra.mxu0 %v17376_v59 }
 0x788   : > { %16817 = vmatprep.mubr.msk.bf16.mxu1 %vm17816_vm1, %v24446_v56  ;;  %16823 = vmatprep.subr.bf16.mxu0 %v24446_v56 }
 0x78f   : > { %16818 = vmatmul.mubr.msk.bf16.gmra.mrb[96].mxu1 %vm427_vm0, %v7251_v12 }
 0x790   : > { %16861 = vmatprep.mubr.msk.bf16.mxu1 %vm17816_vm1, %v24446_v56 }
 0x838   : > { %v7324_v13 = vpop.f32.mrb[80].mxu1 }
 0x839   : > { %v7325_v25 = vadd.f32 %v16060_v6, %v7324_v13  ;;  %v16803_v26 = vpop.f32.mrb[81].mxu1 }
 0x83a   : > { %v7327_v15 = vpop.f32.mrb[82].mxu1 }
 0x83b   : > { %v20810_v30 = vadd.f32 %v17798_v16, %v7325_v25  ;;  %v7328_v3 = vadd.f32 %v16060_v6, %v7327_v15  ;;  %v16804_v51 = vpop.f32.mrb[83].mxu1 }
 0x83d   : > { %v20813_v32 = vadd.f32 %v17799_v29, %v7328_v3  ;;  %v7371_v50 = vsel %vm427_vm0, %v20810_v30, 0.0 }
 0x83e   : > { %7372 = vadd.xlane.f32.xlu0 %v7371_v50 }
 0x83f   : > { %v7374_v41 = vsel %vm427_vm0, %v20813_v32, 0.0 }
 0x840   : > { %7375 = vadd.xlane.f32.xlu1 %v7374_v41 }
 0x846   : > { %v7332_v43 = vpop.f32.mrb[84].mxu1 }
 0x847   : > { %v7333_v19 = vadd.f32 %v16060_v6, %v7332_v43  ;;  %v16807_v11 = vpop.f32.mrb[85].mxu1 }
 0x848   : > { %v7335_v48 = vpop.f32.mrb[86].mxu1 }
 0x849   : > { %v20820_v0 = vadd.f32 %v17800_v5, %v7333_v19  ;;  %v7336_v42 = vadd.f32 %v16060_v6, %v7335_v48  ;;  %v16808_v7 = vpop.f32.mrb[87].mxu1 }
 0x84b   : > { %v20823_v18 = vadd.f32 %v17801_v44, %v7336_v42  ;;  %v7377_v39 = vsel %vm427_vm0, %v20820_v0, 0.0 }
 0x84c   : > { %7378 = vadd.xlane.f32.xlu0 %v7377_v39 }
 0x84d   : > { %v7380_v45 = vsel %vm427_vm0, %v20823_v18, 0.0 }
 0x850   : > { %7381 = vadd.xlane.f32.xlu0 %v7380_v45 }
 0x852   : > { %v7340_v28 = vpop.f32.mrb[88].mxu1 }
 0x853   : > { %v7341_v54 = vadd.f32 %v16060_v6, %v7340_v28  ;;  %v16811_v36 = vpop.f32.mrb[89].mxu1 }
 0x854   : > { %v7343_v27 = vpop.f32.mrb[90].mxu1 }
 0x855   : > { %v20830_v14 = vadd.f32 %v17802_v20, %v7341_v54  ;;  %v7344_v57 = vadd.f32 %v16060_v6, %v7343_v27  ;;  %v16812_v22 = vpop.f32.mrb[91].mxu1 }
 0x857   : > { %v20833_v46 = vadd.f32 %v17803_v37, %v7344_v57  ;;  %v7383_v10 = vsel %vm427_vm0, %v20830_v14, 0.0 }
 0x858   : > { %7384 = vadd.xlane.f32.xlu0 %v7383_v10 }
 0x859   : > { %v7386_v53 = vsel %vm427_vm0, %v20833_v46, 0.0 }
 0x85a   : > { %7387 = vadd.xlane.f32.xlu1 %v7386_v53  ;;  %v7348_v21 = vpop.f32.mrb[92].mxu1 }
 0x85b   : > { %v7349_v38 = vadd.f32 %v16060_v6, %v7348_v21  ;;  %v16815_v2 = vpop.f32.mrb[93].mxu1 }
 0x85c   : > { %v7351_v17 = vpop.f32.mrb[94].mxu1 }
 0x85d   : > { %v20840_v35 = vadd.f32 %v17804_v40, %v7349_v38  ;;  %v7352_v24 = vadd.f32 %v16060_v6, %v7351_v17  ;;  %v16816_v23 = vpop.f32.mrb[95].mxu1 }
 0x85f   : > { %v20843_v61 = vadd.f32 %v17805_v62, %v7352_v24  ;;  %v7389_v49 = vsel %vm427_vm0, %v20840_v35, 0.0  ;;  %v17377_v24 = vld [vmem:[%s24232_s5 + $0x8] sm:$0xff]  }
 0x860   : > { %7390 = vadd.xlane.f32.xlu0 %v7389_v49  ;;  %16824 = vmatpush3.bf16.msra.mxu0 %v17377_v24 }
 0x861   : > { %v7392_v4 = vsel %vm427_vm0, %v20843_v61, 0.0  ;;  %16881 = vmatprep.subr.bf16.mxu0 %v24446_v56 }
 0x862   : > { %7393 = vadd.xlane.f32.xlu1 %v7392_v4  ;;  %v7356_v63 = vpop.f32.mrb[96].mxu1 }
 0x863   : > { %v7357_v8 = vadd.f32 %v16060_v6, %v7356_v63  ;;  %v16819_v47 = vpop.f32.mrb[97].mxu1 }
 0x864   : > { %v7359_v33 = vpop.f32.mrb[98].mxu1  ;;  %v17378_v47 = vld [vmem:[%s24234_s7] sm:$0xff]  }
 0x865   : > { %v20850_v58 = vadd.f32 %v17806_v60, %v7357_v8  ;;  %v16820_v34 = vpop.f32.mrb[99].mxu1  ;;  %16846 = vmatpush3.bf16.msra.mxu1 %v17378_v47  ;;  %v17379_v33 = vld [vmem:[%s24234_s7 + $0x8] sm:$0xff]  }
 0x866   : > { %16847 = vmatprep.subr.bf16.mxu1 %v24446_v56 }
 0x867   : > { %v7395_v9 = vsel %vm427_vm0, %v20850_v58, 0.0 }
 0x868   : > { %7396 = vadd.xlane.f32.xlu0 %v7395_v9 }
 0x869   : > { %16848 = vmatpush3.bf16.msra.mxu1 %v17379_v33 }
 0x86a   : > { %16849 = vmatprep.subr.bf16.mxu1 %v24446_v56 }
 0x8cb   : > { %v7373_v52 = vpop.xlane.xlu0 %7372 }
 0x8cc   : > { %v7398_v31 = vmul.f32 0.03125, %v7373_v52 }
 0x8cd   : > { %v7376_v12 = vpop.xlane.xlu1 %7375 }
 0x8ce   : > { %v20859_v6 = vsub.f32 %v20810_v30, %v7398_v31  ;;  %v7399_v13 = vmul.f32 0.03125, %v7376_v12 }
 0x8d0   : > { %v20862_v25 = vsub.f32 %v20813_v32, %v7399_v13  ;;  %v7416_v26 = vmul.f32 %v20859_v6, %v20859_v6 }
 0x8d2   : > { %v7425_v15 = vsel %vm427_vm0, %v7416_v26, 0.0  ;;  %v7417_v16 = vmul.f32 %v20862_v25, %v20862_v25 }
 0x8d3   : > { %7426 = vadd.xlane.f32.xlu1 %v7425_v15 }
 0x8d4   : > { %v7428_v3 = vsel %vm427_vm0, %v7417_v16, 0.0 }
 0x8d5   : > { %7429 = vadd.xlane.f32.xlu0 %v7428_v3 }
 0x8d9   : > { %v7379_v51 = vpop.xlane.xlu0 %7378 }
 0x8da   : > { %v7400_v29 = vmul.f32 0.03125, %v7379_v51 }
 0x8dc   : > { %v20871_v50 = vsub.f32 %v20820_v0, %v7400_v29 }
 0x8dd   : > { %v7382_v41 = vpop.xlane.xlu0 %7381 }
 0x8de   : > { %v7401_v43 = vmul.f32 0.03125, %v7382_v41  ;;  %v7418_v19 = vmul.f32 %v20871_v50, %v20871_v50 }
 0x8e0   : > { %v20876_v11 = vsub.f32 %v20823_v18, %v7401_v43  ;;  %v7431_v48 = vsel %vm427_vm0, %v7418_v19, 0.0 }
 0x8e1   : > { %7432 = vadd.xlane.f32.xlu1 %v7431_v48 }
 0x8e2   : > { %v7419_v5 = vmul.f32 %v20876_v11, %v20876_v11 }
 0x8e4   : > { %v7434_v42 = vsel %vm427_vm0, %v7419_v5, 0.0 }
 0x8e5   : > { %v7385_v7 = vpop.xlane.xlu0 %7384  ;;  %7435 = vadd.xlane.f32.xlu0 %v7434_v42 }
 0x8e6   : > { %v7402_v44 = vmul.f32 0.03125, %v7385_v7 }
 0x8e7   : > { %v7388_v39 = vpop.xlane.xlu1 %7387 }
 0x8e8   : > { %v20883_v45 = vsub.f32 %v20830_v14, %v7402_v44  ;;  %v7403_v28 = vmul.f32 0.03125, %v7388_v39 }
 0x8ea   : > { %v20886_v54 = vsub.f32 %v20833_v46, %v7403_v28  ;;  %v7420_v36 = vmul.f32 %v20883_v45, %v20883_v45 }
 0x8ec   : > { %v7437_v27 = vsel %vm427_vm0, %v7420_v36, 0.0  ;;  %v7421_v20 = vmul.f32 %v20886_v54, %v20886_v54 }
 0x8ed   : > { %v7391_v57 = vpop.xlane.xlu0 %7390  ;;  %7438 = vadd.xlane.f32.xlu1 %v7437_v27 }
 0x8ee   : > { %v7404_v22 = vmul.f32 0.03125, %v7391_v57  ;;  %v7440_v37 = vsel %vm427_vm0, %v7421_v20, 0.0 }
 0x8ef   : > { %v7394_v10 = vpop.xlane.xlu1 %7393  ;;  %7441 = vadd.xlane.f32.xlu0 %v7440_v37 }
 0x8f0   : > { %v20895_v53 = vsub.f32 %v20840_v35, %v7404_v22  ;;  %v7405_v21 = vmul.f32 0.03125, %v7394_v10 }
 0x8f2   : > { %v20898_v38 = vsub.f32 %v20843_v61, %v7405_v21  ;;  %v7422_v2 = vmul.f32 %v20895_v53, %v20895_v53 }
 0x8f4   : > { %v7443_v17 = vsel %vm427_vm0, %v7422_v2, 0.0  ;;  %v7423_v40 = vmul.f32 %v20898_v38, %v20898_v38 }
 0x8f5   : > { %7444 = vadd.xlane.f32.xlu1 %v7443_v17  ;;  %v7397_v23 = vpop.xlane.xlu0 %7396 }
 0x8f6   : > { %v7406_v62 = vmul.f32 0.03125, %v7397_v23  ;;  %v7446_v49 = vsel %vm427_vm0, %v7423_v40, 0.0 }
 0x8f7   : > { %7447 = vadd.xlane.f32.xlu0 %v7446_v49 }
 0x8f8   : > { %v20911_v4 = vsub.f32 %v20850_v58, %v7406_v62 }
 0x8fa   : > { %v7424_v63 = vmul.f32 %v20911_v4, %v20911_v4 }
 0x8fc   : > { %v7449_v8 = vsel %vm427_vm0, %v7424_v63, 0.0 }
 0x8fd   : > { %7450 = vadd.xlane.f32.xlu1 %v7449_v8 }
 0x960   : > { %v7427_v60 = vpop.xlane.xlu1 %7426 }
 0x961   : > { %v7452_v34 = vmul.f32 0.03125, %v7427_v60 }
 0x962   : > { %v7430_v9 = vpop.xlane.xlu0 %7429 }
 0x963   : > { %v7461_v59 = vadd.f32 1e-05, %v7452_v34  ;;  %v7453_v52 = vmul.f32 0.03125, %v7430_v9  ;;  %v17383_v34 = vld [vmem:[%s24234_s7 + $0x28] sm:$0xff]   ;;  %v17384_v9 = vld [vmem:[%s24234_s7 + $0x30] sm:$0xff]  }
 0x965   : > { %17562 = vrsqrt.f32 %v7461_v59  ;;  %v7462_v31 = vadd.f32 1e-05, %v7453_v52  ;;  %v17385_v59 = vld [vmem:[%s24234_s7 + $0x38] sm:$0xff]   ;;  %v20975_v52 = vld [vmem:[%s24233_s6] ss:$0 sm:$0xff] }
 0x967   : > { %17564 = vrsqrt.f32 %v7462_v31 }
 0x96e   : > { %v7433_v12 = vpop.xlane.xlu1 %7432 }
 0x96f   : > { %v17563_v13 = vpop.eup %17562  ;;  %v7454_v26 = vmul.f32 0.03125, %v7433_v12 }
 0x970   : > { %v7479_v3 = vmul.f32 %v17563_v13, %v20859_v6 }
 0x971   : > { %v17565_v15 = vpop.eup %17564  ;;  %v7463_v16 = vadd.f32 1e-05, %v7454_v26 }
 0x972   : > { %v7480_v51 = vmul.f32 %v17565_v15, %v20862_v25  ;;  %v7436_v29 = vpop.xlane.xlu0 %7435 }
 0x973   : > { %v7455_v41 = vmul.f32 0.03125, %v7436_v29  ;;  %17566 = vrsqrt.f32 %v7463_v16 }
 0x974   : > { %v7488_v43 = vpack.c.bf16 %v7480_v51, %v7479_v3 }
 0x975   : > { %v7464_v19 = vadd.f32 1e-05, %v7455_v41 }
 0x976   : > { %16826 = vmatmul.mubr.msk.bf16.vlgmr.msra.gmra.mrb[100].mxu0 %vm427_vm0, %v7488_v43 }
 0x977   : > { %17568 = vrsqrt.f32 %v7464_v19  ;;  %16829 = vmatprep.mubr.msk.bf16.mxu0 %vm17816_vm1, %v24446_v56 }
 0x97a   : > { %v7439_v48 = vpop.xlane.xlu1 %7438 }
 0x97b   : > { %v7456_v5 = vmul.f32 0.03125, %v7439_v48 }
 0x97c   : > { %v7442_v42 = vpop.xlane.xlu0 %7441 }
 0x97d   : > { %v7465_v7 = vadd.f32 1e-05, %v7456_v5  ;;  %v7457_v44 = vmul.f32 0.03125, %v7442_v42  ;;  %v17567_v39 = vpop.eup %17566 }
 0x97e   : > { %v7481_v36 = vmul.f32 %v17567_v39, %v20871_v50 }
 0x97f   : > { %17570 = vrsqrt.f32 %v7465_v7  ;;  %v7466_v6 = vadd.f32 1e-05, %v7457_v44 }
 0x981   : > { %v17569_v25 = vpop.eup %17568  ;;  %17572 = vrsqrt.f32 %v7466_v6 }
 0x982   : > { %v7445_v28 = vpop.xlane.xlu1 %7444  ;;  %v7482_v27 = vmul.f32 %v17569_v25, %v20876_v11 }
 0x983   : > { %v7458_v20 = vmul.f32 0.03125, %v7445_v28 }
 0x984   : > { %v7448_v57 = vpop.xlane.xlu0 %7447  ;;  %v7489_v22 = vpack.c.bf16 %v7482_v27, %v7481_v36 }
 0x985   : > { %v7467_v37 = vadd.f32 1e-05, %v7458_v20  ;;  %v7459_v10 = vmul.f32 0.03125, %v7448_v57 }
 0x986   : > { %16830 = vmatmul.mubr.msk.bf16.gmra.mrb[104].mxu0 %vm427_vm0, %v7489_v22 }
 0x987   : > { %17574 = vrsqrt.f32 %v7467_v37  ;;  %v7468_v21 = vadd.f32 1e-05, %v7459_v10  ;;  %16833 = vmatprep.mubr.msk.bf16.mxu0 %vm17816_vm1, %v24446_v56 }
 0x989   : > { %v17571_v2 = vpop.eup %17570  ;;  %17576 = vrsqrt.f32 %v7468_v21 }
 0x98a   : > { %v7451_v17 = vpop.xlane.xlu1 %7450  ;;  %v7483_v50 = vmul.f32 %v17571_v2, %v20883_v45 }
 0x98b   : > { %v17573_v40 = vpop.eup %17572  ;;  %v7460_v24 = vmul.f32 0.03125, %v7451_v17 }
 0x98c   : > { %v7484_v11 = vmul.f32 %v17573_v40, %v20886_v54 }
 0x98d   : > { %v7469_v23 = vadd.f32 1e-05, %v7460_v24 }
 0x98e   : > { %v7490_v62 = vpack.c.bf16 %v7484_v11, %v7483_v50 }
 0x98f   : > { %17578 = vrsqrt.f32 %v7469_v23 }
 0x990   : > { %16834 = vmatmul.mubr.msk.bf16.gmra.mrb[108].mxu0 %vm427_vm0, %v7490_v62 }
 0x991   : > { %v17575_v49 = vpop.eup %17574  ;;  %16837 = vmatprep.mubr.msk.bf16.mxu0 %vm17816_vm1, %v24446_v56 }
 0x992   : > { %v7485_v8 = vmul.f32 %v17575_v49, %v20895_v53  ;;  %v17380_v53 = vld [vmem:[%s24234_s7 + $0x10] sm:$0xff]  }
 0x993   : > { %v17577_v63 = vpop.eup %17576  ;;  %16850 = vmatpush3.bf16.msra.mxu1 %v17380_v53 }
 0x994   : > { %v7486_v47 = vmul.f32 %v17577_v63, %v20898_v38  ;;  %v17381_v38 = vld [vmem:[%s24234_s7 + $0x18] sm:$0xff]   ;;  %16851 = vmatprep.subr.bf16.mxu1 %v24446_v56 }
 0x996   : > { %v7491_v33 = vpack.c.bf16 %v7486_v47, %v7485_v8 }
 0x997   : > { %16852 = vmatpush3.bf16.msra.mxu1 %v17381_v38 }
 0x998   : > { %16838 = vmatmul.mubr.msk.bf16.gmra.mrb[112].mxu0 %vm427_vm0, %v7491_v33  ;;  %16853 = vmatprep.subr.bf16.mxu1 %v24446_v56 }
 0x999   : > { %v17579_v45 = vpop.eup %17578  ;;  %16841 = vmatprep.mubr.msk.bf16.mxu0 %vm17816_vm1, %v24446_v56 }
 0x99a   : > { %v7487_v54 = vmul.f32 %v17579_v45, %v20911_v4  ;;  %v17382_v4 = vld [vmem:[%s24234_s7 + $0x20] sm:$0xff]  }
 0x99b   : > { %16854 = vmatpush3.bf16.msra.mxu1 %v17382_v4 }
 0x99c   : > { %v7492_v60 = vpack.c.bf16 %v7487_v54, %v7487_v54  ;;  %16855 = vmatprep.subr.bf16.mxu1 %v24446_v56 }
 0x99f   : > { %16856 = vmatpush3.bf16.msra.mxu1 %v17383_v34 }
 0x9a0   : > { %16842 = vmatmul.mubr.msk.bf16.gmra.mrb[116].mxu0 %vm427_vm0, %v7492_v60  ;;  %16857 = vmatprep.subr.bf16.mxu1 %v24446_v56 }
 0x9a1   : > { %16885 = vmatprep.mubr.msk.bf16.mxu0 %vm17816_vm1, %v24446_v56 }
 0x9a3   : > { %16858 = vmatpush3.bf16.msra.mxu1 %v17384_v9 }
 0x9a4   : > { %16859 = vmatprep.subr.bf16.mxu1 %v24446_v56 }
 0x9a7   : > { %16860 = vmatpush3.bf16.msra.mxu1 %v17385_v59 }
 0x9a8   : > { %16905 = vmatprep.subr.bf16.mxu1 %v24446_v56 }
 0xa49   : > { %v7565_v31 = vpop.f32.mrb[100].mxu0 }
 0xa4a   : > { %v7566_v12 = vadd.f32 %v20975_v52, %v7565_v31  ;;  %v16827_v13 = vpop.f32.mrb[101].mxu0 }
 0xa4b   : > { %v7568_v26 = vpop.f32.mrb[102].mxu0 }
 0xa4c   : > { %v7612_v15 = vmul.f32 0.044715, %v7566_v12  ;;  %v7569_v16 = vadd.f32 %v20975_v52, %v7568_v26  ;;  %v16828_v3 = vpop.f32.mrb[103].mxu0  ;;  %v7603_v24 = vmul.f32 0.5, %v7566_v12 }
 0xa4e   : > { %v7621_v51 = vmul.f32 %v7612_v15, %v7566_v12  ;;  %v7613_v29 = vmul.f32 0.044715, %v7569_v16  ;;  %v7604_v50 = vmul.f32 0.5, %v7569_v16 }
 0xa50   : > { %v7630_v41 = vmul.f32 %v7621_v51, %v7566_v12  ;;  %v7622_v43 = vmul.f32 %v7613_v29, %v7569_v16 }
 0xa52   : > { %v7639_v19 = vadd.f32 %v7630_v41, %v7566_v12  ;;  %v7631_v48 = vmul.f32 %v7622_v43, %v7569_v16 }
 0xa54   : > { %v7648_v5 = vmul.f32 0.7978846, %v7639_v19  ;;  %v7640_v42 = vadd.f32 %v7631_v48, %v7569_v16 }
 0xa56   : > { %17580 = vtanh.f32 %v7648_v5  ;;  %v7649_v7 = vmul.f32 0.7978846, %v7640_v42 }
 0xa58   : > { %17582 = vtanh.f32 %v7649_v7 }
 0xa59   : > { %v7573_v44 = vpop.f32.mrb[104].mxu0 }
 0xa5a   : > { %v7574_v39 = vadd.f32 %v20975_v52, %v7573_v44  ;;  %v16831_v6 = vpop.f32.mrb[105].mxu0 }
 0xa5b   : > { %v7576_v25 = vpop.f32.mrb[106].mxu0 }
 0xa5c   : > { %v7614_v28 = vmul.f32 0.044715, %v7574_v39  ;;  %v7577_v36 = vadd.f32 %v20975_v52, %v7576_v25  ;;  %v16832_v27 = vpop.f32.mrb[107].mxu0 }
 0xa5e   : > { %v7623_v20 = vmul.f32 %v7614_v28, %v7574_v39  ;;  %v7615_v57 = vmul.f32 0.044715, %v7577_v36 }
 0xa60   : > { %v17581_v22 = vpop.eup %17580  ;;  %v7632_v37 = vmul.f32 %v7623_v20, %v7574_v39  ;;  %v7624_v10 = vmul.f32 %v7615_v57, %v7577_v36  ;;  %v7605_v20 = vmul.f32 0.5, %v7574_v39  ;;  %v7606_v57 = vmul.f32 0.5, %v7577_v36 }
 0xa61   : > { %v7666_v21 = vadd.f32 1.0, %v17581_v22 }
 0xa62   : > { %v17583_v2 = vpop.eup %17582  ;;  %v7633_v17 = vmul.f32 %v7624_v10, %v7577_v36  ;;  %v7641_v40 = vadd.f32 %v7632_v37, %v7574_v39 }
 0xa63   : > { %v7581_v11 = vpop.f32.mrb[108].mxu0  ;;  %v7667_v23 = vadd.f32 1.0, %v17583_v2  ;;  %v7675_v33 = vmul.f32 %v7666_v21, %v7603_v24 }
 0xa64   : > { %v20982_v62 = vadd.f32 %v20975_v52, %v7581_v11  ;;  %v16835_v49 = vpop.f32.mrb[109].mxu0  ;;  %v7642_v63 = vadd.f32 %v7633_v17, %v7577_v36  ;;  %v7650_v8 = vmul.f32 0.7978846, %v7641_v40 }
 0xa65   : > { %v7584_v47 = vpop.f32.mrb[110].mxu0  ;;  %v7676_v45 = vmul.f32 %v7667_v23, %v7604_v50 }
 0xa66   : > { %v7616_v54 = vmul.f32 0.044715, %v20982_v62  ;;  %v7585_v60 = vadd.f32 %v20975_v52, %v7584_v47  ;;  %v16836_v53 = vpop.f32.mrb[111].mxu0  ;;  %v7651_v38 = vmul.f32 0.7978846, %v7642_v63  ;;  %17584 = vtanh.f32 %v7650_v8 }
 0xa67   : > { %v7684_v4 = vpack.c.bf16 %v7676_v45, %v7675_v33 }
 0xa68   : > { %v7625_v34 = vmul.f32 %v7616_v54, %v20982_v62  ;;  %v7617_v9 = vmul.f32 0.044715, %v7585_v60  ;;  %17586 = vtanh.f32 %v7651_v38  ;;  %v7607_v54 = vmul.f32 0.5, %v20982_v62 }
 0xa69   : > { %16862 = vmatmul.mubr.bf16.vlgmr.msra.gmra.mrb[100].mxu1 %v7684_v4  ;;  %v7608_v53 = vmul.f32 0.5, %v7585_v60 }
 0xa6a   : > { %v7634_v59 = vmul.f32 %v7625_v34, %v20982_v62  ;;  %v7626_v31 = vmul.f32 %v7617_v9, %v7585_v60  ;;  %16865 = vmatprep.mubr.msk.bf16.mxu1 %vm17816_vm1, %v24446_v56 }
 0xa6b   : > { %v7589_v12 = vpop.f32.mrb[112].mxu0 }
 0xa6c   : > { %v7635_v13 = vmul.f32 %v7626_v31, %v7585_v60  ;;  %v7590_v26 = vadd.f32 %v20975_v52, %v7589_v12  ;;  %v16839_v15 = vpop.f32.mrb[113].mxu0  ;;  %v7643_v16 = vadd.f32 %v7634_v59, %v20982_v62 }
 0xa6d   : > { %v7592_v3 = vpop.f32.mrb[114].mxu0 }
 0xa6e   : > { %v7618_v51 = vmul.f32 0.044715, %v7590_v26  ;;  %v7593_v29 = vadd.f32 %v20975_v52, %v7592_v3  ;;  %v16840_v41 = vpop.f32.mrb[115].mxu0  ;;  %v7644_v43 = vadd.f32 %v7635_v13, %v7585_v60  ;;  %v7652_v19 = vmul.f32 0.7978846, %v7643_v16 }
 0xa6f   : > { %v7609_v15 = vmul.f32 0.5, %v7590_v26 }
 0xa70   : > { %v17585_v48 = vpop.eup %17584  ;;  %v7627_v5 = vmul.f32 %v7618_v51, %v7590_v26  ;;  %v7619_v42 = vmul.f32 0.044715, %v7593_v29  ;;  %v7653_v7 = vmul.f32 0.7978846, %v7644_v43  ;;  %17588 = vtanh.f32 %v7652_v19 }
 0xa71   : > { %v7668_v44 = vadd.f32 1.0, %v17585_v48  ;;  %v7610_v16 = vmul.f32 0.5, %v7593_v29 }
 0xa72   : > { %v17587_v6 = vpop.eup %17586  ;;  %v7636_v25 = vmul.f32 %v7627_v5, %v7590_v26  ;;  %v7628_v28 = vmul.f32 %v7619_v42, %v7593_v29  ;;  %17590 = vtanh.f32 %v7653_v7 }
 0xa73   : > { %v7597_v27 = vpop.f32.mrb[116].mxu0  ;;  %v7669_v22 = vadd.f32 1.0, %v17587_v6  ;;  %v7677_v40 = vmul.f32 %v7668_v44, %v7605_v20 }
 0xa74   : > { %v7637_v37 = vmul.f32 %v7628_v28, %v7593_v29  ;;  %v7598_v10 = vadd.f32 %v20975_v52, %v7597_v27  ;;  %v16843_v21 = vpop.f32.mrb[117].mxu0  ;;  %v7645_v2 = vadd.f32 %v7636_v25, %v7590_v26  ;;  %v16076_v26 = vld [vmem:[%s24235_s8] ss:$0 sm:$0xff] }
 0xa75   : > { %v7600_v17 = vpop.f32.mrb[118].mxu0  ;;  %v7678_v24 = vmul.f32 %v7669_v22, %v7606_v57 }
 0xa76   : > { %v7620_v50 = vmul.f32 0.044715, %v7598_v10  ;;  %v16844_v11 = vpop.f32.mrb[119].mxu0  ;;  %v7646_v23 = vadd.f32 %v7637_v37, %v7593_v29  ;;  %v7654_v49 = vmul.f32 0.7978846, %v7645_v2  ;;  %v7611_v43 = vmul.f32 0.5, %v7598_v10 }
 0xa77   : > { %v7685_v63 = vpack.c.bf16 %v7678_v24, %v7677_v40 }
 0xa78   : > { %v7629_v8 = vmul.f32 %v7620_v50, %v7598_v10  ;;  %v7655_v47 = vmul.f32 0.7978846, %v7646_v23  ;;  %17592 = vtanh.f32 %v7654_v49 }
 0xa79   : > { %16866 = vmatmul.mubr.bf16.gmra.mrb[104].mxu1 %v7685_v63 }
 0xa7a   : > { %v17589_v39 = vpop.eup %17588  ;;  %16869 = vmatprep.mubr.msk.bf16.mxu1 %vm17816_vm1, %v24446_v56  ;;  %17594 = vtanh.f32 %v7655_v47  ;;  %v7638_v52 = vmul.f32 %v7629_v8, %v7598_v10 }
 0xa7b   : > { %v7670_v36 = vadd.f32 1.0, %v17589_v39 }
 0xa7c   : > { %v17591_v33 = vpop.eup %17590  ;;  %v7647_v45 = vadd.f32 %v7638_v52, %v7598_v10 }
 0xa7d   : > { %v7671_v38 = vadd.f32 1.0, %v17591_v33  ;;  %v7679_v34 = vmul.f32 %v7670_v36, %v7607_v54 }
 0xa7e   : > { %v7656_v4 = vmul.f32 0.7978846, %v7647_v45 }
 0xa7f   : > { %v7680_v9 = vmul.f32 %v7671_v38, %v7608_v53 }
 0xa80   : > { %17596 = vtanh.f32 %v7656_v4 }
 0xa81   : > { %v7686_v59 = vpack.c.bf16 %v7680_v9, %v7679_v34 }
 0xa82   : > { %v17593_v31 = vpop.eup %17592 }
 0xa83   : > { %16870 = vmatmul.mubr.bf16.gmra.mrb[108].mxu1 %v7686_v59  ;;  %v7672_v12 = vadd.f32 1.0, %v17593_v31 }
 0xa84   : > { %v17595_v13 = vpop.eup %17594  ;;  %16873 = vmatprep.mubr.msk.bf16.mxu1 %vm17816_vm1, %v24446_v56 }
 0xa85   : > { %v7673_v3 = vadd.f32 1.0, %v17595_v13  ;;  %v7681_v51 = vmul.f32 %v7672_v12, %v7609_v15  ;;  %v17386_v13 = vld [vmem:[%s24228_s1 + $0x10] sm:$0xff]  }
 0xa86   : > { %16882 = vmatpush3.bf16.msra.mxu0 %v17386_v13 }
 0xa87   : > { %v7682_v41 = vmul.f32 %v7673_v3, %v7610_v16  ;;  %16883 = vmatprep.subr.bf16.mxu0 %v24446_v56 }
 0xa89   : > { %v7687_v62 = vpack.c.bf16 %v7682_v41, %v7681_v51 }
 0xa8a   : > { %v17597_v60 = vpop.eup %17596 }
 0xa8b   : > { %16874 = vmatmul.mubr.bf16.gmra.mrb[112].mxu1 %v7687_v62  ;;  %v7674_v19 = vadd.f32 1.0, %v17597_v60 }
 0xa8c   : > { %16877 = vmatprep.mubr.msk.bf16.mxu1 %vm17816_vm1, %v24446_v56 }
 0xa8d   : > { %v7683_v48 = vmul.f32 %v7674_v19, %v7611_v43 }
 0xa8f   : > { %v7688_v5 = vpack.c.bf16 %v7683_v48, %v7683_v48 }
 0xa93   : > { %16878 = vmatmul.mubr.bf16.gmra.mrb[116].mxu1 %v7688_v5 }
 0xa94   : > { %16915 = vmatprep.mubr.msk.bf16.mxu1 %vm17816_vm1, %v24446_v56 }
 0xb3c   : > { %v7794_v29 = vpop.f32.mrb[100].mxu1 }
 0xb3d   : > { %v7795_v42 = vadd.f32 %v16076_v26, %v7794_v29  ;;  %v16863_v7 = vpop.f32.mrb[101].mxu1 }
 0xb3e   : > { %v7797_v44 = vpop.f32.mrb[102].mxu1 }
 0xb3f   : > { %v21007_v6 = vadd.f32 %v7795_v42, %v20810_v30  ;;  %v7798_v25 = vadd.f32 %v16076_v26, %v7797_v44  ;;  %v16864_v28 = vpop.f32.mrb[103].mxu1 }
 0xb41   : > { %24531 = vst [vmem:[#allocation17_spill] sm:$0xff] %v21007_v6  ;;  %v21010_v27 = vadd.f32 %v7798_v25, %v20813_v32  ;;  %v7841_v20 = vsel %vm427_vm0, %v21007_v6, 0.0 }
 0xb42   : > { %7842 = vadd.xlane.f32.xlu0 %v7841_v20 }
 0xb43   : > { %24532 = vst [vmem:[#allocation33_spill] sm:$0xff] %v21010_v27  ;;  %v7844_v57 = vsel %vm427_vm0, %v21010_v27, 0.0 }
 0xb44   : > { %7845 = vadd.xlane.f32.xlu1 %v7844_v57 }
 0xb4c   : > { %v7802_v22 = vpop.f32.mrb[104].mxu1 }
 0xb4d   : > { %v7803_v37 = vadd.f32 %v16076_v26, %v7802_v22  ;;  %v16867_v10 = vpop.f32.mrb[105].mxu1 }
 0xb4e   : > { %v7805_v21 = vpop.f32.mrb[106].mxu1 }
 0xb4f   : > { %v21017_v30 = vadd.f32 %v7803_v37, %v20820_v0  ;;  %v7806_v2 = vadd.f32 %v16076_v26, %v7805_v21  ;;  %v16868_v17 = vpop.f32.mrb[107].mxu1 }
 0xb51   : > { %24533 = vst [vmem:[#allocation32_spill] sm:$0xff] %v21017_v30  ;;  %v21020_v32 = vadd.f32 %v7806_v2, %v20823_v18  ;;  %v7847_v40 = vsel %vm427_vm0, %v21017_v30, 0.0 }
 0xb52   : > { %7848 = vadd.xlane.f32.xlu0 %v7847_v40 }
 0xb53   : > { %24534 = vst [vmem:[#allocation9_spill] sm:$0xff] %v21020_v32  ;;  %v7850_v24 = vsel %vm427_vm0, %v21020_v32, 0.0 }
 0xb54   : > { %7851 = vadd.xlane.f32.xlu1 %v7850_v24 }
 0xb56   : > { %v7810_v50 = vpop.f32.mrb[108].mxu1 }
 0xb57   : > { %v7811_v11 = vadd.f32 %v16076_v26, %v7810_v50  ;;  %v16871_v23 = vpop.f32.mrb[109].mxu1 }
 0xb58   : > { %v7813_v49 = vpop.f32.mrb[110].mxu1 }
 0xb59   : > { %v21027_v0 = vadd.f32 %v7811_v11, %v20830_v14  ;;  %v7814_v63 = vadd.f32 %v16076_v26, %v7813_v49  ;;  %v16872_v8 = vpop.f32.mrb[111].mxu1 }
 0xb5b   : > { %24535 = vst [vmem:[#allocation12_spill] sm:$0xff] %v21027_v0  ;;  %v21030_v18 = vadd.f32 %v7814_v63, %v20833_v46  ;;  %v7853_v47 = vsel %vm427_vm0, %v21027_v0, 0.0 }
 0xb5c   : > { %7854 = vadd.xlane.f32.xlu0 %v7853_v47 }
 0xb5d   : > { %24536 = vst [vmem:[#allocation18_spill] sm:$0xff] %v21030_v18  ;;  %v7856_v39 = vsel %vm427_vm0, %v21030_v18, 0.0 }
 0xb5e   : > { %7857 = vadd.xlane.f32.xlu1 %v7856_v39  ;;  %v7818_v52 = vpop.f32.mrb[112].mxu1 }
 0xb5f   : > { %v7819_v36 = vadd.f32 %v16076_v26, %v7818_v52  ;;  %v16875_v33 = vpop.f32.mrb[113].mxu1 }
 0xb60   : > { %v7821_v45 = vpop.f32.mrb[114].mxu1  ;;  %v17387_v33 = vld [vmem:[%s24228_s1 + $0x18] sm:$0xff]  }
 0xb61   : > { %v21037_v14 = vadd.f32 %v7819_v36, %v20840_v35  ;;  %v7822_v54 = vadd.f32 %v16076_v26, %v7821_v45  ;;  %v16876_v53 = vpop.f32.mrb[115].mxu1  ;;  %16884 = vmatpush3.bf16.msra.mxu0 %v17387_v33 }
 0xb62   : > { %16935 = vmatprep.subr.bf16.mxu0 %v24446_v56 }
 0xb63   : > { %24537 = vst [vmem:[#allocation13_spill] sm:$0xff] %v21037_v14  ;;  %v21040_v46 = vadd.f32 %v7822_v54, %v20843_v61  ;;  %v7859_v38 = vsel %vm427_vm0, %v21037_v14, 0.0 }
 0xb64   : > { %7860 = vadd.xlane.f32.xlu0 %v7859_v38 }
 0xb65   : > { %24538 = vst [vmem:[#allocation3_spill] sm:$0xff] %v21040_v46  ;;  %v7862_v4 = vsel %vm427_vm0, %v21040_v46, 0.0 }
 0xb66   : > { %7863 = vadd.xlane.f32.xlu1 %v7862_v4  ;;  %v7826_v34 = vpop.f32.mrb[116].mxu1 }
 0xb67   : > { %v7827_v9 = vadd.f32 %v16076_v26, %v7826_v34  ;;  %v16879_v59 = vpop.f32.mrb[117].mxu1 }
 0xb68   : > { %v7829_v31 = vpop.f32.mrb[118].mxu1 }
 0xb69   : > { %v21047_v35 = vadd.f32 %v7827_v9, %v20850_v58  ;;  %v16880_v12 = vpop.f32.mrb[119].mxu1 }
 0xb6b   : > { %24539 = vst [vmem:[#allocation27_spill] sm:$0xff] %v21047_v35  ;;  %v7865_v61 = vsel %vm427_vm0, %v21047_v35, 0.0 }
 0xb6c   : > { %7866 = vadd.xlane.f32.xlu0 %v7865_v61 }
 0xbcf   : > { %v7843_v15 = vpop.xlane.xlu0 %7842 }
 0xbd0   : > { %v7868_v16 = vmul.f32 0.03125, %v7843_v15 }
 0xbd1   : > { %v7846_v3 = vpop.xlane.xlu1 %7845 }
 0xbd2   : > { %v21056_v51 = vsub.f32 %v21007_v6, %v7868_v16  ;;  %v7869_v58 = vmul.f32 0.03125, %v7846_v3 }
 0xbd4   : > { %v21059_v41 = vsub.f32 %v21010_v27, %v7869_v58  ;;  %v7886_v62 = vmul.f32 %v21056_v51, %v21056_v51 }
 0xbd6   : > { %v7895_v60 = vsel %vm427_vm0, %v7886_v62, 0.0  ;;  %v7887_v43 = vmul.f32 %v21059_v41, %v21059_v41 }
 0xbd7   : > { %7896 = vadd.xlane.f32.xlu1 %v7895_v60 }
 0xbd8   : > { %v7898_v19 = vsel %vm427_vm0, %v7887_v43, 0.0 }
 0xbd9   : > { %7899 = vadd.xlane.f32.xlu0 %v7898_v19 }
 0xbdf   : > { %v7849_v48 = vpop.xlane.xlu0 %7848 }
 0xbe0   : > { %v7870_v5 = vmul.f32 0.03125, %v7849_v48 }
 0xbe1   : > { %v7852_v26 = vpop.xlane.xlu1 %7851 }
 0xbe2   : > { %v21068_v29 = vsub.f32 %v21017_v30, %v7870_v5  ;;  %v7871_v42 = vmul.f32 0.03125, %v7852_v26 }
 0xbe4   : > { %v21071_v7 = vsub.f32 %v21020_v32, %v7871_v42  ;;  %v7888_v44 = vmul.f32 %v21068_v29, %v21068_v29 }
 0xbe6   : > { %v7901_v25 = vsel %vm427_vm0, %v7888_v44, 0.0  ;;  %v7889_v28 = vmul.f32 %v21071_v7, %v21071_v7 }
 0xbe7   : > { %7902 = vadd.xlane.f32.xlu1 %v7901_v25 }
 0xbe8   : > { %v7904_v20 = vsel %vm427_vm0, %v7889_v28, 0.0 }
 0xbe9   : > { %v7855_v57 = vpop.xlane.xlu0 %7854  ;;  %7905 = vadd.xlane.f32.xlu0 %v7904_v20 }
 0xbea   : > { %v7872_v22 = vmul.f32 0.03125, %v7855_v57 }
 0xbeb   : > { %v7858_v37 = vpop.xlane.xlu1 %7857 }
 0xbec   : > { %v21080_v10 = vsub.f32 %v21027_v0, %v7872_v22  ;;  %v7873_v21 = vmul.f32 0.03125, %v7858_v37 }
 0xbee   : > { %v21083_v2 = vsub.f32 %v21030_v18, %v7873_v21  ;;  %v7890_v17 = vmul.f32 %v21080_v10, %v21080_v10 }
 0xbf0   : > { %v7907_v40 = vsel %vm427_vm0, %v7890_v17, 0.0  ;;  %v7891_v24 = vmul.f32 %v21083_v2, %v21083_v2 }
 0xbf1   : > { %v7861_v50 = vpop.xlane.xlu0 %7860  ;;  %7908 = vadd.xlane.f32.xlu1 %v7907_v40 }
 0xbf2   : > { %v7874_v11 = vmul.f32 0.03125, %v7861_v50  ;;  %v7910_v23 = vsel %vm427_vm0, %v7891_v24, 0.0 }
 0xbf3   : > { %v7864_v49 = vpop.xlane.xlu1 %7863  ;;  %7911 = vadd.xlane.f32.xlu0 %v7910_v23 }
 0xbf4   : > { %v21092_v63 = vsub.f32 %v21037_v14, %v7874_v11  ;;  %v7875_v8 = vmul.f32 0.03125, %v7864_v49 }
 0xbf6   : > { %v21095_v47 = vsub.f32 %v21040_v46, %v7875_v8  ;;  %v7892_v39 = vmul.f32 %v21092_v63, %v21092_v63 }
 0xbf8   : > { %v7913_v52 = vsel %vm427_vm0, %v7892_v39, 0.0  ;;  %v7893_v36 = vmul.f32 %v21095_v47, %v21095_v47 }
 0xbf9   : > { %7914 = vadd.xlane.f32.xlu1 %v7913_v52  ;;  %v7867_v45 = vpop.xlane.xlu0 %7866 }
 0xbfa   : > { %v7876_v54 = vmul.f32 0.03125, %v7867_v45  ;;  %v7916_v53 = vsel %vm427_vm0, %v7893_v36, 0.0 }
 0xbfb   : > { %7917 = vadd.xlane.f32.xlu0 %v7916_v53 }
 0xbfc   : > { %v21108_v38 = vsub.f32 %v21047_v35, %v7876_v54 }
 0xbfe   : > { %v7894_v4 = vmul.f32 %v21108_v38, %v21108_v38 }
 0xc00   : > { %v7919_v34 = vsel %vm427_vm0, %v7894_v4, 0.0 }
 0xc01   : > { %7920 = vadd.xlane.f32.xlu1 %v7919_v34 }
 0xc64   : > { %v7897_v9 = vpop.xlane.xlu1 %7896 }
 0xc65   : > { %v7922_v59 = vmul.f32 0.03125, %v7897_v9 }
 0xc66   : > { %v7900_v31 = vpop.xlane.xlu0 %7899 }
 0xc67   : > { %v7931_v12 = vadd.f32 1e-05, %v7922_v59  ;;  %v7923_v61 = vmul.f32 0.03125, %v7900_v31 }
 0xc69   : > { %17598 = vrsqrt.f32 %v7931_v12  ;;  %v7932_v13 = vadd.f32 1e-05, %v7923_v61 }
 0xc6b   : > { %17600 = vrsqrt.f32 %v7932_v13 }
 0xc73   : > { %v17599_v15 = vpop.eup %17598 }
 0xc74   : > { %v7903_v16 = vpop.xlane.xlu1 %7902  ;;  %v7949_v62 = vmul.f32 %v17599_v15, %v21056_v51 }
 0xc75   : > { %v17601_v3 = vpop.eup %17600  ;;  %v7924_v58 = vmul.f32 0.03125, %v7903_v16 }
 0xc76   : > { %v7950_v60 = vmul.f32 %v17601_v3, %v21059_v41  ;;  %v7906_v43 = vpop.xlane.xlu0 %7905 }
 0xc77   : > { %v7933_v19 = vadd.f32 1e-05, %v7924_v58  ;;  %v7925_v48 = vmul.f32 0.03125, %v7906_v43 }
 0xc78   : > { %v7958_v5 = vpack.c.bf16 %v7950_v60, %v7949_v62 }
 0xc79   : > { %17602 = vrsqrt.f32 %v7933_v19  ;;  %v7934_v26 = vadd.f32 1e-05, %v7925_v48 }
 0xc7a   : > { %16886 = vmatmul.mubr.msk.bf16.vlgmr.msra.gmra.mrb[120].mxu0 %vm427_vm0, %v7958_v5 }
 0xc7b   : > { %17604 = vrsqrt.f32 %v7934_v26  ;;  %16889 = vmatprep.mubr.msk.bf16.mxu0 %vm17816_vm1, %v24446_v56 }
 0xc7e   : > { %v7909_v42 = vpop.xlane.xlu1 %7908 }
 0xc7f   : > { %v7926_v44 = vmul.f32 0.03125, %v7909_v42 }
 0xc80   : > { %v7912_v25 = vpop.xlane.xlu0 %7911 }
 0xc81   : > { %v7935_v28 = vadd.f32 1e-05, %v7926_v44  ;;  %v7927_v20 = vmul.f32 0.03125, %v7912_v25 }
 0xc83   : > { %v17603_v51 = vpop.eup %17602  ;;  %17606 = vrsqrt.f32 %v7935_v28  ;;  %v7936_v41 = vadd.f32 1e-05, %v7927_v20 }
 0xc84   : > { %v7951_v37 = vmul.f32 %v17603_v51, %v21068_v29 }
 0xc85   : > { %v17605_v57 = vpop.eup %17604  ;;  %17608 = vrsqrt.f32 %v7936_v41 }
 0xc86   : > { %v7915_v22 = vpop.xlane.xlu1 %7914  ;;  %v7952_v21 = vmul.f32 %v17605_v57, %v21071_v7 }
 0xc87   : > { %v7928_v17 = vmul.f32 0.03125, %v7915_v22 }
 0xc88   : > { %v7918_v40 = vpop.xlane.xlu0 %7917  ;;  %v7959_v24 = vpack.c.bf16 %v7952_v21, %v7951_v37 }
 0xc89   : > { %v7937_v50 = vadd.f32 1e-05, %v7928_v17  ;;  %v7929_v11 = vmul.f32 0.03125, %v7918_v40 }
 0xc8a   : > { %16890 = vmatmul.mubr.msk.bf16.gmra.mrb[124].mxu0 %vm427_vm0, %v7959_v24 }
 0xc8b   : > { %17610 = vrsqrt.f32 %v7937_v50  ;;  %v7938_v23 = vadd.f32 1e-05, %v7929_v11  ;;  %16893 = vmatprep.mubr.msk.bf16.mxu0 %vm17816_vm1, %v24446_v56 }
 0xc8d   : > { %v17607_v49 = vpop.eup %17606  ;;  %17612 = vrsqrt.f32 %v7938_v23 }
 0xc8e   : > { %v7921_v8 = vpop.xlane.xlu1 %7920  ;;  %v7953_v29 = vmul.f32 %v17607_v49, %v21080_v10 }
 0xc8f   : > { %v17609_v39 = vpop.eup %17608  ;;  %v7930_v52 = vmul.f32 0.03125, %v7921_v8 }
 0xc90   : > { %v7954_v7 = vmul.f32 %v17609_v39, %v21083_v2 }
 0xc91   : > { %v7939_v36 = vadd.f32 1e-05, %v7930_v52 }
 0xc92   : > { %v7960_v33 = vpack.c.bf16 %v7954_v7, %v7953_v29 }
 0xc93   : > { %17614 = vrsqrt.f32 %v7939_v36 }
 0xc94   : > { %16894 = vmatmul.mubr.msk.bf16.gmra.mrb[128].mxu0 %vm427_vm0, %v7960_v33 }
 0xc95   : > { %v17611_v45 = vpop.eup %17610  ;;  %16897 = vmatprep.mubr.msk.bf16.mxu0 %vm17816_vm1, %v24446_v56 }
 0xc96   : > { %v7955_v53 = vmul.f32 %v17611_v45, %v21092_v63  ;;  %v16090_v63 = vld [vmem:[%s24229_s2 + $0x1] ss:$0 sm:$0xff] }
 0xc97   : > { %v17613_v54 = vpop.eup %17612 }
 0xc98   : > { %v7956_v4 = vmul.f32 %v17613_v54, %v21095_v47 }
 0xc9a   : > { %v7961_v34 = vpack.c.bf16 %v7956_v4, %v7955_v53 }
 0xc9c   : > { %16898 = vmatmul.mubr.msk.bf16.gmra.mrb[132].mxu0 %vm427_vm0, %v7961_v34 }
 0xc9d   : > { %v17615_v10 = vpop.eup %17614  ;;  %16901 = vmatprep.mubr.msk.bf16.mxu0 %vm17816_vm1, %v24446_v56 }
 0xc9e   : > { %v7957_v2 = vmul.f32 %v17615_v10, %v21108_v38 }
 0xca0   : > { %v7962_v9 = vpack.c.bf16 %v7957_v2, %v7957_v2 }
 0xca4   : > { %16902 = vmatmul.mubr.msk.bf16.gmra.mrb[136].mxu0 %vm427_vm0, %v7962_v9 }
 0xca5   : > { %16945 = vmatprep.mubr.msk.bf16.mxu0 %vm17816_vm1, %v24446_v56 }
 0xd4d   : > { %v8037_v47 = vpop.f32.mrb[120].mxu0 }
 0xd4e   : > { %v21140_v59 = vadd.f32 %v16090_v63, %v8037_v47  ;;  %v16887_v31 = vpop.f32.mrb[121].mxu0 }
 0xd4f   : > { %v8040_v12 = vpop.f32.mrb[122].mxu0 }
 0xd50   : > { %8111 = vrot.lane.b32.xlu1 %v21140_v59, %s17817_s29  ;;  %8084 = vrot.lane.b32.xlu0 %v21140_v59, %s17818_s30  ;;  %v16888_v38 = vpop.f32.mrb[123].mxu0  ;;  %v21150_v61 = vadd.f32 %v16090_v63, %v8040_v12 }
 0xd54   : > { %9409 = vrot.lane.b32.xlu1 %v21140_v59, %s17819_s12  ;;  %8138 = vrot.lane.b32.xlu0 %v21140_v59, %s17820_s13 }
 0xd58   : > { %9411 = vrot.lane.b32.xlu0 %v21150_v61, %s17819_s12  ;;  %8086 = vrot.lane.b32.xlu1 %v21150_v61, %s17818_s30 }
 0xd5c   : > { %8113 = vrot.lane.b32.xlu1 %v21150_v61, %s17817_s29 }
 0xd5d   : > { %v8045_v13 = vpop.f32.mrb[124].mxu0 }
 0xd5e   : > { %v21158_v15 = vadd.f32 %v16090_v63, %v8045_v13  ;;  %v16891_v16 = vpop.f32.mrb[125].mxu0 }
 0xd5f   : > { %v8048_v3 = vpop.f32.mrb[126].mxu0 }
 0xd60   : > { %v16892_v58 = vpop.f32.mrb[127].mxu0  ;;  %8088 = vrot.lane.b32.xlu0 %v21158_v15, %s17818_s30  ;;  %8140 = vrot.lane.b32.xlu1 %v21150_v61, %s17820_s13  ;;  %v21168_v62 = vadd.f32 %v16090_v63, %v8048_v3 }
 0xd64   : > { %8115 = vrot.lane.b32.xlu0 %v21158_v15, %s17817_s29  ;;  %9413 = vrot.lane.b32.xlu1 %v21158_v15, %s17819_s12 }
 0xd67   : > { %v8053_v60 = vpop.f32.mrb[128].mxu0 }
 0xd68   : > { %v16895_v43 = vpop.f32.mrb[129].mxu0  ;;  %8142 = vrot.lane.b32.xlu0 %v21158_v15, %s17820_s13  ;;  %8090 = vrot.lane.b32.xlu1 %v21168_v62, %s17818_s30  ;;  %v21178_v5 = vadd.f32 %v16090_v63, %v8053_v60 }
 0xd69   : > { %v8056_v19 = vpop.f32.mrb[130].mxu0 }
 0xd6a   : > { %v16896_v48 = vpop.f32.mrb[131].mxu0  ;;  %v21184_v25 = vadd.f32 %v16090_v63, %v8056_v19 }
 0xd6c   : > { %9415 = vrot.lane.b32.xlu0 %v21168_v62, %s17819_s12  ;;  %8117 = vrot.lane.b32.xlu1 %v21168_v62, %s17817_s29 }
 0xd6f   : > { %v8061_v26 = vpop.f32.mrb[132].mxu0 }
 0xd70   : > { %v16899_v42 = vpop.f32.mrb[133].mxu0  ;;  %8092 = vrot.lane.b32.xlu0 %v21178_v5, %s17818_s30  ;;  %8144 = vrot.lane.b32.xlu1 %v21168_v62, %s17820_s13  ;;  %v21194_v57 = vadd.f32 %v16090_v63, %v8061_v26 }
 0xd71   : > { %v8064_v44 = vpop.f32.mrb[134].mxu0 }
 0xd72   : > { %v16900_v28 = vpop.f32.mrb[135].mxu0  ;;  %24540 = vst [vmem:[#allocation28_spill] sm:$0xff] %v21194_v57  ;;  %v21200_v37 = vadd.f32 %v16090_v63, %v8064_v44 }
 0xd74   : > { %8119 = vrot.lane.b32.xlu0 %v21178_v5, %s17817_s29  ;;  %8094 = vrot.lane.b32.xlu1 %v21184_v25, %s17818_s30 }
 0xd77   : > { %v8069_v20 = vpop.f32.mrb[136].mxu0 }
 0xd78   : > { %v16903_v51 = vpop.f32.mrb[137].mxu0  ;;  %8146 = vrot.lane.b32.xlu0 %v21178_v5, %s17820_s13  ;;  %8121 = vrot.lane.b32.xlu1 %v21184_v25, %s17817_s29  ;;  %v21214_v21 = vadd.f32 %v16090_v63, %v8069_v20 }
 0xd79   : > { %v8072_v41 = vpop.f32.mrb[138].mxu0 }
 0xd7a   : > { %v16904_v22 = vpop.f32.mrb[139].mxu0 }
 0xd7c   : > { %8096 = vrot.lane.b32.xlu0 %v21194_v57, %s17818_s30  ;;  %8148 = vrot.lane.b32.xlu1 %v21184_v25, %s17820_s13 }
 0xd80   : > { %8123 = vrot.lane.b32.xlu0 %v21194_v57, %s17817_s29  ;;  %8098 = vrot.lane.b32.xlu1 %v21200_v37, %s17818_s30 }
 0xd84   : > { %8150 = vrot.lane.b32.xlu0 %v21194_v57, %s17820_s13  ;;  %8125 = vrot.lane.b32.xlu1 %v21200_v37, %s17817_s29 }
 0xd88   : > { %9419 = vrot.lane.b32.xlu0 %v21184_v25, %s17819_s12  ;;  %8152 = vrot.lane.b32.xlu1 %v21200_v37, %s17820_s13 }
 0xd8c   : > { %8100 = vrot.lane.b32.xlu0 %v21214_v21, %s17818_s30  ;;  %9417 = vrot.lane.b32.xlu1 %v21178_v5, %s17819_s12 }
 0xd90   : > { %8154 = vrot.lane.b32.xlu0 %v21214_v21, %s17820_s13  ;;  %8127 = vrot.lane.b32.xlu1 %v21214_v21, %s17817_s29 }
 0xd94   : > { %9423 = vrot.lane.b32.xlu0 %v21200_v37, %s17819_s12  ;;  %9421 = vrot.lane.b32.xlu1 %v21194_v57, %s17819_s12 }
 0xdc2   : > { %v21228_v17 = vpop.permute.xlu1 %8111  ;;  %v21230_v40 = vpop.permute.xlu0 %8084 }
 0xdc3   : > { %9427 = vrot.lane.b32.xlu1 %v21230_v40, %s17819_s12  ;;  %v8165_v4 = vcombine.low %v21140_v59, %v21228_v17  ;;  %v8166_v34 = vcombine.high %v21140_v59, %v21228_v17 }
 0xdc5   : > { %v8173_v47 = vrot.slane %v8165_v4, %v24530_v1  ;;  %v8180_v31 = vrot.slane %v8166_v34, %v24530_v1 }
 0xdc6   : > { %v21234_v24 = vpop.permute.xlu1 %9409  ;;  %v21236_v50 = vpop.permute.xlu0 %8138 }
 0xdc7   : > { %24541 = vst [vmem:[#allocation30_spill] sm:$0xff] %v21234_v24  ;;  %9445 = vrot.lane.b32.xlu1 %v21228_v17, %s17819_s12  ;;  %v8181_v54 = vcombine.low %v21230_v40, %v21236_v50  ;;  %v8182_v53 = vcombine.high %v21230_v40, %v21236_v50 }
 0xdc9   : > { %v8189_v9 = vrot.slane %v8181_v54, %v24530_v1  ;;  %v8196_v63 = vrot.slane %v8182_v53, %v24530_v1 }
 0xdca   : > { %v21240_v11 = vpop.permute.xlu1 %8086  ;;  %v21244_v23 = vpop.permute.xlu0 %9411 }
 0xdcb   : > { %9429 = vrot.lane.b32.xlu0 %v21240_v11, %s17819_s12  ;;  %24542 = vst [vmem:[#allocation22_spill] sm:$0xff] %v21244_v23  ;;  %9463 = vrot.lane.b32.xlu1 %v21236_v50, %s17819_s12  ;;  %v8197_v13 = vcombine.low %v8173_v47, %v8189_v9  ;;  %v8198_v16 = vcombine.high %v8173_v47, %v8189_v9 }
 0xdcc   : > { %v8213_v3 = vcombine.low %v8180_v31, %v8196_v63  ;;  %v8214_v58 = vcombine.high %v8180_v31, %v8196_v63 }
 0xdcd   : > { %v8205_v48 = vrot.slane %v8197_v13, %v18180_v55  ;;  %v8212_v26 = vrot.slane %v8198_v16, %v18180_v55 }
 0xdce   : > { %v21248_v49 = vpop.permute.xlu1 %8113  ;;  %v8221_v42 = vrot.slane %v8213_v3, %v18180_v55  ;;  %v8228_v44 = vrot.slane %v8214_v58, %v18180_v55 }
 0xdcf   : > { %9447 = vrot.lane.b32.xlu0 %v21248_v49, %s17819_s12  ;;  %v8233_v28 = vcombine.low %v21150_v61, %v21248_v49  ;;  %v8777_v54 = vcombine.low %v8205_v48, %v8212_v26  ;;  %v8234_v53 = vcombine.high %v21150_v61, %v21248_v49  ;;  %v16098_v4 = vcombine.high %v8205_v48, %v8212_v26 }
 0xdd0   : > { %v8793_v34 = vcombine.low %v8221_v42, %v8228_v44  ;;  %v16099_v9 = vcombine.high %v8221_v42, %v8228_v44 }
 0xdd1   : > { %v8241_v63 = vrot.slane %v8233_v28, %v24530_v1  ;;  %v8248_v48 = vrot.slane %v8234_v53, %v24530_v1  ;;  %v8792_v42 = vrot.slane %v16098_v4, %v24530_v1 }
 0xdd2   : > { %v21252_v8 = vpop.permute.xlu0 %8088  ;;  %v21254_v39 = vpop.permute.xlu1 %8140  ;;  %v8800_v44 = vrot.slane %v8793_v34, %v24530_v1  ;;  %v8808_v28 = vrot.slane %v16099_v9, %v24530_v1 }
 0xdd3   : > { %9431 = vrot.lane.b32.xlu1 %v21252_v8, %s17819_s12  ;;  %9465 = vrot.lane.b32.xlu0 %v21254_v39, %s17819_s12  ;;  %v8249_v60 = vcombine.low %v21240_v11, %v21254_v39  ;;  %v8250_v20 = vcombine.high %v21240_v11, %v21254_v39 }
 0xdd5   : > { %v8257_v51 = vrot.slane %v8249_v60, %v24530_v1  ;;  %v8264_v47 = vrot.slane %v8250_v20, %v24530_v1  ;;  %v8784_v60 = vrot.slane %v8777_v54, %v24530_v1 }
 0xdd6   : > { %v21260_v52 = vpop.permute.xlu0 %8115  ;;  %v21262_v29 = vpop.permute.xlu1 %9413 }
 0xdd7   : > { %24543 = vst [vmem:[#allocation29_spill] sm:$0xff] %v21262_v29  ;;  %9449 = vrot.lane.b32.xlu1 %v21260_v52, %s17819_s12  ;;  %v8265_v31 = vcombine.low %v8241_v63, %v8257_v51  ;;  %v8266_v13 = vcombine.high %v8241_v63, %v8257_v51  ;;  %v8301_v20 = vcombine.low %v21158_v15, %v21260_v52 }
 0xdd8   : > { %v8281_v51 = vcombine.low %v8248_v48, %v8264_v47  ;;  %v8282_v54 = vcombine.high %v8248_v48, %v8264_v47  ;;  %v8302_v53 = vcombine.high %v21158_v15, %v21260_v52  ;;  %v8809_v14 = vcombine.low %v8784_v60, %v8792_v42 }
 0xdd9   : > { %v8273_v63 = vrot.slane %v8265_v31, %v18180_v55  ;;  %v8280_v35 = vrot.slane %v8266_v13, %v18180_v55  ;;  %v8825_v47 = vcombine.low %v8800_v44, %v8808_v28  ;;  %v8309_v48 = vrot.slane %v8301_v20, %v24530_v1 }
 0xdda   : > { %v21266_v7 = vpop.permute.xlu0 %8142  ;;  %v21268_v36 = vpop.permute.xlu1 %8090  ;;  %v8289_v31 = vrot.slane %v8281_v51, %v18180_v55  ;;  %v8296_v13 = vrot.slane %v8282_v54, %v18180_v55  ;;  %v8826_v54 = vcombine.high %v8800_v44, %v8808_v28 }
 0xddb   : > { %24544 = vst [vmem:[#allocation15_spill] sm:$0xff] %v21266_v7  ;;  %9467 = vrot.lane.b32.xlu1 %v21266_v7, %s17819_s12  ;;  %9433 = vrot.lane.b32.xlu0 %v21268_v36, %s17819_s12  ;;  %v8317_v16 = vcombine.low %v21252_v8, %v21266_v7  ;;  %v8318_v26 = vcombine.high %v21252_v8, %v21266_v7 }
 0xddc   : > { %v8845_v0 = vcombine.low %v8273_v63, %v8280_v35  ;;  %v16100_v32 = vcombine.high %v8273_v63, %v8280_v35  ;;  %v21391_v35 = vrot.slane %v8809_v14, %v18180_v55 }
 0xddd   : > { %v8325_v4 = vrot.slane %v8317_v16, %v24530_v1  ;;  %v8332_v46 = vrot.slane %v8318_v26, %v24530_v1  ;;  %v8316_v16 = vrot.slane %v8302_v53, %v24530_v1  ;;  %v8810_v26 = vcombine.high %v8784_v60, %v8792_v42 }
 0xdde   : > { %v21274_v33 = vpop.permute.xlu0 %9415  ;;  %v21276_v45 = vpop.permute.xlu1 %8117  ;;  %v21394_v42 = vrot.slane %v8825_v47, %v18180_v55  ;;  %v16101_v53 = vcombine.high %v8289_v31, %v8296_v13  ;;  %v21401_v44 = vrot.slane %v16100_v32, %v24530_v1 }
 0xddf   : > { %24545 = vst [vmem:[#allocation4_spill] sm:$0xff] %v21274_v33  ;;  %9451 = vrot.lane.b32.xlu0 %v21276_v45, %s17819_s12  ;;  %v8333_v30 = vcombine.low %v8309_v48, %v8325_v4  ;;  %v8334_v20 = vcombine.high %v8309_v48, %v8325_v4  ;;  %v8349_v56 = vcombine.low %v8316_v16, %v8332_v46 }
 0xde0   : > { %v8350_v33 = vcombine.high %v8316_v16, %v8332_v46  ;;  %v8369_v51 = vcombine.low %v21168_v62, %v21276_v45  ;;  %v8861_v46 = vcombine.low %v8289_v31, %v8296_v13  ;;  %v21398_v4 = vrot.slane %v8845_v0, %v24530_v1  ;;  %24557 = vst [vmem:[#allocation39_spill] sm:$0xff] %v21401_v44 }
 0xde1   : > { %v8341_v28 = vrot.slane %v8333_v30, %v18180_v55  ;;  %v8370_v48 = vcombine.high %v21168_v62, %v21276_v45  ;;  %v8348_v47 = vrot.slane %v8334_v20, %v18180_v55  ;;  %v8357_v31 = vrot.slane %v8349_v56, %v18180_v55 }
 0xde2   : > { %v21288_v10 = vpop.permute.xlu0 %8092  ;;  %v21290_v2 = vpop.permute.xlu1 %8144  ;;  %24556 = vst [vmem:[#allocation38_spill] sm:$0xff] %v21398_v4  ;;  %v8377_v0 = vrot.slane %v8369_v51, %v24530_v1  ;;  %v21420_v13 = vrot.slane %v8810_v26, %v18180_v55  ;;  %v21426_v56 = vrot.slane %v8861_v46, %v24530_v1 }
 0xde3   : > { %9435 = vrot.lane.b32.xlu1 %v21288_v10, %s17819_s12  ;;  %9469 = vrot.lane.b32.xlu0 %v21290_v2, %s17819_s12  ;;  %v8385_v18 = vcombine.low %v21268_v36, %v21290_v2  ;;  %v8386_v60 = vcombine.high %v21268_v36, %v21290_v2  ;;  %v8913_v46 = vcombine.low %v8341_v28, %v8348_v47 }
 0xde4   : > { %v16102_v29 = vcombine.high %v8341_v28, %v8348_v47 }
 0xde5   : > { %v8393_v63 = vrot.slane %v8385_v18, %v24530_v1  ;;  %v8364_v18 = vrot.slane %v8350_v33, %v18180_v55  ;;  %v8400_v32 = vrot.slane %v8386_v60, %v24530_v1  ;;  %v21429_v33 = vrot.slane %v16101_v53, %v24530_v1 }
 0xde6   : > { %v21300_v12 = vpop.permute.xlu0 %8119  ;;  %v21302_v38 = vpop.permute.xlu1 %8094  ;;  %v8877_v60 = vcombine.low %v21398_v4, %v21401_v44 }
 0xde7   : > { %24546 = vst [vmem:[#allocation25_spill] sm:$0xff] %v21300_v12  ;;  %9453 = vrot.lane.b32.xlu1 %v21300_v12, %s17819_s12  ;;  %9437 = vrot.lane.b32.xlu0 %v21302_v38, %s17819_s12  ;;  %v8401_v20 = vcombine.low %v8377_v0, %v8393_v63  ;;  %v8402_v51 = vcombine.high %v8377_v0, %v8393_v63 }
 0xde8   : > { %v8929_v23 = vcombine.low %v8357_v31, %v8364_v18  ;;  %v16103_v53 = vcombine.high %v8357_v31, %v8364_v18  ;;  %v8893_v28 = vcombine.low %v21426_v56, %v21429_v33 }
 0xde9   : > { %v8409_v47 = vrot.slane %v8401_v20, %v18180_v55  ;;  %v8416_v31 = vrot.slane %v8402_v51, %v18180_v55  ;;  %v21467_v20 = vrot.slane %v8913_v46, %v24530_v1  ;;  %v21470_v51 = vrot.slane %v16102_v29, %v24530_v1 }
 0xdea   : > { %v21310_v43 = vpop.permute.xlu0 %8146  ;;  %v21312_v19 = vpop.permute.xlu1 %8121  ;;  %v21473_v18 = vrot.slane %v8929_v23, %v24530_v1  ;;  %v21487_v44 = vrot.slane %v8893_v28, %v18180_v55 }
 0xdeb   : > { %24547 = vst [vmem:[#allocation24_spill] sm:$0xff] %v21310_v43  ;;  %9471 = vrot.lane.b32.xlu1 %v21310_v43, %s17819_s12  ;;  %9455 = vrot.lane.b32.xlu0 %v21312_v19, %s17819_s12  ;;  %v8453_v26 = vcombine.low %v21288_v10, %v21310_v43  ;;  %v8454_v7 = vcombine.high %v21288_v10, %v21310_v43  ;;  %24561 = vst [vmem:[#allocation43_spill] sm:$0xff] %v21467_v20 }
 0xdec   : > { %v21462_v43 = vrot.slane %v8877_v60, %v18180_v55  ;;  %24562 = vst [vmem:[#allocation44_spill] sm:$0xff] %v21473_v18  ;;  %v8981_v46 = vcombine.low %v8409_v47, %v8416_v31  ;;  %v16104_v29 = vcombine.high %v8409_v47, %v8416_v31 }
 0xdee   : > { %v21327_v41 = vpop.permute.xlu0 %8096  ;;  %v21329_v22 = vpop.permute.xlu1 %8148 }
 0xdef   : > { %24548 = vst [vmem:[#allocation7_spill] sm:$0xff] %v21327_v41  ;;  %24549 = vst [vmem:[#allocation20_spill] sm:$0xff] %v21329_v22  ;;  %9439 = vrot.lane.b32.xlu1 %v21327_v41, %s17819_s12  ;;  %9473 = vrot.lane.b32.xlu0 %v21329_v22, %s17819_s12  ;;  %v8521_v23 = vcombine.low %v21302_v38, %v21329_v22 }
 0xdf2   : > { %v21341_v3 = vpop.permute.xlu0 %8123  ;;  %v21343_v58 = vpop.permute.xlu1 %8098 }
 0xdf3   : > { %24550 = vst [vmem:[#allocation31_spill] sm:$0xff] %v21341_v3  ;;  %24551 = vst [vmem:[#allocation11_spill] sm:$0xff] %v21343_v58  ;;  %9457 = vrot.lane.b32.xlu1 %v21341_v3, %s17819_s12  ;;  %9441 = vrot.lane.b32.xlu0 %v21343_v58, %s17819_s12 }
 0xdf6   : > { %v21363_v34 = vpop.permute.xlu0 %8150  ;;  %v21365_v9 = vpop.permute.xlu1 %8125 }
 0xdf7   : > { %24552 = vst [vmem:[#allocation34_spill] sm:$0xff] %v21363_v34  ;;  %24553 = vst [vmem:[#allocation35_spill] sm:$0xff] %v21365_v9  ;;  %9475 = vrot.lane.b32.xlu1 %v21363_v34, %s17819_s12  ;;  %9459 = vrot.lane.b32.xlu0 %v21365_v9, %s17819_s12 }
 0xdfa   : > { %v21378_v27 = vpop.permute.xlu0 %9419  ;;  %v21380_v6 = vpop.permute.xlu1 %8152 }
 0xdfb   : > { %24554 = vst [vmem:[#allocation36_spill] sm:$0xff] %v21378_v27  ;;  %24555 = vst [vmem:[#allocation37_spill] sm:$0xff] %v21380_v6  ;;  %9425 = vrot.lane.b32.xlu1 %v21214_v21, %s17819_s12  ;;  %9477 = vrot.lane.b32.xlu0 %v21380_v6, %s17819_s12  ;;  %v21423_v27 = vrot.slane %v8826_v54, %v18180_v55  ;;  %v8461_v54 = vrot.slane %v8453_v26, %v24530_v1 }
 0xdfe   : > { %v21406_v14 = vpop.permute.xlu0 %8100  ;;  %v21408_v16 = vpop.permute.xlu1 %9417 }
 0xdff   : > { %24558 = vst [vmem:[#allocation40_spill] sm:$0xff] %v21408_v16  ;;  %9443 = vrot.lane.b32.xlu0 %v21406_v14, %s17819_s12  ;;  %v8384_v16 = vrot.slane %v8370_v48, %v24530_v1  ;;  %v8437_v48 = vcombine.low %v21178_v5, %v21300_v12 }
 0xe01   : > { %v8417_v63 = vcombine.low %v8384_v16, %v8400_v32  ;;  %v8418_v0 = vcombine.high %v8384_v16, %v8400_v32  ;;  %v8438_v32 = vcombine.high %v21178_v5, %v21300_v12  ;;  %v21476_v16 = vrot.slane %v16103_v53, %v24530_v1 }
 0xe02   : > { %v21436_v30 = vpop.permute.xlu1 %8127  ;;  %v21440_v24 = vpop.permute.xlu0 %8154  ;;  %v8445_v12 = vrot.slane %v8437_v48, %v24530_v1  ;;  %v8945_v48 = vcombine.low %v21467_v20, %v21470_v51  ;;  %v21511_v20 = vrot.slane %v16104_v29, %v24530_v1 }
 0xe03   : > { %24559 = vst [vmem:[#allocation41_spill] sm:$0xff] %v21436_v30  ;;  %24560 = vst [vmem:[#allocation42_spill] sm:$0xff] %v21440_v24  ;;  %9461 = vrot.lane.b32.xlu1 %v21436_v30, %s17819_s12  ;;  %9479 = vrot.lane.b32.xlu0 %v21440_v24, %s17819_s12  ;;  %v8425_v26 = vrot.slane %v8417_v63, %v18180_v55  ;;  %v8432_v60 = vrot.slane %v8418_v0, %v18180_v55 }
 0xe04   : > { %v8452_v53 = vrot.slane %v8438_v32, %v24530_v1  ;;  %v8469_v63 = vcombine.low %v8445_v12, %v8461_v54  ;;  %v8470_v4 = vcombine.high %v8445_v12, %v8461_v54  ;;  %v8522_v0 = vcombine.high %v21302_v38, %v21329_v22 }
 0xe05   : > { %v8961_v28 = vcombine.low %v21473_v18, %v21476_v16  ;;  %v8997_v47 = vcombine.low %v8425_v26, %v8432_v60  ;;  %v16105_v12 = vcombine.high %v8425_v26, %v8432_v60  ;;  %v8529_v32 = vrot.slane %v8521_v23, %v24530_v1 }
 0xe06   : > { %v21514_v18 = vrot.slane %v8469_v63, %v18180_v55  ;;  %v21517_v26 = vrot.slane %v8470_v4, %v18180_v55  ;;  %v8536_v60 = vrot.slane %v8522_v0, %v24530_v1  ;;  %v8642_v22 = vcombine.high %v21200_v37, %v21365_v9 }
 0xe07   : > { %10761 = vrot.lane.b32.xlu1 %v21140_v59, %s17823_s14  ;;  %v8468_v59 = vrot.slane %v8454_v7, %v24530_v1  ;;  %10763 = vrot.lane.b32.xlu0 %v21150_v61, %s17823_s14  ;;  %v8505_v7 = vcombine.low %v21184_v25, %v21312_v19  ;;  %v8506_v61 = vcombine.high %v21184_v25, %v21312_v19 }
 0xe08   : > { %v21530_v29 = vrot.slane %v8961_v28, %v18180_v55  ;;  %v21541_v63 = vrot.slane %v8997_v47, %v24530_v1  ;;  %v9049_v28 = vcombine.low %v21514_v18, %v21517_v26  ;;  %v8573_v47 = vcombine.low %v21194_v57, %v21341_v3 }
 0xe09   : > { %v8485_v54 = vcombine.low %v8452_v53, %v8468_v59  ;;  %v8486_v31 = vcombine.high %v8452_v53, %v8468_v59  ;;  %v8513_v59 = vrot.slane %v8505_v7, %v24530_v1  ;;  %v8520_v23 = vrot.slane %v8506_v61, %v24530_v1 }
 0xe0a   : > { %v8657_v61 = vcombine.low %v21343_v58, %v21380_v6 }
 0xe0b   : > { %10779 = vrot.lane.b32.xlu1 %v21230_v40, %s17823_s14  ;;  %10799 = vrot.lane.b32.xlu0 %v21248_v49, %s17823_s14  ;;  %v21508_v40 = vrot.slane %v8981_v46, %v24530_v1  ;;  %v21527_v46 = vrot.slane %v8945_v48, %v18180_v55  ;;  %v21533_v4 = vrot.slane %v8485_v54, %v18180_v55 }
 0xe0c   : > { %v21536_v53 = vrot.slane %v8486_v31, %v18180_v55  ;;  %v8537_v0 = vcombine.low %v8513_v59, %v8529_v32  ;;  %v8538_v7 = vcombine.high %v8513_v59, %v8529_v32  ;;  %v8553_v54 = vcombine.low %v8520_v23, %v8536_v60 }
 0xe0d   : > { %v8554_v31 = vcombine.high %v8520_v23, %v8536_v60  ;;  %v8590_v32 = vcombine.high %v21327_v41, %v21363_v34  ;;  %v8641_v59 = vcombine.low %v21200_v37, %v21365_v9  ;;  %v16106_v60 = vcombine.high %v21514_v18, %v21517_v26 }
 0xe0e   : > { %v8574_v49 = vcombine.high %v21194_v57, %v21341_v3  ;;  %v8665_v18 = vrot.slane %v8657_v61, %v24530_v1  ;;  %v8561_v26 = vrot.slane %v8553_v54, %v18180_v55  ;;  %v8656_v61 = vrot.slane %v8642_v22, %v24530_v1 }
 0xe0f   : > { %10781 = vrot.lane.b32.xlu1 %v21240_v11, %s17823_s14  ;;  %10817 = vrot.lane.b32.xlu0 %v21254_v39, %s17823_s14  ;;  %v21544_v11 = vrot.slane %v16105_v12, %v24530_v1  ;;  %v8658_v39 = vcombine.high %v21343_v58, %v21380_v6  ;;  %v8589_v12 = vcombine.low %v21327_v41, %v21363_v34 }
 0xe10   : > { %v8552_v34 = vrot.slane %v8538_v7, %v18180_v55  ;;  %v8568_v23 = vrot.slane %v8554_v31, %v18180_v55  ;;  %v8604_v48 = vrot.slane %v8590_v32, %v24530_v1  ;;  %v8588_v7 = vrot.slane %v8574_v49, %v24530_v1 }
 0xe11   : > { %v8672_v3 = vrot.slane %v8658_v39, %v24530_v1  ;;  %v8597_v41 = vrot.slane %v8589_v12, %v24530_v1  ;;  %v8709_v54 = vcombine.low %v21214_v21, %v21436_v30  ;;  %v8710_v31 = vcombine.high %v21214_v21, %v21436_v30 }
 0xe12   : > { %v8726_v22 = vcombine.high %v21406_v14, %v21440_v24  ;;  %v8621_v57 = vcombine.low %v8588_v7, %v8604_v48  ;;  %v8622_v9 = vcombine.high %v8588_v7, %v8604_v48  ;;  %v16109_v30 = vcombine.high %v8561_v26, %v8568_v23 }
 0xe13   : > { %10797 = vrot.lane.b32.xlu1 %v21228_v17, %s17823_s14  ;;  %10765 = vrot.lane.b32.xlu0 %v21158_v15, %s17823_s14  ;;  %v8545_v17 = vrot.slane %v8537_v0, %v18180_v55  ;;  %v8581_v15 = vrot.slane %v8573_v47, %v24530_v1  ;;  %v8649_v0 = vrot.slane %v8641_v59, %v24530_v1 }
 0xe14   : > { %v8689_v59 = vcombine.low %v8656_v61, %v8672_v3  ;;  %v8690_v58 = vcombine.high %v8656_v61, %v8672_v3  ;;  %v21614_v48 = vrot.slane %v16106_v60, %v24530_v1  ;;  %v8629_v7 = vrot.slane %v8621_v57, %v18180_v55 }
 0xe15   : > { %v9117_v39 = vcombine.low %v8545_v17, %v8552_v34  ;;  %v16108_v47 = vcombine.high %v8545_v17, %v8552_v34  ;;  %v8673_v12 = vcombine.low %v8649_v0, %v8665_v18  ;;  %v8674_v32 = vcombine.high %v8649_v0, %v8665_v18 }
 0xe16   : > { %v8605_v49 = vcombine.low %v8581_v15, %v8597_v41  ;;  %v8606_v6 = vcombine.high %v8581_v15, %v8597_v41  ;;  %v8717_v34 = vrot.slane %v8709_v54, %v24530_v1  ;;  %v8724_v17 = vrot.slane %v8710_v31, %v24530_v1 }
 0xe17   : > { %10815 = vrot.lane.b32.xlu1 %v21236_v50, %s17823_s14  ;;  %10785 = vrot.lane.b32.xlu0 %v21268_v36, %s17823_s14  ;;  %v8725_v50 = vcombine.low %v21406_v14, %v21440_v24  ;;  %v9133_v36 = vcombine.low %v8561_v26, %v8568_v23  ;;  %v8681_v3 = vrot.slane %v8673_v12, %v18180_v55  ;;  %v24577_v24 = vld [vmem:[#allocation25_spill] sm:$0xff] }
 0xe18   : > { %v8688_v18 = vrot.slane %v8674_v32, %v18180_v55  ;;  %v21611_v41 = vrot.slane %v9049_v28, %v24530_v1  ;;  %v8704_v23 = vrot.slane %v8690_v58, %v18180_v55  ;;  %v8740_v15 = vrot.slane %v8726_v22, %v24530_v1 }
 0xe19   : > { %v8733_v26 = vrot.slane %v8725_v50, %v24530_v1  ;;  %v8620_v0 = vrot.slane %v8606_v6, %v18180_v55  ;;  %v8636_v28 = vrot.slane %v8622_v9, %v18180_v55  ;;  %v21629_v58 = vrot.slane %v9117_v39, %v24530_v1 }
 0xe1a   : > { %v8757_v54 = vcombine.low %v8724_v17, %v8740_v15  ;;  %v8758_v31 = vcombine.high %v8724_v17, %v8740_v15  ;;  %v21632_v12 = vrot.slane %v16108_v47, %v24530_v1  ;;  %v21635_v6 = vrot.slane %v9133_v36, %v24530_v1 }
 0xe1b   : > { %10767 = vrot.lane.b32.xlu1 %v21168_v62, %s17823_s14  ;;  %10803 = vrot.lane.b32.xlu0 %v21276_v45, %s17823_s14  ;;  %v8697_v62 = vrot.slane %v8689_v59, %v18180_v55  ;;  %v8613_v45 = vrot.slane %v8605_v49, %v18180_v55  ;;  %v8741_v60 = vcombine.low %v8717_v34, %v8733_v26 }
 0xe1c   : > { %v8742_v61 = vcombine.high %v8717_v34, %v8733_v26  ;;  %v21638_v57 = vrot.slane %v16109_v30, %v24530_v1  ;;  %v16112_v9 = vcombine.high %v8681_v3, %v8688_v18  ;;  %v24564_v30 = vcombine.high %v21533_v4, %v21536_v53 }
 0xe1d   : > { %v9269_v32 = vcombine.low %v8697_v62, %v8704_v23  ;;  %v16113_v59 = vcombine.high %v8697_v62, %v8704_v23  ;;  %v9185_v50 = vcombine.low %v8613_v45, %v8620_v0  ;;  %v16110_v22 = vcombine.high %v8613_v45, %v8620_v0 }
 0xe1e   : > { %v21652_v47 = vrot.slane %v24564_v30, %v24530_v1  ;;  %v8749_v49 = vrot.slane %v8741_v60, %v18180_v55  ;;  %v8756_v36 = vrot.slane %v8742_v61, %v18180_v55  ;;  %v8765_v34 = vrot.slane %v8757_v54, %v18180_v55 }
 0xe1f   : > { %10783 = vrot.lane.b32.xlu1 %v21252_v8, %s17823_s14  ;;  %10821 = vrot.lane.b32.xlu0 %v21290_v2, %s17823_s14  ;;  %v9253_v8 = vcombine.low %v8681_v3, %v8688_v18  ;;  %v24563_v2 = vcombine.low %v21533_v4, %v21536_v53  ;;  %v9201_v17 = vcombine.low %v8629_v7, %v8636_v28 }
 0xe20   : > { %v16111_v3 = vcombine.high %v8629_v7, %v8636_v28  ;;  %v9149_v18 = vcombine.low %v21629_v58, %v21632_v12  ;;  %v9165_v4 = vcombine.low %v21635_v6, %v21638_v57  ;;  %v21668_v62 = vrot.slane %v16112_v9, %v24530_v1 }
 0xe21   : > { %v21646_v39 = vrot.slane %v24563_v2, %v24530_v1  ;;  %v21665_v53 = vrot.slane %v9253_v8, %v24530_v1  ;;  %v21671_v23 = vrot.slane %v9269_v32, %v24530_v1  ;;  %v21674_v26 = vrot.slane %v16113_v59, %v24530_v1 }
 0xe22   : > { %v24566_v15 = vcombine.low %v21508_v40, %v21511_v20  ;;  %v24567_v0 = vcombine.low %v21541_v63, %v21544_v11  ;;  %v9081_v28 = vcombine.low %v21611_v41, %v21614_v48  ;;  %v9321_v61 = vcombine.low %v8749_v49, %v8756_v36 }
 0xe23   : > { %10801 = vrot.lane.b32.xlu1 %v21260_v52, %s17823_s14  ;;  %v8772_v52 = vrot.slane %v8758_v31, %v18180_v55  ;;  %10771 = vrot.lane.b32.xlu0 %v21184_v25, %s17823_s14  ;;  %v24565_v25 = vld [vmem:[#allocation15_spill] sm:$0xff]  ;;  %v9097_v60 = vcombine.low %v21646_v39, %v21652_v47  ;;  %v16114_v54 = vcombine.high %v8749_v49, %v8756_v36 }
 0xe24   : > { %v9021_v45 = vrot.slane %v24566_v15, %v18180_v55  ;;  %v9037_v7 = vrot.slane %v24567_v0, %v18180_v55  ;;  %v21693_v9 = vrot.slane %v9185_v50, %v24530_v1  ;;  %v21696_v32 = vrot.slane %v16110_v22, %v24530_v1 }
 0xe25   : > { %v9337_v31 = vcombine.low %v8765_v34, %v8772_v52  ;;  %v16115_v8 = vcombine.high %v8765_v34, %v8772_v52  ;;  %v21699_v59 = vrot.slane %v9201_v17, %v24530_v1  ;;  %v21702_v2 = vrot.slane %v16111_v3, %v24530_v1 }
 0xe26   : > { %v9157_v30 = vrot.slane %v9149_v18, %v18180_v55  ;;  %v9285_v49 = vcombine.low %v21665_v53, %v21668_v62  ;;  %v9301_v50 = vcombine.low %v21671_v23, %v21674_v26  ;;  %v9045_v22 = vcombine.low %v9021_v45, %v9037_v7 }
 0xe27   : > { %10819 = vrot.lane.b32.xlu1 %v24565_v25, %s17823_s14  ;;  %10789 = vrot.lane.b32.xlu0 %v21302_v38, %s17823_s14  ;;  %v9173_v38 = vrot.slane %v9165_v4, %v18180_v55  ;;  %v9046_v36 = vcombine.high %v9021_v45, %v9037_v7  ;;  %v9089_v34 = vrot.slane %v9081_v28, %v18180_v55 }
 0xe28   : > { %v9105_v52 = vrot.slane %v9097_v60, %v18180_v55  ;;  %v21717_v17 = vrot.slane %v9321_v61, %v24530_v1  ;;  %v21720_v3 = vrot.slane %v16114_v54, %v24530_v1  ;;  %v21723_v18 = vrot.slane %v9337_v31, %v24530_v1  ;;  %v24572_v31 = vld [vmem:[#allocation20_spill] sm:$0xff] }
 0xe29   : > { %v8894_v4 = vcombine.high %v21426_v56, %v21429_v33  ;;  %v8977_v25 = vcombine.low %v21527_v46, %v21530_v29  ;;  %v9233_v15 = vcombine.low %v21699_v59, %v21702_v2  ;;  %v8978_v45 = vcombine.high %v21527_v46, %v21530_v29 }
 0xe2a   : > { %v9181_v0 = vcombine.low %v9157_v30, %v9173_v38  ;;  %v9293_v7 = vrot.slane %v9285_v49, %v18180_v55  ;;  %v9309_v28 = vrot.slane %v9301_v50, %v18180_v55  ;;  %v24568_v56 = vcombine.low %v21391_v35, %v21394_v42 }
 0xe2b   : > { %10769 = vrot.lane.b32.xlu1 %v21178_v5, %s17823_s14  ;;  %10807 = vrot.lane.b32.xlu0 %v21312_v19, %s17823_s14  ;;  %v21726_v5 = vrot.slane %v16115_v8, %v24530_v1  ;;  %v9217_v19 = vcombine.low %v21693_v9, %v21696_v32  ;;  %v24569_v33 = vcombine.low %v21462_v43, %v21487_v44 }
 0xe2c   : > { %v24570_v61 = vcombine.high %v21391_v35, %v21394_v42  ;;  %v24571_v46 = vcombine.high %v21462_v43, %v21487_v44  ;;  %v21758_v54 = vpack.c.bf16 %v9045_v22, %v8977_v25  ;;  %v21764_v8 = vpack.c.bf16 %v9046_v36, %v8978_v45  ;;  %v21770_v43 = vpop.permute.xlu1 %9421  ;;  %v24574_v36 = vld [vmem:[#allocation38_spill] sm:$0xff]  ;;  %v24575_v45 = vld [vmem:[#allocation39_spill] sm:$0xff] }
 0xe2d   : > { %v21748_v60 = vpack.c.bf16 %v24569_v33, %v24568_v56  ;;  %v9113_v49 = vcombine.low %v9089_v34, %v9105_v52  ;;  %v9353_v50 = vcombine.low %v21717_v17, %v21720_v3  ;;  %v9369_v35 = vcombine.low %v21723_v18, %v21726_v5 }
 0xe2e   : > { %v21756_v29 = vpack.c.bf16 %v24571_v46, %v24570_v61  ;;  %v9114_v42 = vcombine.high %v9089_v34, %v9105_v52  ;;  %v9182_v44 = vcombine.high %v9157_v30, %v9173_v38  ;;  %v9225_v22 = vrot.slane %v9217_v19, %v18180_v55  ;;  %v24578_v34 = vld [vmem:[#allocation43_spill] sm:$0xff]  ;;  %v24579_v38 = vld [vmem:[#allocation44_spill] sm:$0xff] }
 0xe2f   : > { %10787 = vrot.lane.b32.xlu1 %v21288_v10, %s17823_s14  ;;  %v8844_v10 = vcombine.high %v21420_v13, %v21423_v27  ;;  %10825 = vrot.lane.b32.xlu0 %v24572_v31, %s17823_s14  ;;  %v9241_v25 = vrot.slane %v9233_v15, %v18180_v55  ;;  %v21774_v56 = vpack.c.bf16 %v9181_v0, %v9113_v49 }
 0xe30   : > { %v9317_v33 = vcombine.low %v9293_v7, %v9309_v28  ;;  %v24576_v61 = vcombine.high %v24574_v36, %v24575_v45  ;;  %v8908_v31 = vrot.slane %v8894_v4, %v18180_v55  ;;  %v8946_v30 = vcombine.high %v24578_v34, %v21470_v51 }
 0xe31   : > { %24573 = vst [vmem:[#allocation15_spill] sm:$0xff] %v21774_v56  ;;  %v8962_v52 = vcombine.high %v24579_v38, %v21476_v16  ;;  %v9014_v19 = vcombine.high %v21508_v40, %v21511_v20  ;;  %v9030_v15 = vcombine.high %v21541_v63, %v21544_v11  ;;  %v9361_v4 = vrot.slane %v9353_v50, %v18180_v55 }
 0xe32   : > { %v8892_v46 = vrot.slane %v24576_v61, %v18180_v55  ;;  %v9377_v0 = vrot.slane %v9369_v35, %v18180_v55  ;;  %v9098_v51 = vcombine.high %v21646_v39, %v21652_v47  ;;  %v21801_v49 = vpack.c.bf16 %v9182_v44, %v9114_v42  ;;  %v21821_v42 = vpop.permute.xlu0 %9423 }
 0xe33   : > { %10805 = vrot.lane.b32.xlu1 %v24577_v24, %s17823_s14  ;;  %10775 = vrot.lane.b32.xlu0 %v21200_v37, %s17823_s14  ;;  %v9082_v24 = vcombine.high %v21611_v41, %v21614_v48  ;;  %v9318_v20 = vcombine.high %v9293_v7, %v9309_v28  ;;  %v9150_v40 = vcombine.high %v21629_v58, %v21632_v12  ;;  %v24581_v41 = vld [vmem:[#allocation24_spill] sm:$0xff]  ;;  %v24582_v58 = vld [vmem:[#allocation35_spill] sm:$0xff] }
 0xe34   : > { %24580 = vst [vmem:[#allocation20_spill] sm:$0xff] %v21801_v49  ;;  %v9166_v37 = vcombine.high %v21635_v6, %v21638_v57  ;;  %v9249_v63 = vcombine.low %v9225_v22, %v9241_v25  ;;  %v9250_v11 = vcombine.high %v9225_v22, %v9241_v25  ;;  %v8911_v50 = vcombine.low %v8892_v46, %v8908_v31 }
 0xe35   : > { %v21799_v16 = vpop.permute.xlu1 %9427  ;;  %v8912_v35 = vcombine.high %v8892_v46, %v8908_v31  ;;  %v8960_v48 = vrot.slane %v8946_v30, %v18180_v55  ;;  %v8976_v39 = vrot.slane %v8962_v52, %v18180_v55  ;;  %v9028_v47 = vrot.slane %v9014_v19, %v18180_v55  ;;  %v24590_v30 = vld [vmem:[#allocation28_spill] sm:$0xff] }
 0xe36   : > { %v9044_v7 = vrot.slane %v9030_v15, %v18180_v55  ;;  %v21815_v12 = vpack.c.bf16 %v9317_v33, %v9249_v63  ;;  %v21817_v6 = vcombine.low %v9361_v4, %v9377_v0  ;;  %v9096_v57 = vrot.slane %v9082_v24, %v18180_v55  ;;  %v24593_v63 = vld [vmem:[#allocation7_spill] sm:$0xff] }
 0xe37   : > { %10823 = vrot.lane.b32.xlu1 %v24581_v41, %s17823_s14  ;;  %10811 = vrot.lane.b32.xlu0 %v24582_v58, %s17823_s14  ;;  %v9112_v28 = vrot.slane %v9098_v51, %v18180_v55  ;;  %v21823_v22 = vpack.c.bf16 %v9318_v20, %v9250_v11  ;;  %v21825_v25 = vcombine.high %v9361_v4, %v9377_v0  ;;  %v24591_v4 = vld [vmem:[#allocation37_spill] sm:$0xff] }
 0xe38   : > { %24583 = vst [vmem:[#allocation38_spill] sm:$0xff] %v21815_v12  ;;  %24584 = vst [vmem:[#allocation39_spill] sm:$0xff] %v21817_v6  ;;  %v9164_v36 = vrot.slane %v9150_v40, %v18180_v55  ;;  %v9180_v45 = vrot.slane %v9166_v37, %v18180_v55  ;;  %v24587_v33 = vcombine.low %v21420_v13, %v21423_v27 }
 0xe39   : > { %v9446_v44 = vpop.permute.xlu1 %9445  ;;  %24585 = vst [vmem:[#allocation25_spill] sm:$0xff] %v21823_v22  ;;  %24586 = vst [vmem:[#allocation43_spill] sm:$0xff] %v21825_v25  ;;  %v21834_v46 = vpack.c.bf16 %v8912_v35, %v8844_v10  ;;  %v9286_v31 = vcombine.high %v21665_v53, %v21668_v62  ;;  %v9302_v34 = vcombine.high %v21671_v23, %v21674_v26  ;;  %v24592_v23 = vld [vmem:[#allocation30_spill] sm:$0xff] }
 0xe3a   : > { %v21832_v61 = vpack.c.bf16 %v8911_v50, %v24587_v33  ;;  %v8979_v38 = vcombine.low %v8960_v48, %v8976_v39  ;;  %v9047_v52 = vcombine.low %v9028_v47, %v9044_v7  ;;  %v8980_v19 = vcombine.high %v8960_v48, %v8976_v39  ;;  %v24600_v33 = vld [vmem:[#allocation22_spill] sm:$0xff] }
 0xe3b   : > { %24589 = vst [vmem:[#allocation24_spill] sm:$0xff] %v21834_v46  ;;  %10773 = vrot.lane.b32.xlu1 %v24590_v30, %s17823_s14  ;;  %v9048_v15 = vcombine.high %v9028_v47, %v9044_v7  ;;  %10829 = vrot.lane.b32.xlu0 %v24591_v4, %s17823_s14  ;;  %v9115_v13 = vcombine.low %v9096_v57, %v9112_v28 }
 0xe3c   : > { %24588 = vst [vmem:[#allocation44_spill] sm:$0xff] %v21832_v61  ;;  %v9218_v53 = vcombine.high %v21693_v9, %v21696_v32  ;;  %v9234_v62 = vcombine.high %v21699_v59, %v21702_v2  ;;  %v9517_v26 = vcombine.low %v24592_v23, %v9446_v44  ;;  %v9518_v10 = vcombine.high %v24592_v23, %v9446_v44 }
 0xe3d   : > { %v21852_v0 = vpop.permute.xlu0 %9429  ;;  %v9183_v51 = vcombine.low %v9164_v36, %v9180_v45  ;;  %v9464_v20 = vpop.permute.xlu1 %9463  ;;  %v21857_v40 = vrot.slane %v9286_v31, %v18180_v55  ;;  %v21860_v37 = vrot.slane %v9302_v34, %v18180_v55  ;;  %v9354_v9 = vcombine.high %v21717_v17, %v21720_v3 }
 0xe3e   : > { %v9370_v32 = vcombine.high %v21723_v18, %v21726_v5  ;;  %v9533_v59 = vcombine.low %v21799_v16, %v9464_v20  ;;  %v9534_v2 = vcombine.high %v21799_v16, %v9464_v20  ;;  %v21870_v11 = vpack.c.bf16 %v9047_v52, %v8979_v38 }
 0xe3f   : > { %10791 = vrot.lane.b32.xlu1 %v24593_v63, %s17823_s14  ;;  %v9116_v50 = vcombine.high %v9096_v57, %v9112_v28  ;;  %10795 = vrot.lane.b32.xlu0 %v21406_v14, %s17823_s14  ;;  %v21874_v35 = vpack.c.bf16 %v9048_v15, %v8980_v19  ;;  %v9184_v41 = vcombine.high %v9164_v36, %v9180_v45  ;;  %v24599_v45 = vld [vmem:[#allocation11_spill] sm:$0xff] }
 0xe40   : > { %24594 = vst [vmem:[#allocation35_spill] sm:$0xff] %v21870_v11  ;;  %v9232_v17 = vrot.slane %v9218_v53, %v18180_v55  ;;  %v9248_v3 = vrot.slane %v9234_v62, %v18180_v55  ;;  %v9525_v18 = vrot.slane %v9517_v26, %v24530_v1  ;;  %v9532_v5 = vrot.slane %v9518_v10, %v24530_v1 }
 0xe41   : > { %24595 = vst [vmem:[#allocation28_spill] sm:$0xff] %v21874_v35  ;;  %v9541_v16 = vrot.slane %v9533_v59, %v24530_v1  ;;  %v9548_v48 = vrot.slane %v9534_v2, %v24530_v1  ;;  %v9448_v39 = vpop.permute.xlu0 %9447  ;;  %v21882_v47 = vpack.c.bf16 %v9183_v51, %v9115_v13  ;;  %v9319_v14 = vcombine.low %v21857_v40, %v21860_v37  ;;  %v24604_v59 = vld [vmem:[#allocation31_spill] sm:$0xff] }
 0xe42   : > { %v21887_v7 = vrot.slane %v9354_v9, %v18180_v55  ;;  %v21890_v58 = vrot.slane %v9370_v32, %v18180_v55  ;;  %v9585_v31 = vcombine.low %v24600_v33, %v9448_v39  ;;  %v9586_v34 = vcombine.high %v24600_v33, %v9448_v39 }
 0xe43   : > { %24596 = vst [vmem:[#allocation37_spill] sm:$0xff] %v21882_v47  ;;  %v9549_v57 = vcombine.low %v9525_v18, %v9541_v16  ;;  %v9550_v28 = vcombine.high %v9525_v18, %v9541_v16  ;;  %v9565_v44 = vcombine.low %v9532_v5, %v9548_v48  ;;  %v9566_v36 = vcombine.high %v9532_v5, %v9548_v48  ;;  %v24605_v5 = vld [vmem:[#allocation29_spill] sm:$0xff] }
 0xe44   : > { %24597 = vst [vmem:[#allocation30_spill] sm:$0xff] %v21887_v7  ;;  %24598 = vst [vmem:[#allocation7_spill] sm:$0xff] %v21890_v58  ;;  %10793 = vrot.lane.b32.xlu1 %v24599_v45, %s17823_s14  ;;  %v21896_v30 = vpack.c.bf16 %v9184_v41, %v9116_v50  ;;  %v9251_v38 = vcombine.low %v9232_v17, %v9248_v3  ;;  %v9252_v23 = vcombine.high %v9232_v17, %v9248_v3 }
 0xe45   : > { %v9557_v52 = vrot.slane %v9549_v57, %v18180_v55  ;;  %v9564_v19 = vrot.slane %v9550_v28, %v18180_v55  ;;  %v9573_v15 = vrot.slane %v9565_v44, %v18180_v55  ;;  %v9580_v4 = vrot.slane %v9566_v36, %v18180_v55  ;;  %v9432_v13 = vpop.permute.xlu1 %9431  ;;  %v9466_v53 = vpop.permute.xlu0 %9465 }
 0xe46   : > { %24601 = vst [vmem:[#allocation11_spill] sm:$0xff] %v21896_v30  ;;  %v21902_v62 = vpack.c.bf16 %v9319_v14, %v9251_v38  ;;  %v9320_v26 = vcombine.high %v21857_v40, %v21860_v37  ;;  %v21908_v10 = vcombine.low %v21887_v7, %v21890_v58  ;;  %v9593_v2 = vrot.slane %v9585_v31, %v24530_v1 }
 0xe47   : > { %v10129_v51 = vcombine.low %v9557_v52, %v9564_v19  ;;  %v16116_v20 = vcombine.high %v9557_v52, %v9564_v19  ;;  %v10145_v9 = vcombine.low %v9573_v15, %v9580_v4  ;;  %v16117_v32 = vcombine.high %v9573_v15, %v9580_v4 }
 0xe48   : > { %24602 = vst [vmem:[#allocation22_spill] sm:$0xff] %v21902_v62  ;;  %24603 = vst [vmem:[#allocation45_spill] sm:$0xff] %v21908_v10  ;;  %10809 = vrot.lane.b32.xlu1 %v24604_v59, %s17823_s14  ;;  %v9600_v63 = vrot.slane %v9586_v34, %v24530_v1  ;;  %v9601_v50 = vcombine.low %v21852_v0, %v9466_v53  ;;  %v9602_v41 = vcombine.high %v21852_v0, %v9466_v53  ;;  %v24606_v0 = vld [vmem:[#allocation34_spill] sm:$0xff] }
 0xe49   : > { %v9450_v40 = vpop.permute.xlu1 %9449  ;;  %v10136_v37 = vrot.slane %v10129_v51, %v24530_v1  ;;  %v10144_v17 = vrot.slane %v16116_v20, %v24530_v1  ;;  %v21919_v3 = vrot.slane %v10145_v9, %v24530_v1  ;;  %v21922_v18 = vrot.slane %v16117_v32, %v24530_v1 }
 0xe4a   : > { %v9653_v16 = vcombine.low %v24605_v5, %v9450_v40  ;;  %v9654_v48 = vcombine.high %v24605_v5, %v9450_v40  ;;  %v9609_v39 = vrot.slane %v9601_v50, %v24530_v1  ;;  %v9616_v14 = vrot.slane %v9602_v41, %v24530_v1 }
 0xe4b   : > { %v10161_v57 = vcombine.low %v10136_v37, %v10144_v17  ;;  %v10177_v28 = vcombine.low %v21919_v3, %v21922_v18  ;;  %v10162_v44 = vcombine.high %v10136_v37, %v10144_v17  ;;  %v10178_v36 = vcombine.high %v21919_v3, %v21922_v18 }
 0xe4c   : > { %10827 = vrot.lane.b32.xlu1 %v24606_v0, %s17823_s14  ;;  %v9661_v45 = vrot.slane %v9653_v16, %v24530_v1  ;;  %v9617_v33 = vcombine.low %v9593_v2, %v9609_v39  ;;  %v9618_v31 = vcombine.high %v9593_v2, %v9609_v39  ;;  %v21935_v34 = vpack.c.bf16 %v9320_v26, %v9252_v23  ;;  %v24608_v0 = vld [vmem:[#allocation4_spill] sm:$0xff] }
 0xe4d   : > { %v9633_v38 = vcombine.low %v9600_v63, %v9616_v14  ;;  %v9634_v52 = vcombine.high %v9600_v63, %v9616_v14  ;;  %v9468_v19 = vpop.permute.xlu1 %9467  ;;  %v9434_v15 = vpop.permute.xlu0 %9433  ;;  %v21938_v4 = vrot.slane %v10161_v57, %v18180_v55  ;;  %v21941_v53 = vrot.slane %v10177_v28, %v18180_v55 }
 0xe4e   : > { %24607 = vst [vmem:[#allocation31_spill] sm:$0xff] %v21935_v34  ;;  %v9625_v51 = vrot.slane %v9617_v33, %v18180_v55  ;;  %v9632_v20 = vrot.slane %v9618_v31, %v18180_v55  ;;  %v9669_v9 = vcombine.low %v9432_v13, %v9468_v19  ;;  %v9670_v32 = vcombine.high %v9432_v13, %v9468_v19 }
 0xe4f   : > { %v9668_v59 = vrot.slane %v9654_v48, %v24530_v1  ;;  %v9641_v23 = vrot.slane %v9633_v38, %v18180_v55  ;;  %v9648_v26 = vrot.slane %v9634_v52, %v18180_v55  ;;  %v10193_v2 = vcombine.low %v21938_v4, %v21941_v53 }
 0xe50   : > { %10777 = vrot.lane.b32.xlu1 %v21214_v21, %s17823_s14  ;;  %v10197_v63 = vcombine.low %v9625_v51, %v9632_v20  ;;  %v16118_v50 = vcombine.high %v9625_v51, %v9632_v20  ;;  %v9677_v41 = vrot.slane %v9669_v9, %v24530_v1  ;;  %v9684_v40 = vrot.slane %v9670_v32, %v24530_v1 }
 0xe51   : > { %v10213_v37 = vcombine.low %v9641_v23, %v9648_v26  ;;  %v16119_v13 = vcombine.high %v9641_v23, %v9648_v26  ;;  %v9452_v17 = vpop.permute.xlu0 %9451  ;;  %v10194_v5 = vcombine.high %v21938_v4, %v21941_v53  ;;  %v21957_v16 = vrot.slane %v10162_v44, %v18180_v55 }
 0xe52   : > { %v9685_v48 = vcombine.low %v9661_v45, %v9677_v41  ;;  %v9686_v21 = vcombine.high %v9661_v45, %v9677_v41  ;;  %v9701_v39 = vcombine.low %v9668_v59, %v9684_v40  ;;  %v9702_v14 = vcombine.high %v9668_v59, %v9684_v40 }
 0xe53   : > { %v9721_v57 = vcombine.low %v24608_v0, %v9452_v17  ;;  %v9722_v28 = vcombine.high %v24608_v0, %v9452_v17  ;;  %v21962_v33 = vrot.slane %v10197_v63, %v24530_v1  ;;  %v21965_v31 = vrot.slane %v16118_v50, %v24530_v1 }
 0xe54   : > { %v9693_v38 = vrot.slane %v9685_v48, %v18180_v55  ;;  %v9700_v52 = vrot.slane %v9686_v21, %v18180_v55  ;;  %v9709_v44 = vrot.slane %v9701_v39, %v18180_v55  ;;  %v9716_v45 = vrot.slane %v9702_v14, %v18180_v55 }
 0xe55   : > { %v9436_v19 = vpop.permute.xlu1 %9435  ;;  %v9729_v51 = vrot.slane %v9721_v57, %v24530_v1  ;;  %v9736_v20 = vrot.slane %v9722_v28, %v24530_v1  ;;  %v21974_v9 = vrot.slane %v10213_v37, %v24530_v1  ;;  %v21977_v32 = vrot.slane %v16119_v13, %v24530_v1  ;;  %v9470_v50 = vpop.permute.xlu0 %9469 }
 0xe56   : > { %v10265_v59 = vcombine.low %v9693_v38, %v9700_v52  ;;  %v16120_v23 = vcombine.high %v9693_v38, %v9700_v52  ;;  %v10281_v26 = vcombine.low %v9709_v44, %v9716_v45  ;;  %v16121_v63 = vcombine.high %v9709_v44, %v9716_v45  ;;  %v24609_v38 = vld [vmem:[#allocation40_spill] sm:$0xff] }
 0xe57   : > { %v9737_v41 = vcombine.low %v9434_v15, %v9470_v50  ;;  %v9738_v40 = vcombine.high %v9434_v15, %v9470_v50  ;;  %v10229_v17 = vcombine.low %v21962_v33, %v21965_v31  ;;  %v10245_v48 = vcombine.low %v21974_v9, %v21977_v32 }
 0xe58   : > { %v21984_v21 = vrot.slane %v10265_v59, %v24530_v1  ;;  %v21987_v37 = vrot.slane %v16120_v23, %v24530_v1  ;;  %v21990_v13 = vrot.slane %v10281_v26, %v24530_v1  ;;  %v21993_v39 = vrot.slane %v16121_v63, %v24530_v1 }
 0xe59   : > { %v9454_v14 = vpop.permute.xlu1 %9453  ;;  %v9745_v15 = vrot.slane %v9737_v41, %v24530_v1  ;;  %v9752_v0 = vrot.slane %v9738_v40, %v24530_v1  ;;  %v10237_v57 = vrot.slane %v10229_v17, %v18180_v55  ;;  %v10253_v28 = vrot.slane %v10245_v48, %v18180_v55  ;;  %v9438_v45 = vpop.permute.xlu0 %9437 }
 0xe5a   : > { %v9789_v52 = vcombine.low %v24609_v38, %v9454_v14  ;;  %v9790_v44 = vcombine.high %v24609_v38, %v9454_v14  ;;  %v10297_v59 = vcombine.low %v21984_v21, %v21987_v37  ;;  %v22007_v23 = vrot.slane %v10178_v36, %v18180_v55 }
 0xe5b   : > { %v9753_v26 = vcombine.low %v9729_v51, %v9745_v15  ;;  %v9754_v63 = vcombine.high %v9729_v51, %v9745_v15  ;;  %v9769_v50 = vcombine.low %v9736_v20, %v9752_v0  ;;  %v9770_v41 = vcombine.high %v9736_v20, %v9752_v0 }
 0xe5c   : > { %v9797_v40 = vrot.slane %v9789_v52, %v24530_v1  ;;  %v10261_v17 = vcombine.low %v10237_v57, %v10253_v28  ;;  %v10262_v48 = vcombine.high %v10237_v57, %v10253_v28  ;;  %v10313_v14 = vcombine.low %v21990_v13, %v21993_v39 }
 0xe5d   : > { %v9761_v38 = vrot.slane %v9753_v26, %v18180_v55  ;;  %v9768_v24 = vrot.slane %v9754_v63, %v18180_v55  ;;  %v22015_v27 = vrot.slane %v9769_v50, %v18180_v55  ;;  %v22018_v3 = vrot.slane %v9770_v41, %v18180_v55  ;;  %v9472_v18 = vpop.permute.xlu1 %9471  ;;  %v9456_v0 = vpop.permute.xlu0 %9455 }
 0xe5e   : > { %v9805_v36 = vcombine.low %v9436_v19, %v9472_v18  ;;  %v9806_v51 = vcombine.high %v9436_v19, %v9472_v18  ;;  %v10741_v20 = vpack.c.bf16 %v10261_v17, %v10193_v2  ;;  %v10746_v15 = vpack.c.bf16 %v10262_v48, %v10194_v5  ;;  %v24610_v2 = vld [vmem:[#allocation36_spill] sm:$0xff] }
 0xe5f   : > { %v9804_v57 = vrot.slane %v9790_v44, %v24530_v1  ;;  %v10333_v28 = vcombine.low %v9761_v38, %v9768_v24  ;;  %v16122_v52 = vcombine.high %v9761_v38, %v9768_v24  ;;  %v16123_v4 = vcombine.high %v22015_v27, %v22018_v3 }
 0xe60   : > { %v9813_v63 = vrot.slane %v9805_v36, %v24530_v1  ;;  %v9820_v50 = vrot.slane %v9806_v51, %v24530_v1  ;;  %v12129_v41 = vsel %vm4699_vm2, %v10741_v20, 0  ;;  %v12231_v19 = vsel %vm4699_vm2, %v10746_v15, 0 }
 0xe61   : > { %16906 = vmatpush3.bf16.xpose.msra.mxu1 %v12129_v41  ;;  %16936 = vmatpush3.bf16.xpose.msra.mxu0 %v12231_v19  ;;  %v9440_v53 = vpop.permute.xlu1 %9439  ;;  %v9857_v5 = vcombine.low %v24610_v2, %v9456_v0  ;;  %v9858_v24 = vcombine.high %v24610_v2, %v9456_v0  ;;  %v9474_v18 = vpop.permute.xlu0 %9473  ;;  %v24611_v36 = vmov 0.0   ;;  %v22038_v41 = vrot.slane %v10297_v59, %v18180_v55 }
 0xe62   : > { %v9821_v44 = vcombine.low %v9797_v40, %v9813_v63  ;;  %v9822_v17 = vcombine.high %v9797_v40, %v9813_v63  ;;  %v9837_v48 = vcombine.low %v9804_v57, %v9820_v50  ;;  %v9838_v38 = vcombine.high %v9804_v57, %v9820_v50  ;;  %16907 = vmatprep.subr.bf16.mxu1 %v24611_v36 }
 0xe63   : > { %v9865_v51 = vrot.slane %v9857_v5, %v24530_v1  ;;  %v9873_v20 = vcombine.low %v9438_v45, %v9474_v18  ;;  %v9874_v15 = vcombine.high %v9438_v45, %v9474_v18  ;;  %16937 = vmatprep.subr.bf16.mxu0 %v24611_v36  ;;  %v9872_v63 = vrot.slane %v9858_v24, %v24530_v1 }
 0xe64   : > { %v22041_v19 = vrot.slane %v9821_v44, %v18180_v55  ;;  %v22044_v0 = vrot.slane %v9822_v17, %v18180_v55  ;;  %v22047_v40 = vrot.slane %v9837_v48, %v18180_v55  ;;  %v22050_v57 = vrot.slane %v9838_v38, %v18180_v55 }
 0xe65   : > { %v9458_v45 = vpop.permute.xlu1 %9457  ;;  %v9881_v50 = vrot.slane %v9873_v20, %v24530_v1  ;;  %v9888_v59 = vrot.slane %v9874_v15, %v24530_v1  ;;  %v22056_v2 = vrot.slane %v10313_v14, %v18180_v55  ;;  %v9442_v48 = vpop.permute.xlu0 %9441  ;;  %v22065_v24 = vrot.slane %v10333_v28, %v24530_v1 }
 0xe66   : > { %v9925_v38 = vcombine.low %v21770_v43, %v9458_v45  ;;  %v9926_v18 = vcombine.high %v21770_v43, %v9458_v45  ;;  %v22081_v43 = vrot.slane %v16122_v52, %v24530_v1 }
 0xe67   : > { %v9889_v20 = vcombine.low %v9865_v51, %v9881_v50  ;;  %v9890_v14 = vcombine.high %v9865_v51, %v9881_v50  ;;  %v9905_v5 = vcombine.low %v9872_v63, %v9888_v59  ;;  %v9906_v26 = vcombine.high %v9872_v63, %v9888_v59 }
 0xe68   : > { %v10329_v44 = vcombine.low %v22038_v41, %v22056_v2  ;;  %v9933_v17 = vrot.slane %v9925_v38, %v24530_v1  ;;  %v9940_v38 = vrot.slane %v9926_v18, %v24530_v1 }
 0xe69   : > { %v22075_v10 = vrot.slane %v9889_v20, %v18180_v55  ;;  %v22078_v28 = vrot.slane %v9890_v14, %v18180_v55  ;;  %v9476_v7 = vpop.permute.xlu1 %9475  ;;  %v22084_v51 = vrot.slane %v9905_v5, %v18180_v55  ;;  %v22087_v63 = vrot.slane %v9906_v26, %v18180_v55  ;;  %v9460_v59 = vpop.permute.xlu0 %9459 }
 0xe6a   : > { %v9941_v45 = vcombine.low %v9440_v53, %v9476_v7  ;;  %v9942_v50 = vcombine.high %v9440_v53, %v9476_v7  ;;  %v9993_v14 = vcombine.low %v21821_v42, %v9460_v59  ;;  %v9994_v15 = vcombine.high %v21821_v42, %v9460_v59 }
 0xe6b   : > { %v24612_v20 = vcombine.low %v22015_v27, %v22018_v3  ;;  %v22110_v59 = vrot.slane %v16123_v4, %v24530_v1  ;;  %v10365_v53 = vcombine.low %v22065_v24, %v22081_v43 }
 0xe6c   : > { %v9949_v26 = vrot.slane %v9941_v45, %v24530_v1  ;;  %v9956_v7 = vrot.slane %v9942_v50, %v24530_v1  ;;  %v10001_v18 = vrot.slane %v9993_v14, %v24530_v1  ;;  %v10008_v50 = vrot.slane %v9994_v15, %v24530_v1 }
 0xe6d   : > { %v22107_v42 = vrot.slane %v24612_v20, %v24530_v1  ;;  %v9478_v34 = vpop.permute.xlu0 %9477  ;;  %v9426_v15 = vpop.permute.xlu1 %9425 }
 0xe6e   : > { %v9957_v52 = vcombine.low %v9933_v17, %v9949_v26  ;;  %v9958_v5 = vcombine.high %v9933_v17, %v9949_v26  ;;  %v9973_v58 = vcombine.low %v9940_v38, %v9956_v7  ;;  %v9974_v45 = vcombine.high %v9940_v38, %v9956_v7 }
 0xe6f   : > { %v10381_v14 = vcombine.low %v22107_v42, %v22110_v59  ;;  %v10009_v62 = vcombine.low %v9442_v48, %v9478_v34  ;;  %v10373_v38 = vrot.slane %v10365_v53, %v18180_v55  ;;  %v10010_v26 = vcombine.high %v9442_v48, %v9478_v34 }
 0xe70   : > { %v22118_v27 = vrot.slane %v9957_v52, %v18180_v55  ;;  %v22121_v3 = vrot.slane %v9958_v5, %v18180_v55  ;;  %v22124_v4 = vrot.slane %v9973_v58, %v18180_v55  ;;  %v22127_v17 = vrot.slane %v9974_v45, %v18180_v55 }
 0xe71   : > { %v10389_v20 = vrot.slane %v10381_v14, %v18180_v55  ;;  %v10017_v7 = vrot.slane %v10009_v62, %v24530_v1  ;;  %v10330_v45 = vcombine.high %v22038_v41, %v22056_v2  ;;  %v9444_v30 = vpop.permute.xlu0 %9443  ;;  %v10024_v14 = vrot.slane %v10010_v26, %v24530_v1 }
 0xe72   : > { %v24613_v5 = vcombine.low %v22041_v19, %v22044_v0  ;;  %v24614_v41 = vcombine.high %v22041_v19, %v22044_v0 }
 0xe73   : > { %v10397_v47 = vcombine.low %v10373_v38, %v10389_v20  ;;  %v10398_v53 = vcombine.high %v10373_v38, %v10389_v20  ;;  %v10025_v34 = vcombine.low %v10001_v18, %v10017_v7  ;;  %v10026_v48 = vcombine.high %v10001_v18, %v10017_v7 }
 0xe74   : > { %v22147_v52 = vrot.slane %v24613_v5, %v24530_v1  ;;  %v22153_v2 = vrot.slane %v24614_v41, %v24530_v1  ;;  %v10041_v58 = vcombine.low %v10008_v50, %v10024_v14  ;;  %v10042_v7 = vcombine.high %v10008_v50, %v10024_v14 }
 0xe75   : > { %v10742_v38 = vpack.c.bf16 %v10397_v47, %v10329_v44  ;;  %v10747_v20 = vpack.c.bf16 %v10398_v53, %v10330_v45  ;;  %v22156_v26 = vrot.slane %v10025_v34, %v18180_v55  ;;  %v9462_v62 = vpop.permute.xlu1 %9461  ;;  %v22159_v18 = vrot.slane %v10026_v48, %v18180_v55  ;;  %v9480_v11 = vpop.permute.xlu0 %9479 }
 0xe76   : > { %v10061_v35 = vcombine.low %v9426_v15, %v9462_v62  ;;  %v10062_v5 = vcombine.high %v9426_v15, %v9462_v62  ;;  %v22164_v0 = vrot.slane %v10041_v58, %v18180_v55  ;;  %v10077_v47 = vcombine.low %v9444_v30, %v9480_v11 }
 0xe77   : > { %v12132_v46 = vsel %vm4699_vm2, %v10742_v38, 0  ;;  %v12234_v19 = vsel %vm4699_vm2, %v10747_v20, 0  ;;  %v22167_v44 = vrot.slane %v10042_v7, %v18180_v55  ;;  %v10605_v45 = vcombine.low %v22156_v26, %v22159_v18 }
 0xe78   : > { %16908 = vmatpush3.bf16.xpose.msra.mxu1 %v12132_v46  ;;  %16938 = vmatpush3.bf16.xpose.msra.mxu0 %v12234_v19  ;;  %v24615_v50 = vcombine.low %v22047_v40, %v22050_v57  ;;  %v10069_v53 = vrot.slane %v10061_v35, %v24530_v1  ;;  %v10076_v58 = vrot.slane %v10062_v5, %v24530_v1 }
 0xe79   : > { %v10078_v14 = vcombine.high %v9444_v30, %v9480_v11  ;;  %v10085_v46 = vrot.slane %v10077_v47, %v24530_v1  ;;  %16909 = vmatprep.subr.bf16.mxu1 %v24611_v36  ;;  %v22181_v34 = vpop.permute.xlu1 %10761  ;;  %v16130_v62 = vcombine.high %v22156_v26, %v22159_v18  ;;  %16939 = vmatprep.subr.bf16.mxu0 %v24611_v36  ;;  %v10764_v30 = vpop.permute.xlu0 %10763 }
 0xe7a   : > { %v22175_v15 = vrot.slane %v24615_v50, %v24530_v1  ;;  %v24616_v35 = vcombine.high %v22047_v40, %v22050_v57  ;;  %v10433_v11 = vcombine.low %v22147_v52, %v22153_v2  ;;  %v24617_v26 = vcombine.low %v22075_v10, %v22078_v28 }
 0xe7b   : > { %v10092_v38 = vrot.slane %v10078_v14, %v24530_v1  ;;  %v10093_v20 = vcombine.low %v10069_v53, %v10085_v46  ;;  %v10094_v7 = vcombine.high %v10069_v53, %v10085_v46  ;;  %v24618_v57 = vcombine.high %v22075_v10, %v22078_v28 }
 0xe7c   : > { %v22192_v41 = vrot.slane %v24616_v35, %v24530_v1  ;;  %v22201_v18 = vrot.slane %v24617_v26, %v24530_v1  ;;  %v10441_v5 = vrot.slane %v10433_v11, %v18180_v55  ;;  %v24619_v47 = vcombine.low %v22084_v51, %v22087_v63 }
 0xe7d   : > { %v22210_v19 = vrot.slane %v24618_v57, %v24530_v1  ;;  %v22219_v53 = vrot.slane %v10093_v20, %v18180_v55  ;;  %v22222_v14 = vrot.slane %v10094_v7, %v18180_v55  ;;  %v10109_v46 = vcombine.low %v10076_v58, %v10092_v38  ;;  %v22224_v11 = vpop.permute.xlu1 %10779  ;;  %v10800_v7 = vpop.permute.xlu0 %10799 }
 0xe7e   : > { %v10449_v40 = vcombine.low %v22175_v15, %v22192_v41  ;;  %v22216_v50 = vrot.slane %v24619_v47, %v24530_v1  ;;  %v10110_v35 = vcombine.high %v10076_v58, %v10092_v38  ;;  %v16131_v10 = vcombine.high %v22164_v0, %v22167_v44 }
 0xe7f   : > { %v24620_v26 = vcombine.high %v22084_v51, %v22087_v63  ;;  %v10501_v20 = vcombine.low %v22201_v18, %v22210_v19  ;;  %v22238_v47 = vrot.slane %v10109_v46, %v18180_v55  ;;  %v10937_v38 = vcombine.low %v10764_v30, %v10800_v7 }
 0xe80   : > { %v10457_v28 = vrot.slane %v10449_v40, %v18180_v55  ;;  %v22241_v58 = vrot.slane %v10110_v35, %v18180_v55  ;;  %v24621_v40 = vcombine.low %v22118_v27, %v22121_v3  ;;  %v10938_v25 = vcombine.high %v10764_v30, %v10800_v7 }
 0xe81   : > { %v22233_v57 = vrot.slane %v24620_v26, %v24530_v1  ;;  %v10509_v48 = vrot.slane %v10501_v20, %v18180_v55  ;;  %v10782_v6 = vpop.permute.xlu1 %10781  ;;  %v24623_v63 = vcombine.high %v22118_v27, %v22121_v3  ;;  %v24624_v20 = vcombine.low %v22124_v4, %v22127_v17 }
 0xe82   : > { %v22249_v51 = vrot.slane %v24621_v40, %v24530_v1  ;;  %v10465_v26 = vcombine.low %v10441_v5, %v10457_v28  ;;  %v10466_v61 = vcombine.high %v10441_v5, %v10457_v28  ;;  %v10818_v40 = vpop.permute.xlu0 %10817  ;;  %v24626_v30 = vcombine.high %v22124_v4, %v22127_v17 }
 0xe83   : > { %v10517_v46 = vcombine.low %v22216_v50, %v22233_v57  ;;  %v22263_v12 = vrot.slane %v24623_v63, %v24530_v1  ;;  %v22269_v49 = vrot.slane %v24624_v20, %v24530_v1  ;;  %v10945_v28 = vrot.slane %v10937_v38, %v24530_v1 }
 0xe84   : > { %24622 = vst [vmem:[#allocation29_spill] sm:$0xff] %v22249_v51  ;;  %v22275_v5 = vrot.slane %v24626_v30, %v24530_v1  ;;  %v10952_v7 = vrot.slane %v10938_v25, %v24530_v1  ;;  %v10954_v27 = vcombine.high %v10782_v6, %v10818_v40  ;;  %v22286_v17 = vrot.slane %v10605_v45, %v24530_v1 }
 0xe85   : > { %v10525_v22 = vrot.slane %v10517_v46, %v18180_v55  ;;  %24625 = vst [vmem:[#allocation34_spill] sm:$0xff] %v22269_v49  ;;  %v10953_v46 = vcombine.low %v10782_v6, %v10818_v40  ;;  %v10569_v35 = vcombine.low %v22249_v51, %v22263_v12  ;;  %v22289_v38 = vrot.slane %v16130_v62, %v24530_v1  ;;  %v10798_v25 = vpop.permute.xlu1 %10797 }
 0xe86   : > { %24627 = vst [vmem:[#allocation4_spill] sm:$0xff] %v22275_v5  ;;  %v10585_v20 = vcombine.low %v22269_v49, %v22275_v5  ;;  %v10968_v4 = vrot.slane %v10954_v27, %v24530_v1  ;;  %24628 = vst [vmem:[#allocation40_spill] sm:$0xff] %v22286_v17  ;;  %v22293_v30 = vpop.permute.xlu0 %10765  ;;  %v16133_v45 = vcombine.high %v22238_v47, %v22241_v58 }
 0xe87   : > { %v10533_v3 = vcombine.low %v10509_v48, %v10525_v22  ;;  %v10534_v63 = vcombine.high %v10509_v48, %v10525_v22  ;;  %v10961_v56 = vrot.slane %v10953_v46, %v24530_v1  ;;  %v10577_v22 = vrot.slane %v10569_v35, %v18180_v55 }
 0xe88   : > { %v10593_v48 = vrot.slane %v10585_v20, %v18180_v55  ;;  %v10985_v46 = vcombine.low %v10952_v7, %v10968_v4  ;;  %v10986_v51 = vcombine.high %v10952_v7, %v10968_v4  ;;  %v10869_v4 = vcombine.low %v22181_v34, %v10798_v25 }
 0xe89   : > { %v10743_v6 = vpack.c.bf16 %v10533_v3, %v10465_v26  ;;  %v10748_v40 = vpack.c.bf16 %v10534_v63, %v10466_v61  ;;  %v10969_v49 = vcombine.low %v10945_v28, %v10961_v56  ;;  %v10970_v5 = vcombine.high %v10945_v28, %v10961_v56  ;;  %v10816_v7 = vpop.permute.xlu1 %10815 }
 0xe8a   : > { %v24629_v61 = vcombine.low %v22164_v0, %v22167_v44  ;;  %v22308_v28 = vrot.slane %v10985_v46, %v18180_v55  ;;  %v11000_v3 = vrot.slane %v10986_v51, %v18180_v55  ;;  %v22314_v0 = vrot.slane %v16131_v10, %v24530_v1  ;;  %v22318_v63 = vpop.permute.xlu0 %10785 }
 0xe8b   : > { %v12135_v27 = vsel %vm4699_vm2, %v10743_v6, 0  ;;  %v12237_v62 = vsel %vm4699_vm2, %v10748_v40, 0  ;;  %v10977_v35 = vrot.slane %v10969_v49, %v18180_v55  ;;  %v10984_v56 = vrot.slane %v10970_v5, %v18180_v55 }
 0xe8c   : > { %v22303_v26 = vrot.slane %v24629_v61, %v24530_v1  ;;  %16910 = vmatpush3.bf16.xpose.msra.mxu1 %v12135_v27  ;;  %16940 = vmatpush3.bf16.xpose.msra.mxu0 %v12237_v62  ;;  %v10637_v44 = vcombine.low %v22286_v17, %v22289_v38  ;;  %v10601_v20 = vcombine.low %v10577_v22, %v10593_v48 }
 0xe8d   : > { %16911 = vmatprep.subr.bf16.mxu1 %v24611_v36  ;;  %16941 = vmatprep.subr.bf16.mxu0 %v24611_v36  ;;  %v11549_v49 = vcombine.low %v10977_v35, %v10984_v56  ;;  %v16136_v5 = vcombine.high %v10977_v35, %v10984_v56  ;;  %v11565_v6 = vcombine.low %v22308_v28, %v11000_v3  ;;  %v10768_v35 = vpop.permute.xlu1 %10767 }
 0xe8e   : > { %v10645_v51 = vrot.slane %v10637_v44, %v18180_v55  ;;  %v10653_v40 = vcombine.low %v22303_v26, %v22314_v0  ;;  %v10602_v46 = vcombine.high %v10577_v22, %v10593_v48  ;;  %v16137_v62 = vcombine.high %v22308_v28, %v11000_v3  ;;  %v10804_v48 = vpop.permute.xlu0 %10803 }
 0xe8f   : > { %v22326_v10 = vrot.slane %v11549_v49, %v24530_v1  ;;  %v22329_v27 = vrot.slane %v16136_v5, %v24530_v1  ;;  %v10870_v61 = vcombine.high %v22181_v34, %v10798_v25  ;;  %v22334_v56 = vrot.slane %v11565_v6, %v24530_v1 }
 0xe90   : > { %v10661_v44 = vrot.slane %v10653_v40, %v18180_v55  ;;  %v10877_v17 = vrot.slane %v10869_v4, %v24530_v1  ;;  %v10885_v22 = vcombine.low %v22224_v11, %v10816_v7  ;;  %v10886_v5 = vcombine.high %v22224_v11, %v10816_v7 }
 0xe91   : > { %24630 = vst [vmem:[#allocation36_spill] sm:$0xff] %v22326_v10  ;;  %24631 = vst [vmem:[#allocation46_spill] sm:$0xff] %v22329_v27  ;;  %v10884_v49 = vrot.slane %v10870_v61, %v24530_v1  ;;  %v24633_v28 = vcombine.low %v22219_v53, %v22222_v14  ;;  %v24635_v25 = vcombine.high %v22219_v53, %v22222_v14 }
 0xe92   : > { %24632 = vst [vmem:[#allocation47_spill] sm:$0xff] %v22334_v56  ;;  %v10669_v4 = vcombine.low %v10645_v51, %v10661_v44  ;;  %v10670_v6 = vcombine.high %v10645_v51, %v10661_v44  ;;  %v10893_v40 = vrot.slane %v10885_v22, %v24530_v1  ;;  %v24637_v11 = vcombine.low %v22238_v47, %v22241_v58  ;;  %v10822_v10 = vpop.permute.xlu0 %10821 }
 0xe93   : > { %v22345_v34 = vrot.slane %v24633_v28, %v24530_v1  ;;  %v22351_v3 = vrot.slane %v24635_v25, %v24530_v1  ;;  %v10900_v61 = vrot.slane %v10886_v5, %v24530_v1  ;;  %v22362_v28 = vrot.slane %v16133_v45, %v24530_v1  ;;  %v22366_v25 = vpop.permute.xlu1 %10783 }
 0xe94   : > { %v22358_v7 = vrot.slane %v24637_v11, %v24530_v1  ;;  %v11073_v14 = vcombine.low %v10768_v35, %v10804_v48  ;;  %v10744_v51 = vpack.c.bf16 %v10669_v4, %v10601_v20  ;;  %v10749_v44 = vpack.c.bf16 %v10670_v6, %v10602_v46 }
 0xe95   : > { %24634 = vst [vmem:[#allocation48_spill] sm:$0xff] %v22345_v34  ;;  %24636 = vst [vmem:[#allocation49_spill] sm:$0xff] %v22351_v3  ;;  %v10705_v53 = vcombine.low %v22345_v34, %v22351_v3  ;;  %v10901_v22 = vcombine.low %v10877_v17, %v10893_v40  ;;  %v10902_v56 = vcombine.high %v10877_v17, %v10893_v40 }
 0xe96   : > { %v10917_v27 = vcombine.low %v10884_v49, %v10900_v61  ;;  %v10918_v47 = vcombine.high %v10884_v49, %v10900_v61  ;;  %v10721_v5 = vcombine.low %v22358_v7, %v22362_v28  ;;  %v12138_v45 = vsel %vm4699_vm2, %v10744_v51, 0 }
 0xe97   : > { %v10713_v58 = vrot.slane %v10705_v53, %v18180_v55  ;;  %v12240_v11 = vsel %vm4699_vm2, %v10749_v44, 0  ;;  %v10909_v34 = vrot.slane %v10901_v22, %v18180_v55  ;;  %v10916_v3 = vrot.slane %v10902_v56, %v18180_v55  ;;  %16912 = vmatpush3.bf16.xpose.msra.mxu1 %v12138_v45  ;;  %v22378_v49 = vpop.permute.xlu1 %10801 }
 0xe98   : > { %16942 = vmatpush3.bf16.xpose.msra.mxu0 %v12240_v11  ;;  %v10925_v17 = vrot.slane %v10917_v27, %v18180_v55  ;;  %v10932_v20 = vrot.slane %v10918_v47, %v18180_v55  ;;  %v10729_v46 = vrot.slane %v10721_v5, %v18180_v55  ;;  %16913 = vmatprep.subr.bf16.mxu1 %v24611_v36 }
 0xe99   : > { %v11481_v4 = vcombine.low %v10909_v34, %v10916_v3  ;;  %v16134_v6 = vcombine.high %v10909_v34, %v10916_v3  ;;  %16943 = vmatprep.subr.bf16.mxu0 %v24611_v36  ;;  %v11074_v40 = vcombine.high %v10768_v35, %v10804_v48  ;;  %v22383_v61 = vrot.slane %v16137_v62, %v24530_v1  ;;  %v22392_v3 = vpop.permute.xlu0 %10771 }
 0xe9a   : > { %v11497_v56 = vcombine.low %v10925_v17, %v10932_v20  ;;  %v10737_v53 = vcombine.low %v10713_v58, %v10729_v46  ;;  %v10738_v51 = vcombine.high %v10713_v58, %v10729_v46  ;;  %v16135_v22 = vcombine.high %v10925_v17, %v10932_v20 }
 0xe9b   : > { %v22386_v27 = vrot.slane %v11481_v4, %v24530_v1  ;;  %v22389_v44 = vrot.slane %v16134_v6, %v24530_v1  ;;  %v11081_v34 = vrot.slane %v11073_v14, %v24530_v1  ;;  %v11088_v48 = vrot.slane %v11074_v40, %v24530_v1  ;;  %v10820_v5 = vpop.permute.xlu1 %10819 }
 0xe9c   : > { %v22395_v47 = vrot.slane %v11497_v56, %v24530_v1  ;;  %v10745_v35 = vpack.c.bf16 %v10737_v53, %v10737_v53  ;;  %v10750_v62 = vpack.c.bf16 %v10738_v51, %v10738_v51  ;;  %v11089_v58 = vcombine.low %v22318_v63, %v10822_v10 }
 0xe9d   : > { %v11090_v45 = vcombine.high %v22318_v63, %v10822_v10  ;;  %v10195_v11 = vcombine.low %v21957_v16, %v22007_v23  ;;  %v10230_v14 = vcombine.high %v21962_v33, %v21965_v31  ;;  %v10246_v46 = vcombine.high %v21974_v9, %v21977_v32  ;;  %v22423_v51 = vpop.permute.xlu0 %10789 }
 0xe9e   : > { %v12141_v17 = vsel %vm4699_vm2, %v10745_v35, 0  ;;  %v12243_v20 = vsel %vm4699_vm2, %v10750_v62, 0  ;;  %v10196_v4 = vcombine.high %v21957_v16, %v22007_v23  ;;  %v11097_v6 = vrot.slane %v11089_v58, %v24530_v1 }
 0xe9f   : > { %v11104_v63 = vrot.slane %v11090_v45, %v24530_v1  ;;  %v10244_v10 = vrot.slane %v10230_v14, %v18180_v55  ;;  %v11005_v40 = vcombine.low %v22293_v30, %v22378_v49  ;;  %v22416_v33 = vrot.slane %v16135_v22, %v24530_v1  ;;  %16914 = vmatpush3.bf16.xpose.msra.mxu1 %v12141_v17  ;;  %v22420_v32 = vpop.permute.xlu1 %10769 }
 0xea0   : > { %16944 = vmatpush3.bf16.xpose.msra.mxu0 %v12243_v20  ;;  %v10260_v31 = vrot.slane %v10246_v46, %v18180_v55  ;;  %v11021_v9 = vcombine.low %v22366_v25, %v10820_v5  ;;  %v11105_v16 = vcombine.low %v11081_v34, %v11097_v6  ;;  %v11106_v23 = vcombine.high %v11081_v34, %v11097_v6 }
 0xea1   : > { %v11121_v56 = vcombine.low %v11088_v48, %v11104_v63  ;;  %v11122_v53 = vcombine.high %v11088_v48, %v11104_v63  ;;  %16965 = vmatprep.subr.bf16.mxu1 %v24611_v36  ;;  %16995 = vmatprep.subr.bf16.mxu0 %v24611_v36  ;;  %v11006_v62 = vcombine.high %v22293_v30, %v22378_v49 }
 0xea2   : > { %v10263_v22 = vcombine.low %v10244_v10, %v10260_v31  ;;  %v10264_v35 = vcombine.high %v10244_v10, %v10260_v31  ;;  %v11013_v58 = vrot.slane %v11005_v40, %v24530_v1  ;;  %v11113_v45 = vrot.slane %v11105_v16, %v18180_v55 }
 0xea3   : > { %v11120_v14 = vrot.slane %v11106_v23, %v18180_v55  ;;  %v11129_v34 = vrot.slane %v11121_v56, %v18180_v55  ;;  %v11136_v48 = vrot.slane %v11122_v53, %v18180_v55  ;;  %v11022_v46 = vcombine.high %v22366_v25, %v10820_v5  ;;  %v22435_v63 = vpop.permute.xlu1 %10787 }
 0xea4   : > { %v10751_v17 = vpack.c.bf16 %v10263_v22, %v10195_v11  ;;  %v10756_v20 = vpack.c.bf16 %v10264_v35, %v10196_v4  ;;  %v11029_v6 = vrot.slane %v11021_v9, %v24530_v1  ;;  %v11020_v16 = vrot.slane %v11006_v62, %v24530_v1  ;;  %v10808_v9 = vpop.permute.xlu0 %10807 }
 0xea5   : > { %v11685_v10 = vcombine.low %v11113_v45, %v11120_v14  ;;  %v16140_v30 = vcombine.high %v11113_v45, %v11120_v14  ;;  %v11701_v49 = vcombine.low %v11129_v34, %v11136_v48  ;;  %v16141_v40 = vcombine.high %v11129_v34, %v11136_v48 }
 0xea6   : > { %v12333_v31 = vsel %vm4699_vm2, %v10751_v17, 0  ;;  %v11036_v23 = vrot.slane %v11022_v46, %v24530_v1  ;;  %v11037_v56 = vcombine.low %v11013_v58, %v11029_v6  ;;  %16916 = vmatmul.mubr.msk.bf16.vlgmr.msra.gmra.mrb[120].mxu1 %vm4699_vm2, %v21748_v60  ;;  %v12435_v53 = vsel %vm4699_vm2, %v10756_v20, 0 }
 0xea7   : > { %v22441_v11 = vrot.slane %v11685_v10, %v24530_v1  ;;  %v22444_v25 = vrot.slane %v16140_v30, %v24530_v1  ;;  %v22447_v5 = vrot.slane %v11701_v49, %v24530_v1  ;;  %v22450_v4 = vrot.slane %v16141_v40, %v24530_v1  ;;  %16946 = vmatmul.mubr.msk.bf16.vlgmr.msra.gmra.mrb[140].mxu0 %vm4699_vm2, %v21756_v29  ;;  %v22458_v45 = vpop.permute.xlu1 %10805 }
 0xea8   : > { %16966 = vmatpush3.bf16.xpose.msra.mxu1 %v12333_v31  ;;  %v11038_v22 = vcombine.high %v11013_v58, %v11029_v6  ;;  %v11045_v35 = vrot.slane %v11037_v56, %v18180_v55  ;;  %v11053_v62 = vcombine.low %v11020_v16, %v11036_v23  ;;  %16996 = vmatpush3.bf16.xpose.msra.mxu0 %v12435_v53  ;;  %v10826_v49 = vpop.permute.xlu0 %10825 }
 0xea9   : > { %v11054_v14 = vcombine.high %v11020_v16, %v11036_v23  ;;  %16919 = vmatprep.mubr.msk.bf16.mxu1 %vm17816_vm1, %v24611_v36  ;;  %v10298_v60 = vcombine.high %v21984_v21, %v21987_v37  ;;  %v10314_v29 = vcombine.high %v21990_v13, %v21993_v39  ;;  %16949 = vmatprep.mubr.msk.bf16.mxu0 %vm17816_vm1, %v24611_v36 }
 0xeaa   : > { %v11052_v34 = vrot.slane %v11038_v22, %v18180_v55  ;;  %v11061_v58 = vrot.slane %v11053_v62, %v18180_v55  ;;  %16967 = vmatprep.subr.bf16.mxu1 %v24611_v36  ;;  %v10366_v48 = vcombine.high %v22065_v24, %v22081_v43  ;;  %16997 = vmatprep.subr.bf16.mxu0 %v24611_v36 }
 0xeab   : > { %v11068_v17 = vrot.slane %v11054_v14, %v18180_v55  ;;  %v10312_v21 = vrot.slane %v10298_v60, %v18180_v55  ;;  %v10328_v37 = vrot.slane %v10314_v29, %v18180_v55  ;;  %v10382_v13 = vcombine.high %v22107_v42, %v22110_v59  ;;  %v22482_v40 = vpop.permute.xlu1 %10823 }
 0xeac   : > { %v11617_v39 = vcombine.low %v11045_v35, %v11052_v34  ;;  %v16138_v20 = vcombine.high %v11045_v35, %v11052_v34  ;;  %v10380_v46 = vrot.slane %v10366_v48, %v18180_v55  ;;  %v11209_v6 = vcombine.low %v22392_v3, %v10808_v9 }
 0xead   : > { %v11633_v10 = vcombine.low %v11061_v58, %v11068_v17  ;;  %v16139_v30 = vcombine.high %v11061_v58, %v11068_v17  ;;  %v10331_v24 = vcombine.low %v10312_v21, %v10328_v37  ;;  %v10396_v43 = vrot.slane %v10382_v13, %v18180_v55 }
 0xeae   : > { %v22485_v31 = vrot.slane %v11617_v39, %v24530_v1  ;;  %v22488_v16 = vrot.slane %v16138_v20, %v24530_v1  ;;  %v10332_v42 = vcombine.high %v10312_v21, %v10328_v37  ;;  %v11210_v59 = vcombine.high %v22392_v3, %v10808_v9  ;;  %16920 = vmatmul.mubr.msk.bf16.gmra.mrb[124].mxu1 %vm4699_vm2, %v21758_v54 }
 0xeaf   : > { %v22492_v23 = vrot.slane %v11633_v10, %v24530_v1  ;;  %v22495_v56 = vrot.slane %v16139_v30, %v24530_v1  ;;  %v10399_v53 = vcombine.low %v10380_v46, %v10396_v43  ;;  %v10400_v22 = vcombine.high %v10380_v46, %v10396_v43  ;;  %16950 = vmatmul.mubr.msk.bf16.gmra.mrb[144].mxu0 %vm4699_vm2, %v21764_v8  ;;  %v24638_v10 = vld [vmem:[#allocation15_spill] sm:$0xff] }
 0xeb0   : > { %v11217_v35 = vrot.slane %v11209_v6, %v24530_v1  ;;  %v11224_v62 = vrot.slane %v11210_v59, %v24530_v1  ;;  %16923 = vmatprep.mubr.msk.bf16.mxu1 %vm17816_vm1, %v24611_v36  ;;  %v11225_v3 = vcombine.low %v22423_v51, %v10826_v49  ;;  %16953 = vmatprep.mubr.msk.bf16.mxu0 %vm17816_vm1, %v24611_v36 }
 0xeb1   : > { %v10752_v9 = vpack.c.bf16 %v10399_v53, %v10331_v24  ;;  %v10757_v14 = vpack.c.bf16 %v10400_v22, %v10332_v42  ;;  %v11226_v54 = vcombine.high %v22423_v51, %v10826_v49  ;;  %v10434_v60 = vcombine.high %v22147_v52, %v22153_v2  ;;  %v10776_v52 = vpop.permute.xlu0 %10775  ;;  %v22522_v2 = vpop.permute.xlu1 %10773  ;;  %v24639_v42 = vld [vmem:[#allocation20_spill] sm:$0xff] }
 0xeb2   : > { %v11233_v8 = vrot.slane %v11225_v3, %v24530_v1  ;;  %v10450_v29 = vcombine.high %v22175_v15, %v22192_v41  ;;  %v10502_v34 = vcombine.high %v22201_v18, %v22210_v19  ;;  %v10518_v58 = vcombine.high %v22216_v50, %v22233_v57 }
 0xeb3   : > { %v12336_v48 = vsel %vm4699_vm2, %v10752_v9, 0  ;;  %v12438_v17 = vsel %vm4699_vm2, %v10757_v14, 0  ;;  %v11240_v51 = vrot.slane %v11226_v54, %v24530_v1  ;;  %v10448_v21 = vrot.slane %v10434_v60, %v18180_v55 }
 0xeb4   : > { %16968 = vmatpush3.bf16.xpose.msra.mxu1 %v12336_v48  ;;  %16998 = vmatpush3.bf16.xpose.msra.mxu0 %v12438_v17  ;;  %v11241_v15 = vcombine.low %v11217_v35, %v11233_v8  ;;  %v11242_v41 = vcombine.high %v11217_v35, %v11233_v8  ;;  %v10464_v18 = vrot.slane %v10450_v29, %v18180_v55 }
 0xeb5   : > { %v11257_v19 = vcombine.low %v11224_v62, %v11240_v51  ;;  %v11258_v37 = vcombine.high %v11224_v62, %v11240_v51  ;;  %16969 = vmatprep.subr.bf16.mxu1 %v24611_v36  ;;  %16999 = vmatprep.subr.bf16.mxu0 %v24611_v36  ;;  %v10516_v50 = vrot.slane %v10502_v34, %v18180_v55  ;;  %v10812_v9 = vpop.permute.xlu0 %10811  ;;  %v22544_v14 = vpop.permute.xlu1 %10791 }
 0xeb6   : > { %v11249_v57 = vrot.slane %v11241_v15, %v18180_v55  ;;  %v11256_v13 = vrot.slane %v11242_v41, %v18180_v55  ;;  %v10467_v39 = vcombine.low %v10448_v21, %v10464_v18  ;;  %v10532_v20 = vrot.slane %v10518_v58, %v18180_v55  ;;  %16924 = vmatmul.mubr.msk.bf16.gmra.mrb[128].mxu1 %vm4699_vm2, %v24638_v10 }
 0xeb7   : > { %v11265_v46 = vrot.slane %v11257_v19, %v18180_v55  ;;  %v11272_v6 = vrot.slane %v11258_v37, %v18180_v55  ;;  %v10468_v30 = vcombine.high %v10448_v21, %v10464_v18  ;;  %v11141_v24 = vcombine.low %v22420_v32, %v22458_v45  ;;  %16954 = vmatmul.mubr.msk.bf16.gmra.mrb[148].mxu0 %vm4699_vm2, %v24639_v42  ;;  %v24640_v18 = vld [vmem:[#allocation29_spill] sm:$0xff] }
 0xeb8   : > { %v11821_v43 = vcombine.low %v11249_v57, %v11256_v13  ;;  %v16144_v49 = vcombine.high %v11249_v57, %v11256_v13  ;;  %v10535_v59 = vcombine.low %v10516_v50, %v10532_v20  ;;  %v10536_v53 = vcombine.high %v10516_v50, %v10532_v20  ;;  %16927 = vmatprep.mubr.msk.bf16.mxu1 %vm17816_vm1, %v24611_v36  ;;  %v24641_v57 = vld [vmem:[#allocation4_spill] sm:$0xff] }
 0xeb9   : > { %v11837_v22 = vcombine.low %v11265_v46, %v11272_v6  ;;  %v16145_v35 = vcombine.high %v11265_v46, %v11272_v6  ;;  %v11142_v62 = vcombine.high %v22420_v32, %v22458_v45  ;;  %v11149_v3 = vrot.slane %v11141_v24, %v24530_v1  ;;  %16957 = vmatprep.mubr.msk.bf16.mxu0 %vm17816_vm1, %v24611_v36  ;;  %v10794_v46 = vpop.permute.xlu1 %10793 }
 0xeba   : > { %v22547_v54 = vrot.slane %v11821_v43, %v24530_v1  ;;  %v22550_v60 = vrot.slane %v16144_v49, %v24530_v1  ;;  %v10753_v8 = vpack.c.bf16 %v10535_v59, %v10467_v39  ;;  %v10758_v29 = vpack.c.bf16 %v10536_v53, %v10468_v30  ;;  %v24644_v30 = vld [vmem:[#allocation25_spill] sm:$0xff]  ;;  %v24645_v43 = vld [vmem:[#allocation40_spill] sm:$0xff] }
 0xebb   : > { %v22555_v32 = vrot.slane %v11837_v22, %v24530_v1  ;;  %v22558_v45 = vrot.slane %v16145_v35, %v24530_v1  ;;  %v11156_v34 = vrot.slane %v11142_v62, %v24530_v1  ;;  %v11157_v58 = vcombine.low %v22435_v63, %v22482_v40 }
 0xebc   : > { %v12339_v48 = vsel %vm4699_vm2, %v10753_v8, 0  ;;  %v12441_v17 = vsel %vm4699_vm2, %v10758_v29, 0  ;;  %v11158_v51 = vcombine.high %v22435_v63, %v22482_v40  ;;  %v11345_v21 = vcombine.low %v10776_v52, %v10812_v9  ;;  %v24642_v63 = vld [vmem:[#allocation34_spill] sm:$0xff] }
 0xebd   : > { %16970 = vmatpush3.bf16.xpose.msra.mxu1 %v12339_v48  ;;  %17000 = vmatpush3.bf16.xpose.msra.mxu0 %v12441_v17  ;;  %v11165_v15 = vrot.slane %v11157_v58, %v24530_v1  ;;  %v11346_v41 = vcombine.high %v10776_v52, %v10812_v9  ;;  %v10570_v19 = vcombine.high %v24640_v18, %v22263_v12  ;;  %v24643_v52 = vld [vmem:[#allocation38_spill] sm:$0xff]  ;;  %v24647_v58 = vld [vmem:[#allocation48_spill] sm:$0xff]  ;;  %v10810_v18 = vpop.permute.xlu1 %10809 }
 0xebe   : > { %v11172_v37 = vrot.slane %v11158_v51, %v24530_v1  ;;  %v22572_v50 = vrot.slane %v11345_v21, %v24530_v1  ;;  %16971 = vmatprep.subr.bf16.mxu1 %v24611_v36  ;;  %17001 = vmatprep.subr.bf16.mxu0 %v24611_v36  ;;  %v10586_v40 = vcombine.high %v24642_v63, %v24641_v57  ;;  %v10830_v57 = vpop.permute.xlu0 %10829 }
 0xebf   : > { %v11173_v13 = vcombine.low %v11149_v3, %v11165_v15  ;;  %v11174_v39 = vcombine.high %v11149_v3, %v11165_v15  ;;  %v22579_v20 = vrot.slane %v11346_v41, %v24530_v1  ;;  %16928 = vmatmul.mubr.msk.bf16.gmra.mrb[132].mxu1 %vm4699_vm2, %v24643_v52  ;;  %v10584_v12 = vrot.slane %v10570_v19, %v18180_v55 }
 0xec0   : > { %v11189_v6 = vcombine.low %v11156_v34, %v11172_v37  ;;  %v11190_v10 = vcombine.high %v11156_v34, %v11172_v37  ;;  %16958 = vmatmul.mubr.msk.bf16.gmra.mrb[152].mxu0 %vm4699_vm2, %v24644_v30  ;;  %v10600_v24 = vrot.slane %v10586_v40, %v18180_v55  ;;  %v10638_v49 = vcombine.high %v24645_v43, %v22289_v38 }
 0xec1   : > { %v11181_v42 = vrot.slane %v11173_v13, %v18180_v55  ;;  %v11188_v59 = vrot.slane %v11174_v39, %v18180_v55  ;;  %v10654_v53 = vcombine.high %v22303_v26, %v22314_v0  ;;  %16931 = vmatprep.mubr.msk.bf16.mxu1 %vm17816_vm1, %v24611_v36  ;;  %16961 = vmatprep.mubr.msk.bf16.mxu0 %vm17816_vm1, %v24611_v36  ;;  %v24646_v0 = vld [vmem:[#allocation49_spill] sm:$0xff]  ;;  %v24648_v13 = vld [vmem:[#allocation39_spill] sm:$0xff] }
 0xec2   : > { %v11197_v22 = vrot.slane %v11189_v6, %v18180_v55  ;;  %v11204_v35 = vrot.slane %v11190_v10, %v18180_v55  ;;  %v10603_v62 = vcombine.low %v10584_v12, %v10600_v24  ;;  %v10652_v38 = vrot.slane %v10638_v49, %v18180_v55  ;;  %v24650_v6 = vld [vmem:[#allocation43_spill] sm:$0xff] }
 0xec3   : > { %v11753_v3 = vcombine.low %v11181_v42, %v11188_v59  ;;  %v16142_v9 = vcombine.high %v11181_v42, %v11188_v59  ;;  %v10668_v8 = vrot.slane %v10654_v53, %v18180_v55  ;;  %v10604_v29 = vcombine.high %v10584_v12, %v10600_v24 }
 0xec4   : > { %v11769_v34 = vcombine.low %v11197_v22, %v11204_v35  ;;  %v16143_v26 = vcombine.high %v11197_v22, %v11204_v35  ;;  %v10706_v48 = vcombine.high %v24647_v58, %v24646_v0  ;;  %v10722_v17 = vcombine.high %v22358_v7, %v22362_v28 }
 0xec5   : > { %v22606_v51 = vrot.slane %v11753_v3, %v24530_v1  ;;  %v22609_v21 = vrot.slane %v16142_v9, %v24530_v1  ;;  %v10671_v15 = vcombine.low %v10652_v38, %v10668_v8  ;;  %v10672_v41 = vcombine.high %v10652_v38, %v10668_v8 }
 0xec6   : > { %v22612_v19 = vrot.slane %v11769_v34, %v24530_v1  ;;  %v22615_v37 = vrot.slane %v16143_v26, %v24530_v1  ;;  %v10720_v63 = vrot.slane %v10706_v48, %v18180_v55  ;;  %v10736_v7 = vrot.slane %v10722_v17, %v18180_v55  ;;  %v10828_v26 = vpop.permute.xlu1 %10827 }
 0xec7   : > { %v10754_v28 = vpack.c.bf16 %v10671_v15, %v10603_v62  ;;  %v10759_v40 = vpack.c.bf16 %v10672_v41, %v10604_v29  ;;  %v24649_v39 = vpack.c.bf16 %v24648_v13, %v24648_v13  ;;  %v11361_v52 = vcombine.low %v10794_v46, %v10830_v57  ;;  %v24652_v41 = vld [vmem:[#allocation46_spill] sm:$0xff] }
 0xec8   : > { %v11362_v12 = vcombine.high %v10794_v46, %v10830_v57  ;;  %v24651_v10 = vpack.c.bf16 %v24650_v6, %v24650_v6  ;;  %v10739_v30 = vcombine.low %v10720_v63, %v10736_v7  ;;  %v10740_v24 = vcombine.high %v10720_v63, %v10736_v7  ;;  %v24654_v57 = vld [vmem:[#allocation47_spill] sm:$0xff] }
 0xec9   : > { %16932 = vmatmul.mubr.msk.bf16.gmra.mrb[136].mxu1 %vm4699_vm2, %v24649_v39  ;;  %v11277_v43 = vcombine.low %v22522_v2, %v10810_v18  ;;  %v11278_v49 = vcombine.high %v22522_v2, %v10810_v18  ;;  %v12342_v42 = vsel %vm4699_vm2, %v10754_v28, 0  ;;  %v12444_v59 = vsel %vm4699_vm2, %v10759_v40, 0  ;;  %v24653_v18 = vld [vmem:[#allocation36_spill] sm:$0xff] }
 0xeca   : > { %16962 = vmatmul.mubr.msk.bf16.gmra.mrb[156].mxu0 %vm4699_vm2, %v24651_v10  ;;  %v11369_v53 = vrot.slane %v11361_v52, %v24530_v1  ;;  %v11376_v22 = vrot.slane %v11362_v12, %v24530_v1  ;;  %16975 = vmatprep.mubr.msk.bf16.mxu1 %vm17816_vm1, %v24611_v36  ;;  %v10755_v46 = vpack.c.bf16 %v10739_v30, %v10739_v30 }
 0xecb   : > { %17005 = vmatprep.mubr.msk.bf16.mxu0 %vm17816_vm1, %v24611_v36  ;;  %16972 = vmatpush3.bf16.xpose.msra.mxu1 %v12342_v42  ;;  %v10760_v35 = vpack.c.bf16 %v10740_v24, %v10740_v24  ;;  %v11285_v2 = vrot.slane %v11277_v43, %v24530_v1  ;;  %v11292_v34 = vrot.slane %v11278_v49, %v24530_v1 }
 0xecc   : > { %17002 = vmatpush3.bf16.xpose.msra.mxu0 %v12444_v59  ;;  %16973 = vmatprep.subr.bf16.mxu1 %v24611_v36  ;;  %v11377_v62 = vcombine.low %v22572_v50, %v11369_v53  ;;  %v11378_v38 = vcombine.high %v22572_v50, %v11369_v53  ;;  %v11393_v3 = vcombine.low %v22579_v20, %v11376_v22  ;;  %v12345_v9 = vsel %vm4699_vm2, %v10755_v46, 0 }
 0xecd   : > { %17003 = vmatprep.subr.bf16.mxu0 %v24611_v36  ;;  %v12447_v8 = vsel %vm4699_vm2, %v10760_v35, 0  ;;  %v11394_v29 = vcombine.high %v22579_v20, %v11376_v22  ;;  %v11513_v50 = vcombine.low %v22386_v27, %v22389_v44  ;;  %v11529_v15 = vcombine.low %v22395_v47, %v22416_v33 }
 0xece   : > { %v11385_v0 = vrot.slane %v11377_v62, %v18180_v55  ;;  %v11392_v58 = vrot.slane %v11378_v38, %v18180_v55  ;;  %v11401_v48 = vrot.slane %v11393_v3, %v18180_v55  ;;  %v11581_v20 = vcombine.low %v24653_v18, %v24652_v41 }
 0xecf   : > { %v11408_v17 = vrot.slane %v11394_v29, %v18180_v55  ;;  %v11597_v63 = vcombine.low %v24654_v57, %v22383_v61  ;;  %v11521_v40 = vrot.slane %v11513_v50, %v18180_v55  ;;  %v11293_v13 = vcombine.low %v22544_v14, %v10828_v26 }
 0xed0   : > { %v11957_v7 = vcombine.low %v11385_v0, %v11392_v58  ;;  %v16148_v28 = vcombine.high %v11385_v0, %v11392_v58  ;;  %v11537_v12 = vrot.slane %v11529_v15, %v18180_v55  ;;  %v11589_v6 = vrot.slane %v11581_v20, %v18180_v55 }
 0xed1   : > { %v11973_v39 = vcombine.low %v11401_v48, %v11408_v17  ;;  %v16149_v52 = vcombine.high %v11401_v48, %v11408_v17  ;;  %v11605_v24 = vrot.slane %v11597_v63, %v18180_v55  ;;  %v11294_v43 = vcombine.high %v22544_v14, %v10828_v26 }
 0xed2   : > { %v22664_v10 = vrot.slane %v11957_v7, %v24530_v1  ;;  %v22667_v30 = vrot.slane %v16148_v28, %v24530_v1  ;;  %v11545_v59 = vcombine.low %v11521_v40, %v11537_v12  ;;  %v11546_v22 = vcombine.high %v11521_v40, %v11537_v12 }
 0xed3   : > { %16974 = vmatpush3.bf16.xpose.msra.mxu1 %v12345_v9  ;;  %v22672_v49 = vrot.slane %v11973_v39, %v24530_v1  ;;  %v22675_v42 = vrot.slane %v16149_v52, %v24530_v1  ;;  %v11613_v53 = vcombine.low %v11589_v6, %v11605_v24  ;;  %v11614_v46 = vcombine.high %v11589_v6, %v11605_v24 }
 0xed4   : > { %17004 = vmatpush3.bf16.xpose.msra.mxu0 %v12447_v8  ;;  %17025 = vmatprep.subr.bf16.mxu1 %v24611_v36  ;;  %v11301_v35 = vrot.slane %v11293_v13, %v24530_v1  ;;  %v11308_v14 = vrot.slane %v11294_v43, %v24530_v1  ;;  %v11649_v62 = vcombine.low %v22485_v31, %v22488_v16  ;;  %v24655_v13 = vld [vmem:[#allocation44_spill] sm:$0xff] }
 0xed5   : > { %17055 = vmatprep.subr.bf16.mxu0 %v24611_v36  ;;  %v11665_v38 = vcombine.low %v22492_v23, %v22495_v56  ;;  %v12093_v3 = vpack.c.bf16 %v11613_v53, %v11545_v59  ;;  %v12098_v9 = vpack.c.bf16 %v11614_v46, %v11546_v22  ;;  %v11717_v8 = vcombine.low %v22441_v11, %v22444_v25 }
 0xed6   : > { %v11733_v29 = vcombine.low %v22447_v5, %v22450_v4  ;;  %v11309_v26 = vcombine.low %v11285_v2, %v11301_v35  ;;  %v11310_v0 = vcombine.high %v11285_v2, %v11301_v35  ;;  %v11325_v58 = vcombine.low %v11292_v34, %v11308_v14  ;;  %v24656_v2 = vld [vmem:[#allocation24_spill] sm:$0xff] }
 0xed7   : > { %v11326_v48 = vcombine.high %v11292_v34, %v11308_v14  ;;  %v11657_v50 = vrot.slane %v11649_v62, %v18180_v55  ;;  %v11673_v17 = vrot.slane %v11665_v38, %v18180_v55  ;;  %v11725_v15 = vrot.slane %v11717_v8, %v18180_v55 }
 0xed8   : > { %v11741_v20 = vrot.slane %v11733_v29, %v18180_v55  ;;  %v11317_v63 = vrot.slane %v11309_v26, %v18180_v55  ;;  %v11324_v7 = vrot.slane %v11310_v0, %v18180_v55  ;;  %v11333_v28 = vrot.slane %v11325_v58, %v18180_v55 }
 0xed9   : > { %v11340_v40 = vrot.slane %v11326_v48, %v18180_v55  ;;  %v11681_v34 = vcombine.low %v11657_v50, %v11673_v17  ;;  %v11682_v52 = vcombine.high %v11657_v50, %v11673_v17  ;;  %v11785_v38 = vcombine.low %v22606_v51, %v22609_v21 }
 0xeda   : > { %16976 = vmatmul.mubr.msk.bf16.vlgmr.msra.gmra.mrb[140].mxu1 %vm4699_vm2, %v24655_v13  ;;  %v11749_v39 = vcombine.low %v11725_v15, %v11741_v20  ;;  %v11889_v12 = vcombine.low %v11317_v63, %v11324_v7  ;;  %v16146_v6 = vcombine.high %v11317_v63, %v11324_v7  ;;  %v11750_v53 = vcombine.high %v11725_v15, %v11741_v20  ;;  %v24657_v63 = vld [vmem:[#allocation35_spill] sm:$0xff]  ;;  %v24658_v7 = vld [vmem:[#allocation28_spill] sm:$0xff] }
 0xedb   : > { %17006 = vmatmul.mubr.msk.bf16.vlgmr.msra.gmra.mrb[160].mxu0 %vm4699_vm2, %v24656_v2  ;;  %17026 = vmatpush3.bf16.msra.mxu1 %v12093_v3  ;;  %v11905_v24 = vcombine.low %v11333_v28, %v11340_v40  ;;  %v16147_v43 = vcombine.high %v11333_v28, %v11340_v40  ;;  %v11801_v3 = vcombine.low %v22612_v19, %v22615_v37 }
 0xedc   : > { %17056 = vmatpush3.bf16.msra.mxu0 %v12098_v9  ;;  %17027 = vmatprep.subr.bf16.mxu1 %v24611_v36  ;;  %v12094_v59 = vpack.c.bf16 %v11749_v39, %v11681_v34  ;;  %v22704_v22 = vrot.slane %v11889_v12, %v24530_v1  ;;  %v22707_v46 = vrot.slane %v16146_v6, %v24530_v1 }
 0xedd   : > { %17057 = vmatprep.subr.bf16.mxu0 %v24611_v36  ;;  %v22710_v35 = vrot.slane %v11905_v24, %v24530_v1  ;;  %16979 = vmatprep.mubr.msk.bf16.mxu1 %vm17816_vm1, %v24611_v36  ;;  %v22717_v14 = vrot.slane %v16147_v43, %v24530_v1  ;;  %v12099_v62 = vpack.c.bf16 %v11750_v53, %v11682_v52 }
 0xede   : > { %17009 = vmatprep.mubr.msk.bf16.mxu0 %vm17816_vm1, %v24611_v36  ;;  %v11853_v9 = vcombine.low %v22547_v54, %v22550_v60  ;;  %v11869_v8 = vcombine.low %v22555_v32, %v22558_v45  ;;  %v11921_v29 = vcombine.low %v22704_v22, %v22707_v46  ;;  %v11989_v26 = vcombine.low %v22664_v10, %v22667_v30 }
 0xedf   : > { %17028 = vmatpush3.bf16.msra.mxu1 %v12094_v59  ;;  %v11793_v0 = vrot.slane %v11785_v38, %v18180_v55  ;;  %v11809_v58 = vrot.slane %v11801_v3, %v18180_v55  ;;  %v11937_v48 = vcombine.low %v22710_v35, %v22717_v14  ;;  %v12005_v39 = vcombine.low %v22672_v49, %v22675_v42 }
 0xee0   : > { %17058 = vmatpush3.bf16.msra.mxu0 %v12099_v62  ;;  %17029 = vmatprep.subr.bf16.mxu1 %v24611_v36  ;;  %v11861_v50 = vrot.slane %v11853_v9, %v18180_v55  ;;  %v11877_v17 = vrot.slane %v11869_v8, %v18180_v55  ;;  %v11929_v15 = vrot.slane %v11921_v29, %v18180_v55 }
 0xee1   : > { %17059 = vmatprep.subr.bf16.mxu0 %v24611_v36  ;;  %v11997_v20 = vrot.slane %v11989_v26, %v18180_v55  ;;  %v11817_v28 = vcombine.low %v11793_v0, %v11809_v58  ;;  %v11818_v40 = vcombine.high %v11793_v0, %v11809_v58  ;;  %v11945_v13 = vrot.slane %v11937_v48, %v18180_v55 }
 0xee2   : > { %16980 = vmatmul.mubr.msk.bf16.gmra.mrb[144].mxu1 %vm4699_vm2, %v24657_v63  ;;  %v11885_v2 = vcombine.low %v11861_v50, %v11877_v17  ;;  %v11886_v34 = vcombine.high %v11861_v50, %v11877_v17  ;;  %v11514_v6 = vcombine.high %v22386_v27, %v22389_v44  ;;  %v11530_v24 = vcombine.high %v22395_v47, %v22416_v33 }
 0xee3   : > { %17010 = vmatmul.mubr.msk.bf16.gmra.mrb[164].mxu0 %vm4699_vm2, %v24658_v7  ;;  %16983 = vmatprep.mubr.msk.bf16.mxu1 %vm17816_vm1, %v24611_v36  ;;  %v11953_v52 = vcombine.low %v11929_v15, %v11945_v13  ;;  %v11954_v12 = vcombine.high %v11929_v15, %v11945_v13  ;;  %v12013_v53 = vrot.slane %v12005_v39, %v18180_v55 }
 0xee4   : > { %17013 = vmatprep.mubr.msk.bf16.mxu0 %vm17816_vm1, %v24611_v36  ;;  %v12095_v43 = vpack.c.bf16 %v11885_v2, %v11817_v28  ;;  %v12100_v59 = vpack.c.bf16 %v11886_v34, %v11818_v40  ;;  %v11582_v62 = vcombine.high %v24653_v18, %v24652_v41  ;;  %v11528_v38 = vrot.slane %v11514_v6, %v18180_v55 }
 0xee5   : > { %v11544_v3 = vrot.slane %v11530_v24, %v18180_v55  ;;  %v11598_v9 = vcombine.high %v24654_v57, %v22383_v61  ;;  %v11650_v27 = vcombine.high %v22485_v31, %v22488_v16  ;;  %v12021_v44 = vcombine.low %v11997_v20, %v12013_v53  ;;  %v24659_v16 = vld [vmem:[#allocation37_spill] sm:$0xff]  ;;  %v24660_v57 = vld [vmem:[#allocation11_spill] sm:$0xff] }
 0xee6   : > { %17030 = vmatpush3.bf16.msra.mxu1 %v12095_v43  ;;  %17060 = vmatpush3.bf16.msra.mxu0 %v12100_v59  ;;  %v12022_v47 = vcombine.high %v11997_v20, %v12013_v53  ;;  %v11596_v33 = vrot.slane %v11582_v62, %v18180_v55  ;;  %v11666_v31 = vcombine.high %v22492_v23, %v22495_v56 }
 0xee7   : > { %17031 = vmatprep.subr.bf16.mxu1 %v24611_v36  ;;  %17061 = vmatprep.subr.bf16.mxu0 %v24611_v36  ;;  %v11547_v41 = vcombine.low %v11528_v38, %v11544_v3  ;;  %v11612_v18 = vrot.slane %v11598_v9, %v18180_v55  ;;  %v11548_v8 = vcombine.high %v11528_v38, %v11544_v3  ;;  %v24665_v3 = vld [vmem:[#allocation45_spill] sm:$0xff] }
 0xee8   : > { %v12096_v29 = vpack.c.bf16 %v12021_v44, %v11953_v52  ;;  %v12101_v26 = vpack.c.bf16 %v12022_v47, %v11954_v12  ;;  %v11664_v61 = vrot.slane %v11650_v27, %v18180_v55  ;;  %v11718_v48 = vcombine.high %v22441_v11, %v22444_v25 }
 0xee9   : > { %v11615_v0 = vcombine.low %v11596_v33, %v11612_v18  ;;  %v11616_v58 = vcombine.high %v11596_v33, %v11612_v18  ;;  %v11680_v50 = vrot.slane %v11666_v31, %v18180_v55  ;;  %v11734_v23 = vcombine.high %v22447_v5, %v22450_v4 }
 0xeea   : > { %16984 = vmatmul.mubr.msk.bf16.gmra.mrb[148].mxu1 %vm4699_vm2, %v24659_v16  ;;  %v11786_v56 = vcombine.high %v22606_v51, %v22609_v21  ;;  %17062 = vmatpush3.bf16.msra.mxu0 %v12101_v26  ;;  %v11732_v11 = vrot.slane %v11718_v48, %v18180_v55  ;;  %v11802_v4 = vcombine.high %v22612_v19, %v22615_v37 }
 0xeeb   : > { %17014 = vmatmul.mubr.msk.bf16.gmra.mrb[168].mxu0 %vm4699_vm2, %v24660_v57  ;;  %16987 = vmatprep.mubr.msk.bf16.mxu1 %vm17816_vm1, %v24611_v36  ;;  %v22787_v17 = vpack.c.bf16 %v11615_v0, %v11547_v41  ;;  %v22789_v15 = vpack.c.bf16 %v11616_v58, %v11548_v8  ;;  %v11683_v25 = vcombine.low %v11664_v61, %v11680_v50  ;;  %v24667_v58 = vld [vmem:[#allocation19_spill] sm:$0xff] }
 0xeec   : > { %17017 = vmatprep.mubr.msk.bf16.mxu0 %vm17816_vm1, %v24611_v36  ;;  %17032 = vmatpush3.bf16.msra.mxu1 %v12096_v29  ;;  %v11748_v20 = vrot.slane %v11734_v23, %v18180_v55  ;;  %v11684_v63 = vcombine.high %v11664_v61, %v11680_v50  ;;  %v11800_v5 = vrot.slane %v11786_v56, %v18180_v55 }
 0xeed   : > { %17033 = vmatprep.subr.bf16.mxu1 %v24611_v36  ;;  %17063 = vmatprep.subr.bf16.mxu0 %v24611_v36  ;;  %v11854_v51 = vcombine.high %v22547_v54, %v22550_v60  ;;  %v11870_v21 = vcombine.high %v22555_v32, %v22558_v45  ;;  %v11922_v40 = vcombine.high %v22704_v22, %v22707_v46  ;;  %v24661_v22 = vld [vmem:[#allocation22_spill] sm:$0xff]  ;;  %v24662_v46 = vld [vmem:[#allocation31_spill] sm:$0xff] }
 0xeee   : > { %v11751_v7 = vcombine.low %v11732_v11, %v11748_v20  ;;  %v11752_v28 = vcombine.high %v11732_v11, %v11748_v20  ;;  %v11938_v13 = vcombine.high %v22710_v35, %v22717_v14  ;;  %v11816_v2 = vrot.slane %v11802_v4, %v18180_v55 }
 0xeef   : > { %v11868_v34 = vrot.slane %v11854_v51, %v18180_v55  ;;  %v11884_v19 = vrot.slane %v11870_v21, %v18180_v55  ;;  %v11990_v54 = vcombine.high %v22664_v10, %v22667_v30  ;;  %v11936_v45 = vrot.slane %v11922_v40, %v18180_v55  ;;  %v24663_v10 = vld [vmem:[#allocation7_spill] sm:$0xff]  ;;  %v24664_v30 = vld [vmem:[#allocation30_spill] sm:$0xff] }
 0xef0   : > { %v22811_v60 = vpack.c.bf16 %v11751_v7, %v11683_v25  ;;  %v22813_v32 = vpack.c.bf16 %v11752_v28, %v11684_v63  ;;  %v11952_v37 = vrot.slane %v11938_v13, %v18180_v55  ;;  %v11819_v35 = vcombine.low %v11800_v5, %v11816_v2  ;;  %v24668_v63 = vld [vmem:[#allocation21_spill] sm:$0xff] }
 0xef1   : > { %v11887_v14 = vcombine.low %v11868_v34, %v11884_v19  ;;  %v11820_v39 = vcombine.high %v11800_v5, %v11816_v2  ;;  %v9388_v52 = vcombine.high %v24664_v30, %v24663_v10  ;;  %v11888_v12 = vcombine.high %v11868_v34, %v11884_v19  ;;  %v24669_v2 = vld [vmem:[#allocation26_spill] sm:$0xff] }
 0xef2   : > { %16988 = vmatmul.mubr.msk.bf16.gmra.mrb[152].mxu1 %vm4699_vm2, %v24661_v22  ;;  %v11955_v6 = vcombine.low %v11936_v45, %v11952_v37  ;;  %v12004_v43 = vrot.slane %v11990_v54, %v18180_v55  ;;  %v12006_v59 = vcombine.high %v22672_v49, %v22675_v42  ;;  %v11956_v53 = vcombine.high %v11936_v45, %v11952_v37  ;;  %v24666_v42 = vld [vmem:[#allocation6_spill] sm:$0xff] }
 0xef3   : > { %17018 = vmatmul.mubr.msk.bf16.gmra.mrb[172].mxu0 %vm4699_vm2, %v24662_v46  ;;  %16991 = vmatprep.mubr.msk.bf16.mxu1 %vm17816_vm1, %v24611_v36  ;;  %v22827_v24 = vpack.c.bf16 %v11887_v14, %v11819_v35  ;;  %v22832_v62 = vpack.c.bf16 %v11888_v12, %v11820_v39  ;;  %v9403_v9 = vpack.c.bf16 %v24665_v3, %v24665_v3  ;;  %v24670_v14 = vld [vmem:[#allocation5_spill] sm:$0xff] }
 0xef4   : > { %17021 = vmatprep.mubr.msk.bf16.mxu0 %vm17816_vm1, %v24611_v36  ;;  %v12020_v38 = vrot.slane %v12006_v59, %v18180_v55  ;;  %v9408_v27 = vpack.c.bf16 %v9388_v52, %v9388_v52 }
 0xef6   : > { %v12023_v44 = vcombine.low %v12004_v43, %v12020_v38  ;;  %v12024_v47 = vcombine.high %v12004_v43, %v12020_v38 }
 0xef8   : > { %v22839_v33 = vpack.c.bf16 %v12023_v44, %v11955_v6  ;;  %v22841_v41 = vpack.c.bf16 %v12024_v47, %v11956_v53  ;;  %v24671_v53 = vld [vmem:[#allocation14_spill] sm:$0xff] }
 0xefa   : > { %16992 = vmatmul.mubr.msk.bf16.gmra.mrb[156].mxu1 %vm4699_vm2, %v9403_v9 }
 0xefb   : > { %17022 = vmatmul.mubr.msk.bf16.gmra.mrb[176].mxu0 %vm4699_vm2, %v9408_v27  ;;  %17035 = vmatprep.mubr.msk.bf16.mxu1 %vm17816_vm1, %v24611_v36 }
 0xefc   : > { %17065 = vmatprep.mubr.msk.bf16.mxu0 %vm17816_vm1, %v24611_v36 }
 0xf79   : > { %v12177_v49 = vpop.f32.mrb[120].mxu1 }
 0xf7a   : > { %v22848_v18 = vadd.f32 %v12177_v49, %v24666_v42  ;;  %v12279_v8 = vpop.f32.mrb[140].mxu0  ;;  %v16917_v29 = vpop.f32.mrb[121].mxu1 }
 0xf7b   : > { %v22851_v26 = vadd.f32 %v12279_v8, %v24666_v42  ;;  %v16947_v61 = vpop.f32.mrb[141].mxu0  ;;  %v12180_v31 = vpop.f32.mrb[122].mxu1  ;;  %v24672_v29 = vld [vmem:[#allocation2_spill] sm:$0xff] }
 0xf7c   : > { %v12282_v16 = vpop.f32.mrb[142].mxu0  ;;  %v16918_v57 = vpop.f32.mrb[123].mxu1  ;;  %v12521_v0 = vsel %vm5108_vm5, %v22848_v18, -inf  ;;  %v22856_v48 = vadd.f32 %v12180_v31, %v24667_v58 }
 0xf7d   : > { %v16948_v50 = vpop.f32.mrb[143].mxu0  ;;  %v12548_v23 = vsel %vm5108_vm5, %v22851_v26, -inf  ;;  %12522 = vmax.xlane.f32.xlu1 %v12521_v0  ;;  %v22861_v56 = vadd.f32 %v12282_v16, %v24667_v58 }
 0xf7e   : > { %12549 = vmax.xlane.f32.xlu0 %v12548_v23  ;;  %v12524_v11 = vsel %vm5108_vm5, %v22856_v48, -inf }
 0xf7f   : > { %v12551_v54 = vsel %vm5108_vm5, %v22861_v56, -inf }
 0xf81   : > { %v12185_v25 = vpop.f32.mrb[124].mxu1 }
 0xf82   : > { %v12287_v20 = vpop.f32.mrb[144].mxu0  ;;  %12525 = vmax.xlane.f32.xlu0 %v12524_v11  ;;  %v22866_v5 = vadd.f32 %v12185_v25, %v24668_v63  ;;  %v16921_v4 = vpop.f32.mrb[125].mxu1  ;;  %v24673_v25 = vld [vmem:[#allocation16_spill] sm:$0xff] }
 0xf83   : > { %v16951_v51 = vpop.f32.mrb[145].mxu0  ;;  %v12188_v21 = vpop.f32.mrb[126].mxu1  ;;  %v22869_v7 = vadd.f32 %v12287_v20, %v24668_v63 }
 0xf84   : > { %v12290_v28 = vpop.f32.mrb[146].mxu0  ;;  %v16922_v40 = vpop.f32.mrb[127].mxu1  ;;  %v12527_v13 = vsel %vm5108_vm5, %v22866_v5, -inf  ;;  %v22874_v34 = vadd.f32 %v12188_v21, %v24669_v2 }
 0xf85   : > { %v16952_v19 = vpop.f32.mrb[147].mxu0  ;;  %12528 = vmax.xlane.f32.xlu1 %v12527_v13  ;;  %v12554_v45 = vsel %vm5108_vm5, %v22869_v7, -inf  ;;  %v22881_v37 = vadd.f32 %v12290_v28, %v24669_v2 }
 0xf86   : > { %12552 = vmax.xlane.f32.xlu0 %v12551_v54  ;;  %v12530_v22 = vsel %vm5108_vm5, %v22874_v34, -inf  ;;  %v24674_v54 = vld [vmem:[#allocation23_spill] sm:$0xff] }
 0xf87   : > { %v12557_v9 = vsel %vm5108_vm5, %v22881_v37, -inf }
 0xf89   : > { %12555 = vmax.xlane.f32.xlu1 %v12554_v45  ;;  %v12193_v46 = vpop.f32.mrb[128].mxu1 }
 0xf8a   : > { %v12295_v35 = vpop.f32.mrb[148].mxu0  ;;  %12531 = vmax.xlane.f32.xlu0 %v12530_v22  ;;  %v22886_v39 = vadd.f32 %v12193_v46, %v24670_v14  ;;  %v16925_v10 = vpop.f32.mrb[129].mxu1 }
 0xf8b   : > { %v16955_v30 = vpop.f32.mrb[149].mxu0  ;;  %v12196_v52 = vpop.f32.mrb[130].mxu1  ;;  %v22889_v12 = vadd.f32 %v12295_v35, %v24670_v14 }
 0xf8c   : > { %v12298_v6 = vpop.f32.mrb[150].mxu0  ;;  %v16926_v43 = vpop.f32.mrb[131].mxu1  ;;  %v12533_v59 = vsel %vm5108_vm5, %v22886_v39, -inf  ;;  %v22894_v38 = vadd.f32 %v12196_v52, %v24671_v53 }
 0xf8d   : > { %v16956_v3 = vpop.f32.mrb[151].mxu0  ;;  %12534 = vmax.xlane.f32.xlu1 %v12533_v59  ;;  %v12560_v27 = vsel %vm5108_vm5, %v22889_v12, -inf  ;;  %v22901_v44 = vadd.f32 %v12298_v6, %v24671_v53 }
 0xf8e   : > { %12558 = vmax.xlane.f32.xlu0 %v12557_v9  ;;  %v12536_v47 = vsel %vm5108_vm5, %v22894_v38, -inf }
 0xf8f   : > { %v12563_v51 = vsel %vm5108_vm5, %v22901_v44, -inf }
 0xf91   : > { %12561 = vmax.xlane.f32.xlu1 %v12560_v27 }
 0xf92   : > { %v12201_v49 = vpop.f32.mrb[132].mxu1  ;;  %12537 = vmax.xlane.f32.xlu0 %v12536_v47 }
 0xf93   : > { %v12303_v8 = vpop.f32.mrb[152].mxu0  ;;  %v22906_v61 = vadd.f32 %v12201_v49, %v24672_v29  ;;  %v16929_v31 = vpop.f32.mrb[133].mxu1 }
 0xf94   : > { %v16959_v16 = vpop.f32.mrb[153].mxu0  ;;  %v12204_v57 = vpop.f32.mrb[134].mxu1  ;;  %v22909_v0 = vadd.f32 %v12303_v8, %v24672_v29 }
 0xf95   : > { %v12306_v50 = vpop.f32.mrb[154].mxu0  ;;  %v16930_v23 = vpop.f32.mrb[135].mxu1  ;;  %v12539_v11 = vsel %vm5108_vm5, %v22906_v61, -inf  ;;  %v22914_v20 = vadd.f32 %v12204_v57, %v24673_v25 }
 0xf96   : > { %v16960_v4 = vpop.f32.mrb[155].mxu0  ;;  %12540 = vmax.xlane.f32.xlu1 %v12539_v11  ;;  %12564 = vmax.xlane.f32.xlu0 %v12563_v51  ;;  %v12566_v21 = vsel %vm5108_vm5, %v22909_v0, -inf  ;;  %v22921_v28 = vadd.f32 %v12306_v50, %v24673_v25 }
 0xf97   : > { %v12542_v40 = vsel %vm5108_vm5, %v22914_v20, -inf }
 0xf98   : > { %v12569_v59 = vsel %vm5108_vm5, %v22921_v28, -inf }
 0xf9a   : > { %12567 = vmax.xlane.f32.xlu1 %v12566_v21  ;;  %12543 = vmax.xlane.f32.xlu0 %v12542_v40 }
 0xf9c   : > { %v12209_v13 = vpop.f32.mrb[136].mxu1 }
 0xf9d   : > { %v12311_v19 = vpop.f32.mrb[156].mxu0  ;;  %v22926_v45 = vadd.f32 %v12209_v13, %v24674_v54  ;;  %v16933_v22 = vpop.f32.mrb[137].mxu1 }
 0xf9e   : > { %v16963_v46 = vpop.f32.mrb[157].mxu0  ;;  %v12212_v35 = vpop.f32.mrb[138].mxu1  ;;  %v22931_v6 = vadd.f32 %v12311_v19, %v24674_v54  ;;  %12570 = vmax.xlane.f32.xlu0 %v12569_v59 }
 0xf9f   : > { %v12314_v10 = vpop.f32.mrb[158].mxu0  ;;  %v16934_v30 = vpop.f32.mrb[139].mxu1  ;;  %v12545_v52 = vsel %vm5108_vm5, %v22926_v45, -inf }
 0xfa0   : > { %v16964_v43 = vpop.f32.mrb[159].mxu0  ;;  %12546 = vmax.xlane.f32.xlu1 %v12545_v52  ;;  %v12572_v3 = vsel %vm5108_vm5, %v22931_v6, -inf }
 0xfa2   : > { %12573 = vmax.xlane.f32.xlu0 %v12572_v3 }
 0xfad   : > { %v12381_v27 = vpop.f32.mrb[140].mxu1 }
 0xfae   : > { %v12483_v9 = vpop.f32.mrb[160].mxu0  ;;  %v22938_v47 = vadd.f32 %v12381_v27, %v24666_v42  ;;  %v16977_v49 = vpop.f32.mrb[141].mxu1 }
 0xfaf   : > { %v17007_v8 = vpop.f32.mrb[161].mxu0  ;;  %v12384_v31 = vpop.f32.mrb[142].mxu1  ;;  %v22941_v57 = vadd.f32 %v12483_v9, %v24666_v42 }
 0xfb0   : > { %v12486_v16 = vpop.f32.mrb[162].mxu0  ;;  %v22944_v50 = vadd.f32 %v12384_v31, %v24667_v58  ;;  %v16978_v23 = vpop.f32.mrb[143].mxu1  ;;  %v12575_v4 = vsel %vm5108_vm5, %v22938_v47, -inf }
 0xfb1   : > { %v17008_v11 = vpop.f32.mrb[163].mxu0  ;;  %12576 = vmax.xlane.f32.xlu1 %v12575_v4  ;;  %v22949_v51 = vadd.f32 %v12486_v16, %v24667_v58  ;;  %v12602_v42 = vsel %vm5108_vm5, %v22941_v57, -inf }
 0xfb2   : > { %v12578_v21 = vsel %vm5108_vm5, %v22944_v50, -inf }
 0xfb3   : > { %12579 = vmax.xlane.f32.xlu0 %v12578_v21  ;;  %v12605_v35 = vsel %vm5108_vm5, %v22949_v51, -inf }
 0xfb5   : > { %12603 = vmax.xlane.f32.xlu1 %v12602_v42  ;;  %v12389_v13 = vpop.f32.mrb[144].mxu1 }
 0xfb6   : > { %v12491_v40 = vpop.f32.mrb[164].mxu0  ;;  %v22956_v19 = vadd.f32 %v12389_v13, %v24668_v63  ;;  %v16981_v22 = vpop.f32.mrb[145].mxu1 }
 0xfb7   : > { %v17011_v46 = vpop.f32.mrb[165].mxu0  ;;  %12606 = vmax.xlane.f32.xlu0 %v12605_v35  ;;  %v12392_v10 = vpop.f32.mrb[146].mxu1  ;;  %v22961_v30 = vadd.f32 %v12491_v40, %v24668_v63 }
 0xfb8   : > { %v12494_v58 = vpop.f32.mrb[166].mxu0  ;;  %v22964_v52 = vadd.f32 %v12392_v10, %v24669_v2  ;;  %v16982_v43 = vpop.f32.mrb[147].mxu1  ;;  %v12581_v3 = vsel %vm5108_vm5, %v22956_v19, -inf }
 0xfb9   : > { %v17012_v59 = vpop.f32.mrb[167].mxu0  ;;  %12582 = vmax.xlane.f32.xlu1 %v12581_v3  ;;  %v22969_v9 = vadd.f32 %v12494_v58, %v24669_v2  ;;  %v12608_v63 = vsel %vm5108_vm5, %v22961_v30, -inf }
 0xfba   : > { %v12584_v27 = vsel %vm5108_vm5, %v22964_v52, -inf }
 0xfbb   : > { %12585 = vmax.xlane.f32.xlu0 %v12584_v27  ;;  %v12611_v11 = vsel %vm5108_vm5, %v22969_v9, -inf }
 0xfbd   : > { %12609 = vmax.xlane.f32.xlu1 %v12608_v63  ;;  %v12397_v8 = vpop.f32.mrb[148].mxu1 }
 0xfbe   : > { %v12499_v49 = vpop.f32.mrb[168].mxu0  ;;  %v22976_v31 = vadd.f32 %v12397_v8, %v24670_v14  ;;  %v16985_v16 = vpop.f32.mrb[149].mxu1 }
 0xfbf   : > { %v17015_v23 = vpop.f32.mrb[169].mxu0  ;;  %12612 = vmax.xlane.f32.xlu0 %v12611_v11  ;;  %v12400_v4 = vpop.f32.mrb[150].mxu1  ;;  %v22981_v21 = vadd.f32 %v12499_v49, %v24670_v14 }
 0xfc0   : > { %v12502_v2 = vpop.f32.mrb[170].mxu0  ;;  %v22984_v42 = vadd.f32 %v12400_v4, %v24671_v53  ;;  %v16986_v40 = vpop.f32.mrb[151].mxu1  ;;  %v12587_v22 = vsel %vm5108_vm5, %v22976_v31, -inf }
 0xfc1   : > { %v17016_v13 = vpop.f32.mrb[171].mxu0  ;;  %12588 = vmax.xlane.f32.xlu1 %v12587_v22  ;;  %v22989_v46 = vadd.f32 %v12502_v2, %v24671_v53  ;;  %v12614_v14 = vsel %vm5108_vm5, %v22981_v21, -inf }
 0xfc2   : > { %v12590_v35 = vsel %vm5108_vm5, %v22984_v42, -inf }
 0xfc3   : > { %12591 = vmax.xlane.f32.xlu0 %v12590_v35  ;;  %v12617_v27 = vsel %vm5108_vm5, %v22989_v46, -inf }
 0xfc5   : > { %12615 = vmax.xlane.f32.xlu1 %v12614_v14  ;;  %v12405_v10 = vpop.f32.mrb[152].mxu1 }
 0xfc6   : > { %v12507_v58 = vpop.f32.mrb[172].mxu0  ;;  %v22996_v43 = vadd.f32 %v12405_v10, %v24672_v29  ;;  %v16989_v59 = vpop.f32.mrb[153].mxu1 }
 0xfc7   : > { %v17019_v3 = vpop.f32.mrb[173].mxu0  ;;  %12618 = vmax.xlane.f32.xlu0 %v12617_v27  ;;  %v12408_v63 = vpop.f32.mrb[154].mxu1  ;;  %v23001_v49 = vadd.f32 %v12507_v58, %v24672_v29 }
 0xfc8   : > { %v12510_v53 = vpop.f32.mrb[174].mxu0  ;;  %v23004_v8 = vadd.f32 %v12408_v63, %v24673_v25  ;;  %v16990_v16 = vpop.f32.mrb[155].mxu1  ;;  %v12593_v11 = vsel %vm5108_vm5, %v22996_v43, -inf }
 0xfc9   : > { %v17020_v23 = vpop.f32.mrb[175].mxu0  ;;  %12594 = vmax.xlane.f32.xlu1 %v12593_v11  ;;  %v23009_v2 = vadd.f32 %v12510_v53, %v24673_v25  ;;  %v12620_v29 = vsel %vm5108_vm5, %v23001_v49, -inf  ;;  %v23029_v16 = vpop.permute.xlu1 %10777 }
 0xfca   : > { %v12596_v4 = vsel %vm5108_vm5, %v23004_v8, -inf  ;;  %v23031_v23 = vpop.permute.xlu0 %10795 }
 0xfcb   : > { %12597 = vmax.xlane.f32.xlu0 %v12596_v4  ;;  %v12623_v25 = vsel %vm5108_vm5, %v23009_v2, -inf }
 0xfcd   : > { %12621 = vmax.xlane.f32.xlu1 %v12620_v29  ;;  %v12413_v13 = vpop.f32.mrb[156].mxu1 }
 0xfce   : > { %v12515_v40 = vpop.f32.mrb[176].mxu0  ;;  %v23019_v35 = vadd.f32 %v12413_v13, %v24674_v54  ;;  %v16993_v14 = vpop.f32.mrb[157].mxu1 }
 0xfcf   : > { %v23016_v22 = vadd.f32 %v12515_v40, %v24674_v54  ;;  %v17023_v58 = vpop.f32.mrb[177].mxu0  ;;  %12624 = vmax.xlane.f32.xlu0 %v12623_v25  ;;  %v12416_v59 = vpop.f32.mrb[158].mxu1  ;;  %v24675_v54 = vld [vmem:[#allocation42_spill] sm:$0xff] }
 0xfd0   : > { %v12518_v10 = vpop.f32.mrb[178].mxu0  ;;  %v16994_v3 = vpop.f32.mrb[159].mxu1  ;;  %v12599_v53 = vsel %vm5108_vm5, %v23019_v35, -inf }
 0xfd1   : > { %v17024_v27 = vpop.f32.mrb[179].mxu0  ;;  %12600 = vmax.xlane.f32.xlu1 %v12599_v53  ;;  %v12626_v63 = vsel %vm5108_vm5, %v23016_v22, -inf }
 0xfd3   : > { %12627 = vmax.xlane.f32.xlu0 %v12626_v63 }
 0xfe9   : > { %10831 = vrot.lane.b32.xlu0 %v24675_v54, %s17823_s14 }
0x100a   : > { %v12523_v11 = vpop.xlane.xlu1 %12522 }
0x100b   : > { %v12550_v4 = vpop.xlane.xlu0 %12549  ;;  %v12629_v29 = vsub.f32 %v22848_v18, %v12523_v11 }
0x100c   : > { %v12638_v40 = vsub.f32 %v22851_v26, %v12550_v4 }
0x100d   : > { %v12665_v13 = vmul.f32 1.442695, %v12629_v29 }
0x100e   : > { %v12683_v14 = vmul.f32 1.442695, %v12638_v40 }
0x100f   : > { %17616 = vpow2.f32 %v12665_v13  ;;  %v12526_v58 = vpop.xlane.xlu0 %12525 }
0x1010   : > { %17618 = vpow2.f32 %v12683_v14  ;;  %v12630_v25 = vsub.f32 %v22856_v48, %v12526_v58 }
0x1012   : > { %v12667_v10 = vmul.f32 1.442695, %v12630_v25  ;;  %v23036_v59 = vpop.xlane.xlu1 %12528 }
0x1013   : > { %v12553_v3 = vpop.xlane.xlu0 %12552 }
0x1014   : > { %17620 = vpow2.f32 %v12667_v10  ;;  %v12639_v27 = vsub.f32 %v22861_v56, %v12553_v3 }
0x1016   : > { %v12685_v53 = vmul.f32 1.442695, %v12639_v27  ;;  %v12556_v63 = vpop.xlane.xlu1 %12555 }
0x1017   : > { %v12640_v18 = vsub.f32 %v22869_v7, %v12556_v63  ;;  %v12532_v54 = vpop.xlane.xlu0 %12531 }
0x1018   : > { %17622 = vpow2.f32 %v12685_v53  ;;  %v12632_v26 = vsub.f32 %v22874_v34, %v12532_v54 }
0x1019   : > { %v23041_v11 = vpop.eup %17616  ;;  %v12687_v4 = vmul.f32 1.442695, %v12640_v18 }
0x101a   : > { %v23043_v29 = vpop.eup %17618  ;;  %v12671_v48 = vmul.f32 1.442695, %v12632_v26  ;;  %v12737_v40 = vsel %vm5108_vm5, %v23041_v11, 0.0  ;;  %v12535_v53 = vpop.xlane.xlu1 %12534 }
0x101b   : > { %17624 = vpow2.f32 %v12687_v4  ;;  %v12559_v13 = vpop.xlane.xlu0 %12558  ;;  %v12764_v56 = vsel %vm5108_vm5, %v23043_v29, 0.0  ;;  %12738 = vadd.xlane.f32.xlu1 %v12737_v40 }
0x101c   : > { %v12641_v7 = vsub.f32 %v22881_v37, %v12559_v13  ;;  %12765 = vadd.xlane.f32.xlu0 %v12764_v56  ;;  %17626 = vpow2.f32 %v12671_v48 }
0x101e   : > { %v23050_v14 = vpop.eup %17620  ;;  %v12689_v34 = vmul.f32 1.442695, %v12641_v7  ;;  %v12562_v13 = vpop.xlane.xlu1 %12561 }
0x101f   : > { %v12538_v58 = vpop.xlane.xlu0 %12537  ;;  %v12740_v25 = vsel %vm5108_vm5, %v23050_v14, 0.0 }
0x1020   : > { %v12634_v10 = vsub.f32 %v22894_v38, %v12538_v58  ;;  %12741 = vadd.xlane.f32.xlu0 %v12740_v25  ;;  %17628 = vpow2.f32 %v12689_v34  ;;  %v24676_v25 = vld [vmem:[#allocation41_spill] sm:$0xff] }
0x1022   : > { %v23055_v3 = vpop.eup %17622  ;;  %v12675_v27 = vmul.f32 1.442695, %v12634_v10 }
0x1023   : > { %v12565_v63 = vpop.xlane.xlu0 %12564  ;;  %v12767_v37 = vsel %vm5108_vm5, %v23055_v3, 0.0 }
0x1024   : > { %v12643_v18 = vsub.f32 %v22901_v44, %v12565_v63  ;;  %12768 = vadd.xlane.f32.xlu0 %v12767_v37  ;;  %17630 = vpow2.f32 %v12675_v27  ;;  %v12541_v27 = vpop.xlane.xlu1 %12540 }
0x1025   : > { %v23060_v54 = vpop.eup %17624 }
0x1026   : > { %v12693_v26 = vmul.f32 1.442695, %v12643_v18  ;;  %v12770_v38 = vsel %vm5108_vm5, %v23060_v54, 0.0  ;;  %v23064_v48 = vpop.eup %17626 }
0x1027   : > { %v12544_v4 = vpop.xlane.xlu0 %12543  ;;  %v12746_v44 = vsel %vm5108_vm5, %v23064_v48, 0.0 }
0x1028   : > { %v12636_v40 = vsub.f32 %v22914_v20, %v12544_v4  ;;  %12771 = vadd.xlane.f32.xlu0 %v12770_v38  ;;  %17632 = vpow2.f32 %v12693_v26  ;;  %v12568_v4 = vpop.xlane.xlu1 %12567 }
0x102a   : > { %v12679_v56 = vmul.f32 1.442695, %v12636_v40  ;;  %v23069_v34 = vpop.eup %17628 }
0x102b   : > { %v12571_v7 = vpop.xlane.xlu0 %12570  ;;  %v12773_v63 = vsel %vm5108_vm5, %v23069_v34, 0.0 }
0x102c   : > { %v12645_v58 = vsub.f32 %v22921_v28, %v12571_v7  ;;  %12747 = vadd.xlane.f32.xlu0 %v12746_v44  ;;  %10813 = vrot.lane.b32.xlu1 %v24676_v25, %s17823_s14  ;;  %17634 = vpow2.f32 %v12679_v56 }
0x102d   : > { %v12547_v7 = vpop.xlane.xlu1 %12546 }
0x102e   : > { %v12697_v10 = vmul.f32 1.442695, %v12645_v58  ;;  %v23076_v37 = vpop.eup %17630 }
0x102f   : > { %v12574_v20 = vpop.xlane.xlu0 %12573  ;;  %v12752_v28 = vsel %vm5108_vm5, %v23076_v37, 0.0 }
0x1030   : > { %v12646_v18 = vsub.f32 %v22931_v6, %v12574_v20  ;;  %12774 = vadd.xlane.f32.xlu0 %v12773_v63  ;;  %17636 = vpow2.f32 %v12697_v10  ;;  %v12631_v6 = vsub.f32 %v22866_v5, %v23036_v59  ;;  %v12633_v10 = vsub.f32 %v22886_v39, %v12535_v53 }
0x1032   : > { %v12699_v26 = vmul.f32 1.442695, %v12646_v18  ;;  %v23081_v38 = vpop.eup %17632  ;;  %v12669_v25 = vmul.f32 1.442695, %v12631_v6  ;;  %v12673_v59 = vmul.f32 1.442695, %v12633_v10 }
0x1033   : > { %v12779_v40 = vsel %vm5108_vm5, %v23081_v38, 0.0 }
0x1034   : > { %12753 = vadd.xlane.f32.xlu0 %v12752_v28  ;;  %17638 = vpow2.f32 %v12699_v26 }
0x1035   : > { %17640 = vpow2.f32 %v12669_v25 }
0x1036   : > { %v23085_v56 = vpop.eup %17634 }
0x1037   : > { %24677 = vst [vmem:[#allocation15_spill] sm:$0xff] %v23085_v56  ;;  %v12758_v44 = vsel %vm5108_vm5, %v23085_v56, 0.0 }
0x1038   : > { %12780 = vadd.xlane.f32.xlu0 %v12779_v40  ;;  %v12642_v40 = vsub.f32 %v22889_v12, %v12562_v13  ;;  %v12644_v13 = vsub.f32 %v22909_v0, %v12568_v4 }
0x103a   : > { %v23091_v58 = vpop.eup %17636 }
0x103b   : > { %v12785_v26 = vsel %vm5108_vm5, %v23091_v58, 0.0 }
0x103c   : > { %12759 = vadd.xlane.f32.xlu0 %v12758_v44  ;;  %v12691_v44 = vmul.f32 1.442695, %v12642_v40 }
0x103e   : > { %v12577_v63 = vpop.xlane.xlu1 %12576  ;;  %v23097_v28 = vpop.eup %17638 }
0x103f   : > { %v12788_v39 = vsel %vm5108_vm5, %v23097_v28, 0.0 }
0x1040   : > { %v12580_v20 = vpop.xlane.xlu0 %12579  ;;  %12786 = vadd.xlane.f32.xlu0 %v12785_v26 }
0x1041   : > { %v12648_v18 = vsub.f32 %v22944_v50, %v12580_v20  ;;  %v12635_v20 = vsub.f32 %v22906_v61, %v12541_v27  ;;  %v12695_v61 = vmul.f32 1.442695, %v12644_v13  ;;  %v12637_v27 = vsub.f32 %v22926_v45, %v12547_v7 }
0x1042   : > { %v12604_v50 = vpop.xlane.xlu1 %12603  ;;  %v12647_v7 = vsub.f32 %v22938_v47, %v12577_v63 }
0x1043   : > { %v12703_v5 = vmul.f32 1.442695, %v12648_v18  ;;  %v12677_v12 = vmul.f32 1.442695, %v12635_v20  ;;  %v12681_v45 = vmul.f32 1.442695, %v12637_v27  ;;  %v12656_v47 = vsub.f32 %v22941_v57, %v12604_v50 }
0x1044   : > { %v12607_v56 = vpop.xlane.xlu0 %12606  ;;  %12789 = vadd.xlane.f32.xlu0 %v12788_v39 }
0x1045   : > { %17642 = vpow2.f32 %v12703_v5  ;;  %v12657_v6 = vsub.f32 %v22949_v51, %v12607_v56  ;;  %v23107_v5 = vpop.eup %17640  ;;  %v12719_v57 = vmul.f32 1.442695, %v12656_v47 }
0x1046   : > { %17644 = vpow2.f32 %v12673_v59  ;;  %v12583_v56 = vpop.xlane.xlu1 %12582 }
0x1047   : > { %v12721_v53 = vmul.f32 1.442695, %v12657_v6  ;;  %v12649_v50 = vsub.f32 %v22956_v19, %v12583_v56 }
0x1048   : > { %v12586_v26 = vpop.xlane.xlu0 %12585 }
0x1049   : > { %17646 = vpow2.f32 %v12721_v53  ;;  %v12650_v25 = vsub.f32 %v22964_v52, %v12586_v26  ;;  %v12705_v19 = vmul.f32 1.442695, %v12649_v50 }
0x104a   : > { %17648 = vpow2.f32 %v12691_v44  ;;  %v12610_v53 = vpop.xlane.xlu1 %12609 }
0x104b   : > { %v12707_v10 = vmul.f32 1.442695, %v12650_v25  ;;  %v12658_v56 = vsub.f32 %v22961_v30, %v12610_v53 }
0x104c   : > { %v12613_v51 = vpop.xlane.xlu0 %12612 }
0x104d   : > { %17650 = vpow2.f32 %v12707_v10  ;;  %v12659_v18 = vsub.f32 %v22969_v9, %v12613_v51  ;;  %v12743_v9 = vsel %vm5108_vm5, %v23107_v5, 0.0  ;;  %v12701_v51 = vmul.f32 1.442695, %v12647_v7 }
0x104e   : > { %17652 = vpow2.f32 %v12677_v12 }
0x104f   : > { %v23109_v59 = vpop.eup %17642  ;;  %v12725_v40 = vmul.f32 1.442695, %v12659_v18 }
0x1050   : > { %v12592_v52 = vpop.xlane.xlu0 %12591  ;;  %v12794_v6 = vsel %vm5108_vm5, %v23109_v59, 0.0  ;;  %v23117_v4 = vpop.eup %17644  ;;  %12744 = vadd.xlane.f32.xlu1 %v12743_v9 }
0x1051   : > { %17654 = vpow2.f32 %v12725_v40  ;;  %v12652_v0 = vsub.f32 %v22984_v42, %v12592_v52  ;;  %12795 = vadd.xlane.f32.xlu0 %v12794_v6  ;;  %v12749_v25 = vsel %vm5108_vm5, %v23117_v4, 0.0  ;;  %v12589_v40 = vpop.xlane.xlu1 %12588 }
0x1052   : > { %17656 = vpow2.f32 %v12695_v61  ;;  %v12651_v30 = vsub.f32 %v22976_v31, %v12589_v40 }
0x1053   : > { %v23119_v39 = vpop.eup %17646  ;;  %v12711_v44 = vmul.f32 1.442695, %v12652_v0 }
0x1054   : > { %v12619_v20 = vpop.xlane.xlu0 %12618  ;;  %v12821_v26 = vsel %vm5108_vm5, %v23119_v39, 0.0  ;;  %v23127_v10 = vpop.eup %17648  ;;  %12750 = vadd.xlane.f32.xlu1 %v12749_v25 }
0x1055   : > { %17658 = vpow2.f32 %v12711_v44  ;;  %v12661_v42 = vsub.f32 %v22989_v46, %v12619_v20  ;;  %12822 = vadd.xlane.f32.xlu0 %v12821_v26  ;;  %v12776_v61 = vsel %vm5108_vm5, %v23127_v10, 0.0  ;;  %v12616_v20 = vpop.xlane.xlu1 %12615 }
0x1056   : > { %17660 = vpow2.f32 %v12681_v45  ;;  %v12660_v50 = vsub.f32 %v22981_v21, %v12616_v20 }
0x1057   : > { %v23129_v12 = vpop.eup %17650  ;;  %v12729_v13 = vmul.f32 1.442695, %v12661_v42 }
0x1058   : > { %v12598_v63 = vpop.xlane.xlu0 %12597  ;;  %v12800_v18 = vsel %vm5108_vm5, %v23129_v12, 0.0  ;;  %v23137_v27 = vpop.eup %17652  ;;  %12777 = vadd.xlane.f32.xlu1 %v12776_v61 }
0x1059   : > { %17662 = vpow2.f32 %v12729_v13  ;;  %v12654_v46 = vsub.f32 %v23004_v8, %v12598_v63  ;;  %12801 = vadd.xlane.f32.xlu0 %v12800_v18  ;;  %v12755_v44 = vsel %vm5108_vm5, %v23137_v27, 0.0  ;;  %v12723_v18 = vmul.f32 1.442695, %v12658_v56 }
0x105a   : > { %17664 = vpow2.f32 %v12701_v51 }
0x105b   : > { %v23139_v52 = vpop.eup %17654  ;;  %v12715_v6 = vmul.f32 1.442695, %v12654_v46  ;;  %v12595_v46 = vpop.xlane.xlu1 %12594 }
0x105c   : > { %v12625_v0 = vpop.xlane.xlu0 %12624  ;;  %v12827_v9 = vsel %vm5108_vm5, %v23139_v52, 0.0  ;;  %v23147_v45 = vpop.eup %17656  ;;  %12756 = vadd.xlane.f32.xlu1 %v12755_v44  ;;  %v12727_v44 = vmul.f32 1.442695, %v12660_v50 }
0x105d   : > { %17666 = vpow2.f32 %v12715_v6  ;;  %v12663_v8 = vsub.f32 %v23009_v2, %v12625_v0  ;;  %12828 = vadd.xlane.f32.xlu0 %v12827_v9  ;;  %v12782_v13 = vsel %vm5108_vm5, %v23147_v45, 0.0 }
0x105e   : > { %17668 = vpow2.f32 %v12719_v57  ;;  %v12709_v57 = vmul.f32 1.442695, %v12651_v30 }
0x105f   : > { %v23149_v7 = vpop.eup %17658  ;;  %v12733_v26 = vmul.f32 1.442695, %v12663_v8  ;;  %v12622_v8 = vpop.xlane.xlu1 %12621 }
0x1060   : > { %v12628_v42 = vpop.xlane.xlu0 %12627  ;;  %v12806_v25 = vsel %vm5108_vm5, %v23149_v7, 0.0  ;;  %v23157_v51 = vpop.eup %17660  ;;  %12783 = vadd.xlane.f32.xlu1 %v12782_v13 }
0x1061   : > { %17670 = vpow2.f32 %v12733_v26  ;;  %v12664_v2 = vsub.f32 %v23016_v22, %v12628_v42  ;;  %12807 = vadd.xlane.f32.xlu0 %v12806_v25  ;;  %v12761_v22 = vsel %vm5108_vm5, %v23157_v51, 0.0  ;;  %v12653_v26 = vsub.f32 %v22996_v43, %v12595_v46 }
0x1062   : > { %17672 = vpow2.f32 %v12705_v19  ;;  %v12662_v25 = vsub.f32 %v23001_v49, %v12622_v8 }
0x1063   : > { %v23159_v47 = vpop.eup %17662  ;;  %v12735_v63 = vmul.f32 1.442695, %v12664_v2  ;;  %v12713_v42 = vmul.f32 1.442695, %v12653_v26  ;;  %v12601_v43 = vpop.xlane.xlu1 %12600 }
0x1064   : > { %v12833_v53 = vsel %vm5108_vm5, %v23159_v47, 0.0  ;;  %v23166_v61 = vpop.eup %17664  ;;  %12762 = vadd.xlane.f32.xlu1 %v12761_v22  ;;  %v12655_v30 = vsub.f32 %v23019_v35, %v12601_v43 }
0x1065   : > { %17674 = vpow2.f32 %v12735_v63  ;;  %12834 = vadd.xlane.f32.xlu0 %v12833_v53  ;;  %v12791_v40 = vsel %vm5108_vm5, %v23166_v61, 0.0 }
0x1066   : > { %17676 = vpow2.f32 %v12723_v18  ;;  %v12731_v18 = vmul.f32 1.442695, %v12662_v25  ;;  %v12717_v49 = vmul.f32 1.442695, %v12655_v30 }
0x1067   : > { %v23168_v6 = vpop.eup %17666  ;;  %17678 = vpow2.f32 %v12709_v57 }
0x1068   : > { %24678 = vst [vmem:[#allocation20_spill] sm:$0xff] %v23168_v6  ;;  %v12812_v31 = vsel %vm5108_vm5, %v23168_v6, 0.0  ;;  %v23175_v0 = vpop.eup %17668  ;;  %12792 = vadd.xlane.f32.xlu1 %v12791_v40  ;;  %17680 = vpow2.f32 %v12727_v44 }
0x1069   : > { %12813 = vadd.xlane.f32.xlu0 %v12812_v31  ;;  %v12818_v20 = vsel %vm5108_vm5, %v23175_v0, 0.0  ;;  %17682 = vpow2.f32 %v12713_v42 }
0x106a   : > { %17684 = vpow2.f32 %v12731_v18 }
0x106b   : > { %v23177_v9 = vpop.eup %17670  ;;  %17686 = vpow2.f32 %v12717_v49 }
0x106c   : > { %24679 = vst [vmem:[#allocation29_spill] sm:$0xff] %v23177_v9  ;;  %v12839_v21 = vsel %vm5108_vm5, %v23177_v9, 0.0  ;;  %v23184_v19 = vpop.eup %17672  ;;  %12819 = vadd.xlane.f32.xlu1 %v12818_v20 }
0x106d   : > { %12840 = vadd.xlane.f32.xlu0 %v12839_v21  ;;  %v12797_v13 = vsel %vm5108_vm5, %v23184_v19, 0.0  ;;  %v10832_v21 = vpop.permute.xlu0 %10831 }
0x106e   : > { %v11429_v25 = vcombine.low %v23031_v23, %v10832_v21 }
0x106f   : > { %v23186_v56 = vpop.eup %17674 }
0x1070   : > { %24680 = vst [vmem:[#allocation4_spill] sm:$0xff] %v23186_v56  ;;  %v12842_v2 = vsel %vm5108_vm5, %v23186_v56, 0.0  ;;  %v23193_v63 = vpop.eup %17676  ;;  %12798 = vadd.xlane.f32.xlu1 %v12797_v13 }
0x1071   : > { %12843 = vadd.xlane.f32.xlu0 %v12842_v2  ;;  %v12824_v53 = vsel %vm5108_vm5, %v23193_v63, 0.0  ;;  %v23198_v46 = vpop.eup %17678  ;;  %v11430_v2 = vcombine.high %v23031_v23, %v10832_v21 }
0x1072   : > { %v12803_v22 = vsel %vm5108_vm5, %v23198_v46, 0.0  ;;  %v23202_v57 = vpop.eup %17680 }
0x1073   : > { %v12830_v50 = vsel %vm5108_vm5, %v23202_v57, 0.0  ;;  %v23206_v31 = vpop.eup %17682  ;;  %v11444_v49 = vrot.slane %v11430_v2, %v24530_v1 }
0x1074   : > { %12825 = vadd.xlane.f32.xlu1 %v12824_v53  ;;  %v12809_v35 = vsel %vm5108_vm5, %v23206_v31, 0.0  ;;  %v23210_v40 = vpop.eup %17684  ;;  %v11437_v53 = vrot.slane %v11429_v25, %v24530_v1 }
0x1075   : > { %v12836_v8 = vsel %vm5108_vm5, %v23210_v40, 0.0  ;;  %v23214_v44 = vpop.eup %17686 }
0x1076   : > { %24681 = vst [vmem:[#allocation34_spill] sm:$0xff] %v23214_v44  ;;  %v12815_v26 = vsel %vm5108_vm5, %v23214_v44, 0.0 }
0x1078   : > { %12804 = vadd.xlane.f32.xlu1 %v12803_v22 }
0x107c   : > { %12831 = vadd.xlane.f32.xlu1 %v12830_v50 }
0x1080   : > { %12810 = vadd.xlane.f32.xlu1 %v12809_v35 }
0x1084   : > { %12837 = vadd.xlane.f32.xlu1 %v12836_v8 }
0x1088   : > { %12816 = vadd.xlane.f32.xlu1 %v12815_v26 }
0x10a8   : > { %v12739_v20 = vpop.xlane.xlu1 %12738 }
0x10a9   : > { %v12766_v42 = vpop.xlane.xlu0 %12765 }
0x10ac   : > { %v10814_v43 = vpop.permute.xlu1 %10813 }
0x10ad   : > { %v12742_v13 = vpop.xlane.xlu0 %12741  ;;  %v11413_v18 = vcombine.low %v23029_v16, %v10814_v43  ;;  %v11414_v30 = vcombine.high %v23029_v16, %v10814_v43 }
0x10ae   : > { %17688 = vrcp.f32 %v12742_v13 }
0x10af   : > { %v11421_v22 = vrot.slane %v11413_v18, %v24530_v1  ;;  %v11428_v50 = vrot.slane %v11414_v30, %v24530_v1 }
0x10b1   : > { %v11445_v35 = vcombine.low %v11421_v22, %v11437_v53  ;;  %v11446_v8 = vcombine.high %v11421_v22, %v11437_v53  ;;  %v11461_v26 = vcombine.low %v11428_v50, %v11444_v49  ;;  %v11462_v56 = vcombine.high %v11428_v50, %v11444_v49  ;;  %v12769_v23 = vpop.xlane.xlu0 %12768 }
0x10b2   : > { %17690 = vrcp.f32 %v12769_v23 }
0x10b3   : > { %v11453_v21 = vrot.slane %v11445_v35, %v18180_v55  ;;  %v11460_v44 = vrot.slane %v11446_v8, %v18180_v55  ;;  %v11469_v16 = vrot.slane %v11461_v26, %v18180_v55  ;;  %v11476_v25 = vrot.slane %v11462_v56, %v18180_v55 }
0x10b4   : > { %17692 = vrcp.f32 %v12739_v20 }
0x10b5   : > { %17694 = vrcp.f32 %v12766_v42  ;;  %v12025_v2 = vcombine.low %v11453_v21, %v11460_v44  ;;  %v16150_v43 = vcombine.high %v11453_v21, %v11460_v44  ;;  %v12041_v18 = vcombine.low %v11469_v16, %v11476_v25  ;;  %v12772_v13 = vpop.xlane.xlu0 %12771 }
0x10b6   : > { %v16151_v30 = vcombine.high %v11469_v16, %v11476_v25  ;;  %17696 = vrcp.f32 %v12772_v13 }
0x10b7   : > { %v12032_v53 = vrot.slane %v12025_v2, %v24530_v1  ;;  %v12040_v49 = vrot.slane %v16150_v43, %v24530_v1  ;;  %v12048_v22 = vrot.slane %v12041_v18, %v24530_v1 }
0x10b8   : > { %v12056_v50 = vrot.slane %v16151_v30, %v24530_v1  ;;  %v17689_v26 = vpop.eup %17688 }
0x10b9   : > { %v23234_v35 = vpop.xlane.xlu0 %12747  ;;  %v12057_v8 = vcombine.low %v12032_v53, %v12040_v49  ;;  %v12882_v43 = vmul.f32 %v17689_v26, %v23050_v14 }
0x10ba   : > { %v12073_v56 = vcombine.low %v12048_v22, %v12056_v50 }
0x10bb   : > { %v12065_v20 = vrot.slane %v12057_v8, %v18180_v55 }
0x10bc   : > { %v17691_v42 = vpop.eup %17690  ;;  %v12081_v44 = vrot.slane %v12073_v56, %v18180_v55 }
0x10bd   : > { %v12775_v23 = vpop.xlane.xlu0 %12774  ;;  %v12891_v18 = vmul.f32 %v17691_v42, %v23055_v3  ;;  %v12074_v3 = vcombine.high %v12048_v22, %v12056_v50 }
0x10be   : > { %v17693_v21 = vpop.eup %17692  ;;  %17698 = vrcp.f32 %v12775_v23  ;;  %v12089_v16 = vcombine.low %v12065_v20, %v12081_v44  ;;  %v12090_v25 = vcombine.high %v12065_v20, %v12081_v44 }
0x10bf   : > { %v17695_v2 = vpop.eup %17694  ;;  %v12881_v8 = vmul.f32 %v17693_v21, %v23041_v11  ;;  %17700 = vrcp.f32 %v23234_v35 }
0x10c0   : > { %v12097_v30 = vpack.c.bf16 %v12089_v16, %v12089_v16  ;;  %v12102_v1 = vpack.c.bf16 %v12090_v25, %v12090_v25  ;;  %v12890_v9 = vmul.f32 %v17695_v2, %v23043_v29  ;;  %v17697_v14 = vpop.eup %17696  ;;  %v12058_v29 = vcombine.high %v12032_v53, %v12040_v49 }
0x10c1   : > { %v12917_v23 = vpack.c.bf16 %v12882_v43, %v12881_v8  ;;  %v12754_v11 = vpop.xlane.xlu0 %12753 }
0x10c2   : > { %v12953_v13 = vsel %vm5540_vm13, %v12097_v30, 0  ;;  %v13043_v56 = vsel %vm5540_vm13, %v12102_v1, 0  ;;  %v12922_v6 = vpack.c.bf16 %v12891_v18, %v12890_v9  ;;  %v12892_v9 = vmul.f32 %v17697_v14, %v23060_v54 }
0x10c3   : > { %17034 = vmatpush3.bf16.msra.mxu1 %v12953_v13  ;;  %17064 = vmatpush3.bf16.msra.mxu0 %v13043_v56 }
0x10c4   : > { %17085 = vmatprep.subr.bf16.mxu1 %v24611_v36  ;;  %17115 = vmatprep.subr.bf16.mxu0 %v24611_v36 }
0x10c5   : > { %v12781_v53 = vpop.xlane.xlu0 %12780 }
0x10c6   : > { %17036 = vmatmul.mubr.msk.bf16.vlgmr.msra.gmra.mrb[160].mxu1 %vm5108_vm5, %v12917_v23  ;;  %17066 = vmatmul.mubr.msk.bf16.vlgmr.msra.gmra.mrb[180].mxu0 %vm5108_vm5, %v12922_v6 }
0x10c7   : > { %17086 = vmatpush3.bf16.msra.mxu1 %v22787_v17  ;;  %17116 = vmatpush3.bf16.msra.mxu0 %v22789_v15  ;;  %v12072_v17 = vrot.slane %v12058_v29, %v18180_v55  ;;  %v12088_v15 = vrot.slane %v12074_v3, %v18180_v55 }
0x10c8   : > { %v17699_v1 = vpop.eup %17698  ;;  %17087 = vmatprep.subr.bf16.mxu1 %v24611_v36  ;;  %17117 = vmatprep.subr.bf16.mxu0 %v24611_v36 }
0x10c9   : > { %17069 = vmatprep.mubr.msk.bf16.mxu0 %vm17816_vm1, %v24611_v36  ;;  %v12893_v26 = vmul.f32 %v17699_v1, %v23069_v34  ;;  %17039 = vmatprep.mubr.msk.bf16.mxu1 %vm17816_vm1, %v24611_v36  ;;  %v12091_v54 = vcombine.low %v12072_v17, %v12088_v15  ;;  %v12092_v34 = vcombine.high %v12072_v17, %v12088_v15  ;;  %v12760_v49 = vpop.xlane.xlu0 %12759  ;;  %v17701_v42 = vpop.eup %17700 }
0x10ca   : > { %v12884_v2 = vmul.f32 %v17701_v42, %v23064_v48 }
0x10cb   : > { %17088 = vmatpush3.bf16.msra.mxu1 %v22811_v60  ;;  %17118 = vmatpush3.bf16.msra.mxu0 %v22813_v32  ;;  %v12923_v6 = vpack.c.bf16 %v12893_v26, %v12892_v9  ;;  %v12107_v60 = vpack.c.bf16 %v12091_v54, %v12091_v54  ;;  %v12112_v32 = vpack.c.bf16 %v12092_v34, %v12092_v34 }
0x10cc   : > { %17089 = vmatprep.subr.bf16.mxu1 %v24611_v36  ;;  %17119 = vmatprep.subr.bf16.mxu0 %v24611_v36 }
0x10cd   : > { %v12787_v22 = vpop.xlane.xlu0 %12786 }
0x10ce   : > { %17070 = vmatmul.mubr.msk.bf16.gmra.mrb[184].mxu0 %vm5108_vm5, %v12923_v6  ;;  %v24682_v6 = vld [vmem:[#allocation15_spill] sm:$0xff] }
0x10cf   : > { %17090 = vmatpush3.bf16.msra.mxu1 %v22827_v24  ;;  %17120 = vmatpush3.bf16.msra.mxu0 %v22832_v62  ;;  %v13133_v24 = vsel %vm5540_vm13, %v12107_v60, 0  ;;  %v13223_v62 = vsel %vm5540_vm13, %v12112_v32, 0 }
0x10d0   : > { %17091 = vmatprep.subr.bf16.mxu1 %v24611_v36  ;;  %17121 = vmatprep.subr.bf16.mxu0 %v24611_v36 }
0x10d1   : > { %17073 = vmatprep.mubr.msk.bf16.mxu0 %vm17816_vm1, %v24611_v36 }
0x10d3   : > { %17092 = vmatpush3.bf16.msra.mxu1 %v22839_v33  ;;  %17122 = vmatpush3.bf16.msra.mxu0 %v22841_v41  ;;  %v12790_v41 = vpop.xlane.xlu0 %12789 }
0x10d4   : > { %17093 = vmatprep.subr.bf16.mxu1 %v24611_v36  ;;  %17123 = vmatprep.subr.bf16.mxu0 %v24611_v36 }
0x10d7   : > { %17094 = vmatpush3.bf16.msra.mxu1 %v13133_v24  ;;  %17124 = vmatpush3.bf16.msra.mxu0 %v13223_v62 }
0x10d8   : > { %17145 = vmatprep.subr.bf16.mxu1 %v24611_v36  ;;  %17169 = vmatprep.subr.bf16.mxu0 %v24611_v36 }
0x10dd   : > { %v12745_v33 = vpop.xlane.xlu1 %12744 }
0x10de   : > { %17702 = vrcp.f32 %v12745_v33  ;;  %v12796_v44 = vpop.xlane.xlu0 %12795 }
0x10e1   : > { %v12751_v50 = vpop.xlane.xlu1 %12750 }
0x10e2   : > { %17704 = vrcp.f32 %v12751_v50  ;;  %v12823_v18 = vpop.xlane.xlu0 %12822 }
0x10e3   : > { %17706 = vrcp.f32 %v12754_v11 }
0x10e4   : > { %17708 = vrcp.f32 %v12781_v53 }
0x10e5   : > { %v12778_v20 = vpop.xlane.xlu1 %12777 }
0x10e6   : > { %17710 = vrcp.f32 %v12778_v20  ;;  %v12802_v3 = vpop.xlane.xlu0 %12801 }
0x10e8   : > { %v17703_v21 = vpop.eup %17702 }
0x10e9   : > { %v12757_v16 = vpop.xlane.xlu1 %12756  ;;  %v12883_v25 = vmul.f32 %v17703_v21, %v23107_v5 }
0x10ea   : > { %17712 = vrcp.f32 %v12757_v16 }
0x10eb   : > { %17714 = vrcp.f32 %v12760_v49  ;;  %v12918_v35 = vpack.c.bf16 %v12884_v2, %v12883_v25 }
0x10ec   : > { %v17705_v43 = vpop.eup %17704  ;;  %17716 = vrcp.f32 %v12787_v22 }
0x10ed   : > { %v17707_v30 = vpop.eup %17706  ;;  %17040 = vmatmul.mubr.msk.bf16.gmra.mrb[164].mxu1 %vm5108_vm5, %v12918_v35  ;;  %v12784_v8 = vpop.xlane.xlu1 %12783  ;;  %v12885_v56 = vmul.f32 %v17705_v43, %v23117_v4 }
0x10ee   : > { %v17709_v13 = vpop.eup %17708  ;;  %17718 = vrcp.f32 %v12784_v8  ;;  %17043 = vmatprep.mubr.msk.bf16.mxu1 %vm17816_vm1, %v24611_v36  ;;  %v12886_v23 = vmul.f32 %v17707_v30, %v23076_v37 }
0x10ef   : > { %17720 = vrcp.f32 %v12790_v41  ;;  %v12895_v29 = vmul.f32 %v17709_v13, %v23081_v38 }
0x10f0   : > { %v17711_v5 = vpop.eup %17710  ;;  %v12919_v1 = vpack.c.bf16 %v12886_v23, %v12885_v56 }
0x10f1   : > { %v12763_v48 = vpop.xlane.xlu1 %12762  ;;  %v12894_v14 = vmul.f32 %v17711_v5, %v23127_v10  ;;  %v12829_v10 = vpop.xlane.xlu0 %12828 }
0x10f2   : > { %17722 = vrcp.f32 %v12763_v48 }
0x10f3   : > { %v12924_v11 = vpack.c.bf16 %v12895_v29, %v12894_v14 }
0x10f4   : > { %v17713_v9 = vpop.eup %17712 }
0x10f5   : > { %v17715_v26 = vpop.eup %17714  ;;  %17044 = vmatmul.mubr.msk.bf16.gmra.mrb[168].mxu1 %vm5108_vm5, %v12919_v1  ;;  %17074 = vmatmul.mubr.msk.bf16.gmra.mrb[188].mxu0 %vm5108_vm5, %v12924_v11  ;;  %v12793_v4 = vpop.xlane.xlu1 %12792  ;;  %v12887_v37 = vmul.f32 %v17713_v9, %v23137_v27 }
0x10f6   : > { %v17717_v17 = vpop.eup %17716  ;;  %17047 = vmatprep.mubr.msk.bf16.mxu1 %vm17816_vm1, %v24611_v36  ;;  %17077 = vmatprep.mubr.msk.bf16.mxu0 %vm17816_vm1, %v24611_v36  ;;  %17724 = vrcp.f32 %v12793_v4  ;;  %v12888_v53 = vmul.f32 %v17715_v26, %v24682_v6  ;;  %v12808_v62 = vpop.xlane.xlu0 %12807 }
0x10f7   : > { %v12897_v34 = vmul.f32 %v17717_v17, %v23091_v58 }
0x10f8   : > { %v17719_v38 = vpop.eup %17718  ;;  %v12920_v32 = vpack.c.bf16 %v12888_v53, %v12887_v37 }
0x10f9   : > { %v12820_v15 = vpop.xlane.xlu1 %12819  ;;  %v12896_v54 = vmul.f32 %v17719_v38, %v23147_v45  ;;  %v17721_v60 = vpop.eup %17720 }
0x10fa   : > { %17726 = vrcp.f32 %v12820_v15  ;;  %v12898_v45 = vmul.f32 %v17721_v60, %v23097_v28  ;;  %v12835_v42 = vpop.xlane.xlu0 %12834 }
0x10fb   : > { %17728 = vrcp.f32 %v12796_v44  ;;  %v12925_v49 = vpack.c.bf16 %v12897_v34, %v12896_v54  ;;  %v24684_v54 = vld [vmem:[#allocation29_spill] sm:$0xff] }
0x10fc   : > { %v17723_v24 = vpop.eup %17722  ;;  %17730 = vrcp.f32 %v12823_v18  ;;  %v12926_v50 = vpack.c.bf16 %v12898_v45, %v12898_v45 }
0x10fd   : > { %17048 = vmatmul.mubr.msk.bf16.gmra.mrb[172].mxu1 %vm5108_vm5, %v12920_v32  ;;  %17078 = vmatmul.mubr.msk.bf16.gmra.mrb[192].mxu0 %vm5108_vm5, %v12925_v49  ;;  %v12799_v27 = vpop.xlane.xlu1 %12798  ;;  %v12889_v58 = vmul.f32 %v17723_v24, %v23157_v51 }
0x10fe   : > { %17051 = vmatprep.mubr.msk.bf16.mxu1 %vm17816_vm1, %v24611_v36  ;;  %17081 = vmatprep.mubr.msk.bf16.mxu0 %vm17816_vm1, %v24611_v36  ;;  %17732 = vrcp.f32 %v12799_v27  ;;  %v12814_v43 = vpop.xlane.xlu0 %12813  ;;  %v24686_v27 = vld [vmem:[#allocation4_spill] sm:$0xff] }
0x10ff   : > { %v12921_v41 = vpack.c.bf16 %v12889_v58, %v12889_v58 }
0x1100   : > { %v17725_v33 = vpop.eup %17724 }
0x1101   : > { %v12826_v22 = vpop.xlane.xlu1 %12825  ;;  %v12899_v28 = vmul.f32 %v17725_v33, %v23166_v61 }
0x1102   : > { %17734 = vrcp.f32 %v12826_v22  ;;  %v12841_v5 = vpop.xlane.xlu0 %12840 }
0x1103   : > { %17736 = vrcp.f32 %v12802_v3 }
0x1104   : > { %v17727_v20 = vpop.eup %17726  ;;  %17738 = vrcp.f32 %v12829_v10 }
0x1105   : > { %v17729_v44 = vpop.eup %17728  ;;  %17052 = vmatmul.mubr.msk.bf16.gmra.mrb[176].mxu1 %vm5108_vm5, %v12921_v41  ;;  %17082 = vmatmul.mubr.msk.bf16.gmra.mrb[196].mxu0 %vm5108_vm5, %v12926_v50  ;;  %v12805_v21 = vpop.xlane.xlu1 %12804  ;;  %v12908_v51 = vmul.f32 %v17727_v20, %v23175_v0 }
0x1106   : > { %v17731_v16 = vpop.eup %17730  ;;  %17095 = vmatprep.mubr.msk.bf16.mxu1 %vm17816_vm1, %v24611_v36  ;;  %17125 = vmatprep.mubr.msk.bf16.mxu0 %vm17816_vm1, %v24611_v36  ;;  %v12900_v25 = vmul.f32 %v17729_v44, %v23109_v59  ;;  %17740 = vrcp.f32 %v12805_v21 }
0x1107   : > { %v12909_v2 = vmul.f32 %v17731_v16, %v23119_v39 }
0x1108   : > { %v17733_v18 = vpop.eup %17732  ;;  %v12927_v30 = vpack.c.bf16 %v12900_v25, %v12899_v28 }
0x1109   : > { %v12832_v35 = vpop.xlane.xlu1 %12831  ;;  %v12932_v8 = vpack.c.bf16 %v12909_v2, %v12908_v51  ;;  %v12901_v59 = vmul.f32 %v17733_v18, %v23184_v19  ;;  %v17388_v2 = vld [vmem:[%s24230_s3 + $0x10] sm:$0xff]   ;;  %v17389_v18 = vld [vmem:[%s24230_s3 + $0x18] sm:$0xff]  }
0x110a   : > { %17742 = vrcp.f32 %v12832_v35 }
0x110b   : > { %17744 = vrcp.f32 %v12808_v62 }
0x110c   : > { %v17735_v13 = vpop.eup %17734  ;;  %17746 = vrcp.f32 %v12835_v42 }
0x110d   : > { %v17737_v56 = vpop.eup %17736  ;;  %17096 = vmatmul.mubr.msk.bf16.vlgmr.msra.gmra.mrb[180].mxu1 %vm5108_vm5, %v12927_v30  ;;  %17126 = vmatmul.mubr.msk.bf16.vlgmr.msra.gmra.mrb[200].mxu0 %vm5108_vm5, %v12932_v8  ;;  %v12811_v61 = vpop.xlane.xlu1 %12810  ;;  %v12910_v39 = vmul.f32 %v17735_v13, %v23193_v63 }
0x110e   : > { %v17739_v0 = vpop.eup %17738  ;;  %17099 = vmatprep.mubr.msk.bf16.mxu1 %vm17816_vm1, %v24611_v36  ;;  %17129 = vmatprep.mubr.msk.bf16.mxu0 %vm17816_vm1, %v24611_v36  ;;  %17748 = vrcp.f32 %v12811_v61  ;;  %v12902_v23 = vmul.f32 %v17737_v56, %v23129_v12  ;;  %v12844_v63 = vpop.xlane.xlu0 %12843 }
0x110f   : > { %v12911_v14 = vmul.f32 %v17739_v0, %v23139_v52  ;;  %17146 = vmatpush3.bf16.msra.mxu1 %v17388_v2 }
0x1110   : > { %v17741_v29 = vpop.eup %17740  ;;  %v12928_v3 = vpack.c.bf16 %v12902_v23, %v12901_v59  ;;  %17147 = vmatprep.subr.bf16.mxu1 %v24611_v36 }
0x1111   : > { %v12838_v48 = vpop.xlane.xlu1 %12837  ;;  %v12933_v1 = vpack.c.bf16 %v12911_v14, %v12910_v39  ;;  %v12903_v52 = vmul.f32 %v17741_v29, %v23198_v46  ;;  %v24683_v46 = vld [vmem:[#allocation20_spill] sm:$0xff] }
0x1112   : > { %17750 = vrcp.f32 %v12838_v48 }
0x1113   : > { %17752 = vrcp.f32 %v12814_v43  ;;  %17148 = vmatpush3.bf16.msra.mxu1 %v17389_v18 }
0x1114   : > { %v17743_v11 = vpop.eup %17742  ;;  %17754 = vrcp.f32 %v12841_v5  ;;  %17193 = vmatprep.subr.bf16.mxu1 %v24611_v36 }
0x1115   : > { %v17745_v9 = vpop.eup %17744  ;;  %17100 = vmatmul.mubr.msk.bf16.gmra.mrb[184].mxu1 %vm5108_vm5, %v12928_v3  ;;  %17130 = vmatmul.mubr.msk.bf16.gmra.mrb[204].mxu0 %vm5108_vm5, %v12933_v1  ;;  %v12817_v12 = vpop.xlane.xlu1 %12816  ;;  %v12912_v26 = vmul.f32 %v17743_v11, %v23202_v57  ;;  %17756 = vrcp.f32 %v12844_v63 }
0x1116   : > { %v17747_v19 = vpop.eup %17746  ;;  %17103 = vmatprep.mubr.msk.bf16.mxu1 %vm17816_vm1, %v24611_v36  ;;  %17133 = vmatprep.mubr.msk.bf16.mxu0 %vm17816_vm1, %v24611_v36  ;;  %v12904_v4 = vmul.f32 %v17745_v9, %v23149_v7  ;;  %17758 = vrcp.f32 %v12817_v12 }
0x1117   : > { %v12913_v17 = vmul.f32 %v17747_v19, %v23159_v47 }
0x1118   : > { %v17749_v37 = vpop.eup %17748  ;;  %v12929_v38 = vpack.c.bf16 %v12904_v4, %v12903_v52 }
0x1119   : > { %v12934_v10 = vpack.c.bf16 %v12913_v17, %v12912_v26  ;;  %v12905_v7 = vmul.f32 %v17749_v37, %v23206_v31  ;;  %v24685_v31 = vld [vmem:[#allocation34_spill] sm:$0xff] }
0x111c   : > { %v17751_v15 = vpop.eup %17750 }
0x111d   : > { %v17753_v6 = vpop.eup %17752  ;;  %17104 = vmatmul.mubr.msk.bf16.gmra.mrb[188].mxu1 %vm5108_vm5, %v12929_v38  ;;  %17134 = vmatmul.mubr.msk.bf16.gmra.mrb[208].mxu0 %vm5108_vm5, %v12934_v10  ;;  %v12914_v47 = vmul.f32 %v17751_v15, %v23210_v40 }
0x111e   : > { %v17755_v53 = vpop.eup %17754  ;;  %17107 = vmatprep.mubr.msk.bf16.mxu1 %vm17816_vm1, %v24611_v36  ;;  %17137 = vmatprep.mubr.msk.bf16.mxu0 %vm17816_vm1, %v24611_v36  ;;  %v12906_v57 = vmul.f32 %v17753_v6, %v24683_v46 }
0x111f   : > { %v12915_v34 = vmul.f32 %v17755_v53, %v24684_v54  ;;  %v17757_v60 = vpop.eup %17756 }
0x1120   : > { %v12930_v32 = vpack.c.bf16 %v12906_v57, %v12905_v7  ;;  %v17759_v24 = vpop.eup %17758  ;;  %v12916_v62 = vmul.f32 %v17757_v60, %v24686_v27  ;;  %v24687_v60 = vld [vmem:[#allocation10_spill] sm:$0xff] }
0x1121   : > { %v12935_v49 = vpack.c.bf16 %v12915_v34, %v12914_v47  ;;  %v12907_v40 = vmul.f32 %v17759_v24, %v24685_v31 }
0x1122   : > { %v12936_v45 = vpack.c.bf16 %v12916_v62, %v12916_v62 }
0x1123   : > { %v12931_v58 = vpack.c.bf16 %v12907_v40, %v12907_v40 }
0x1125   : > { %17108 = vmatmul.mubr.msk.bf16.gmra.mrb[192].mxu1 %vm5108_vm5, %v12930_v32  ;;  %17138 = vmatmul.mubr.msk.bf16.gmra.mrb[212].mxu0 %vm5108_vm5, %v12935_v49 }
0x1126   : > { %17111 = vmatprep.mubr.msk.bf16.mxu1 %vm17816_vm1, %v24611_v36  ;;  %17141 = vmatprep.mubr.msk.bf16.mxu0 %vm17816_vm1, %v24611_v36 }
0x112d   : > { %17112 = vmatmul.mubr.msk.bf16.gmra.mrb[196].mxu1 %vm5108_vm5, %v12931_v58  ;;  %17142 = vmatmul.mubr.msk.bf16.gmra.mrb[216].mxu0 %vm5108_vm5, %v12936_v45 }
0x112e   : > { %17149 = vmatprep.mubr.msk.bf16.mxu1 %vm17816_vm1, %v24611_v36  ;;  %17173 = vmatprep.mubr.msk.bf16.mxu0 %vm17816_vm1, %v24611_v36 }
0x1199   : > { %v12989_v22 = vpop.f32.mrb[160].mxu1  ;;  %v13079_v33 = vpop.f32.mrb[180].mxu0 }
0x119a   : > { %v17037_v41 = vpop.f32.mrb[161].mxu1  ;;  %v17067_v50 = vpop.f32.mrb[181].mxu0 }
0x119b   : > { %v23361_v20 = vpop.f32.mrb[162].mxu1  ;;  %v23363_v42 = vpop.f32.mrb[182].mxu0 }
0x119c   : > { %v17038_v44 = vpop.f32.mrb[163].mxu1  ;;  %v17068_v21 = vpop.f32.mrb[183].mxu0 }
0x11a1   : > { %v23365_v16 = vpop.f32.mrb[184].mxu0 }
0x11a2   : > { %v17071_v28 = vpop.f32.mrb[185].mxu0 }
0x11a3   : > { %v23367_v51 = vpop.f32.mrb[186].mxu0 }
0x11a4   : > { %v17072_v25 = vpop.f32.mrb[187].mxu0 }
0x11c0   : > { %v23372_v35 = vpop.f32.mrb[164].mxu1 }
0x11c1   : > { %v17041_v43 = vpop.f32.mrb[165].mxu1 }
0x11c2   : > { %v23377_v30 = vpop.f32.mrb[166].mxu1 }
0x11c3   : > { %v17042_v8 = vpop.f32.mrb[167].mxu1 }
0x11c8   : > { %v23381_v13 = vpop.f32.mrb[168].mxu1  ;;  %v23383_v56 = vpop.f32.mrb[188].mxu0 }
0x11c9   : > { %v17045_v61 = vpop.f32.mrb[169].mxu1  ;;  %v17075_v0 = vpop.f32.mrb[189].mxu0 }
0x11ca   : > { %v23385_v59 = vpop.f32.mrb[170].mxu1  ;;  %v23387_v39 = vpop.f32.mrb[190].mxu0 }
0x11cb   : > { %v17046_v5 = vpop.f32.mrb[171].mxu1  ;;  %v17076_v48 = vpop.f32.mrb[191].mxu0 }
0x11d0   : > { %v23389_v23 = vpop.f32.mrb[172].mxu1  ;;  %v23391_v14 = vpop.f32.mrb[192].mxu0 }
0x11d1   : > { %v17049_v29 = vpop.f32.mrb[173].mxu1  ;;  %v17079_v3 = vpop.f32.mrb[193].mxu0 }
0x11d2   : > { %v23393_v1 = vpop.f32.mrb[174].mxu1  ;;  %v23395_v11 = vpop.f32.mrb[194].mxu0 }
0x11d3   : > { %v17050_v9 = vpop.f32.mrb[175].mxu1  ;;  %v17080_v19 = vpop.f32.mrb[195].mxu0 }
0x11d8   : > { %v23397_v63 = vpop.f32.mrb[176].mxu1  ;;  %v23399_v12 = vpop.f32.mrb[196].mxu0 }
0x11d9   : > { %v17053_v52 = vpop.f32.mrb[177].mxu1  ;;  %v17083_v26 = vpop.f32.mrb[197].mxu0 }
0x11da   : > { %v13024_v4 = vpop.f32.mrb[178].mxu1  ;;  %v13114_v17 = vpop.f32.mrb[198].mxu0 }
0x11db   : > { %v17054_v37 = vpop.f32.mrb[179].mxu1  ;;  %v17084_v38 = vpop.f32.mrb[199].mxu0 }
0x11e0   : > { %v13169_v10 = vpop.f32.mrb[180].mxu1  ;;  %v13259_v15 = vpop.f32.mrb[200].mxu0 }
0x11e1   : > { %v13297_v6 = vcombine.low %v12989_v22, %v13169_v10  ;;  %v13298_v53 = vcombine.high %v12989_v22, %v13169_v10  ;;  %v13313_v7 = vcombine.low %v13079_v33, %v13259_v15  ;;  %v13314_v47 = vcombine.high %v13079_v33, %v13259_v15  ;;  %v17097_v46 = vpop.f32.mrb[181].mxu1  ;;  %v17127_v57 = vpop.f32.mrb[201].mxu0 }
0x11e2   : > { %v13172_v54 = vpop.f32.mrb[182].mxu1  ;;  %v13262_v34 = vpop.f32.mrb[202].mxu0 }
0x11e3   : > { %v13305_v32 = vrot.slane %v13297_v6, %v24687_v60  ;;  %v13312_v49 = vrot.slane %v13298_v53, %v24687_v60  ;;  %v13321_v24 = vrot.slane %v13313_v7, %v24687_v60  ;;  %v13328_v31 = vrot.slane %v13314_v47, %v24687_v60  ;;  %v17098_v40 = vpop.f32.mrb[183].mxu1  ;;  %v17128_v27 = vpop.f32.mrb[203].mxu0 }
0x11e4   : > { %v13365_v62 = vcombine.low %v23361_v20, %v13172_v54  ;;  %v13366_v58 = vcombine.high %v23361_v20, %v13172_v54  ;;  %v13381_v45 = vcombine.low %v23363_v42, %v13262_v34  ;;  %v13382_v22 = vcombine.high %v23363_v42, %v13262_v34 }
0x11e5   : > { %v13329_v33 = vcombine.low %v13305_v32, %v13321_v24  ;;  %v13330_v41 = vcombine.high %v13305_v32, %v13321_v24  ;;  %v13345_v50 = vcombine.low %v13312_v49, %v13328_v31  ;;  %v13346_v44 = vcombine.high %v13312_v49, %v13328_v31 }
0x11e6   : > { %v13373_v21 = vrot.slane %v13365_v62, %v24687_v60  ;;  %v13380_v28 = vrot.slane %v13366_v58, %v24687_v60  ;;  %v13389_v25 = vrot.slane %v13381_v45, %v24687_v60  ;;  %v13396_v2 = vrot.slane %v13382_v22, %v24687_v60 }
0x11e7   : > { %v13337_v43 = vrot.slane %v13329_v33, %v18180_v55  ;;  %v13344_v20 = vrot.slane %v13330_v41, %v18180_v55  ;;  %v13353_v18 = vrot.slane %v13345_v50, %v18180_v55  ;;  %v13360_v42 = vrot.slane %v13346_v44, %v18180_v55 }
0x11e8   : > { %v13397_v8 = vcombine.low %v13373_v21, %v13389_v25  ;;  %v13398_v61 = vcombine.high %v13373_v21, %v13389_v25  ;;  %v13413_v0 = vcombine.low %v13380_v28, %v13396_v2  ;;  %v13414_v5 = vcombine.high %v13380_v28, %v13396_v2  ;;  %v13177_v48 = vpop.f32.mrb[184].mxu1  ;;  %v13267_v29 = vpop.f32.mrb[204].mxu0 }
0x11e9   : > { %v13909_v3 = vcombine.low %v13337_v43, %v13344_v20  ;;  %v16192_v9 = vcombine.high %v13337_v43, %v13344_v20  ;;  %v13925_v19 = vcombine.low %v13353_v18, %v13360_v42  ;;  %v16193_v52 = vcombine.high %v13353_v18, %v13360_v42  ;;  %v17101_v26 = vpop.f32.mrb[185].mxu1  ;;  %v17131_v4 = vpop.f32.mrb[205].mxu0 }
0x11ea   : > { %v13405_v17 = vrot.slane %v13397_v8, %v18180_v55  ;;  %v13412_v37 = vrot.slane %v13398_v61, %v18180_v55  ;;  %v13421_v38 = vrot.slane %v13413_v0, %v18180_v55  ;;  %v13428_v10 = vrot.slane %v13414_v5, %v18180_v55  ;;  %v13180_v15 = vpop.f32.mrb[186].mxu1  ;;  %v13270_v6 = vpop.f32.mrb[206].mxu0 }
0x11eb   : > { %v23422_v53 = vrot.slane %v13909_v3, %v24687_v60  ;;  %v23425_v7 = vrot.slane %v16192_v9, %v24687_v60  ;;  %v23428_v47 = vrot.slane %v13925_v19, %v24687_v60  ;;  %v23431_v46 = vrot.slane %v16193_v52, %v24687_v60  ;;  %v17102_v57 = vpop.f32.mrb[187].mxu1  ;;  %v17132_v54 = vpop.f32.mrb[207].mxu0 }
0x11ec   : > { %v13977_v34 = vcombine.low %v13405_v17, %v13412_v37  ;;  %v16194_v32 = vcombine.high %v13405_v17, %v13412_v37  ;;  %v13993_v49 = vcombine.low %v13421_v38, %v13428_v10  ;;  %v16195_v24 = vcombine.high %v13421_v38, %v13428_v10 }
0x11ed   : > { %v13433_v31 = vcombine.low %v23372_v35, %v13177_v48  ;;  %v13434_v40 = vcombine.high %v23372_v35, %v13177_v48  ;;  %v13449_v27 = vcombine.low %v23365_v16, %v13267_v29  ;;  %v13450_v62 = vcombine.high %v23365_v16, %v13267_v29 }
0x11ee   : > { %v23438_v58 = vrot.slane %v13977_v34, %v24687_v60  ;;  %v23441_v45 = vrot.slane %v16194_v32, %v24687_v60  ;;  %v23444_v22 = vrot.slane %v13993_v49, %v24687_v60  ;;  %v23447_v33 = vrot.slane %v16195_v24, %v24687_v60 }
0x11ef   : > { %v13441_v41 = vrot.slane %v13433_v31, %v24687_v60  ;;  %v13448_v35 = vrot.slane %v13434_v40, %v24687_v60  ;;  %v13457_v50 = vrot.slane %v13449_v27, %v24687_v60  ;;  %v13464_v16 = vrot.slane %v13450_v62, %v24687_v60 }
0x11f0   : > { %v13501_v44 = vcombine.low %v23377_v30, %v13180_v15  ;;  %v13502_v21 = vcombine.high %v23377_v30, %v13180_v15  ;;  %v13517_v28 = vcombine.low %v23367_v51, %v13270_v6  ;;  %v13518_v25 = vcombine.high %v23367_v51, %v13270_v6  ;;  %v13185_v2 = vpop.f32.mrb[188].mxu1  ;;  %v13275_v43 = vpop.f32.mrb[208].mxu0 }
0x11f1   : > { %v13465_v20 = vcombine.low %v13441_v41, %v13457_v50  ;;  %v13466_v18 = vcombine.high %v13441_v41, %v13457_v50  ;;  %v13481_v42 = vcombine.low %v13448_v35, %v13464_v16  ;;  %v13482_v8 = vcombine.high %v13448_v35, %v13464_v16  ;;  %v17105_v61 = vpop.f32.mrb[189].mxu1  ;;  %v17135_v0 = vpop.f32.mrb[209].mxu0 }
0x11f2   : > { %v13509_v5 = vrot.slane %v13501_v44, %v24687_v60  ;;  %v13516_v48 = vrot.slane %v13502_v21, %v24687_v60  ;;  %v13525_v29 = vrot.slane %v13517_v28, %v24687_v60  ;;  %v13532_v30 = vrot.slane %v13518_v25, %v24687_v60  ;;  %v13188_v3 = vpop.f32.mrb[190].mxu1  ;;  %v13278_v9 = vpop.f32.mrb[210].mxu0 }
0x11f3   : > { %v13473_v51 = vrot.slane %v13465_v20, %v18180_v55  ;;  %v13480_v19 = vrot.slane %v13466_v18, %v18180_v55  ;;  %v13489_v52 = vrot.slane %v13481_v42, %v18180_v55  ;;  %v13496_v26 = vrot.slane %v13482_v8, %v18180_v55  ;;  %v17106_v4 = vpop.f32.mrb[191].mxu1  ;;  %v17136_v17 = vpop.f32.mrb[211].mxu0 }
0x11f4   : > { %v13533_v37 = vcombine.low %v13509_v5, %v13525_v29  ;;  %v13534_v38 = vcombine.high %v13509_v5, %v13525_v29  ;;  %v13549_v10 = vcombine.low %v13516_v48, %v13532_v30  ;;  %v13550_v15 = vcombine.high %v13516_v48, %v13532_v30 }
0x11f5   : > { %v14045_v6 = vcombine.low %v13473_v51, %v13480_v19  ;;  %v16196_v57 = vcombine.high %v13473_v51, %v13480_v19  ;;  %v14061_v54 = vcombine.low %v13489_v52, %v13496_v26  ;;  %v16197_v34 = vcombine.high %v13489_v52, %v13496_v26 }
0x11f6   : > { %v13541_v32 = vrot.slane %v13533_v37, %v18180_v55  ;;  %v13548_v49 = vrot.slane %v13534_v38, %v18180_v55  ;;  %v13557_v24 = vrot.slane %v13549_v10, %v18180_v55  ;;  %v13564_v31 = vrot.slane %v13550_v15, %v18180_v55 }
0x11f7   : > { %v23470_v40 = vrot.slane %v14045_v6, %v24687_v60  ;;  %v23473_v27 = vrot.slane %v16196_v57, %v24687_v60  ;;  %v23476_v62 = vrot.slane %v14061_v54, %v24687_v60  ;;  %v23479_v41 = vrot.slane %v16197_v34, %v24687_v60 }
0x11f8   : > { %v14113_v35 = vcombine.low %v13541_v32, %v13548_v49  ;;  %v16198_v50 = vcombine.high %v13541_v32, %v13548_v49  ;;  %v14129_v16 = vcombine.low %v13557_v24, %v13564_v31  ;;  %v16199_v44 = vcombine.high %v13557_v24, %v13564_v31  ;;  %v23481_v21 = vpop.f32.mrb[192].mxu1  ;;  %v23483_v28 = vpop.f32.mrb[212].mxu0 }
0x11f9   : > { %v13569_v25 = vcombine.low %v23381_v13, %v13185_v2  ;;  %v13570_v20 = vcombine.high %v23381_v13, %v13185_v2  ;;  %v13585_v18 = vcombine.low %v23383_v56, %v13275_v43  ;;  %v13586_v42 = vcombine.high %v23383_v56, %v13275_v43  ;;  %v17109_v8 = vpop.f32.mrb[193].mxu1  ;;  %v17139_v61 = vpop.f32.mrb[213].mxu0 }
0x11fa   : > { %v23490_v0 = vrot.slane %v14113_v35, %v24687_v60  ;;  %v23493_v5 = vrot.slane %v16198_v50, %v24687_v60  ;;  %v23496_v48 = vrot.slane %v14129_v16, %v24687_v60  ;;  %v23499_v29 = vrot.slane %v16199_v44, %v24687_v60  ;;  %v23501_v30 = vpop.f32.mrb[194].mxu1  ;;  %v23503_v13 = vpop.f32.mrb[214].mxu0 }
0x11fb   : > { %v13577_v56 = vrot.slane %v13569_v25, %v24687_v60  ;;  %v13584_v2 = vrot.slane %v13570_v20, %v24687_v60  ;;  %v13593_v43 = vrot.slane %v13585_v18, %v24687_v60  ;;  %v13600_v51 = vrot.slane %v13586_v42, %v24687_v60  ;;  %v17140_v19 = vpop.f32.mrb[215].mxu0  ;;  %v17110_v52 = vpop.f32.mrb[195].mxu1 }
0x11fc   : > { %v13637_v26 = vcombine.low %v23385_v59, %v13188_v3  ;;  %v13638_v4 = vcombine.high %v23385_v59, %v13188_v3  ;;  %v13653_v17 = vcombine.low %v23387_v39, %v13278_v9  ;;  %v13654_v37 = vcombine.high %v23387_v39, %v13278_v9 }
0x11fd   : > { %v13601_v38 = vcombine.low %v13577_v56, %v13593_v43  ;;  %v13602_v10 = vcombine.high %v13577_v56, %v13593_v43  ;;  %v13617_v15 = vcombine.low %v13584_v2, %v13600_v51  ;;  %v13618_v6 = vcombine.high %v13584_v2, %v13600_v51 }
0x11fe   : > { %v13645_v57 = vrot.slane %v13637_v26, %v24687_v60  ;;  %v13652_v54 = vrot.slane %v13638_v4, %v24687_v60  ;;  %v13661_v34 = vrot.slane %v13653_v17, %v24687_v60  ;;  %v13668_v32 = vrot.slane %v13654_v37, %v24687_v60 }
0x11ff   : > { %v13609_v49 = vrot.slane %v13601_v38, %v18180_v55  ;;  %v13616_v59 = vrot.slane %v13602_v10, %v18180_v55  ;;  %v13625_v3 = vrot.slane %v13617_v15, %v18180_v55  ;;  %v13632_v39 = vrot.slane %v13618_v6, %v18180_v55 }
0x1200   : > { %v13669_v9 = vcombine.low %v13645_v57, %v13661_v34  ;;  %v13670_v24 = vcombine.high %v13645_v57, %v13661_v34  ;;  %v13685_v31 = vcombine.low %v13652_v54, %v13668_v32  ;;  %v13686_v35 = vcombine.high %v13652_v54, %v13668_v32  ;;  %v23521_v50 = vpop.f32.mrb[196].mxu1  ;;  %v23523_v16 = vpop.f32.mrb[216].mxu0 }
0x1201   : > { %v14181_v44 = vcombine.low %v13609_v49, %v13616_v59  ;;  %v16200_v25 = vcombine.high %v13609_v49, %v13616_v59  ;;  %v14197_v20 = vcombine.low %v13625_v3, %v13632_v39  ;;  %v16201_v18 = vcombine.high %v13625_v3, %v13632_v39  ;;  %v17113_v42 = vpop.f32.mrb[197].mxu1  ;;  %v17143_v8 = vpop.f32.mrb[217].mxu0 }
0x1202   : > { %v13677_v61 = vrot.slane %v13669_v9, %v18180_v55  ;;  %v13684_v56 = vrot.slane %v13670_v24, %v18180_v55  ;;  %v13693_v2 = vrot.slane %v13685_v31, %v18180_v55  ;;  %v13700_v43 = vrot.slane %v13686_v35, %v18180_v55  ;;  %v13204_v51 = vpop.f32.mrb[198].mxu1  ;;  %v13294_v19 = vpop.f32.mrb[218].mxu0 }
0x1203   : > { %v23530_v52 = vrot.slane %v14181_v44, %v24687_v60  ;;  %v23533_v26 = vrot.slane %v16200_v25, %v24687_v60  ;;  %v23536_v4 = vrot.slane %v14197_v20, %v24687_v60  ;;  %v23539_v17 = vrot.slane %v16201_v18, %v24687_v60  ;;  %v17144_v37 = vpop.f32.mrb[219].mxu0  ;;  %v17114_v38 = vpop.f32.mrb[199].mxu1 }
0x1204   : > { %v14249_v10 = vcombine.low %v13677_v61, %v13684_v56  ;;  %v16202_v15 = vcombine.high %v13677_v61, %v13684_v56  ;;  %v14265_v6 = vcombine.low %v13693_v2, %v13700_v43  ;;  %v16203_v57 = vcombine.high %v13693_v2, %v13700_v43 }
0x1205   : > { %v13942_v54 = vcombine.high %v23422_v53, %v23425_v7  ;;  %v13958_v34 = vcombine.high %v23428_v47, %v23431_v46  ;;  %v14010_v32 = vcombine.high %v23438_v58, %v23441_v45  ;;  %v14026_v49 = vcombine.high %v23444_v22, %v23447_v33 }
0x1206   : > { %v23550_v59 = vrot.slane %v14249_v10, %v24687_v60  ;;  %v23553_v3 = vrot.slane %v16202_v15, %v24687_v60  ;;  %v23556_v39 = vrot.slane %v14265_v6, %v24687_v60  ;;  %v23559_v9 = vrot.slane %v16203_v57, %v24687_v60 }
0x1207   : > { %v23562_v24 = vrot.slane %v13942_v54, %v18180_v55  ;;  %v23565_v31 = vrot.slane %v13958_v34, %v18180_v55  ;;  %v23568_v35 = vrot.slane %v14010_v32, %v18180_v55  ;;  %v23571_v44 = vrot.slane %v14026_v49, %v18180_v55 }
0x1208   : > { %v13941_v25 = vcombine.low %v23422_v53, %v23425_v7  ;;  %v13957_v20 = vcombine.low %v23428_v47, %v23431_v46  ;;  %v14009_v18 = vcombine.low %v23438_v58, %v23441_v45  ;;  %v14025_v42 = vcombine.low %v23444_v22, %v23447_v33 }
0x1209   : > { %v13975_v8 = vcombine.low %v23562_v24, %v23565_v31  ;;  %v14043_v61 = vcombine.low %v23568_v35, %v23571_v44  ;;  %v13705_v56 = vcombine.low %v23389_v23, %v23481_v21  ;;  %v13706_v53 = vcombine.high %v23389_v23, %v23481_v21 }
0x120a   : > { %v23590_v7 = vrot.slane %v13941_v25, %v18180_v55  ;;  %v23593_v47 = vrot.slane %v13957_v20, %v18180_v55  ;;  %v23596_v46 = vrot.slane %v14009_v18, %v18180_v55  ;;  %v23599_v58 = vrot.slane %v14025_v42, %v18180_v55 }
0x120b   : > { %v17317_v45 = vpack.i.bf16 %v14043_v61, %v13975_v8  ;;  %v13713_v22 = vrot.slane %v13705_v56, %v24687_v60  ;;  %v13720_v33 = vrot.slane %v13706_v53, %v24687_v60  ;;  %v13721_v23 = vcombine.low %v23391_v14, %v23483_v28 }
0x120c   : > { %v13974_v21 = vcombine.high %v23590_v7, %v23593_v47  ;;  %v14042_v2 = vcombine.high %v23596_v46, %v23599_v58  ;;  %v13722_v43 = vcombine.high %v23391_v14, %v23483_v28  ;;  %v13773_v51 = vcombine.low %v23393_v1, %v23501_v30 }
0x120d   : > { %17318 = vrot.lane.b32.xlu0 %v17317_v45, %s17825_s21  ;;  %v13729_v19 = vrot.slane %v13721_v23, %v24687_v60  ;;  %v13774_v37 = vcombine.high %v23393_v1, %v23501_v30  ;;  %v13789_v38 = vcombine.low %v23395_v11, %v23503_v13  ;;  %v13790_v10 = vcombine.high %v23395_v11, %v23503_v13 }
0x120e   : > { %v17312_v15 = vpack.i.bf16 %v14042_v2, %v13974_v21  ;;  %v13736_v6 = vrot.slane %v13722_v43, %v24687_v60  ;;  %v13781_v14 = vrot.slane %v13773_v51, %v24687_v60  ;;  %v13976_v28 = vcombine.high %v23562_v24, %v23565_v31 }
0x120f   : > { %v13737_v57 = vcombine.low %v13713_v22, %v13729_v19  ;;  %v13738_v54 = vcombine.high %v13713_v22, %v13729_v19  ;;  %v13788_v34 = vrot.slane %v13774_v37, %v24687_v60  ;;  %v13797_v1 = vrot.slane %v13789_v38, %v24687_v60 }
0x1210   : > { %17313 = vrot.lane.b32.xlu1 %v17312_v15, %s17826_s23  ;;  %v13753_v30 = vcombine.low %v13720_v33, %v13736_v6  ;;  %v13754_v32 = vcombine.high %v13720_v33, %v13736_v6  ;;  %v13804_v11 = vrot.slane %v13790_v10, %v24687_v60  ;;  %v14044_v13 = vcombine.high %v23568_v35, %v23571_v44 }
0x1211   : > { %v13745_v49 = vrot.slane %v13737_v57, %v18180_v55  ;;  %v13752_v25 = vrot.slane %v13738_v54, %v18180_v55  ;;  %v13805_v24 = vcombine.low %v13781_v14, %v13797_v1  ;;  %v13806_v31 = vcombine.high %v13781_v14, %v13797_v1 }
0x1212   : > { %v13761_v20 = vrot.slane %v13753_v30, %v18180_v55  ;;  %v13768_v18 = vrot.slane %v13754_v32, %v18180_v55  ;;  %v13821_v42 = vcombine.low %v13788_v34, %v13804_v11  ;;  %v13822_v8 = vcombine.high %v13788_v34, %v13804_v11 }
0x1213   : > { %v14317_v61 = vcombine.low %v13745_v49, %v13752_v25  ;;  %v16204_v56 = vcombine.high %v13745_v49, %v13752_v25  ;;  %v13813_v53 = vrot.slane %v13805_v24, %v18180_v55  ;;  %v13820_v45 = vrot.slane %v13806_v31, %v18180_v55 }
0x1214   : > { %v14333_v22 = vcombine.low %v13761_v20, %v13768_v18  ;;  %v16205_v35 = vcombine.high %v13761_v20, %v13768_v18  ;;  %v13829_v44 = vrot.slane %v13821_v42, %v18180_v55  ;;  %v13836_v33 = vrot.slane %v13822_v8, %v18180_v55 }
0x1215   : > { %v23640_v23 = vrot.slane %v14317_v61, %v24687_v60  ;;  %v23643_v21 = vrot.slane %v16204_v56, %v24687_v60  ;;  %v14385_v2 = vcombine.low %v13813_v53, %v13820_v45  ;;  %v16206_v43 = vcombine.high %v13813_v53, %v13820_v45 }
0x1216   : > { %v23646_v51 = vrot.slane %v14333_v22, %v24687_v60  ;;  %v23649_v19 = vrot.slane %v16205_v35, %v24687_v60  ;;  %v14401_v37 = vcombine.low %v13829_v44, %v13836_v33  ;;  %v16207_v38 = vcombine.high %v13829_v44, %v13836_v33 }
0x1217   : > { %v23652_v10 = vrot.slane %v14385_v2, %v24687_v60  ;;  %v23655_v15 = vrot.slane %v16206_v43, %v24687_v60  ;;  %v17322_v6 = vpack.i.bf16 %v14044_v13, %v13976_v28  ;;  %v14078_v14 = vcombine.high %v23470_v40, %v23473_v27 }
0x1218   : > { %v23660_v57 = vrot.slane %v14401_v37, %v24687_v60  ;;  %v23663_v54 = vrot.slane %v16207_v38, %v24687_v60  ;;  %v14094_v34 = vcombine.high %v23476_v62, %v23479_v41  ;;  %v14146_v1 = vcombine.high %v23490_v0, %v23493_v5 }
0x1219   : > { %17323 = vrot.lane.b32.xlu1 %v17322_v6, %s17827_s24  ;;  %v14092_v30 = vrot.slane %v14078_v14, %v18180_v55  ;;  %v14162_v28 = vcombine.high %v23496_v48, %v23499_v29  ;;  %v14077_v32 = vcombine.low %v23470_v40, %v23473_v27  ;;  %v14093_v11 = vcombine.low %v23476_v62, %v23479_v41 }
0x121a   : > { %v14108_v13 = vrot.slane %v14094_v34, %v18180_v55  ;;  %v14160_v49 = vrot.slane %v14146_v1, %v18180_v55  ;;  %v14145_v25 = vcombine.low %v23490_v0, %v23493_v5  ;;  %v14161_v24 = vcombine.low %v23496_v48, %v23499_v29 }
0x121b   : > { %v14176_v31 = vrot.slane %v14162_v28, %v18180_v55  ;;  %v23685_v20 = vrot.slane %v14077_v32, %v18180_v55  ;;  %v23688_v40 = vrot.slane %v14093_v11, %v18180_v55  ;;  %v13841_v27 = vcombine.low %v23397_v63, %v23521_v50 }
0x121c   : > { %v14112_v62 = vcombine.high %v14092_v30, %v14108_v13  ;;  %v23693_v41 = vrot.slane %v14145_v25, %v18180_v55  ;;  %v23696_v0 = vrot.slane %v14161_v24, %v18180_v55  ;;  %v13842_v5 = vcombine.high %v23397_v63, %v23521_v50 }
0x121d   : > { %v14180_v48 = vcombine.high %v14160_v49, %v14176_v31  ;;  %v14110_v29 = vcombine.high %v23685_v20, %v23688_v40  ;;  %v13849_v18 = vrot.slane %v13841_v27, %v24687_v60  ;;  %v13857_v42 = vcombine.low %v23399_v12, %v23523_v16 }
0x121e   : > { %v14178_v8 = vcombine.high %v23693_v41, %v23696_v0  ;;  %v13856_v61 = vrot.slane %v13842_v5, %v24687_v60  ;;  %v13858_v56 = vcombine.high %v23399_v12, %v23523_v16  ;;  %v14111_v53 = vcombine.low %v14092_v30, %v14108_v13 }
0x121f   : > { %v17337_v45 = vpack.i.bf16 %v14180_v48, %v14112_v62  ;;  %v13865_v63 = vrot.slane %v13857_v42, %v24687_v60  ;;  %v14179_v50 = vcombine.low %v14160_v49, %v14176_v31  ;;  %v14214_v22 = vcombine.high %v23530_v52, %v23533_v26 }
0x1220   : > { %v17327_v35 = vpack.i.bf16 %v14178_v8, %v14110_v29  ;;  %v13872_v44 = vrot.slane %v13858_v56, %v24687_v60  ;;  %v14230_v33 = vcombine.high %v23536_v4, %v23539_v17  ;;  %v14282_v2 = vcombine.high %v23550_v59, %v23553_v3 }
0x1221   : > { %17338 = vrot.lane.b32.xlu0 %v17337_v45, %s17827_s24  ;;  %v13873_v12 = vcombine.low %v13849_v18, %v13865_v63  ;;  %v13874_v16 = vcombine.high %v13849_v18, %v13865_v63  ;;  %v17332_v43 = vpack.i.bf16 %v14179_v50, %v14111_v53  ;;  %v14228_v37 = vrot.slane %v14214_v22, %v18180_v55 }
0x1222   : > { %17328 = vrot.lane.b32.xlu1 %v17327_v35, %s17826_s23  ;;  %v13889_v38 = vcombine.low %v13856_v61, %v13872_v44  ;;  %v13890_v6 = vcombine.high %v13856_v61, %v13872_v44  ;;  %v14244_v14 = vrot.slane %v14230_v33, %v18180_v55  ;;  %v14296_v34 = vrot.slane %v14282_v2, %v18180_v55 }
0x1223   : > { %v13881_v1 = vrot.slane %v13873_v12, %v18180_v55  ;;  %v13888_v30 = vrot.slane %v13874_v16, %v18180_v55  ;;  %v14298_v28 = vcombine.high %v23556_v39, %v23559_v9  ;;  %v14213_v32 = vcombine.low %v23530_v52, %v23533_v26 }
0x1224   : > { %v13897_v11 = vrot.slane %v13889_v38, %v18180_v55  ;;  %v13904_v13 = vrot.slane %v13890_v6, %v18180_v55  ;;  %v14247_v49 = vcombine.low %v14228_v37, %v14244_v14  ;;  %v14229_v25 = vcombine.low %v23536_v4, %v23539_v17 }
0x1225   : > { %v14453_v24 = vcombine.low %v13881_v1, %v13888_v30  ;;  %v16208_v31 = vcombine.high %v13881_v1, %v13888_v30  ;;  %v14312_v27 = vrot.slane %v14298_v28, %v18180_v55  ;;  %v23735_v62 = vrot.slane %v14213_v32, %v18180_v55 }
0x1226   : > { %v14469_v5 = vcombine.low %v13897_v11, %v13904_v13  ;;  %v16209_v48 = vcombine.high %v13897_v11, %v13904_v13  ;;  %17333 = vrot.lane.b32.xlu1 %v17332_v43, %s17825_s21  ;;  %v23739_v52 = vrot.slane %v14229_v25, %v18180_v55  ;;  %v14281_v26 = vcombine.low %v23550_v59, %v23553_v3 }
0x1227   : > { %v14460_v29 = vrot.slane %v14453_v24, %v24687_v60  ;;  %v14468_v4 = vrot.slane %v16208_v31, %v24687_v60  ;;  %v14315_v17 = vcombine.low %v14296_v34, %v14312_v27  ;;  %v14297_v18 = vcombine.low %v23556_v39, %v23559_v9 }
0x1228   : > { %v14476_v42 = vrot.slane %v14469_v5, %v24687_v60  ;;  %v14484_v8 = vrot.slane %v16209_v48, %v24687_v60  ;;  %v14246_v61 = vcombine.high %v23735_v62, %v23739_v52  ;;  %v23752_v56 = vrot.slane %v14281_v26, %v18180_v55 }
0x1229   : > { %v17347_v53 = vpack.i.bf16 %v14315_v17, %v14247_v49  ;;  %v23755_v59 = vrot.slane %v14297_v18, %v18180_v55  ;;  %v14248_v3 = vcombine.high %v14228_v37, %v14244_v14  ;;  %v14316_v45 = vcombine.high %v14296_v34, %v14312_v27 }
0x122a   : > { %v14350_v63 = vcombine.high %v23640_v23, %v23643_v21  ;;  %v14366_v39 = vcombine.high %v23646_v51, %v23649_v19  ;;  %v14418_v60 = vcombine.high %v23652_v10, %v23655_v15  ;;  %v14434_v9 = vcombine.high %v23660_v57, %v23663_v54 }
0x122b   : > { %17348 = vrot.lane.b32.xlu0 %v17347_v53, %s17825_s21  ;;  %v14314_v50 = vcombine.high %v23752_v56, %v23755_v59  ;;  %v17352_v22 = vpack.i.bf16 %v14316_v45, %v14248_v3  ;;  %v14349_v35 = vcombine.low %v23640_v23, %v23643_v21  ;;  %v14365_v44 = vcombine.low %v23646_v51, %v23649_v19 }
0x122c   : > { %v14364_v33 = vrot.slane %v14350_v63, %v18180_v55  ;;  %v14380_v2 = vrot.slane %v14366_v39, %v18180_v55  ;;  %v14432_v12 = vrot.slane %v14418_v60, %v18180_v55  ;;  %v14448_v16 = vrot.slane %v14434_v9, %v18180_v55 }
0x122d   : > { %v17342_v43 = vpack.i.bf16 %v14314_v50, %v14246_v61  ;;  %v23777_v37 = vrot.slane %v14349_v35, %v18180_v55  ;;  %v23780_v38 = vrot.slane %v14365_v44, %v18180_v55  ;;  %v14417_v23 = vcombine.low %v23652_v10, %v23655_v15 }
0x122e   : > { %v14383_v21 = vcombine.low %v14364_v33, %v14380_v2  ;;  %v14451_v51 = vcombine.low %v14432_v12, %v14448_v16  ;;  %v14433_v19 = vcombine.low %v23660_v57, %v23663_v54  ;;  %v14384_v6 = vcombine.high %v14364_v33, %v14380_v2 }
0x122f   : > { %17343 = vrot.lane.b32.xlu1 %v17342_v43, %s17826_s23  ;;  %v14382_v14 = vcombine.high %v23777_v37, %v23780_v38  ;;  %v23790_v34 = vrot.slane %v14417_v23, %v18180_v55  ;;  %v14452_v1 = vcombine.high %v14432_v12, %v14448_v16  ;;  %v14485_v30 = vcombine.low %v14460_v29, %v14468_v4 }
0x1230   : > { %v17362_v28 = vpack.i.bf16 %v14451_v51, %v14383_v21  ;;  %v23793_v32 = vrot.slane %v14433_v19, %v18180_v55  ;;  %v14501_v10 = vcombine.low %v14476_v42, %v14484_v8  ;;  %v14486_v15 = vcombine.high %v14460_v29, %v14468_v4 }
0x1231   : > { %v17367_v11 = vpack.i.bf16 %v14452_v1, %v14384_v6  ;;  %v23796_v57 = vrot.slane %v14485_v30, %v18180_v55  ;;  %v14502_v54 = vcombine.high %v14476_v42, %v14484_v8  ;;  %v13973_v13 = vcombine.low %v23590_v7, %v23593_v47 }
0x1232   : > { %v14450_v49 = vcombine.high %v23790_v34, %v23793_v32  ;;  %v23803_v25 = vrot.slane %v14501_v10, %v18180_v55  ;;  %v14500_v24 = vrot.slane %v14486_v15, %v18180_v55  ;;  %v14041_v31 = vcombine.low %v23596_v46, %v23599_v58 }
0x1233   : > { %17353 = vrot.lane.b32.xlu1 %v17352_v22, %s17827_s24  ;;  %v14516_v27 = vrot.slane %v14502_v54, %v18180_v55  ;;  %v14109_v5 = vcombine.low %v23685_v20, %v23688_v40  ;;  %v14177_v7 = vcombine.low %v23693_v41, %v23696_v0  ;;  %v14245_v47 = vcombine.low %v23735_v62, %v23739_v52 }
0x1234   : > { %v17357_v48 = vpack.i.bf16 %v14450_v49, %v14382_v14  ;;  %v14518_v26 = vcombine.high %v23796_v57, %v23803_v25  ;;  %v14313_v46 = vcombine.low %v23752_v56, %v23755_v59  ;;  %v14381_v58 = vcombine.low %v23777_v37, %v23780_v38 }
0x1235   : > { %v14519_v55 = vcombine.low %v14500_v24, %v14516_v27  ;;  %v14520_v29 = vcombine.high %v14500_v24, %v14516_v27  ;;  %v14449_v20 = vcombine.low %v23790_v34, %v23793_v32  ;;  %v14517_v40 = vcombine.low %v23796_v57, %v23803_v25  ;;  %v16215_v57 = vld [vmem:[%s24231_s4 + $0x1] ss:$0 sm:$0xff] }
0x1236   : > { %17358 = vrot.lane.b32.xlu0 %v17357_v48, %s17826_s23 }
0x1237   : > { %17363 = vrot.lane.b32.xlu1 %v17362_v28, %s17825_s21 }
0x123a   : > { %17368 = vrot.lane.b32.xlu0 %v17367_v11, %s17827_s24 }
0x123b   : > { %14546 = vrot.lane.b32.xlu1 %v14518_v26, %s17826_s23 }
0x123e   : > { %14582 = vrot.lane.b32.xlu0 %v14519_v55, %s17825_s21 }
0x123f   : > { %14618 = vrot.lane.b32.xlu1 %v14520_v29, %s17827_s24 }
0x127f   : > { %v17319_v0 = vpop.permute.xlu0 %17318 }
0x1280   : > { %v17321_v4 = vunpack.i.h.bf16 %v17319_v0  ;;  %v17320_v17 = vunpack.i.l.bf16 %v17319_v0 }
0x1282   : > { %v17314_v41 = vpop.permute.xlu1 %17313 }
0x1283   : > { %v17316_v62 = vunpack.i.h.bf16 %v17314_v41  ;;  %v17315_v52 = vunpack.i.l.bf16 %v17314_v41 }
0x1285   : > { %v14629_v18 = vsel %vm4699_vm2, %v13973_v13, %v17315_v52  ;;  %v14630_v42 = vsel %vm4699_vm2, %v14041_v31, %v17316_v62 }
0x1286   : > { %v14638_v53 = vsel %vm7227_vm14, %v14629_v18, %v17320_v17  ;;  %v14639_v59 = vsel %vm7227_vm14, %v14630_v42, %v17321_v4 }
0x128b   : > { %v17324_v8 = vpop.permute.xlu1 %17323 }
0x128c   : > { %v17326_v61 = vunpack.i.h.bf16 %v17324_v8  ;;  %v17325_v56 = vunpack.i.l.bf16 %v17324_v8 }
0x128e   : > { %v14647_v3 = vsel %vm7237_vm15, %v14638_v53, %v17325_v56  ;;  %v14648_v45 = vsel %vm7237_vm15, %v14639_v59, %v17326_v61 }
0x128f   : > { %v14656_v63 = vpack.c.bf16 %v14648_v45, %v14647_v3  ;;  %v24688_v3 = vld [vmem:[#allocation17_spill] sm:$0xff] }
0x1291   : > { %17150 = vmatmul.mubr.msk.bf16.vlgmr.msra.gmra.mrb[200].mxu1 %vm427_vm0, %v14656_v63 }
0x1292   : > { %17153 = vmatprep.mubr.msk.bf16.mxu1 %vm17816_vm1, %v24611_v36 }
0x1293   : > { %v17339_v50 = vpop.permute.xlu0 %17338 }
0x1294   : > { %v17329_v39 = vpop.permute.xlu1 %17328  ;;  %v17341_v33 = vunpack.i.h.bf16 %v17339_v50  ;;  %v17340_v2 = vunpack.i.l.bf16 %v17339_v50 }
0x1295   : > { %v17331_v60 = vunpack.i.h.bf16 %v17329_v39  ;;  %v17330_v9 = vunpack.i.l.bf16 %v17329_v39 }
0x1297   : > { %v14631_v12 = vsel %vm4699_vm2, %v14109_v5, %v17330_v9  ;;  %v14632_v16 = vsel %vm4699_vm2, %v14177_v7, %v17331_v60  ;;  %v24689_v60 = vld [vmem:[#allocation33_spill] sm:$0xff] }
0x1298   : > { %v17334_v22 = vpop.permute.xlu1 %17333 }
0x1299   : > { %v17336_v35 = vunpack.i.h.bf16 %v17334_v22  ;;  %v17335_v44 = vunpack.i.l.bf16 %v17334_v22 }
0x129b   : > { %v14640_v43 = vsel %vm7227_vm14, %v14631_v12, %v17335_v44  ;;  %v14641_v23 = vsel %vm7227_vm14, %v14632_v16, %v17336_v35  ;;  %v24690_v12 = vld [vmem:[#allocation32_spill] sm:$0xff] }
0x129c   : > { %v14649_v21 = vsel %vm7237_vm15, %v14640_v43, %v17340_v2  ;;  %v14650_v51 = vsel %vm7237_vm15, %v14641_v23, %v17341_v33 }
0x129d   : > { %v14657_v19 = vpack.c.bf16 %v14650_v51, %v14649_v21  ;;  %v17349_v6 = vpop.permute.xlu0 %17348  ;;  %v24691_v21 = vld [vmem:[#allocation9_spill] sm:$0xff] }
0x129e   : > { %v17351_v28 = vunpack.i.h.bf16 %v17349_v6  ;;  %v17350_v10 = vunpack.i.l.bf16 %v17349_v6 }
0x129f   : > { %17154 = vmatmul.mubr.msk.bf16.gmra.mrb[204].mxu1 %vm427_vm0, %v14657_v19 }
0x12a0   : > { %17157 = vmatprep.mubr.msk.bf16.mxu1 %vm17816_vm1, %v24611_v36 }
0x12a1   : > { %v17344_v14 = vpop.permute.xlu1 %17343 }
0x12a2   : > { %v17346_v1 = vunpack.i.h.bf16 %v17344_v14  ;;  %v17345_v30 = vunpack.i.l.bf16 %v17344_v14 }
0x12a4   : > { %v14633_v15 = vsel %vm4699_vm2, %v14245_v47, %v17345_v30  ;;  %v14634_v11 = vsel %vm4699_vm2, %v14313_v46, %v17346_v1 }
0x12a5   : > { %v17354_v54 = vpop.permute.xlu1 %17353  ;;  %v14642_v24 = vsel %vm7227_vm14, %v14633_v15, %v17350_v10  ;;  %v14643_v31 = vsel %vm7227_vm14, %v14634_v11, %v17351_v28  ;;  %v24692_v10 = vld [vmem:[#allocation12_spill] sm:$0xff] }
0x12a6   : > { %v17356_v13 = vunpack.i.h.bf16 %v17354_v54  ;;  %v17355_v49 = vunpack.i.l.bf16 %v17354_v54 }
0x12a8   : > { %v14651_v27 = vsel %vm7237_vm15, %v14642_v24, %v17355_v49  ;;  %v14652_v5 = vsel %vm7237_vm15, %v14643_v31, %v17356_v13  ;;  %v17359_v7 = vpop.permute.xlu0 %17358  ;;  %v24693_v13 = vld [vmem:[#allocation18_spill] sm:$0xff] }
0x12a9   : > { %v14658_v48 = vpack.c.bf16 %v14652_v5, %v14651_v27  ;;  %v17364_v26 = vpop.permute.xlu1 %17363  ;;  %v17361_v55 = vunpack.i.h.bf16 %v17359_v7  ;;  %v17360_v29 = vunpack.i.l.bf16 %v17359_v7 }
0x12aa   : > { %v17366_v41 = vunpack.i.h.bf16 %v17364_v26  ;;  %v17365_v47 = vunpack.i.l.bf16 %v17364_v26  ;;  %v24694_v26 = vld [vmem:[#allocation13_spill] sm:$0xff] }
0x12ab   : > { %v14635_v46 = vsel %vm4699_vm2, %v14381_v58, %v17360_v29  ;;  %v14636_v0 = vsel %vm4699_vm2, %v14449_v20, %v17361_v55  ;;  %17158 = vmatmul.mubr.msk.bf16.gmra.mrb[208].mxu1 %vm427_vm0, %v14658_v48 }
0x12ac   : > { %v17369_v62 = vpop.permute.xlu0 %17368  ;;  %17161 = vmatprep.mubr.msk.bf16.mxu1 %vm17816_vm1, %v24611_v36  ;;  %v14644_v18 = vsel %vm7227_vm14, %v14635_v46, %v17365_v47  ;;  %v14645_v37 = vsel %vm7227_vm14, %v14636_v0, %v17366_v41  ;;  %v24695_v47 = vld [vmem:[#allocation3_spill] sm:$0xff] }
0x12ad   : > { %v17371_v52 = vunpack.i.h.bf16 %v17369_v62  ;;  %v17370_v4 = vunpack.i.l.bf16 %v17369_v62  ;;  %v14547_v17 = vpop.permute.xlu1 %14546 }
0x12ae   : > { %v14637_v20 = vsel %vm4699_vm2, %v14517_v40, %v14547_v17 }
0x12af   : > { %v14653_v38 = vsel %vm7237_vm15, %v14644_v18, %v17370_v4  ;;  %v14654_v58 = vsel %vm7237_vm15, %v14645_v37, %v17371_v52  ;;  %v24696_v37 = vld [vmem:[#allocation27_spill] sm:$0xff] }
0x12b0   : > { %v14659_v34 = vpack.c.bf16 %v14654_v58, %v14653_v38  ;;  %v14583_v32 = vpop.permute.xlu0 %14582 }
0x12b1   : > { %v14646_v42 = vsel %vm7227_vm14, %v14637_v20, %v14583_v32  ;;  %v14619_v8 = vpop.permute.xlu1 %14618  ;;  %v17390_v32 = vld [vmem:[%s24232_s5 + $0x10] sm:$0xff]  }
0x12b2   : > { %v14655_v61 = vsel %vm7237_vm15, %v14646_v42, %v14619_v8  ;;  %17170 = vmatpush3.bf16.msra.mxu0 %v17390_v32 }
0x12b3   : > { %17162 = vmatmul.mubr.msk.bf16.gmra.mrb[212].mxu1 %vm427_vm0, %v14659_v34  ;;  %v14660_v56 = vpack.c.bf16 %v14655_v61, %v14655_v61  ;;  %17171 = vmatprep.subr.bf16.mxu0 %v24611_v36 }
0x12b4   : > { %17165 = vmatprep.mubr.msk.bf16.mxu1 %vm17816_vm1, %v24611_v36 }
0x12bb   : > { %17166 = vmatmul.mubr.msk.bf16.gmra.mrb[216].mxu1 %vm427_vm0, %v14660_v56 }
0x12bc   : > { %17209 = vmatprep.mubr.msk.bf16.mxu1 %vm17816_vm1, %v24611_v36 }
0x1364   : > { %v14735_v25 = vpop.f32.mrb[200].mxu1 }
0x1365   : > { %v14736_v40 = vadd.f32 %v16215_v57, %v14735_v25  ;;  %v17151_v53 = vpop.f32.mrb[201].mxu1 }
0x1366   : > { %v14738_v59 = vpop.f32.mrb[202].mxu1 }
0x1367   : > { %v14773_v45 = vadd.f32 %v14736_v40, %v24688_v3  ;;  %v14739_v63 = vadd.f32 %v16215_v57, %v14738_v59  ;;  %v17152_v39 = vpop.f32.mrb[203].mxu1 }
0x1369   : > { %v14774_v9 = vadd.f32 %v14739_v63, %v24689_v60  ;;  %v14782_v50 = vsel %vm427_vm0, %v14773_v45, 0.0 }
0x136a   : > { %14783 = vadd.xlane.f32.xlu0 %v14782_v50 }
0x136b   : > { %v14785_v22 = vsel %vm427_vm0, %v14774_v9, 0.0 }
0x136c   : > { %14786 = vadd.xlane.f32.xlu1 %v14785_v22 }
0x1372   : > { %v14743_v35 = vpop.f32.mrb[204].mxu1 }
0x1373   : > { %v14744_v44 = vadd.f32 %v16215_v57, %v14743_v35  ;;  %v17155_v33 = vpop.f32.mrb[205].mxu1 }
0x1374   : > { %v14746_v2 = vpop.f32.mrb[206].mxu1 }
0x1375   : > { %v14775_v16 = vadd.f32 %v14744_v44, %v24690_v12  ;;  %v14747_v43 = vadd.f32 %v16215_v57, %v14746_v2  ;;  %v17156_v23 = vpop.f32.mrb[207].mxu1 }
0x1377   : > { %v14776_v51 = vadd.f32 %v14747_v43, %v24691_v21  ;;  %v14788_v19 = vsel %vm427_vm0, %v14775_v16, 0.0 }
0x1378   : > { %14789 = vadd.xlane.f32.xlu0 %v14788_v19 }
0x1379   : > { %v14791_v6 = vsel %vm427_vm0, %v14776_v51, 0.0 }
0x137c   : > { %14792 = vadd.xlane.f32.xlu0 %v14791_v6 }
0x137e   : > { %v14751_v14 = vpop.f32.mrb[208].mxu1 }
0x137f   : > { %v14752_v1 = vadd.f32 %v16215_v57, %v14751_v14  ;;  %v17159_v30 = vpop.f32.mrb[209].mxu1 }
0x1380   : > { %v14754_v28 = vpop.f32.mrb[210].mxu1 }
0x1381   : > { %v14777_v15 = vadd.f32 %v14752_v1, %v24692_v10  ;;  %v14755_v11 = vadd.f32 %v16215_v57, %v14754_v28  ;;  %v17160_v54 = vpop.f32.mrb[211].mxu1 }
0x1383   : > { %v14778_v49 = vadd.f32 %v14755_v11, %v24693_v13  ;;  %v14794_v24 = vsel %vm427_vm0, %v14777_v15, 0.0 }
0x1384   : > { %14795 = vadd.xlane.f32.xlu0 %v14794_v24 }
0x1385   : > { %v14797_v31 = vsel %vm427_vm0, %v14778_v49, 0.0 }
0x1386   : > { %14798 = vadd.xlane.f32.xlu1 %v14797_v31  ;;  %v14759_v27 = vpop.f32.mrb[212].mxu1 }
0x1387   : > { %v14760_v5 = vadd.f32 %v16215_v57, %v14759_v27  ;;  %v17163_v7 = vpop.f32.mrb[213].mxu1 }
0x1388   : > { %v14762_v48 = vpop.f32.mrb[214].mxu1 }
0x1389   : > { %v14779_v55 = vadd.f32 %v14760_v5, %v24694_v26  ;;  %v14763_v29 = vadd.f32 %v16215_v57, %v14762_v48  ;;  %v17164_v41 = vpop.f32.mrb[215].mxu1  ;;  %v17392_v26 = vld [vmem:[%s24234_s7 + $0x40] sm:$0xff]  }
0x138a   : > { %17194 = vmatpush3.bf16.msra.mxu1 %v17392_v26 }
0x138b   : > { %v14780_v46 = vadd.f32 %v14763_v29, %v24695_v47  ;;  %v14800_v0 = vsel %vm427_vm0, %v14779_v55, 0.0  ;;  %17195 = vmatprep.subr.bf16.mxu1 %v24611_v36 }
0x138c   : > { %14801 = vadd.xlane.f32.xlu0 %v14800_v0 }
0x138d   : > { %v14803_v62 = vsel %vm427_vm0, %v14780_v46, 0.0 }
0x138e   : > { %14804 = vadd.xlane.f32.xlu1 %v14803_v62  ;;  %v14767_v52 = vpop.f32.mrb[216].mxu1 }
0x138f   : > { %v14768_v4 = vadd.f32 %v16215_v57, %v14767_v52  ;;  %v17167_v17 = vpop.f32.mrb[217].mxu1 }
0x1390   : > { %v14770_v18 = vpop.f32.mrb[218].mxu1 }
0x1391   : > { %v23903_v38 = vadd.f32 %v14768_v4, %v24696_v37  ;;  %v17168_v58 = vpop.f32.mrb[219].mxu1 }
0x1393   : > { %v14806_v34 = vsel %vm427_vm0, %v23903_v38, 0.0 }
0x1394   : > { %14807 = vadd.xlane.f32.xlu0 %v14806_v34 }
0x13f7   : > { %v14784_v20 = vpop.xlane.xlu0 %14783 }
0x13f8   : > { %v14809_v42 = vmul.f32 0.03125, %v14784_v20 }
0x13f9   : > { %v14787_v8 = vpop.xlane.xlu1 %14786 }
0x13fa   : > { %v23911_v61 = vsub.f32 %v14773_v45, %v14809_v42  ;;  %v14810_v56 = vmul.f32 0.03125, %v14787_v8 }
0x13fc   : > { %v23913_v57 = vsub.f32 %v14774_v9, %v14810_v56  ;;  %v14827_v25 = vmul.f32 %v23911_v61, %v23911_v61 }
0x13fe   : > { %v14836_v40 = vsel %vm427_vm0, %v14827_v25, 0.0  ;;  %v14828_v53 = vmul.f32 %v23913_v57, %v23913_v57 }
0x13ff   : > { %14837 = vadd.xlane.f32.xlu1 %v14836_v40 }
0x1400   : > { %v14839_v59 = vsel %vm427_vm0, %v14828_v53, 0.0 }
0x1401   : > { %14840 = vadd.xlane.f32.xlu0 %v14839_v59 }
0x1405   : > { %v14790_v3 = vpop.xlane.xlu0 %14789 }
0x1406   : > { %v14811_v63 = vmul.f32 0.03125, %v14790_v3 }
0x1408   : > { %v23921_v39 = vsub.f32 %v14775_v16, %v14811_v63 }
0x1409   : > { %v14793_v45 = vpop.xlane.xlu0 %14792 }
0x140a   : > { %v14812_v60 = vmul.f32 0.03125, %v14793_v45  ;;  %v14829_v9 = vmul.f32 %v23921_v39, %v23921_v39 }
0x140c   : > { %v23925_v50 = vsub.f32 %v14776_v51, %v14812_v60  ;;  %v14842_v22 = vsel %vm427_vm0, %v14829_v9, 0.0 }
0x140d   : > { %14843 = vadd.xlane.f32.xlu1 %v14842_v22 }
0x140e   : > { %v14830_v35 = vmul.f32 %v23925_v50, %v23925_v50 }
0x1410   : > { %v14845_v44 = vsel %vm427_vm0, %v14830_v35, 0.0 }
0x1411   : > { %v14796_v33 = vpop.xlane.xlu0 %14795  ;;  %14846 = vadd.xlane.f32.xlu0 %v14845_v44 }
0x1412   : > { %v14813_v2 = vmul.f32 0.03125, %v14796_v33 }
0x1413   : > { %v14799_v12 = vpop.xlane.xlu1 %14798 }
0x1414   : > { %v23931_v16 = vsub.f32 %v14777_v15, %v14813_v2  ;;  %v14814_v43 = vmul.f32 0.03125, %v14799_v12 }
0x1416   : > { %v23933_v23 = vsub.f32 %v14778_v49, %v14814_v43  ;;  %v14831_v21 = vmul.f32 %v23931_v16, %v23931_v16  ;;  %v17391_v49 = vld [vmem:[%s24232_s5 + $0x18] sm:$0xff]  }
0x1417   : > { %17172 = vmatpush3.bf16.msra.mxu0 %v17391_v49  ;;  %v17397_v49 = vld [vmem:[%s24234_s7 + $0x68] sm:$0xff]  }
0x1418   : > { %v14848_v51 = vsel %vm427_vm0, %v14831_v21, 0.0  ;;  %v14832_v19 = vmul.f32 %v23933_v23, %v23933_v23 }
0x1419   : > { %v14802_v6 = vpop.xlane.xlu0 %14801  ;;  %14849 = vadd.xlane.f32.xlu1 %v14848_v51 }
0x141a   : > { %v14815_v14 = vmul.f32 0.03125, %v14802_v6  ;;  %v14851_v1 = vsel %vm427_vm0, %v14832_v19, 0.0 }
0x141b   : > { %v14805_v30 = vpop.xlane.xlu1 %14804  ;;  %14852 = vadd.xlane.f32.xlu0 %v14851_v1 }
0x141c   : > { %v23941_v28 = vsub.f32 %v14779_v55, %v14815_v14  ;;  %v14816_v10 = vmul.f32 0.03125, %v14805_v30 }
0x141e   : > { %v23943_v15 = vsub.f32 %v14780_v46, %v14816_v10  ;;  %v14833_v11 = vmul.f32 %v23941_v28, %v23941_v28 }
0x1420   : > { %v14854_v54 = vsel %vm427_vm0, %v14833_v11, 0.0  ;;  %v14834_v13 = vmul.f32 %v23943_v15, %v23943_v15 }
0x1421   : > { %14855 = vadd.xlane.f32.xlu1 %v14854_v54  ;;  %v14808_v24 = vpop.xlane.xlu0 %14807  ;;  %v17393_v54 = vld [vmem:[%s24234_s7 + $0x48] sm:$0xff]  }
0x1422   : > { %v14817_v31 = vmul.f32 0.03125, %v14808_v24  ;;  %v14857_v27 = vsel %vm427_vm0, %v14834_v13, 0.0  ;;  %17196 = vmatpush3.bf16.msra.mxu1 %v17393_v54  ;;  %v17396_v13 = vld [vmem:[%s24234_s7 + $0x60] sm:$0xff]   ;;  %v17398_v24 = vld [vmem:[%s24234_s7 + $0x70] sm:$0xff]  }
0x1423   : > { %14858 = vadd.xlane.f32.xlu0 %v14857_v27  ;;  %17197 = vmatprep.subr.bf16.mxu1 %v24611_v36  ;;  %v24016_v27 = vld [vmem:[%s24233_s6 + $0x1] ss:$0 sm:$0xff] }
0x1424   : > { %v23955_v5 = vsub.f32 %v23903_v38, %v14817_v31  ;;  %v17399_v31 = vld [vmem:[%s24234_s7 + $0x78] sm:$0xff]  }
0x1426   : > { %v14835_v7 = vmul.f32 %v23955_v5, %v23955_v5 }
0x1428   : > { %v14860_v48 = vsel %vm427_vm0, %v14835_v7, 0.0 }
0x1429   : > { %14861 = vadd.xlane.f32.xlu1 %v14860_v48 }
0x148c   : > { %v14838_v55 = vpop.xlane.xlu1 %14837 }
0x148d   : > { %v14863_v29 = vmul.f32 0.03125, %v14838_v55 }
0x148e   : > { %v14841_v41 = vpop.xlane.xlu0 %14840 }
0x148f   : > { %v14872_v47 = vadd.f32 1e-05, %v14863_v29  ;;  %v14864_v46 = vmul.f32 0.03125, %v14841_v41 }
0x1491   : > { %17760 = vrsqrt.f32 %v14872_v47  ;;  %v14873_v0 = vadd.f32 1e-05, %v14864_v46 }
0x1493   : > { %17762 = vrsqrt.f32 %v14873_v0 }
0x149a   : > { %v14844_v62 = vpop.xlane.xlu1 %14843 }
0x149b   : > { %v17761_v52 = vpop.eup %17760  ;;  %v14865_v4 = vmul.f32 0.03125, %v14844_v62 }
0x149c   : > { %v14890_v37 = vmul.f32 %v17761_v52, %v23911_v61 }
0x149d   : > { %v17763_v17 = vpop.eup %17762  ;;  %v14874_v18 = vadd.f32 1e-05, %v14865_v4 }
0x149e   : > { %v14891_v58 = vmul.f32 %v17763_v17, %v23913_v57  ;;  %v14847_v34 = vpop.xlane.xlu0 %14846 }
0x149f   : > { %v14866_v32 = vmul.f32 0.03125, %v14847_v34  ;;  %17764 = vrsqrt.f32 %v14874_v18 }
0x14a0   : > { %v14899_v20 = vpack.c.bf16 %v14891_v58, %v14890_v37 }
0x14a1   : > { %v14875_v42 = vadd.f32 1e-05, %v14866_v32 }
0x14a2   : > { %17174 = vmatmul.mubr.msk.bf16.vlgmr.msra.gmra.mrb[220].mxu0 %vm427_vm0, %v14899_v20 }
0x14a3   : > { %17766 = vrsqrt.f32 %v14875_v42  ;;  %17177 = vmatprep.mubr.msk.bf16.mxu0 %vm17816_vm1, %v24611_v36 }
0x14a6   : > { %v14850_v8 = vpop.xlane.xlu1 %14849 }
0x14a7   : > { %v14867_v56 = vmul.f32 0.03125, %v14850_v8 }
0x14a8   : > { %v14853_v25 = vpop.xlane.xlu0 %14852 }
0x14a9   : > { %v14876_v40 = vadd.f32 1e-05, %v14867_v56  ;;  %v14868_v53 = vmul.f32 0.03125, %v14853_v25  ;;  %v17765_v59 = vpop.eup %17764 }
0x14aa   : > { %v14892_v63 = vmul.f32 %v17765_v59, %v23921_v39 }
0x14ab   : > { %17768 = vrsqrt.f32 %v14876_v40  ;;  %v14877_v61 = vadd.f32 1e-05, %v14868_v53 }
0x14ad   : > { %v17767_v57 = vpop.eup %17766  ;;  %17770 = vrsqrt.f32 %v14877_v61 }
0x14ae   : > { %v14856_v3 = vpop.xlane.xlu1 %14855  ;;  %v14893_v45 = vmul.f32 %v17767_v57, %v23925_v50 }
0x14af   : > { %v14869_v60 = vmul.f32 0.03125, %v14856_v3 }
0x14b0   : > { %v14859_v9 = vpop.xlane.xlu0 %14858  ;;  %v14900_v22 = vpack.c.bf16 %v14893_v45, %v14892_v63 }
0x14b1   : > { %v14878_v35 = vadd.f32 1e-05, %v14869_v60  ;;  %v14870_v44 = vmul.f32 0.03125, %v14859_v9 }
0x14b2   : > { %17178 = vmatmul.mubr.msk.bf16.gmra.mrb[224].mxu0 %vm427_vm0, %v14900_v22 }
0x14b3   : > { %17772 = vrsqrt.f32 %v14878_v35  ;;  %v14879_v33 = vadd.f32 1e-05, %v14870_v44  ;;  %17181 = vmatprep.mubr.msk.bf16.mxu0 %vm17816_vm1, %v24611_v36 }
0x14b5   : > { %v17769_v2 = vpop.eup %17768  ;;  %17774 = vrsqrt.f32 %v14879_v33 }
0x14b6   : > { %v14862_v12 = vpop.xlane.xlu1 %14861  ;;  %v14894_v39 = vmul.f32 %v17769_v2, %v23931_v16 }
0x14b7   : > { %v17771_v43 = vpop.eup %17770  ;;  %v14871_v21 = vmul.f32 0.03125, %v14862_v12 }
0x14b8   : > { %v14895_v50 = vmul.f32 %v17771_v43, %v23933_v23 }
0x14b9   : > { %v14880_v51 = vadd.f32 1e-05, %v14871_v21 }
0x14ba   : > { %v14901_v19 = vpack.c.bf16 %v14895_v50, %v14894_v39 }
0x14bb   : > { %17776 = vrsqrt.f32 %v14880_v51 }
0x14bc   : > { %17182 = vmatmul.mubr.msk.bf16.gmra.mrb[228].mxu0 %vm427_vm0, %v14901_v19 }
0x14bd   : > { %v17773_v6 = vpop.eup %17772  ;;  %17185 = vmatprep.mubr.msk.bf16.mxu0 %vm17816_vm1, %v24611_v36 }
0x14be   : > { %v14896_v1 = vmul.f32 %v17773_v6, %v23941_v28  ;;  %v17394_v28 = vld [vmem:[%s24234_s7 + $0x50] sm:$0xff]  }
0x14bf   : > { %v17775_v14 = vpop.eup %17774  ;;  %17198 = vmatpush3.bf16.msra.mxu1 %v17394_v28 }
0x14c0   : > { %v14897_v30 = vmul.f32 %v17775_v14, %v23943_v15  ;;  %17199 = vmatprep.subr.bf16.mxu1 %v24611_v36  ;;  %v17395_v15 = vld [vmem:[%s24234_s7 + $0x58] sm:$0xff]  }
0x14c2   : > { %v14902_v10 = vpack.c.bf16 %v14897_v30, %v14896_v1 }
0x14c3   : > { %17200 = vmatpush3.bf16.msra.mxu1 %v17395_v15 }
0x14c4   : > { %17186 = vmatmul.mubr.msk.bf16.gmra.mrb[232].mxu0 %vm427_vm0, %v14902_v10  ;;  %17201 = vmatprep.subr.bf16.mxu1 %v24611_v36 }
0x14c5   : > { %v17777_v16 = vpop.eup %17776  ;;  %17189 = vmatprep.mubr.msk.bf16.mxu0 %vm17816_vm1, %v24611_v36 }
0x14c6   : > { %v14898_v23 = vmul.f32 %v17777_v16, %v23955_v5 }
0x14c7   : > { %17202 = vmatpush3.bf16.msra.mxu1 %v17396_v13 }
0x14c8   : > { %v14903_v11 = vpack.c.bf16 %v14898_v23, %v14898_v23  ;;  %17203 = vmatprep.subr.bf16.mxu1 %v24611_v36 }
0x14cb   : > { %17204 = vmatpush3.bf16.msra.mxu1 %v17397_v49 }
0x14cc   : > { %17190 = vmatmul.mubr.msk.bf16.gmra.mrb[236].mxu0 %vm427_vm0, %v14903_v11  ;;  %17205 = vmatprep.subr.bf16.mxu1 %v24611_v36 }
0x14cf   : > { %17206 = vmatpush3.bf16.msra.mxu1 %v17398_v24 }
0x14d0   : > { %17207 = vmatprep.subr.bf16.mxu1 %v24611_v36 }
0x14d3   : > { %17208 = vmatpush3.bf16.msra.mxu1 %v17399_v31 }
0x1575   : > { %v14978_v5 = vpop.f32.mrb[220].mxu0 }
0x1576   : > { %v14979_v7 = vadd.f32 %v24016_v27, %v14978_v5  ;;  %v17175_v48 = vpop.f32.mrb[221].mxu0 }
0x1577   : > { %v14981_v26 = vpop.f32.mrb[222].mxu0 }
0x1578   : > { %v15025_v55 = vmul.f32 0.044715, %v14979_v7  ;;  %v14982_v29 = vadd.f32 %v24016_v27, %v14981_v26  ;;  %v17176_v41 = vpop.f32.mrb[223].mxu0  ;;  %v15016_v60 = vmul.f32 0.5, %v14979_v7 }
0x157a   : > { %v15034_v47 = vmul.f32 %v15025_v55, %v14979_v7  ;;  %v15026_v46 = vmul.f32 0.044715, %v14982_v29  ;;  %v15017_v9 = vmul.f32 0.5, %v14982_v29 }
0x157c   : > { %v15043_v0 = vmul.f32 %v15034_v47, %v14979_v7  ;;  %v15035_v62 = vmul.f32 %v15026_v46, %v14982_v29 }
0x157e   : > { %v15052_v52 = vadd.f32 %v15043_v0, %v14979_v7  ;;  %v15044_v4 = vmul.f32 %v15035_v62, %v14982_v29 }
0x1580   : > { %v15061_v17 = vmul.f32 0.7978846, %v15052_v52  ;;  %v15053_v18 = vadd.f32 %v15044_v4, %v14982_v29 }
0x1582   : > { %17778 = vtanh.f32 %v15061_v17  ;;  %v15062_v37 = vmul.f32 0.7978846, %v15053_v18 }
0x1584   : > { %17780 = vtanh.f32 %v15062_v37 }
0x1585   : > { %v14986_v58 = vpop.f32.mrb[224].mxu0 }
0x1586   : > { %v14987_v34 = vadd.f32 %v24016_v27, %v14986_v58  ;;  %v17179_v32 = vpop.f32.mrb[225].mxu0 }
0x1587   : > { %v14989_v20 = vpop.f32.mrb[226].mxu0 }
0x1588   : > { %v15027_v42 = vmul.f32 0.044715, %v14987_v34  ;;  %v14990_v8 = vadd.f32 %v24016_v27, %v14989_v20  ;;  %v17180_v56 = vpop.f32.mrb[227].mxu0  ;;  %v15018_v52 = vmul.f32 0.5, %v14987_v34 }
0x158a   : > { %v15036_v25 = vmul.f32 %v15027_v42, %v14987_v34  ;;  %v15028_v40 = vmul.f32 0.044715, %v14990_v8  ;;  %v15019_v4 = vmul.f32 0.5, %v14990_v8 }
0x158c   : > { %v17779_v53 = vpop.eup %17778  ;;  %v15045_v59 = vmul.f32 %v15036_v25, %v14987_v34  ;;  %v15037_v61 = vmul.f32 %v15028_v40, %v14990_v8 }
0x158d   : > { %v15079_v57 = vadd.f32 1.0, %v17779_v53 }
0x158e   : > { %v17781_v3 = vpop.eup %17780  ;;  %v15046_v63 = vmul.f32 %v15037_v61, %v14990_v8  ;;  %v15054_v45 = vadd.f32 %v15045_v59, %v14987_v34 }
0x158f   : > { %v14994_v22 = vpop.f32.mrb[228].mxu0  ;;  %v15080_v35 = vadd.f32 1.0, %v17781_v3  ;;  %v15088_v21 = vmul.f32 %v15079_v57, %v15016_v60 }
0x1590   : > { %v24023_v44 = vadd.f32 %v24016_v27, %v14994_v22  ;;  %v17183_v33 = vpop.f32.mrb[229].mxu0  ;;  %v15055_v2 = vadd.f32 %v15046_v63, %v14990_v8  ;;  %v15063_v12 = vmul.f32 0.7978846, %v15054_v45 }
0x1591   : > { %v14997_v43 = vpop.f32.mrb[230].mxu0  ;;  %v15089_v39 = vmul.f32 %v15080_v35, %v15017_v9 }
0x1592   : > { %v15029_v50 = vmul.f32 0.044715, %v24023_v44  ;;  %v14998_v51 = vadd.f32 %v24016_v27, %v14997_v43  ;;  %v17184_v19 = vpop.f32.mrb[231].mxu0  ;;  %v15064_v6 = vmul.f32 0.7978846, %v15055_v2  ;;  %17782 = vtanh.f32 %v15063_v12 }
0x1593   : > { %v15097_v14 = vpack.c.bf16 %v15089_v39, %v15088_v21  ;;  %v15020_v60 = vmul.f32 0.5, %v24023_v44 }
0x1594   : > { %v15038_v1 = vmul.f32 %v15029_v50, %v24023_v44  ;;  %v15030_v30 = vmul.f32 0.044715, %v14998_v51  ;;  %17784 = vtanh.f32 %v15064_v6  ;;  %v15021_v9 = vmul.f32 0.5, %v14998_v51 }
0x1595   : > { %17210 = vmatmul.mubr.bf16.vlgmr.msra.gmra.mrb[220].mxu1 %v15097_v14 }
0x1596   : > { %v15047_v10 = vmul.f32 %v15038_v1, %v24023_v44  ;;  %v15039_v16 = vmul.f32 %v15030_v30, %v14998_v51  ;;  %17213 = vmatprep.mubr.msk.bf16.mxu1 %vm17816_vm1, %v24611_v36 }
0x1597   : > { %v15002_v23 = vpop.f32.mrb[232].mxu0 }
0x1598   : > { %v15048_v11 = vmul.f32 %v15039_v16, %v14998_v51  ;;  %v15003_v54 = vadd.f32 %v24016_v27, %v15002_v23  ;;  %v17187_v28 = vpop.f32.mrb[233].mxu0  ;;  %v15056_v15 = vadd.f32 %v15047_v10, %v24023_v44 }
0x1599   : > { %v15005_v13 = vpop.f32.mrb[234].mxu0 }
0x159a   : > { %v15031_v49 = vmul.f32 0.044715, %v15003_v54  ;;  %v15006_v24 = vadd.f32 %v24016_v27, %v15005_v13  ;;  %v17188_v31 = vpop.f32.mrb[235].mxu0  ;;  %v15057_v5 = vadd.f32 %v15048_v11, %v14998_v51  ;;  %v15065_v7 = vmul.f32 0.7978846, %v15056_v15 }
0x159b   : > { %v15022_v50 = vmul.f32 0.5, %v15003_v54 }
0x159c   : > { %v17783_v48 = vpop.eup %17782  ;;  %v15040_v26 = vmul.f32 %v15031_v49, %v15003_v54  ;;  %v15032_v55 = vmul.f32 0.044715, %v15006_v24  ;;  %v15066_v29 = vmul.f32 0.7978846, %v15057_v5  ;;  %17786 = vtanh.f32 %v15065_v7 }
0x159d   : > { %v15081_v41 = vadd.f32 1.0, %v17783_v48  ;;  %v15023_v19 = vmul.f32 0.5, %v15006_v24 }
0x159e   : > { %v17785_v47 = vpop.eup %17784  ;;  %v15049_v46 = vmul.f32 %v15040_v26, %v15003_v54  ;;  %v15041_v0 = vmul.f32 %v15032_v55, %v15006_v24  ;;  %17788 = vtanh.f32 %v15066_v29 }
0x159f   : > { %v15010_v62 = vpop.f32.mrb[236].mxu0  ;;  %v15082_v17 = vadd.f32 1.0, %v17785_v47  ;;  %v15090_v42 = vmul.f32 %v15081_v41, %v15018_v52 }
0x15a0   : > { %v15050_v18 = vmul.f32 %v15041_v0, %v15006_v24  ;;  %v15011_v37 = vadd.f32 %v24016_v27, %v15010_v62  ;;  %v17191_v58 = vpop.f32.mrb[237].mxu0  ;;  %v15058_v32 = vadd.f32 %v15049_v46, %v15003_v54 }
0x15a1   : > { %v15013_v20 = vpop.f32.mrb[238].mxu0  ;;  %v15091_v56 = vmul.f32 %v15082_v17, %v15019_v4  ;;  %v15262_v58 = vld [vmem:[%s24236_s9 + $0x40] sm:$0xff] }
0x15a2   : > { %v15033_v25 = vmul.f32 0.044715, %v15011_v37  ;;  %v17192_v40 = vpop.f32.mrb[239].mxu0  ;;  %v15059_v53 = vadd.f32 %v15050_v18, %v15006_v24  ;;  %v15067_v59 = vmul.f32 0.7978846, %v15058_v32  ;;  %v15024_v30 = vmul.f32 0.5, %v15011_v37 }
0x15a3   : > { %v15098_v61 = vpack.c.bf16 %v15091_v56, %v15090_v42  ;;  %v15270_v32 = vld [vmem:[%s24236_s9 + $0x80] sm:$0xff] }
0x15a4   : > { %v15042_v57 = vmul.f32 %v15033_v25, %v15011_v37  ;;  %v15068_v3 = vmul.f32 0.7978846, %v15059_v53  ;;  %17790 = vtanh.f32 %v15067_v59 }
0x15a5   : > { %17214 = vmatmul.mubr.bf16.gmra.mrb[224].mxu1 %v15098_v61 }
0x15a6   : > { %v17787_v34 = vpop.eup %17786  ;;  %17217 = vmatprep.mubr.msk.bf16.mxu1 %vm17816_vm1, %v24611_v36  ;;  %17792 = vtanh.f32 %v15068_v3  ;;  %v15051_v27 = vmul.f32 %v15042_v57, %v15011_v37  ;;  %v15259_v3 = vld [vmem:[%s24236_s9 + $0x28] sm:$0xff] }
0x15a7   : > { %v15083_v8 = vadd.f32 1.0, %v17787_v34  ;;  %v15267_v34 = vld [vmem:[%s24236_s9 + $0x68] sm:$0xff] }
0x15a8   : > { %v17789_v63 = vpop.eup %17788  ;;  %v15060_v45 = vadd.f32 %v15051_v27, %v15011_v37  ;;  %v15254_v37 = vld [vmem:[%s24236_s9] sm:$0xff]  ;;  %v15275_v27 = vld [vmem:[%s24236_s9 + $0xa8] sm:$0xff] }
0x15a9   : > { %v15084_v22 = vadd.f32 1.0, %v17789_v63  ;;  %v15092_v33 = vmul.f32 %v15083_v8, %v15020_v60  ;;  %v16262_v20 = vcombine.low %v15254_v37, %v15262_v58  ;;  %v16263_v42 = vcombine.high %v15254_v37, %v15262_v58  ;;  %v15282_v37 = vld [vmem:[%s24236_s9 + $0xe0] sm:$0xff] }
0x15aa   : > { %v15069_v35 = vmul.f32 0.7978846, %v15060_v45  ;;  %v16272_v8 = vcombine.low %v15259_v3, %v15267_v34  ;;  %v16273_v63 = vcombine.high %v15259_v3, %v15267_v34  ;;  %v15283_v45 = vld [vmem:[%s24236_s9 + $0xe8] sm:$0xff]  ;;  %v17828_v60 = vmov 0  }
0x15ab   : > { %v15093_v2 = vmul.f32 %v15084_v22, %v15021_v9  ;;  %15533 = vmatprep.subr.bf16.mxu0 %v16263_v42  ;;  %15565 = vmatprep.mubr.bf16.mxu0 %v17828_v60  ;;  %v16289_v9 = vcombine.high %v15275_v27, %v15283_v45  ;;  %v15255_v22 = vld [vmem:[%s24236_s9 + $0x8] sm:$0xff]  ;;  %v15268_v42 = vld [vmem:[%s24236_s9 + $0x70] sm:$0xff] }
0x15ac   : > { %17794 = vtanh.f32 %v15069_v35  ;;  %15534 = vmatpush1.bf16.msra.mxu0 %v16262_v20  ;;  %v15263_v35 = vld [vmem:[%s24236_s9 + $0x48] sm:$0xff]  ;;  %15738 = vmatprep.subr.bf16.mxu1 %v16273_v63  ;;  %v15260_v20 = vld [vmem:[%s24236_s9 + $0x30] sm:$0xff] }
0x15ad   : > { %v15099_v12 = vpack.c.bf16 %v15093_v2, %v15092_v33  ;;  %v15261_v33 = vld [vmem:[%s24236_s9 + $0x38] sm:$0xff]  ;;  %v16264_v2 = vcombine.low %v15255_v22, %v15263_v35  ;;  %15739 = vmatpush1.bf16.msra.mxu1 %v16272_v8  ;;  %v24178_v8 = vld [vmem:[%s24237_s10 + $0x8] sm:$0xff] }
0x15ae   : > { %v17791_v43 = vpop.eup %17790  ;;  %15740 = vmatprep.subr.bf16.mxu1 %v16289_v9 }
0x15af   : > { %17218 = vmatmul.mubr.bf16.gmra.mrb[228].mxu1 %v15099_v12  ;;  %v15085_v21 = vadd.f32 1.0, %v17791_v43  ;;  %v16265_v12 = vcombine.high %v15255_v22, %v15263_v35  ;;  %v15269_v43 = vld [vmem:[%s24236_s9 + $0x78] sm:$0xff] }
0x15b0   : > { %v17793_v39 = vpop.eup %17792  ;;  %17221 = vmatprep.mubr.msk.bf16.mxu1 %vm17816_vm1, %v24611_v36 }
0x15b1   : > { %v15086_v6 = vadd.f32 1.0, %v17793_v39  ;;  %v15094_v14 = vmul.f32 %v15085_v21, %v15022_v50  ;;  %v16288_v21 = vcombine.low %v15275_v27, %v15283_v45  ;;  %v16276_v39 = vcombine.low %v15261_v33, %v15269_v43  ;;  %v15286_v27 = vld [vmem:[%s24237_s10] sm:$0xff] }
0x15b2   : > { %v16277_v50 = vcombine.high %v15261_v33, %v15269_v43 }
0x15b3   : > { %v15095_v1 = vmul.f32 %v15086_v6, %v15023_v19  ;;  %15741 = vmatpush1.bf16.msra.mxu1 %v16288_v21 }
0x15b4   : > { %15820 = vmatprep.subr.bf16.mxu1 %v16277_v50 }
0x15b5   : > { %v15100_v44 = vpack.c.bf16 %v15095_v1, %v15094_v14  ;;  %v15271_v1 = vld [vmem:[%s24236_s9 + $0x88] sm:$0xff] }
0x15b6   : > { %v17795_v51 = vpop.eup %17794 }
0x15b7   : > { %17222 = vmatmul.mubr.bf16.gmra.mrb[232].mxu1 %v15100_v44  ;;  %v15087_v10 = vadd.f32 1.0, %v17795_v51  ;;  %v15279_v51 = vld [vmem:[%s24236_s9 + $0xc8] sm:$0xff] }
0x15b8   : > { %17225 = vmatprep.mubr.msk.bf16.mxu1 %vm17816_vm1, %v24611_v36  ;;  %v16253_v36 = vld [vmem:[%s24235_s8 + $0x1] ss:$0 sm:$0xff] }
0x15b9   : > { %v15096_v16 = vmul.f32 %v15087_v10, %v15024_v30  ;;  %v15277_v30 = vld [vmem:[%s24236_s9 + $0xb8] sm:$0xff] }
0x15ba   : > { %v15285_v10 = vld [vmem:[%s24236_s9 + $0xf8] sm:$0xff] }
0x15bb   : > { %v15101_v23 = vpack.c.bf16 %v15096_v16, %v15096_v16 }
0x15bf   : > { %17226 = vmatmul.mubr.bf16.gmra.mrb[236].mxu1 %v15101_v23 }
0x15c0   : > { %15770 = vmatprep.mubr.bf16.mxu1 %v17828_v60 }
0x1668   : > { %v15209_v11 = vpop.f32.mrb[220].mxu1 }
0x1669   : > { %v17211_v28 = vpop.f32.mrb[221].mxu1  ;;  %v16281_v11 = vcombine.high %v15271_v1, %v15279_v51 }
0x166a   : > { %v15211_v15 = vpop.f32.mrb[222].mxu1  ;;  %v16293_v28 = vcombine.high %v15277_v30, %v15285_v10 }
0x166b   : > { %v17212_v13 = vpop.f32.mrb[223].mxu1  ;;  %v15256_v15 = vld [vmem:[%s24236_s9 + $0x10] sm:$0xff] }
0x166c   : > { %v15264_v13 = vld [vmem:[%s24236_s9 + $0x50] sm:$0xff] }
0x1678   : > { %v15215_v54 = vpop.f32.mrb[224].mxu1 }
0x1679   : > { %v17215_v49 = vpop.f32.mrb[225].mxu1  ;;  %v16280_v54 = vcombine.low %v15271_v1, %v15279_v51 }
0x167a   : > { %v15217_v24 = vpop.f32.mrb[226].mxu1  ;;  %v16292_v49 = vcombine.low %v15277_v30, %v15285_v10 }
0x167b   : > { %v17216_v31 = vpop.f32.mrb[227].mxu1  ;;  %v16267_v24 = vcombine.high %v15256_v15, %v15264_v13 }
0x167c   : > { %v15272_v31 = vld [vmem:[%s24236_s9 + $0x90] sm:$0xff] }
0x1682   : > { %v15221_v5 = vpop.f32.mrb[228].mxu1 }
0x1683   : > { %v17219_v7 = vpop.f32.mrb[229].mxu1  ;;  %v15280_v5 = vld [vmem:[%s24236_s9 + $0xd0] sm:$0xff] }
0x1684   : > { %v15223_v48 = vpop.f32.mrb[230].mxu1  ;;  %v16266_v7 = vcombine.low %v15256_v15, %v15264_v13 }
0x1685   : > { %v17220_v26 = vpop.f32.mrb[231].mxu1  ;;  %v16283_v48 = vcombine.high %v15272_v31, %v15280_v5 }
0x1686   : > { %v15257_v26 = vld [vmem:[%s24236_s9 + $0x18] sm:$0xff] }
0x168a   : > { %v15227_v55 = vpop.f32.mrb[232].mxu1 }
0x168b   : > { %v17223_v29 = vpop.f32.mrb[233].mxu1  ;;  %v15265_v55 = vld [vmem:[%s24236_s9 + $0x58] sm:$0xff] }
0x168c   : > { %v15229_v41 = vpop.f32.mrb[234].mxu1  ;;  %v16282_v29 = vcombine.low %v15272_v31, %v15280_v5 }
0x168d   : > { %v17224_v47 = vpop.f32.mrb[235].mxu1  ;;  %v16269_v41 = vcombine.high %v15257_v26, %v15265_v55 }
0x168e   : > { %v15273_v47 = vld [vmem:[%s24236_s9 + $0x98] sm:$0xff] }
0x1692   : > { %v15233_v46 = vpop.f32.mrb[236].mxu1 }
0x1693   : > { %v15234_v0 = vadd.f32 %v16253_v36, %v15233_v46  ;;  %v17227_v62 = vpop.f32.mrb[237].mxu1  ;;  %v15281_v36 = vld [vmem:[%s24236_s9 + $0xd8] sm:$0xff]  ;;  %v16268_v46 = vcombine.low %v15257_v26, %v15265_v55 }
0x1694   : > { %v15236_v52 = vpop.f32.mrb[238].mxu1  ;;  %v15258_v62 = vld [vmem:[%s24236_s9 + $0x20] sm:$0xff] }
0x1695   : > { %v15239_v4 = vadd.f32 %v15234_v0, %v23903_v38  ;;  %v17228_v17 = vpop.f32.mrb[239].mxu1  ;;  %v15278_v38 = vld [vmem:[%s24236_s9 + $0xc0] sm:$0xff]  ;;  %v16285_v0 = vcombine.high %v15273_v47, %v15281_v36 }
0x1696   : > { %v16279_v56 = vcombine.high %v15270_v32, %v15278_v38  ;;  %v16278_v25 = vcombine.low %v15270_v32, %v15278_v38  ;;  %v15266_v52 = vld [vmem:[%s24236_s9 + $0x60] sm:$0xff] }
0x1697   : > { %v15240_v18 = vsel %vm427_vm0, %v15239_v4, 0.0  ;;  %v16271_v17 = vcombine.high %v15258_v62, %v15266_v52  ;;  %v16270_v58 = vcombine.low %v15258_v62, %v15266_v52 }
0x1698   : > { %15241 = vadd.xlane.f32.xlu0 %v15240_v18  ;;  %15535 = vmatprep.subr.bf16.mxu0 %v16279_v56  ;;  %v15274_v18 = vld [vmem:[%s24236_s9 + $0xa0] sm:$0xff]  ;;  %v16275_v56 = vcombine.high %v15260_v20, %v15268_v42 }
0x1699   : > { %15536 = vmatpush1.bf16.msra.mxu0 %v16278_v25  ;;  %v16287_v32 = vcombine.high %v15274_v18, %v15282_v37  ;;  %v16286_v38 = vcombine.low %v15274_v18, %v15282_v37  ;;  %v15276_v25 = vld [vmem:[%s24236_s9 + $0xb0] sm:$0xff] }
0x169a   : > { %15574 = vmatprep.subr.bf16.mxu0 %v16265_v12 }
0x1725   : > { %v15242_v40 = vpop.xlane.xlu0 %15241 }
0x1726   : > { %v15243_v53 = vmul.f32 0.03125, %v15242_v40  ;;  %v15284_v40 = vld [vmem:[%s24236_s9 + $0xf0] sm:$0xff] }
0x1728   : > { %v15244_v59 = vsub.f32 %v15239_v4, %v15243_v53  ;;  %v16284_v4 = vcombine.low %v15273_v47, %v15281_v36  ;;  %v16274_v53 = vcombine.low %v15260_v20, %v15268_v42 }
0x172a   : > { %v15245_v61 = vmul.f32 %v15244_v59, %v15244_v59 }
0x172c   : > { %v15246_v57 = vsel %vm427_vm0, %v15245_v61, 0.0  ;;  %v16290_v61 = vcombine.low %v15276_v25, %v15284_v40 }
0x172d   : > { %15247 = vadd.xlane.f32.xlu1 %v15246_v57  ;;  %v24697_v57 = vld [vmem:[#allocation8_spill] sm:$0xff] }
0x172e   : > { %v15292_v3 = vsub.s32 0, %v24697_v57  ;;  %v15300_v34 = vsub.s32 2, %v24697_v57  ;;  %v15296_v63 = vsub.s32 1, %v24697_v57  ;;  %v15304_v45 = vsub.s32 3, %v24697_v57 }
0x172f   : > { %v15316_v50 = vsub.s32 6, %v24697_v57  ;;  %v15308_v31 = vsub.s32 4, %v24697_v57  ;;  %v15312_v55 = vsub.s32 5, %v24697_v57 }
0x1730   : > { %v15333_v9 = vrot.slane %v24178_v8, %v15300_v34  ;;  %v15297_v22 = vrot.slane %v15286_v27, %v15296_v63  ;;  %v15337_v35 = vrot.slane %v24178_v8, %v15304_v45  ;;  %v15301_v10 = vrot.slane %v15286_v27, %v15300_v34 }
0x1731   : > { %v15309_v47 = vrot.slane %v15286_v27, %v15308_v31  ;;  %v15313_v36 = vrot.slane %v15286_v27, %v15312_v55  ;;  %v15317_v18 = vrot.slane %v15286_v27, %v15316_v50 }
0x17ba   : > { %v15248_v19 = vpop.xlane.xlu1 %15247 }
0x17bb   : > { %v15249_v6 = vmul.f32 0.03125, %v15248_v19 }
0x17bd   : > { %v15250_v14 = vadd.f32 1e-05, %v15249_v6 }
0x17bf   : > { %17796 = vrsqrt.f32 %v15250_v14 }
0x17c9   : > { %v17797_v44 = vpop.eup %17796 }
0x17ca   : > { %v15252_v16 = vmul.f32 %v17797_v44, %v15244_v59  ;;  %v16291_v59 = vcombine.high %v15276_v25, %v15284_v40  ;;  %v15320_v44 = vsub.s32 7, %v24697_v57  ;;  %v15325_v25 = vrot.slane %v24178_v8, %v15292_v3 }
0x17cb   : > { %v15329_v40 = vrot.slane %v24178_v8, %v15296_v63 }
0x17cc   : > { %v24098_v23 = vpack.c.bf16 %v15252_v16, %v15252_v16  ;;  %v15349_v16 = vrot.slane %v24178_v8, %v15316_v50  ;;  %v15321_v37 = vrot.slane %v15286_v27, %v15320_v44 }
0x17ce   : > { %16294 = vmatmul.mubr.msk.bf16.vlgmr.msra.gmra.mrb[240].mxu0 %vm427_vm0, %v24098_v23  ;;  %16299 = vmatmul.mubr.msk.bf16.vlgmr.msra.gmra.mrb[240].mxu1 %vm427_vm0, %v24098_v23 }
0x17cf   : > { %15575 = vmatpush1.bf16.msra.mxu0 %v16264_v2  ;;  %15821 = vmatpush1.bf16.msra.mxu1 %v16276_v39 }
0x17d0   : > { %15576 = vmatprep.subr.bf16.mxu0 %v16281_v11  ;;  %15822 = vmatprep.subr.bf16.mxu1 %v16293_v28  ;;  %v15353_v11 = vrot.slane %v24178_v8, %v15320_v44 }
0x17d1   : > { %15606 = vmatprep.mubr.bf16.mxu0 %v17828_v60  ;;  %15852 = vmatprep.mubr.bf16.mxu1 %v17828_v60 }
0x17d3   : > { %15577 = vmatpush1.bf16.msra.mxu0 %v16280_v54  ;;  %15823 = vmatpush1.bf16.msra.mxu1 %v16292_v49 }
0x17d4   : > { %15615 = vmatprep.subr.bf16.mxu0 %v16267_v24 }
0x17d6   : > { %16295 = vmatmul.mubr.msk.bf16.vlgmr.msra.gmra.mrb[244].mxu0 %vm427_vm0, %v24098_v23  ;;  %16301 = vmatmul.mubr.msk.bf16.vlgmr.msra.gmra.mrb[244].mxu1 %vm427_vm0, %v24098_v23 }
0x17d7   : > { %15616 = vmatpush1.bf16.msra.mxu0 %v16266_v7  ;;  %15647 = vmatprep.mubr.bf16.mxu0 %v17828_v60 }
0x17d8   : > { %15617 = vmatprep.subr.bf16.mxu0 %v16283_v48 }
0x17db   : > { %15618 = vmatpush1.bf16.msra.mxu0 %v16282_v29 }
0x17dc   : > { %15656 = vmatprep.subr.bf16.mxu0 %v16269_v41 }
0x17de   : > { %16296 = vmatmul.mubr.msk.bf16.vlgmr.msra.gmra.mrb[248].mxu0 %vm427_vm0, %v24098_v23 }
0x17df   : > { %15657 = vmatpush1.bf16.msra.mxu0 %v16268_v46  ;;  %15688 = vmatprep.mubr.bf16.mxu0 %v17828_v60 }
0x17e0   : > { %15658 = vmatprep.subr.bf16.mxu0 %v16285_v0 }
0x17e3   : > { %15659 = vmatpush1.bf16.msra.mxu0 %v16284_v4 }
0x17e4   : > { %15697 = vmatprep.subr.bf16.mxu0 %v16271_v17 }
0x17e6   : > { %16297 = vmatmul.mubr.msk.bf16.vlgmr.msra.gmra.mrb[252].mxu0 %vm427_vm0, %v24098_v23 }
0x17e7   : > { %15698 = vmatpush1.bf16.msra.mxu0 %v16270_v58  ;;  %15729 = vmatprep.mubr.bf16.mxu0 %v17828_v60 }
0x17e8   : > { %15699 = vmatprep.subr.bf16.mxu0 %v16287_v32 }
0x17eb   : > { %15700 = vmatpush1.bf16.msra.mxu0 %v16286_v38 }
0x17ec   : > { %15779 = vmatprep.subr.bf16.mxu0 %v16275_v56 }
0x17ee   : > { %16298 = vmatmul.mubr.msk.bf16.vlgmr.msra.gmra.mrb[0].mxu0 %vm427_vm0, %v24098_v23 }
0x17ef   : > { %15780 = vmatpush1.bf16.msra.mxu0 %v16274_v53  ;;  %15811 = vmatprep.mubr.bf16.mxu0 %v17828_v60  ;;  %v15293_v60 = vrot.slane %v15286_v27, %v15292_v3 }
0x17f0   : > { %15781 = vmatprep.subr.bf16.mxu0 %v16291_v59 }
0x17f3   : > { %15782 = vmatpush1.bf16.msra.mxu0 %v16290_v61 }
0x17f6   : > { %16300 = vmatmul.mubr.msk.bf16.vlgmr.msra.gmra.mrb[4].mxu0 %vm427_vm0, %v24098_v23  ;;  %v15305_v23 = vrot.slane %v15286_v27, %v15304_v45 }
0x18a1   : > { %v15567_v33 = vpop.f32.mrb[240].mxu0  ;;  %v15772_v2 = vpop.f32.mrb[240].mxu1 }
0x18a2   : > { %v15568_v12 = vadd.f32 %v15567_v33, %v15293_v60  ;;  %v15773_v43 = vadd.f32 %v15772_v2, %v15333_v9  ;;  %v15569_v21 = vpop.f32.mrb[241].mxu0  ;;  %v15774_v39 = vpop.f32.mrb[241].mxu1  ;;  %v15341_v60 = vrot.slane %v24178_v8, %v15308_v31  ;;  %v15345_v9 = vrot.slane %v24178_v8, %v15312_v55 }
0x18a3   : > { %v15570_v19 = vadd.f32 %v15569_v21, %v15297_v22  ;;  %v15775_v6 = vadd.f32 %v15774_v39, %v15337_v35  ;;  %v15571_v14 = vpop.f32.mrb[242].mxu0  ;;  %v15776_v1 = vpop.f32.mrb[242].mxu1 }
0x18a4   : > { %15861 = vst [vmem:[%s24192_s22] sm:$0xff] %v15568_v12  ;;  %15871 = vst [vmem:[%s24192_s22 + $0x50] sm:$0xff] %v15773_v43  ;;  %v15572_v51 = vpop.f32.mrb[243].mxu0  ;;  %v15777_v30 = vpop.f32.mrb[243].mxu1 }
0x18a5   : > { %15862 = vst [vmem:[%s24192_s22 + $0x8] sm:$0xff] %v15570_v19  ;;  %15872 = vst [vmem:[%s24192_s22 + $0x58] sm:$0xff] %v15775_v6 }
0x18a9   : > { %v15608_v28 = vpop.f32.mrb[244].mxu0  ;;  %v15854_v15 = vpop.f32.mrb[244].mxu1 }
0x18aa   : > { %v15609_v13 = vadd.f32 %v15608_v28, %v15301_v10  ;;  %v15855_v54 = vadd.f32 %v15854_v15, %v15349_v16  ;;  %v15610_v49 = vpop.f32.mrb[245].mxu0  ;;  %v15856_v24 = vpop.f32.mrb[245].mxu1 }
0x18ab   : > { %v15611_v5 = vadd.f32 %v15610_v49, %v15305_v23  ;;  %v15857_v7 = vadd.f32 %v15856_v24, %v15353_v11  ;;  %v15612_v48 = vpop.f32.mrb[246].mxu0  ;;  %v15858_v26 = vpop.f32.mrb[246].mxu1 }
0x18ac   : > { %15863 = vst [vmem:[%s24192_s22 + $0x10] sm:$0xff] %v15609_v13  ;;  %15875 = vst [vmem:[%s24192_s22 + $0x70] sm:$0xff] %v15855_v54  ;;  %v15613_v29 = vpop.f32.mrb[247].mxu0  ;;  %v15859_v41 = vpop.f32.mrb[247].mxu1 }
0x18ad   : > { %15864 = vst [vmem:[%s24192_s22 + $0x18] sm:$0xff] %v15611_v5  ;;  %15876 = vst [vmem:[%s24192_s22 + $0x78] sm:$0xff] %v15857_v7 }
0x18b1   : > { %v15649_v46 = vpop.f32.mrb[248].mxu0 }
0x18b2   : > { %v15650_v0 = vadd.f32 %v15649_v46, %v15309_v47  ;;  %v15651_v62 = vpop.f32.mrb[249].mxu0 }
0x18b3   : > { %v15652_v52 = vadd.f32 %v15651_v62, %v15313_v36  ;;  %v15653_v4 = vpop.f32.mrb[250].mxu0 }
0x18b4   : > { %15865 = vst [vmem:[%s24192_s22 + $0x20] sm:$0xff] %v15650_v0  ;;  %v15654_v17 = vpop.f32.mrb[251].mxu0 }
0x18b5   : > { %15866 = vst [vmem:[%s24192_s22 + $0x28] sm:$0xff] %v15652_v52 }
0x18b9   : > { %v15690_v58 = vpop.f32.mrb[252].mxu0 }
0x18ba   : > { %v15691_v32 = vadd.f32 %v15690_v58, %v15317_v18  ;;  %v15692_v20 = vpop.f32.mrb[253].mxu0 }
0x18bb   : > { %v15693_v42 = vadd.f32 %v15692_v20, %v15321_v37  ;;  %v15694_v38 = vpop.f32.mrb[254].mxu0 }
0x18bc   : > { %15867 = vst [vmem:[%s24192_s22 + $0x30] sm:$0xff] %v15691_v32  ;;  %v15695_v56 = vpop.f32.mrb[255].mxu0 }
0x18bd   : > { %15868 = vst [vmem:[%s24192_s22 + $0x38] sm:$0xff] %v15693_v42 }
0x18c1   : > { %v15731_v53 = vpop.f32.mrb[0].mxu0 }
0x18c2   : > { %v15732_v59 = vadd.f32 %v15731_v53, %v15325_v25  ;;  %v15733_v61 = vpop.f32.mrb[1].mxu0 }
0x18c3   : > { %v15734_v34 = vadd.f32 %v15733_v61, %v15329_v40  ;;  %v15735_v27 = vpop.f32.mrb[2].mxu0 }
0x18c4   : > { %15869 = vst [vmem:[%s24192_s22 + $0x40] sm:$0xff] %v15732_v59  ;;  %v15736_v45 = vpop.f32.mrb[3].mxu0 }
0x18c5   : > { %15870 = vst [vmem:[%s24192_s22 + $0x48] sm:$0xff] %v15734_v34 }
0x18c9   : > { %v15813_v22 = vpop.f32.mrb[4].mxu0 }
0x18ca   : > { %v15814_v3 = vadd.f32 %v15813_v22, %v15341_v60  ;;  %v15815_v35 = vpop.f32.mrb[5].mxu0 }
0x18cb   : > { %v15816_v57 = vadd.f32 %v15815_v35, %v15345_v9  ;;  %v15817_v33 = vpop.f32.mrb[6].mxu0 }
0x18cc   : > { %15873 = vst [vmem:[%s24192_s22 + $0x60] sm:$0xff] %v15814_v3  ;;  %v15818_v63 = vpop.f32.mrb[7].mxu0 }
0x18cd   : > { %15874 = vst [vmem:[%s24192_s22 + $0x68] sm:$0xff] %v15816_v57 }
0x18ce PF: > { %s21_s17 = sadd.s32 1, %s17813_s17  }
0x18cf   : > { %p18_p4 = scmp.ge.s32.totalorder %s21_s17, 4  }
0x18d1   :  { %20 = sbr.rel (!%p18_p4) target bundleno = 1 (0x1), region = 102 }

</bundles_post_ra>
